<compile_context>
chip_gen: v7x
topology: tpu7x:2x2x1
jax: 0.10.0
libtpu: 0.0.40
codegen_flags: <defaults>
</compile_context>

<pallas_src>
import functools

import jax
import jax.numpy as jnp
from jax.experimental import pallas as pl
from jax.experimental.pallas import tpu as pltpu


# ----------------------------------------------------------------------------
# Fused forward kernel
# ----------------------------------------------------------------------------
def _net_kernel(patches_ref, w1_ref, b1_ref, w2_ref, b2_ref,
                wfc1_ref, bfc1_ref, wfc2_ref, bfc2_ref,
                out_ref, a1_ref, y2_ref, *, batch):
    B = batch
    f32 = jnp.float32
    bf16 = jnp.bfloat16

    # ---- conv1 (4 pool-phase GEMMs) + bias + ReLU + 2x2 max-pool -----------
    # patches_ref: (4, B*12*16, 32) bf16, w1_ref: (32, 128) bf16
    b1 = b1_ref[...]                                              # (1, 128) f32
    pooled1 = None
    for p in range(4):
        g = jnp.dot(patches_ref[p], w1_ref[...],
                    preferred_element_type=f32)                   # (B*192, 128)
        g = jnp.maximum(g + b1, 0.0)
        pooled1 = g if pooled1 is None else jnp.maximum(pooled1, g)
    # NHWC layout, wo padded 12->16 (padding cols never read), C padded to 128.
    a1_ref[...] = pooled1.reshape(B, 12, 16, 128)

    # ---- conv2: in-kernel tap accumulation (no materialized im2col) --------
    acc = jnp.zeros((B * 64, 128), f32)
    for di in range(5):
        for dj in range(5):
            lhs = a1_ref[:, di:di + 8, dj:dj + 8, :]              # (B, 8, 8, 128)
            lhs = lhs.reshape(B * 64, 128).astype(bf16)
            acc = acc + jnp.dot(lhs, w2_ref[di * 5 + dj],
                                preferred_element_type=f32)
    y2 = jnp.maximum(acc + b2_ref[...], 0.0)                      # (B*64, 128) f32
    y2_ref[...] = y2.reshape(B, 8, 8, 128)

    # ---- 2x2 max-pool + flatten, fused into the fc1 GEMM accumulation ------
    fc1_acc = jnp.zeros((B, 512), f32)
    for ho in range(4):
        for wo in range(4):
            t00 = y2_ref[:, 2 * ho,     2 * wo,     :]
            t01 = y2_ref[:, 2 * ho,     2 * wo + 1, :]
            t10 = y2_ref[:, 2 * ho + 1, 2 * wo,     :]
            t11 = y2_ref[:, 2 * ho + 1, 2 * wo + 1, :]
            m = jnp.maximum(jnp.maximum(t00, t01),
                            jnp.maximum(t10, t11))                # (B, 128)
            k0 = (ho * 4 + wo) * 128
            fc1_acc = fc1_acc + jnp.dot(m.astype(bf16),
                                        wfc1_ref[k0:k0 + 128, :],
                                        preferred_element_type=f32)
    h1 = jnp.maximum(fc1_acc + bfc1_ref[...], 0.0)                # (B, 512)

    # ---- fc2 + log_softmax (padded lanes carry -1e30 bias -> exp == 0) -----
    logits = jnp.dot(h1.astype(bf16), wfc2_ref[...],
                     preferred_element_type=f32) + bfc2_ref[...]  # (B, 128)
    mx = jnp.max(logits, axis=-1, keepdims=True)
    lse = jnp.log(jnp.sum(jnp.exp(logits - mx), axis=-1, keepdims=True)) + mx
    out_ref[...] = logits - lse


def _full_spec(shape):
    n = len(shape)
    return pl.BlockSpec(shape, lambda i, _n=n: (0,) * _n)


# ----------------------------------------------------------------------------
# Wrapper: layout plumbing in plain JAX, one pallas_call
# ----------------------------------------------------------------------------
def _build_conv1_patches(x):
    """x: (B, 1, 28, 28) -> (4, B*12*16, 32) bf16 pool-phase-split im2col.

    Row order within a phase is (b, ho, wo_padded16); k = di*5 + dj padded to 32.
    """
    B = x.shape[0]
    xb = x[:, 0]                                                  # (B, 28, 28)
    taps = [xb[:, di:di + 24, dj:dj + 24]
            for di in range(5) for dj in range(5)]
    p = jnp.stack(taps, axis=-1)                                  # (B, 24, 24, 25)
    p = p.reshape(B, 12, 2, 12, 2, 25)                            # (B, ho, dh, wo, dw, k)
    p = p.transpose(2, 4, 0, 1, 3, 5)                             # (dh, dw, B, ho, wo, k)
    p = p.reshape(4, B, 12, 12, 25)
    p = jnp.pad(p, ((0, 0), (0, 0), (0, 0), (0, 4), (0, 7)))      # wo->16, k->32
    return p.reshape(4, B * 12 * 16, 32).astype(jnp.bfloat16)


def net_forward(x, p):
    """x: (B, 1, 28, 28) f32, p: prepare_params(...) output -> (B, 10) log-probs."""
    B = x.shape[0]
    patches = _build_conv1_patches(x)

    out = pl.pallas_call(
        functools.partial(_net_kernel, batch=B),
        out_shape=jax.ShapeDtypeStruct((B, 128), jnp.float32),
        grid=(1,),
        in_specs=[
            _full_spec(patches.shape),        # conv1 phase patches
            _full_spec(p["w1"].shape), _full_spec(p["b1"].shape),
            _full_spec(p["w2"].shape), _full_spec(p["b2"].shape),
            _full_spec(p["wfc1"].shape), _full_spec(p["bfc1"].shape),
            _full_spec(p["wfc2"].shape), _full_spec(p["bfc2"].shape),
        ],
        out_specs=_full_spec((B, 128)),
        scratch_shapes=[
            pltpu.VMEM((B, 12, 16, 128), jnp.float32),   # pool1 activations (NHWC)
            pltpu.VMEM((B, 8, 8, 128), jnp.float32),     # conv2 output (NHWC)
        ],
        compiler_params=pltpu.CompilerParams(
            dimension_semantics=("arbitrary",)),
    )(patches, p["w1"], p["b1"], p["w2"], p["b2"],
      p["wfc1"], p["bfc1"], p["wfc2"], p["bfc2"])
    return out[:, :10]


# ----------------------------------------------------------------------------
# One-time weight preparation (pad / transpose / bf16) — done outside jit
# ----------------------------------------------------------------------------
def prepare_params(params):
    f32, bf16 = jnp.float32, jnp.bfloat16
    w1, b1 = params["w1"], params["b1"]          # (20,1,5,5), (20,)
    w2, b2 = params["w2"], params["b2"]          # (50,20,5,5), (50,)
    wf1, bf1 = params["wfc1"], params["bfc1"]    # (500,800), (500,)
    wf2, bf2 = params["wfc2"], params["bfc2"]    # (10,500), (10,)

    # conv1: (25, 20) -> (32, 128), k = di*5 + dj
    w1p = jnp.transpose(w1.reshape(20, 25))
    w1p = jnp.pad(w1p, ((0, 7), (0, 108))).astype(bf16)
    b1p = jnp.pad(b1, (0, 108)).reshape(1, 128).astype(f32)

    # conv2: one (Cin, Cout) slice per tap -> (25, 128, 128)
    w2p = jnp.transpose(w2, (2, 3, 1, 0)).reshape(25, 20, 50)
    w2p = jnp.pad(w2p, ((0, 0), (0, 108), (0, 78))).astype(bf16)
    b2p = jnp.pad(b2, (0, 78)).reshape(1, 128).astype(f32)

    # fc1: reorder input dim from NCHW-flat (c*16+h*4+w) to (h*4+w)*128 + c
    wf1p = wf1.reshape(500, 50, 4, 4).transpose(2, 3, 1, 0)       # (h, w, c, n)
    wf1p = jnp.pad(wf1p, ((0, 0), (0, 0), (0, 78), (0, 12)))      # (4,4,128,512)
    wf1p = wf1p.reshape(2048, 512).astype(bf16)
    bf1p = jnp.pad(bf1, (0, 12)).reshape(1, 512).astype(f32)

    # fc2: (500, 10) -> (512, 128); padded bias = -1e30 so padded lanes vanish
    wf2p = jnp.pad(jnp.transpose(wf2), ((0, 12), (0, 118))).astype(bf16)
    bf2p = jnp.pad(bf2, (0, 118), constant_values=-1e30).reshape(1, 128).astype(f32)

    return dict(w1=w1p, b1=b1p, w2=w2p, b2=b2p,
                wfc1=wf1p, bfc1=bf1p, wfc2=wf2p, bfc2=bf2p)


# ----------------------------------------------------------------------------
# Pure-JAX reference (mirrors the PyTorch module) and param init
# ----------------------------------------------------------------------------
def reference_forward(x, params):
    dn = ("NCHW", "OIHW", "NCHW")
    y = jax.lax.conv_general_dilated(x, params["w1"], (1, 1), "VALID",
                                     dimension_numbers=dn)
    y = jax.nn.relu(y + params["b1"][None, :, None, None])
    B, C, H, W = y.shape
    y = y.reshape(B, C, H // 2, 2, W // 2, 2).max(axis=(3, 5))
    y = jax.lax.conv_general_dilated(y, params["w2"], (1, 1), "VALID",
                                     dimension_numbers=dn)
    y = jax.nn.relu(y + params["b2"][None, :, None, None])
    B, C, H, W = y.shape
    y = y.reshape(B, C, H // 2, 2, W // 2, 2).max(axis=(3, 5))
    flat = y.reshape(B, 4 * 4 * 50)                               # NCHW flatten
    h = jax.nn.relu(flat @ params["wfc1"].T + params["bfc1"])
    logits = h @ params["wfc2"].T + params["bfc2"]
    return jax.nn.log_softmax(logits, axis=-1)


def init_params(key):
    ks = jax.random.split(key, 8)
    s = 0.1
    return {
        "w1": s * jax.random.normal(ks[0], (20, 1, 5, 5), jnp.float32),
        "b1": s * jax.random.normal(ks[1], (20,), jnp.float32),
        "w2": s * jax.random.normal(ks[2], (50, 20, 5, 5), jnp.float32),
        "b2": s * jax.random.normal(ks[3], (50,), jnp.float32),
        "wfc1": s * jax.random.normal(ks[4], (500, 800), jnp.float32),
        "bfc1": s * jax.random.normal(ks[5], (500,), jnp.float32),
        "wfc2": s * jax.random.normal(ks[6], (10, 500), jnp.float32),
        "bfc2": s * jax.random.normal(ks[7], (10,), jnp.float32),
    }


if __name__ == "__main__":
    key = jax.random.PRNGKey(0)
    pkey, xkey = jax.random.split(key)
    params = init_params(pkey)
    prepped = prepare_params(params)          # one-time weight prep

    # MNIST-shaped input (fc1 dim 4*4*50 implies 28x28), batch = 2.
    x = jax.random.normal(xkey, (2, 1, 28, 28), jnp.float32)

    fwd = jax.jit(net_forward)
    out = jax.block_until_ready(fwd(x, prepped))

    assert out.shape == (2, 10)
    assert bool(jnp.all(jnp.isfinite(out)))
    # log_softmax rows must sum to 1 in probability space
    assert jnp.allclose(jnp.sum(jnp.exp(out), axis=1), 1.0, atol=1e-4)
    # match the f32 reference up to bf16-operand rounding
    ref = reference_forward(x, params)
    assert jnp.allclose(out, ref, atol=5e-2, rtol=5e-2)
    print("KERNEL_OK")
</pallas_src>

<mosaic_0001>
module attributes {stable_mosaic.version = 11 : i64} {
  func.func @_net_kernel(%arg0: i32, %arg1: memref<4x384x32xbf16, #tpu.memory_space<vmem>>, %arg2: memref<32x128xbf16, #tpu.memory_space<vmem>>, %arg3: memref<1x128xf32, #tpu.memory_space<vmem>>, %arg4: memref<25x128x128xbf16, #tpu.memory_space<vmem>>, %arg5: memref<1x128xf32, #tpu.memory_space<vmem>>, %arg6: memref<2048x512xbf16, #tpu.memory_space<vmem>>, %arg7: memref<1x512xf32, #tpu.memory_space<vmem>>, %arg8: memref<512x128xbf16, #tpu.memory_space<vmem>>, %arg9: memref<1x128xf32, #tpu.memory_space<vmem>>, %arg10: memref<2x128xf32, #tpu.memory_space<vmem>>, %arg11: memref<2x12x16x128xf32, #tpu.memory_space<vmem>>, %arg12: memref<2x8x8x128xf32, #tpu.memory_space<vmem>>) attributes {dimension_semantics = [#tpu.dimension_semantics<arbitrary>], iteration_bounds = array<i64: 1>, scalar_prefetch = 0 : i64, scratch_operands = 2 : i64, tpu.core_type = #tpu.core_type<tc>, window_params = [{pipeline_mode = #tpu.pipeline_mode<synchronous>, transform_indices = @transform_0, window_bounds = array<i64: 4, 384, 32>}, {pipeline_mode = #tpu.pipeline_mode<synchronous>, transform_indices = @transform_1, window_bounds = array<i64: 32, 128>}, {pipeline_mode = #tpu.pipeline_mode<synchronous>, transform_indices = @transform_2, window_bounds = array<i64: 1, 128>}, {pipeline_mode = #tpu.pipeline_mode<synchronous>, transform_indices = @transform_3, window_bounds = array<i64: 25, 128, 128>}, {pipeline_mode = #tpu.pipeline_mode<synchronous>, transform_indices = @transform_4, window_bounds = array<i64: 1, 128>}, {pipeline_mode = #tpu.pipeline_mode<synchronous>, transform_indices = @transform_5, window_bounds = array<i64: 2048, 512>}, {pipeline_mode = #tpu.pipeline_mode<synchronous>, transform_indices = @transform_6, window_bounds = array<i64: 1, 512>}, {pipeline_mode = #tpu.pipeline_mode<synchronous>, transform_indices = @transform_7, window_bounds = array<i64: 512, 128>}, {pipeline_mode = #tpu.pipeline_mode<synchronous>, transform_indices = @transform_8, window_bounds = array<i64: 1, 128>}, {pipeline_mode = #tpu.pipeline_mode<synchronous>, transform_indices = @transform_9, window_bounds = array<i64: 2, 128>}]} {
    %c0 = arith.constant 0 : index
    %c0_0 = arith.constant 0 : index
    %0 = vector.load %arg3[%c0, %c0_0] : memref<1x128xf32, #tpu.memory_space<vmem>>, vector<1x128xf32>
    %c0_1 = arith.constant 0 : index
    %c0_2 = arith.constant 0 : index
    %c0_3 = arith.constant 0 : index
    %1 = vector.load %arg1[%c0_1, %c0_2, %c0_3] : memref<4x384x32xbf16, #tpu.memory_space<vmem>>, vector<1x384x32xbf16>
    %2 = vector.shape_cast %1 : vector<1x384x32xbf16> to vector<384x32xbf16>
    %c0_4 = arith.constant 0 : index
    %c0_5 = arith.constant 0 : index
    %3 = vector.load %arg2[%c0_4, %c0_5] : memref<32x128xbf16, #tpu.memory_space<vmem>>, vector<32x128xbf16>
    %cst = arith.constant dense<0.000000e+00> : vector<384x128xf32>
    %4 = tpu.matmul %2, %3, %cst {dimension_numbers = #tpu.dot_dimension_numbers<[1], [0], [0], [1], [0, 0, 1, 1], [], []>} : vector<384x32xbf16>, vector<32x128xbf16>, vector<384x128xf32> -> vector<384x128xf32>
    %5 = vector.broadcast %0 : vector<1x128xf32> to vector<384x128xf32>
    %6 = arith.addf %4, %5 : vector<384x128xf32>
    %cst_6 = arith.constant 0.000000e+00 : f32
    %7 = vector.broadcast %cst_6 : f32 to vector<384x128xf32>
    %8 = arith.maximumf %6, %7 : vector<384x128xf32>
    %c1 = arith.constant 1 : index
    %c0_7 = arith.constant 0 : index
    %c0_8 = arith.constant 0 : index
    %9 = vector.load %arg1[%c1, %c0_7, %c0_8] : memref<4x384x32xbf16, #tpu.memory_space<vmem>>, vector<1x384x32xbf16>
    %10 = vector.shape_cast %9 : vector<1x384x32xbf16> to vector<384x32xbf16>
    %c0_9 = arith.constant 0 : index
    %c0_10 = arith.constant 0 : index
    %11 = vector.load %arg2[%c0_9, %c0_10] : memref<32x128xbf16, #tpu.memory_space<vmem>>, vector<32x128xbf16>
    %cst_11 = arith.constant dense<0.000000e+00> : vector<384x128xf32>
    %12 = tpu.matmul %10, %11, %cst_11 {dimension_numbers = #tpu.dot_dimension_numbers<[1], [0], [0], [1], [0, 0, 1, 1], [], []>} : vector<384x32xbf16>, vector<32x128xbf16>, vector<384x128xf32> -> vector<384x128xf32>
    %13 = vector.broadcast %0 : vector<1x128xf32> to vector<384x128xf32>
    %14 = arith.addf %12, %13 : vector<384x128xf32>
    %cst_12 = arith.constant 0.000000e+00 : f32
    %15 = vector.broadcast %cst_12 : f32 to vector<384x128xf32>
    %16 = arith.maximumf %14, %15 : vector<384x128xf32>
    %17 = arith.maximumf %8, %16 : vector<384x128xf32>
    %c2 = arith.constant 2 : index
    %c0_13 = arith.constant 0 : index
    %c0_14 = arith.constant 0 : index
    %18 = vector.load %arg1[%c2, %c0_13, %c0_14] : memref<4x384x32xbf16, #tpu.memory_space<vmem>>, vector<1x384x32xbf16>
    %19 = vector.shape_cast %18 : vector<1x384x32xbf16> to vector<384x32xbf16>
    %c0_15 = arith.constant 0 : index
    %c0_16 = arith.constant 0 : index
    %20 = vector.load %arg2[%c0_15, %c0_16] : memref<32x128xbf16, #tpu.memory_space<vmem>>, vector<32x128xbf16>
    %cst_17 = arith.constant dense<0.000000e+00> : vector<384x128xf32>
    %21 = tpu.matmul %19, %20, %cst_17 {dimension_numbers = #tpu.dot_dimension_numbers<[1], [0], [0], [1], [0, 0, 1, 1], [], []>} : vector<384x32xbf16>, vector<32x128xbf16>, vector<384x128xf32> -> vector<384x128xf32>
    %22 = vector.broadcast %0 : vector<1x128xf32> to vector<384x128xf32>
    %23 = arith.addf %21, %22 : vector<384x128xf32>
    %cst_18 = arith.constant 0.000000e+00 : f32
    %24 = vector.broadcast %cst_18 : f32 to vector<384x128xf32>
    %25 = arith.maximumf %23, %24 : vector<384x128xf32>
    %26 = arith.maximumf %17, %25 : vector<384x128xf32>
    %c3 = arith.constant 3 : index
    %c0_19 = arith.constant 0 : index
    %c0_20 = arith.constant 0 : index
    %27 = vector.load %arg1[%c3, %c0_19, %c0_20] : memref<4x384x32xbf16, #tpu.memory_space<vmem>>, vector<1x384x32xbf16>
    %28 = vector.shape_cast %27 : vector<1x384x32xbf16> to vector<384x32xbf16>
    %c0_21 = arith.constant 0 : index
    %c0_22 = arith.constant 0 : index
    %29 = vector.load %arg2[%c0_21, %c0_22] : memref<32x128xbf16, #tpu.memory_space<vmem>>, vector<32x128xbf16>
    %cst_23 = arith.constant dense<0.000000e+00> : vector<384x128xf32>
    %30 = tpu.matmul %28, %29, %cst_23 {dimension_numbers = #tpu.dot_dimension_numbers<[1], [0], [0], [1], [0, 0, 1, 1], [], []>} : vector<384x32xbf16>, vector<32x128xbf16>, vector<384x128xf32> -> vector<384x128xf32>
    %31 = vector.broadcast %0 : vector<1x128xf32> to vector<384x128xf32>
    %32 = arith.addf %30, %31 : vector<384x128xf32>
    %cst_24 = arith.constant 0.000000e+00 : f32
    %33 = vector.broadcast %cst_24 : f32 to vector<384x128xf32>
    %34 = arith.maximumf %32, %33 : vector<384x128xf32>
    %35 = arith.maximumf %26, %34 : vector<384x128xf32>
    %36 = vector.shape_cast %35 : vector<384x128xf32> to vector<2x12x16x128xf32>
    %c0_25 = arith.constant 0 : index
    %c0_26 = arith.constant 0 : index
    %c0_27 = arith.constant 0 : index
    %c0_28 = arith.constant 0 : index
    %37 = vector.load %arg11[%c0_25, %c0_26, %c0_27, %c0_28] : memref<2x12x16x128xf32, #tpu.memory_space<vmem>>, vector<2x12x16x128xf32>
    tpu.vector_store %arg11[%c0_25, %c0_26, %c0_27, %c0_28], %36 {strides = array<i32>} : memref<2x12x16x128xf32, #tpu.memory_space<vmem>>, vector<2x12x16x128xf32>,
    %cst_29 = arith.constant 0.000000e+00 : f32
    %38 = vector.broadcast %cst_29 : f32 to vector<128x128xf32>
    %c0_30 = arith.constant 0 : index
    %c0_31 = arith.constant 0 : index
    %c0_32 = arith.constant 0 : index
    %c0_33 = arith.constant 0 : index
    %39 = vector.load %arg11[%c0_30, %c0_31, %c0_32, %c0_33] : memref<2x12x16x128xf32, #tpu.memory_space<vmem>>, vector<2x8x8x128xf32>
    %40 = vector.shape_cast %39 : vector<2x8x8x128xf32> to vector<128x128xf32>
    %41 = arith.truncf %40 : vector<128x128xf32> to vector<128x128xbf16>
    %c0_34 = arith.constant 0 : index
    %c0_35 = arith.constant 0 : index
    %c0_36 = arith.constant 0 : index
    %42 = vector.load %arg4[%c0_34, %c0_35, %c0_36] : memref<25x128x128xbf16, #tpu.memory_space<vmem>>, vector<1x128x128xbf16>
    %43 = vector.shape_cast %42 : vector<1x128x128xbf16> to vector<128x128xbf16>
    %cst_37 = arith.constant dense<0.000000e+00> : vector<128x128xf32>
    %44 = tpu.matmul %41, %43, %cst_37 {dimension_numbers = #tpu.dot_dimension_numbers<[1], [0], [0], [1], [0, 0, 1, 1], [], []>} : vector<128x128xbf16>, vector<128x128xbf16>, vector<128x128xf32> -> vector<128x128xf32>
    %45 = arith.addf %38, %44 : vector<128x128xf32>
    %c0_38 = arith.constant 0 : index
    %c0_39 = arith.constant 0 : index
    %c1_40 = arith.constant 1 : index
    %c0_41 = arith.constant 0 : index
    %46 = vector.load %arg11[%c0_38, %c0_39, %c1_40, %c0_41] : memref<2x12x16x128xf32, #tpu.memory_space<vmem>>, vector<2x8x8x128xf32>
    %47 = vector.shape_cast %46 : vector<2x8x8x128xf32> to vector<128x128xf32>
    %48 = arith.truncf %47 : vector<128x128xf32> to vector<128x128xbf16>
    %c1_42 = arith.constant 1 : index
    %c0_43 = arith.constant 0 : index
    %c0_44 = arith.constant 0 : index
    %49 = vector.load %arg4[%c1_42, %c0_43, %c0_44] : memref<25x128x128xbf16, #tpu.memory_space<vmem>>, vector<1x128x128xbf16>
    %50 = vector.shape_cast %49 : vector<1x128x128xbf16> to vector<128x128xbf16>
    %cst_45 = arith.constant dense<0.000000e+00> : vector<128x128xf32>
    %51 = tpu.matmul %48, %50, %cst_45 {dimension_numbers = #tpu.dot_dimension_numbers<[1], [0], [0], [1], [0, 0, 1, 1], [], []>} : vector<128x128xbf16>, vector<128x128xbf16>, vector<128x128xf32> -> vector<128x128xf32>
    %52 = arith.addf %45, %51 : vector<128x128xf32>
    %c0_46 = arith.constant 0 : index
    %c0_47 = arith.constant 0 : index
    %c2_48 = arith.constant 2 : index
    %c0_49 = arith.constant 0 : index
    %53 = vector.load %arg11[%c0_46, %c0_47, %c2_48, %c0_49] : memref<2x12x16x128xf32, #tpu.memory_space<vmem>>, vector<2x8x8x128xf32>
    %54 = vector.shape_cast %53 : vector<2x8x8x128xf32> to vector<128x128xf32>
    %55 = arith.truncf %54 : vector<128x128xf32> to vector<128x128xbf16>
    %c2_50 = arith.constant 2 : index
    %c0_51 = arith.constant 0 : index
    %c0_52 = arith.constant 0 : index
    %56 = vector.load %arg4[%c2_50, %c0_51, %c0_52] : memref<25x128x128xbf16, #tpu.memory_space<vmem>>, vector<1x128x128xbf16>
    %57 = vector.shape_cast %56 : vector<1x128x128xbf16> to vector<128x128xbf16>
    %cst_53 = arith.constant dense<0.000000e+00> : vector<128x128xf32>
    %58 = tpu.matmul %55, %57, %cst_53 {dimension_numbers = #tpu.dot_dimension_numbers<[1], [0], [0], [1], [0, 0, 1, 1], [], []>} : vector<128x128xbf16>, vector<128x128xbf16>, vector<128x128xf32> -> vector<128x128xf32>
    %59 = arith.addf %52, %58 : vector<128x128xf32>
    %c0_54 = arith.constant 0 : index
    %c0_55 = arith.constant 0 : index
    %c3_56 = arith.constant 3 : index
    %c0_57 = arith.constant 0 : index
    %60 = vector.load %arg11[%c0_54, %c0_55, %c3_56, %c0_57] : memref<2x12x16x128xf32, #tpu.memory_space<vmem>>, vector<2x8x8x128xf32>
    %61 = vector.shape_cast %60 : vector<2x8x8x128xf32> to vector<128x128xf32>
    %62 = arith.truncf %61 : vector<128x128xf32> to vector<128x128xbf16>
    %c3_58 = arith.constant 3 : index
    %c0_59 = arith.constant 0 : index
    %c0_60 = arith.constant 0 : index
    %63 = vector.load %arg4[%c3_58, %c0_59, %c0_60] : memref<25x128x128xbf16, #tpu.memory_space<vmem>>, vector<1x128x128xbf16>
    %64 = vector.shape_cast %63 : vector<1x128x128xbf16> to vector<128x128xbf16>
    %cst_61 = arith.constant dense<0.000000e+00> : vector<128x128xf32>
    %65 = tpu.matmul %62, %64, %cst_61 {dimension_numbers = #tpu.dot_dimension_numbers<[1], [0], [0], [1], [0, 0, 1, 1], [], []>} : vector<128x128xbf16>, vector<128x128xbf16>, vector<128x128xf32> -> vector<128x128xf32>
    %66 = arith.addf %59, %65 : vector<128x128xf32>
    %c0_62 = arith.constant 0 : index
    %c0_63 = arith.constant 0 : index
    %c4 = arith.constant 4 : index
    %c0_64 = arith.constant 0 : index
    %67 = vector.load %arg11[%c0_62, %c0_63, %c4, %c0_64] : memref<2x12x16x128xf32, #tpu.memory_space<vmem>>, vector<2x8x8x128xf32>
    %68 = vector.shape_cast %67 : vector<2x8x8x128xf32> to vector<128x128xf32>
    %69 = arith.truncf %68 : vector<128x128xf32> to vector<128x128xbf16>
    %c4_65 = arith.constant 4 : index
    %c0_66 = arith.constant 0 : index
    %c0_67 = arith.constant 0 : index
    %70 = vector.load %arg4[%c4_65, %c0_66, %c0_67] : memref<25x128x128xbf16, #tpu.memory_space<vmem>>, vector<1x128x128xbf16>
    %71 = vector.shape_cast %70 : vector<1x128x128xbf16> to vector<128x128xbf16>
    %cst_68 = arith.constant dense<0.000000e+00> : vector<128x128xf32>
    %72 = tpu.matmul %69, %71, %cst_68 {dimension_numbers = #tpu.dot_dimension_numbers<[1], [0], [0], [1], [0, 0, 1, 1], [], []>} : vector<128x128xbf16>, vector<128x128xbf16>, vector<128x128xf32> -> vector<128x128xf32>
    %73 = arith.addf %66, %72 : vector<128x128xf32>
    %c0_69 = arith.constant 0 : index
    %c1_70 = arith.constant 1 : index
    %c0_71 = arith.constant 0 : index
    %c0_72 = arith.constant 0 : index
    %74 = vector.load %arg11[%c0_69, %c1_70, %c0_71, %c0_72] : memref<2x12x16x128xf32, #tpu.memory_space<vmem>>, vector<2x8x8x128xf32>
    %75 = vector.shape_cast %74 : vector<2x8x8x128xf32> to vector<128x128xf32>
    %76 = arith.truncf %75 : vector<128x128xf32> to vector<128x128xbf16>
    %c5 = arith.constant 5 : index
    %c0_73 = arith.constant 0 : index
    %c0_74 = arith.constant 0 : index
    %77 = vector.load %arg4[%c5, %c0_73, %c0_74] : memref<25x128x128xbf16, #tpu.memory_space<vmem>>, vector<1x128x128xbf16>
    %78 = vector.shape_cast %77 : vector<1x128x128xbf16> to vector<128x128xbf16>
    %cst_75 = arith.constant dense<0.000000e+00> : vector<128x128xf32>
    %79 = tpu.matmul %76, %78, %cst_75 {dimension_numbers = #tpu.dot_dimension_numbers<[1], [0], [0], [1], [0, 0, 1, 1], [], []>} : vector<128x128xbf16>, vector<128x128xbf16>, vector<128x128xf32> -> vector<128x128xf32>
    %80 = arith.addf %73, %79 : vector<128x128xf32>
    %c0_76 = arith.constant 0 : index
    %c1_77 = arith.constant 1 : index
    %c1_78 = arith.constant 1 : index
    %c0_79 = arith.constant 0 : index
    %81 = vector.load %arg11[%c0_76, %c1_77, %c1_78, %c0_79] : memref<2x12x16x128xf32, #tpu.memory_space<vmem>>, vector<2x8x8x128xf32>
    %82 = vector.shape_cast %81 : vector<2x8x8x128xf32> to vector<128x128xf32>
    %83 = arith.truncf %82 : vector<128x128xf32> to vector<128x128xbf16>
    %c6 = arith.constant 6 : index
    %c0_80 = arith.constant 0 : index
    %c0_81 = arith.constant 0 : index
    %84 = vector.load %arg4[%c6, %c0_80, %c0_81] : memref<25x128x128xbf16, #tpu.memory_space<vmem>>, vector<1x128x128xbf16>
    %85 = vector.shape_cast %84 : vector<1x128x128xbf16> to vector<128x128xbf16>
    %cst_82 = arith.constant dense<0.000000e+00> : vector<128x128xf32>
    %86 = tpu.matmul %83, %85, %cst_82 {dimension_numbers = #tpu.dot_dimension_numbers<[1], [0], [0], [1], [0, 0, 1, 1], [], []>} : vector<128x128xbf16>, vector<128x128xbf16>, vector<128x128xf32> -> vector<128x128xf32>
    %87 = arith.addf %80, %86 : vector<128x128xf32>
    %c0_83 = arith.constant 0 : index
    %c1_84 = arith.constant 1 : index
    %c2_85 = arith.constant 2 : index
    %c0_86 = arith.constant 0 : index
    %88 = vector.load %arg11[%c0_83, %c1_84, %c2_85, %c0_86] : memref<2x12x16x128xf32, #tpu.memory_space<vmem>>, vector<2x8x8x128xf32>
    %89 = vector.shape_cast %88 : vector<2x8x8x128xf32> to vector<128x128xf32>
    %90 = arith.truncf %89 : vector<128x128xf32> to vector<128x128xbf16>
    %c7 = arith.constant 7 : index
    %c0_87 = arith.constant 0 : index
    %c0_88 = arith.constant 0 : index
    %91 = vector.load %arg4[%c7, %c0_87, %c0_88] : memref<25x128x128xbf16, #tpu.memory_space<vmem>>, vector<1x128x128xbf16>
    %92 = vector.shape_cast %91 : vector<1x128x128xbf16> to vector<128x128xbf16>
    %cst_89 = arith.constant dense<0.000000e+00> : vector<128x128xf32>
    %93 = tpu.matmul %90, %92, %cst_89 {dimension_numbers = #tpu.dot_dimension_numbers<[1], [0], [0], [1], [0, 0, 1, 1], [], []>} : vector<128x128xbf16>, vector<128x128xbf16>, vector<128x128xf32> -> vector<128x128xf32>
    %94 = arith.addf %87, %93 : vector<128x128xf32>
    %c0_90 = arith.constant 0 : index
    %c1_91 = arith.constant 1 : index
    %c3_92 = arith.constant 3 : index
    %c0_93 = arith.constant 0 : index
    %95 = vector.load %arg11[%c0_90, %c1_91, %c3_92, %c0_93] : memref<2x12x16x128xf32, #tpu.memory_space<vmem>>, vector<2x8x8x128xf32>
    %96 = vector.shape_cast %95 : vector<2x8x8x128xf32> to vector<128x128xf32>
    %97 = arith.truncf %96 : vector<128x128xf32> to vector<128x128xbf16>
    %c8 = arith.constant 8 : index
    %c0_94 = arith.constant 0 : index
    %c0_95 = arith.constant 0 : index
    %98 = vector.load %arg4[%c8, %c0_94, %c0_95] : memref<25x128x128xbf16, #tpu.memory_space<vmem>>, vector<1x128x128xbf16>
    %99 = vector.shape_cast %98 : vector<1x128x128xbf16> to vector<128x128xbf16>
    %cst_96 = arith.constant dense<0.000000e+00> : vector<128x128xf32>
    %100 = tpu.matmul %97, %99, %cst_96 {dimension_numbers = #tpu.dot_dimension_numbers<[1], [0], [0], [1], [0, 0, 1, 1], [], []>} : vector<128x128xbf16>, vector<128x128xbf16>, vector<128x128xf32> -> vector<128x128xf32>
    %101 = arith.addf %94, %100 : vector<128x128xf32>
    %c0_97 = arith.constant 0 : index
    %c1_98 = arith.constant 1 : index
    %c4_99 = arith.constant 4 : index
    %c0_100 = arith.constant 0 : index
    %102 = vector.load %arg11[%c0_97, %c1_98, %c4_99, %c0_100] : memref<2x12x16x128xf32, #tpu.memory_space<vmem>>, vector<2x8x8x128xf32>
    %103 = vector.shape_cast %102 : vector<2x8x8x128xf32> to vector<128x128xf32>
    %104 = arith.truncf %103 : vector<128x128xf32> to vector<128x128xbf16>
    %c9 = arith.constant 9 : index
    %c0_101 = arith.constant 0 : index
    %c0_102 = arith.constant 0 : index
    %105 = vector.load %arg4[%c9, %c0_101, %c0_102] : memref<25x128x128xbf16, #tpu.memory_space<vmem>>, vector<1x128x128xbf16>
    %106 = vector.shape_cast %105 : vector<1x128x128xbf16> to vector<128x128xbf16>
    %cst_103 = arith.constant dense<0.000000e+00> : vector<128x128xf32>
    %107 = tpu.matmul %104, %106, %cst_103 {dimension_numbers = #tpu.dot_dimension_numbers<[1], [0], [0], [1], [0, 0, 1, 1], [], []>} : vector<128x128xbf16>, vector<128x128xbf16>, vector<128x128xf32> -> vector<128x128xf32>
    %108 = arith.addf %101, %107 : vector<128x128xf32>
    %c0_104 = arith.constant 0 : index
    %c2_105 = arith.constant 2 : index
    %c0_106 = arith.constant 0 : index
    %c0_107 = arith.constant 0 : index
    %109 = vector.load %arg11[%c0_104, %c2_105, %c0_106, %c0_107] : memref<2x12x16x128xf32, #tpu.memory_space<vmem>>, vector<2x8x8x128xf32>
    %110 = vector.shape_cast %109 : vector<2x8x8x128xf32> to vector<128x128xf32>
    %111 = arith.truncf %110 : vector<128x128xf32> to vector<128x128xbf16>
    %c10 = arith.constant 10 : index
    %c0_108 = arith.constant 0 : index
    %c0_109 = arith.constant 0 : index
    %112 = vector.load %arg4[%c10, %c0_108, %c0_109] : memref<25x128x128xbf16, #tpu.memory_space<vmem>>, vector<1x128x128xbf16>
    %113 = vector.shape_cast %112 : vector<1x128x128xbf16> to vector<128x128xbf16>
    %cst_110 = arith.constant dense<0.000000e+00> : vector<128x128xf32>
    %114 = tpu.matmul %111, %113, %cst_110 {dimension_numbers = #tpu.dot_dimension_numbers<[1], [0], [0], [1], [0, 0, 1, 1], [], []>} : vector<128x128xbf16>, vector<128x128xbf16>, vector<128x128xf32> -> vector<128x128xf32>
    %115 = arith.addf %108, %114 : vector<128x128xf32>
    %c0_111 = arith.constant 0 : index
    %c2_112 = arith.constant 2 : index
    %c1_113 = arith.constant 1 : index
    %c0_114 = arith.constant 0 : index
    %116 = vector.load %arg11[%c0_111, %c2_112, %c1_113, %c0_114] : memref<2x12x16x128xf32, #tpu.memory_space<vmem>>, vector<2x8x8x128xf32>
    %117 = vector.shape_cast %116 : vector<2x8x8x128xf32> to vector<128x128xf32>
    %118 = arith.truncf %117 : vector<128x128xf32> to vector<128x128xbf16>
    %c11 = arith.constant 11 : index
    %c0_115 = arith.constant 0 : index
    %c0_116 = arith.constant 0 : index
    %119 = vector.load %arg4[%c11, %c0_115, %c0_116] : memref<25x128x128xbf16, #tpu.memory_space<vmem>>, vector<1x128x128xbf16>
    %120 = vector.shape_cast %119 : vector<1x128x128xbf16> to vector<128x128xbf16>
    %cst_117 = arith.constant dense<0.000000e+00> : vector<128x128xf32>
    %121 = tpu.matmul %118, %120, %cst_117 {dimension_numbers = #tpu.dot_dimension_numbers<[1], [0], [0], [1], [0, 0, 1, 1], [], []>} : vector<128x128xbf16>, vector<128x128xbf16>, vector<128x128xf32> -> vector<128x128xf32>
    %122 = arith.addf %115, %121 : vector<128x128xf32>
    %c0_118 = arith.constant 0 : index
    %c2_119 = arith.constant 2 : index
    %c2_120 = arith.constant 2 : index
    %c0_121 = arith.constant 0 : index
    %123 = vector.load %arg11[%c0_118, %c2_119, %c2_120, %c0_121] : memref<2x12x16x128xf32, #tpu.memory_space<vmem>>, vector<2x8x8x128xf32>
    %124 = vector.shape_cast %123 : vector<2x8x8x128xf32> to vector<128x128xf32>
    %125 = arith.truncf %124 : vector<128x128xf32> to vector<128x128xbf16>
    %c12 = arith.constant 12 : index
    %c0_122 = arith.constant 0 : index
    %c0_123 = arith.constant 0 : index
    %126 = vector.load %arg4[%c12, %c0_122, %c0_123] : memref<25x128x128xbf16, #tpu.memory_space<vmem>>, vector<1x128x128xbf16>
    %127 = vector.shape_cast %126 : vector<1x128x128xbf16> to vector<128x128xbf16>
    %cst_124 = arith.constant dense<0.000000e+00> : vector<128x128xf32>
    %128 = tpu.matmul %125, %127, %cst_124 {dimension_numbers = #tpu.dot_dimension_numbers<[1], [0], [0], [1], [0, 0, 1, 1], [], []>} : vector<128x128xbf16>, vector<128x128xbf16>, vector<128x128xf32> -> vector<128x128xf32>
    %129 = arith.addf %122, %128 : vector<128x128xf32>
    %c0_125 = arith.constant 0 : index
    %c2_126 = arith.constant 2 : index
    %c3_127 = arith.constant 3 : index
    %c0_128 = arith.constant 0 : index
    %130 = vector.load %arg11[%c0_125, %c2_126, %c3_127, %c0_128] : memref<2x12x16x128xf32, #tpu.memory_space<vmem>>, vector<2x8x8x128xf32>
    %131 = vector.shape_cast %130 : vector<2x8x8x128xf32> to vector<128x128xf32>
    %132 = arith.truncf %131 : vector<128x128xf32> to vector<128x128xbf16>
    %c13 = arith.constant 13 : index
    %c0_129 = arith.constant 0 : index
    %c0_130 = arith.constant 0 : index
    %133 = vector.load %arg4[%c13, %c0_129, %c0_130] : memref<25x128x128xbf16, #tpu.memory_space<vmem>>, vector<1x128x128xbf16>
    %134 = vector.shape_cast %133 : vector<1x128x128xbf16> to vector<128x128xbf16>
    %cst_131 = arith.constant dense<0.000000e+00> : vector<128x128xf32>
    %135 = tpu.matmul %132, %134, %cst_131 {dimension_numbers = #tpu.dot_dimension_numbers<[1], [0], [0], [1], [0, 0, 1, 1], [], []>} : vector<128x128xbf16>, vector<128x128xbf16>, vector<128x128xf32> -> vector<128x128xf32>
    %136 = arith.addf %129, %135 : vector<128x128xf32>
    %c0_132 = arith.constant 0 : index
    %c2_133 = arith.constant 2 : index
    %c4_134 = arith.constant 4 : index
    %c0_135 = arith.constant 0 : index
    %137 = vector.load %arg11[%c0_132, %c2_133, %c4_134, %c0_135] : memref<2x12x16x128xf32, #tpu.memory_space<vmem>>, vector<2x8x8x128xf32>
    %138 = vector.shape_cast %137 : vector<2x8x8x128xf32> to vector<128x128xf32>
    %139 = arith.truncf %138 : vector<128x128xf32> to vector<128x128xbf16>
    %c14 = arith.constant 14 : index
    %c0_136 = arith.constant 0 : index
    %c0_137 = arith.constant 0 : index
    %140 = vector.load %arg4[%c14, %c0_136, %c0_137] : memref<25x128x128xbf16, #tpu.memory_space<vmem>>, vector<1x128x128xbf16>
    %141 = vector.shape_cast %140 : vector<1x128x128xbf16> to vector<128x128xbf16>
    %cst_138 = arith.constant dense<0.000000e+00> : vector<128x128xf32>
    %142 = tpu.matmul %139, %141, %cst_138 {dimension_numbers = #tpu.dot_dimension_numbers<[1], [0], [0], [1], [0, 0, 1, 1], [], []>} : vector<128x128xbf16>, vector<128x128xbf16>, vector<128x128xf32> -> vector<128x128xf32>
    %143 = arith.addf %136, %142 : vector<128x128xf32>
    %c0_139 = arith.constant 0 : index
    %c3_140 = arith.constant 3 : index
    %c0_141 = arith.constant 0 : index
    %c0_142 = arith.constant 0 : index
    %144 = vector.load %arg11[%c0_139, %c3_140, %c0_141, %c0_142] : memref<2x12x16x128xf32, #tpu.memory_space<vmem>>, vector<2x8x8x128xf32>
    %145 = vector.shape_cast %144 : vector<2x8x8x128xf32> to vector<128x128xf32>
    %146 = arith.truncf %145 : vector<128x128xf32> to vector<128x128xbf16>
    %c15 = arith.constant 15 : index
    %c0_143 = arith.constant 0 : index
    %c0_144 = arith.constant 0 : index
    %147 = vector.load %arg4[%c15, %c0_143, %c0_144] : memref<25x128x128xbf16, #tpu.memory_space<vmem>>, vector<1x128x128xbf16>
    %148 = vector.shape_cast %147 : vector<1x128x128xbf16> to vector<128x128xbf16>
    %cst_145 = arith.constant dense<0.000000e+00> : vector<128x128xf32>
    %149 = tpu.matmul %146, %148, %cst_145 {dimension_numbers = #tpu.dot_dimension_numbers<[1], [0], [0], [1], [0, 0, 1, 1], [], []>} : vector<128x128xbf16>, vector<128x128xbf16>, vector<128x128xf32> -> vector<128x128xf32>
    %150 = arith.addf %143, %149 : vector<128x128xf32>
    %c0_146 = arith.constant 0 : index
    %c3_147 = arith.constant 3 : index
    %c1_148 = arith.constant 1 : index
    %c0_149 = arith.constant 0 : index
    %151 = vector.load %arg11[%c0_146, %c3_147, %c1_148, %c0_149] : memref<2x12x16x128xf32, #tpu.memory_space<vmem>>, vector<2x8x8x128xf32>
    %152 = vector.shape_cast %151 : vector<2x8x8x128xf32> to vector<128x128xf32>
    %153 = arith.truncf %152 : vector<128x128xf32> to vector<128x128xbf16>
    %c16 = arith.constant 16 : index
    %c0_150 = arith.constant 0 : index
    %c0_151 = arith.constant 0 : index
    %154 = vector.load %arg4[%c16, %c0_150, %c0_151] : memref<25x128x128xbf16, #tpu.memory_space<vmem>>, vector<1x128x128xbf16>
    %155 = vector.shape_cast %154 : vector<1x128x128xbf16> to vector<128x128xbf16>
    %cst_152 = arith.constant dense<0.000000e+00> : vector<128x128xf32>
    %156 = tpu.matmul %153, %155, %cst_152 {dimension_numbers = #tpu.dot_dimension_numbers<[1], [0], [0], [1], [0, 0, 1, 1], [], []>} : vector<128x128xbf16>, vector<128x128xbf16>, vector<128x128xf32> -> vector<128x128xf32>
    %157 = arith.addf %150, %156 : vector<128x128xf32>
    %c0_153 = arith.constant 0 : index
    %c3_154 = arith.constant 3 : index
    %c2_155 = arith.constant 2 : index
    %c0_156 = arith.constant 0 : index
    %158 = vector.load %arg11[%c0_153, %c3_154, %c2_155, %c0_156] : memref<2x12x16x128xf32, #tpu.memory_space<vmem>>, vector<2x8x8x128xf32>
    %159 = vector.shape_cast %158 : vector<2x8x8x128xf32> to vector<128x128xf32>
    %160 = arith.truncf %159 : vector<128x128xf32> to vector<128x128xbf16>
    %c17 = arith.constant 17 : index
    %c0_157 = arith.constant 0 : index
    %c0_158 = arith.constant 0 : index
    %161 = vector.load %arg4[%c17, %c0_157, %c0_158] : memref<25x128x128xbf16, #tpu.memory_space<vmem>>, vector<1x128x128xbf16>
    %162 = vector.shape_cast %161 : vector<1x128x128xbf16> to vector<128x128xbf16>
    %cst_159 = arith.constant dense<0.000000e+00> : vector<128x128xf32>
    %163 = tpu.matmul %160, %162, %cst_159 {dimension_numbers = #tpu.dot_dimension_numbers<[1], [0], [0], [1], [0, 0, 1, 1], [], []>} : vector<128x128xbf16>, vector<128x128xbf16>, vector<128x128xf32> -> vector<128x128xf32>
    %164 = arith.addf %157, %163 : vector<128x128xf32>
    %c0_160 = arith.constant 0 : index
    %c3_161 = arith.constant 3 : index
    %c3_162 = arith.constant 3 : index
    %c0_163 = arith.constant 0 : index
    %165 = vector.load %arg11[%c0_160, %c3_161, %c3_162, %c0_163] : memref<2x12x16x128xf32, #tpu.memory_space<vmem>>, vector<2x8x8x128xf32>
    %166 = vector.shape_cast %165 : vector<2x8x8x128xf32> to vector<128x128xf32>
    %167 = arith.truncf %166 : vector<128x128xf32> to vector<128x128xbf16>
    %c18 = arith.constant 18 : index
    %c0_164 = arith.constant 0 : index
    %c0_165 = arith.constant 0 : index
    %168 = vector.load %arg4[%c18, %c0_164, %c0_165] : memref<25x128x128xbf16, #tpu.memory_space<vmem>>, vector<1x128x128xbf16>
    %169 = vector.shape_cast %168 : vector<1x128x128xbf16> to vector<128x128xbf16>
    %cst_166 = arith.constant dense<0.000000e+00> : vector<128x128xf32>
    %170 = tpu.matmul %167, %169, %cst_166 {dimension_numbers = #tpu.dot_dimension_numbers<[1], [0], [0], [1], [0, 0, 1, 1], [], []>} : vector<128x128xbf16>, vector<128x128xbf16>, vector<128x128xf32> -> vector<128x128xf32>
    %171 = arith.addf %164, %170 : vector<128x128xf32>
    %c0_167 = arith.constant 0 : index
    %c3_168 = arith.constant 3 : index
    %c4_169 = arith.constant 4 : index
    %c0_170 = arith.constant 0 : index
    %172 = vector.load %arg11[%c0_167, %c3_168, %c4_169, %c0_170] : memref<2x12x16x128xf32, #tpu.memory_space<vmem>>, vector<2x8x8x128xf32>
    %173 = vector.shape_cast %172 : vector<2x8x8x128xf32> to vector<128x128xf32>
    %174 = arith.truncf %173 : vector<128x128xf32> to vector<128x128xbf16>
    %c19 = arith.constant 19 : index
    %c0_171 = arith.constant 0 : index
    %c0_172 = arith.constant 0 : index
    %175 = vector.load %arg4[%c19, %c0_171, %c0_172] : memref<25x128x128xbf16, #tpu.memory_space<vmem>>, vector<1x128x128xbf16>
    %176 = vector.shape_cast %175 : vector<1x128x128xbf16> to vector<128x128xbf16>
    %cst_173 = arith.constant dense<0.000000e+00> : vector<128x128xf32>
    %177 = tpu.matmul %174, %176, %cst_173 {dimension_numbers = #tpu.dot_dimension_numbers<[1], [0], [0], [1], [0, 0, 1, 1], [], []>} : vector<128x128xbf16>, vector<128x128xbf16>, vector<128x128xf32> -> vector<128x128xf32>
    %178 = arith.addf %171, %177 : vector<128x128xf32>
    %c0_174 = arith.constant 0 : index
    %c4_175 = arith.constant 4 : index
    %c0_176 = arith.constant 0 : index
    %c0_177 = arith.constant 0 : index
    %179 = vector.load %arg11[%c0_174, %c4_175, %c0_176, %c0_177] : memref<2x12x16x128xf32, #tpu.memory_space<vmem>>, vector<2x8x8x128xf32>
    %180 = vector.shape_cast %179 : vector<2x8x8x128xf32> to vector<128x128xf32>
    %181 = arith.truncf %180 : vector<128x128xf32> to vector<128x128xbf16>
    %c20 = arith.constant 20 : index
    %c0_178 = arith.constant 0 : index
    %c0_179 = arith.constant 0 : index
    %182 = vector.load %arg4[%c20, %c0_178, %c0_179] : memref<25x128x128xbf16, #tpu.memory_space<vmem>>, vector<1x128x128xbf16>
    %183 = vector.shape_cast %182 : vector<1x128x128xbf16> to vector<128x128xbf16>
    %cst_180 = arith.constant dense<0.000000e+00> : vector<128x128xf32>
    %184 = tpu.matmul %181, %183, %cst_180 {dimension_numbers = #tpu.dot_dimension_numbers<[1], [0], [0], [1], [0, 0, 1, 1], [], []>} : vector<128x128xbf16>, vector<128x128xbf16>, vector<128x128xf32> -> vector<128x128xf32>
    %185 = arith.addf %178, %184 : vector<128x128xf32>
    %c0_181 = arith.constant 0 : index
    %c4_182 = arith.constant 4 : index
    %c1_183 = arith.constant 1 : index
    %c0_184 = arith.constant 0 : index
    %186 = vector.load %arg11[%c0_181, %c4_182, %c1_183, %c0_184] : memref<2x12x16x128xf32, #tpu.memory_space<vmem>>, vector<2x8x8x128xf32>
    %187 = vector.shape_cast %186 : vector<2x8x8x128xf32> to vector<128x128xf32>
    %188 = arith.truncf %187 : vector<128x128xf32> to vector<128x128xbf16>
    %c21 = arith.constant 21 : index
    %c0_185 = arith.constant 0 : index
    %c0_186 = arith.constant 0 : index
    %189 = vector.load %arg4[%c21, %c0_185, %c0_186] : memref<25x128x128xbf16, #tpu.memory_space<vmem>>, vector<1x128x128xbf16>
    %190 = vector.shape_cast %189 : vector<1x128x128xbf16> to vector<128x128xbf16>
    %cst_187 = arith.constant dense<0.000000e+00> : vector<128x128xf32>
    %191 = tpu.matmul %188, %190, %cst_187 {dimension_numbers = #tpu.dot_dimension_numbers<[1], [0], [0], [1], [0, 0, 1, 1], [], []>} : vector<128x128xbf16>, vector<128x128xbf16>, vector<128x128xf32> -> vector<128x128xf32>
    %192 = arith.addf %185, %191 : vector<128x128xf32>
    %c0_188 = arith.constant 0 : index
    %c4_189 = arith.constant 4 : index
    %c2_190 = arith.constant 2 : index
    %c0_191 = arith.constant 0 : index
    %193 = vector.load %arg11[%c0_188, %c4_189, %c2_190, %c0_191] : memref<2x12x16x128xf32, #tpu.memory_space<vmem>>, vector<2x8x8x128xf32>
    %194 = vector.shape_cast %193 : vector<2x8x8x128xf32> to vector<128x128xf32>
    %195 = arith.truncf %194 : vector<128x128xf32> to vector<128x128xbf16>
    %c22 = arith.constant 22 : index
    %c0_192 = arith.constant 0 : index
    %c0_193 = arith.constant 0 : index
    %196 = vector.load %arg4[%c22, %c0_192, %c0_193] : memref<25x128x128xbf16, #tpu.memory_space<vmem>>, vector<1x128x128xbf16>
    %197 = vector.shape_cast %196 : vector<1x128x128xbf16> to vector<128x128xbf16>
    %cst_194 = arith.constant dense<0.000000e+00> : vector<128x128xf32>
    %198 = tpu.matmul %195, %197, %cst_194 {dimension_numbers = #tpu.dot_dimension_numbers<[1], [0], [0], [1], [0, 0, 1, 1], [], []>} : vector<128x128xbf16>, vector<128x128xbf16>, vector<128x128xf32> -> vector<128x128xf32>
    %199 = arith.addf %192, %198 : vector<128x128xf32>
    %c0_195 = arith.constant 0 : index
    %c4_196 = arith.constant 4 : index
    %c3_197 = arith.constant 3 : index
    %c0_198 = arith.constant 0 : index
    %200 = vector.load %arg11[%c0_195, %c4_196, %c3_197, %c0_198] : memref<2x12x16x128xf32, #tpu.memory_space<vmem>>, vector<2x8x8x128xf32>
    %201 = vector.shape_cast %200 : vector<2x8x8x128xf32> to vector<128x128xf32>
    %202 = arith.truncf %201 : vector<128x128xf32> to vector<128x128xbf16>
    %c23 = arith.constant 23 : index
    %c0_199 = arith.constant 0 : index
    %c0_200 = arith.constant 0 : index
    %203 = vector.load %arg4[%c23, %c0_199, %c0_200] : memref<25x128x128xbf16, #tpu.memory_space<vmem>>, vector<1x128x128xbf16>
    %204 = vector.shape_cast %203 : vector<1x128x128xbf16> to vector<128x128xbf16>
    %cst_201 = arith.constant dense<0.000000e+00> : vector<128x128xf32>
    %205 = tpu.matmul %202, %204, %cst_201 {dimension_numbers = #tpu.dot_dimension_numbers<[1], [0], [0], [1], [0, 0, 1, 1], [], []>} : vector<128x128xbf16>, vector<128x128xbf16>, vector<128x128xf32> -> vector<128x128xf32>
    %206 = arith.addf %199, %205 : vector<128x128xf32>
    %c0_202 = arith.constant 0 : index
    %c4_203 = arith.constant 4 : index
    %c4_204 = arith.constant 4 : index
    %c0_205 = arith.constant 0 : index
    %207 = vector.load %arg11[%c0_202, %c4_203, %c4_204, %c0_205] : memref<2x12x16x128xf32, #tpu.memory_space<vmem>>, vector<2x8x8x128xf32>
    %208 = vector.shape_cast %207 : vector<2x8x8x128xf32> to vector<128x128xf32>
    %209 = arith.truncf %208 : vector<128x128xf32> to vector<128x128xbf16>
    %c24 = arith.constant 24 : index
    %c0_206 = arith.constant 0 : index
    %c0_207 = arith.constant 0 : index
    %210 = vector.load %arg4[%c24, %c0_206, %c0_207] : memref<25x128x128xbf16, #tpu.memory_space<vmem>>, vector<1x128x128xbf16>
    %211 = vector.shape_cast %210 : vector<1x128x128xbf16> to vector<128x128xbf16>
    %cst_208 = arith.constant dense<0.000000e+00> : vector<128x128xf32>
    %212 = tpu.matmul %209, %211, %cst_208 {dimension_numbers = #tpu.dot_dimension_numbers<[1], [0], [0], [1], [0, 0, 1, 1], [], []>} : vector<128x128xbf16>, vector<128x128xbf16>, vector<128x128xf32> -> vector<128x128xf32>
    %213 = arith.addf %206, %212 : vector<128x128xf32>
    %c0_209 = arith.constant 0 : index
    %c0_210 = arith.constant 0 : index
    %214 = vector.load %arg5[%c0_209, %c0_210] : memref<1x128xf32, #tpu.memory_space<vmem>>, vector<1x128xf32>
    %215 = vector.broadcast %214 : vector<1x128xf32> to vector<128x128xf32>
    %216 = arith.addf %213, %215 : vector<128x128xf32>
    %cst_211 = arith.constant 0.000000e+00 : f32
    %217 = vector.broadcast %cst_211 : f32 to vector<128x128xf32>
    %218 = arith.maximumf %216, %217 : vector<128x128xf32>
    %219 = vector.shape_cast %218 : vector<128x128xf32> to vector<2x8x8x128xf32>
    %c0_212 = arith.constant 0 : index
    %c0_213 = arith.constant 0 : index
    %c0_214 = arith.constant 0 : index
    %c0_215 = arith.constant 0 : index
    %220 = vector.load %arg12[%c0_212, %c0_213, %c0_214, %c0_215] : memref<2x8x8x128xf32, #tpu.memory_space<vmem>>, vector<2x8x8x128xf32>
    tpu.vector_store %arg12[%c0_212, %c0_213, %c0_214, %c0_215], %219 {strides = array<i32>} : memref<2x8x8x128xf32, #tpu.memory_space<vmem>>, vector<2x8x8x128xf32>,
    %cst_216 = arith.constant 0.000000e+00 : f32
    %221 = vector.broadcast %cst_216 : f32 to vector<2x512xf32>
    %c0_217 = arith.constant 0 : index
    %c0_218 = arith.constant 0 : index
    %c0_219 = arith.constant 0 : index
    %c0_220 = arith.constant 0 : index
    %222 = vector.load %arg12[%c0_217, %c0_218, %c0_219, %c0_220] : memref<2x8x8x128xf32, #tpu.memory_space<vmem>>, vector<2x1x1x128xf32>
    %223 = vector.shape_cast %222 : vector<2x1x1x128xf32> to vector<2x128xf32>
    %c0_221 = arith.constant 0 : index
    %c0_222 = arith.constant 0 : index
    %c1_223 = arith.constant 1 : index
    %c0_224 = arith.constant 0 : index
    %224 = vector.load %arg12[%c0_221, %c0_222, %c1_223, %c0_224] : memref<2x8x8x128xf32, #tpu.memory_space<vmem>>, vector<2x1x1x128xf32>
    %225 = vector.shape_cast %224 : vector<2x1x1x128xf32> to vector<2x128xf32>
    %c0_225 = arith.constant 0 : index
    %c1_226 = arith.constant 1 : index
    %c0_227 = arith.constant 0 : index
    %c0_228 = arith.constant 0 : index
    %226 = vector.load %arg12[%c0_225, %c1_226, %c0_227, %c0_228] : memref<2x8x8x128xf32, #tpu.memory_space<vmem>>, vector<2x1x1x128xf32>
    %227 = vector.shape_cast %226 : vector<2x1x1x128xf32> to vector<2x128xf32>
    %c0_229 = arith.constant 0 : index
    %c1_230 = arith.constant 1 : index
    %c1_231 = arith.constant 1 : index
    %c0_232 = arith.constant 0 : index
    %228 = vector.load %arg12[%c0_229, %c1_230, %c1_231, %c0_232] : memref<2x8x8x128xf32, #tpu.memory_space<vmem>>, vector<2x1x1x128xf32>
    %229 = vector.shape_cast %228 : vector<2x1x1x128xf32> to vector<2x128xf32>
    %230 = arith.maximumf %223, %225 : vector<2x128xf32>
    %231 = arith.maximumf %227, %229 : vector<2x128xf32>
    %232 = arith.maximumf %230, %231 : vector<2x128xf32>
    %233 = arith.truncf %232 : vector<2x128xf32> to vector<2x128xbf16>
    %c0_233 = arith.constant 0 : index
    %c0_234 = arith.constant 0 : index
    %234 = vector.load %arg6[%c0_233, %c0_234] : memref<2048x512xbf16, #tpu.memory_space<vmem>>, vector<128x512xbf16>
    %cst_235 = arith.constant dense<0.000000e+00> : vector<2x512xf32>
    %235 = tpu.matmul %233, %234, %cst_235 {dimension_numbers = #tpu.dot_dimension_numbers<[1], [0], [0], [1], [0, 0, 1, 1], [], []>} : vector<2x128xbf16>, vector<128x512xbf16>, vector<2x512xf32> -> vector<2x512xf32>
    %236 = arith.addf %221, %235 : vector<2x512xf32>
    %c0_236 = arith.constant 0 : index
    %c0_237 = arith.constant 0 : index
    %c2_238 = arith.constant 2 : index
    %c0_239 = arith.constant 0 : index
    %237 = vector.load %arg12[%c0_236, %c0_237, %c2_238, %c0_239] : memref<2x8x8x128xf32, #tpu.memory_space<vmem>>, vector<2x1x1x128xf32>
    %238 = vector.shape_cast %237 : vector<2x1x1x128xf32> to vector<2x128xf32>
    %c0_240 = arith.constant 0 : index
    %c0_241 = arith.constant 0 : index
    %c3_242 = arith.constant 3 : index
    %c0_243 = arith.constant 0 : index
    %239 = vector.load %arg12[%c0_240, %c0_241, %c3_242, %c0_243] : memref<2x8x8x128xf32, #tpu.memory_space<vmem>>, vector<2x1x1x128xf32>
    %240 = vector.shape_cast %239 : vector<2x1x1x128xf32> to vector<2x128xf32>
    %c0_244 = arith.constant 0 : index
    %c1_245 = arith.constant 1 : index
    %c2_246 = arith.constant 2 : index
    %c0_247 = arith.constant 0 : index
    %241 = vector.load %arg12[%c0_244, %c1_245, %c2_246, %c0_247] : memref<2x8x8x128xf32, #tpu.memory_space<vmem>>, vector<2x1x1x128xf32>
    %242 = vector.shape_cast %241 : vector<2x1x1x128xf32> to vector<2x128xf32>
    %c0_248 = arith.constant 0 : index
    %c1_249 = arith.constant 1 : index
    %c3_250 = arith.constant 3 : index
    %c0_251 = arith.constant 0 : index
    %243 = vector.load %arg12[%c0_248, %c1_249, %c3_250, %c0_251] : memref<2x8x8x128xf32, #tpu.memory_space<vmem>>, vector<2x1x1x128xf32>
    %244 = vector.shape_cast %243 : vector<2x1x1x128xf32> to vector<2x128xf32>
    %245 = arith.maximumf %238, %240 : vector<2x128xf32>
    %246 = arith.maximumf %242, %244 : vector<2x128xf32>
    %247 = arith.maximumf %245, %246 : vector<2x128xf32>
    %248 = arith.truncf %247 : vector<2x128xf32> to vector<2x128xbf16>
    %c128 = arith.constant 128 : index
    %c0_252 = arith.constant 0 : index
    %249 = vector.load %arg6[%c128, %c0_252] : memref<2048x512xbf16, #tpu.memory_space<vmem>>, vector<128x512xbf16>
    %cst_253 = arith.constant dense<0.000000e+00> : vector<2x512xf32>
    %250 = tpu.matmul %248, %249, %cst_253 {dimension_numbers = #tpu.dot_dimension_numbers<[1], [0], [0], [1], [0, 0, 1, 1], [], []>} : vector<2x128xbf16>, vector<128x512xbf16>, vector<2x512xf32> -> vector<2x512xf32>
    %251 = arith.addf %236, %250 : vector<2x512xf32>
    %c0_254 = arith.constant 0 : index
    %c0_255 = arith.constant 0 : index
    %c4_256 = arith.constant 4 : index
    %c0_257 = arith.constant 0 : index
    %252 = vector.load %arg12[%c0_254, %c0_255, %c4_256, %c0_257] : memref<2x8x8x128xf32, #tpu.memory_space<vmem>>, vector<2x1x1x128xf32>
    %253 = vector.shape_cast %252 : vector<2x1x1x128xf32> to vector<2x128xf32>
    %c0_258 = arith.constant 0 : index
    %c0_259 = arith.constant 0 : index
    %c5_260 = arith.constant 5 : index
    %c0_261 = arith.constant 0 : index
    %254 = vector.load %arg12[%c0_258, %c0_259, %c5_260, %c0_261] : memref<2x8x8x128xf32, #tpu.memory_space<vmem>>, vector<2x1x1x128xf32>
    %255 = vector.shape_cast %254 : vector<2x1x1x128xf32> to vector<2x128xf32>
    %c0_262 = arith.constant 0 : index
    %c1_263 = arith.constant 1 : index
    %c4_264 = arith.constant 4 : index
    %c0_265 = arith.constant 0 : index
    %256 = vector.load %arg12[%c0_262, %c1_263, %c4_264, %c0_265] : memref<2x8x8x128xf32, #tpu.memory_space<vmem>>, vector<2x1x1x128xf32>
    %257 = vector.shape_cast %256 : vector<2x1x1x128xf32> to vector<2x128xf32>
    %c0_266 = arith.constant 0 : index
    %c1_267 = arith.constant 1 : index
    %c5_268 = arith.constant 5 : index
    %c0_269 = arith.constant 0 : index
    %258 = vector.load %arg12[%c0_266, %c1_267, %c5_268, %c0_269] : memref<2x8x8x128xf32, #tpu.memory_space<vmem>>, vector<2x1x1x128xf32>
    %259 = vector.shape_cast %258 : vector<2x1x1x128xf32> to vector<2x128xf32>
    %260 = arith.maximumf %253, %255 : vector<2x128xf32>
    %261 = arith.maximumf %257, %259 : vector<2x128xf32>
    %262 = arith.maximumf %260, %261 : vector<2x128xf32>
    %263 = arith.truncf %262 : vector<2x128xf32> to vector<2x128xbf16>
    %c256 = arith.constant 256 : index
    %c0_270 = arith.constant 0 : index
    %264 = vector.load %arg6[%c256, %c0_270] : memref<2048x512xbf16, #tpu.memory_space<vmem>>, vector<128x512xbf16>
    %cst_271 = arith.constant dense<0.000000e+00> : vector<2x512xf32>
    %265 = tpu.matmul %263, %264, %cst_271 {dimension_numbers = #tpu.dot_dimension_numbers<[1], [0], [0], [1], [0, 0, 1, 1], [], []>} : vector<2x128xbf16>, vector<128x512xbf16>, vector<2x512xf32> -> vector<2x512xf32>
    %266 = arith.addf %251, %265 : vector<2x512xf32>
    %c0_272 = arith.constant 0 : index
    %c0_273 = arith.constant 0 : index
    %c6_274 = arith.constant 6 : index
    %c0_275 = arith.constant 0 : index
    %267 = vector.load %arg12[%c0_272, %c0_273, %c6_274, %c0_275] : memref<2x8x8x128xf32, #tpu.memory_space<vmem>>, vector<2x1x1x128xf32>
    %268 = vector.shape_cast %267 : vector<2x1x1x128xf32> to vector<2x128xf32>
    %c0_276 = arith.constant 0 : index
    %c0_277 = arith.constant 0 : index
    %c7_278 = arith.constant 7 : index
    %c0_279 = arith.constant 0 : index
    %269 = vector.load %arg12[%c0_276, %c0_277, %c7_278, %c0_279] : memref<2x8x8x128xf32, #tpu.memory_space<vmem>>, vector<2x1x1x128xf32>
    %270 = vector.shape_cast %269 : vector<2x1x1x128xf32> to vector<2x128xf32>
    %c0_280 = arith.constant 0 : index
    %c1_281 = arith.constant 1 : index
    %c6_282 = arith.constant 6 : index
    %c0_283 = arith.constant 0 : index
    %271 = vector.load %arg12[%c0_280, %c1_281, %c6_282, %c0_283] : memref<2x8x8x128xf32, #tpu.memory_space<vmem>>, vector<2x1x1x128xf32>
    %272 = vector.shape_cast %271 : vector<2x1x1x128xf32> to vector<2x128xf32>
    %c0_284 = arith.constant 0 : index
    %c1_285 = arith.constant 1 : index
    %c7_286 = arith.constant 7 : index
    %c0_287 = arith.constant 0 : index
    %273 = vector.load %arg12[%c0_284, %c1_285, %c7_286, %c0_287] : memref<2x8x8x128xf32, #tpu.memory_space<vmem>>, vector<2x1x1x128xf32>
    %274 = vector.shape_cast %273 : vector<2x1x1x128xf32> to vector<2x128xf32>
    %275 = arith.maximumf %268, %270 : vector<2x128xf32>
    %276 = arith.maximumf %272, %274 : vector<2x128xf32>
    %277 = arith.maximumf %275, %276 : vector<2x128xf32>
    %278 = arith.truncf %277 : vector<2x128xf32> to vector<2x128xbf16>
    %c384 = arith.constant 384 : index
    %c0_288 = arith.constant 0 : index
    %279 = vector.load %arg6[%c384, %c0_288] : memref<2048x512xbf16, #tpu.memory_space<vmem>>, vector<128x512xbf16>
    %cst_289 = arith.constant dense<0.000000e+00> : vector<2x512xf32>
    %280 = tpu.matmul %278, %279, %cst_289 {dimension_numbers = #tpu.dot_dimension_numbers<[1], [0], [0], [1], [0, 0, 1, 1], [], []>} : vector<2x128xbf16>, vector<128x512xbf16>, vector<2x512xf32> -> vector<2x512xf32>
    %281 = arith.addf %266, %280 : vector<2x512xf32>
    %c0_290 = arith.constant 0 : index
    %c2_291 = arith.constant 2 : index
    %c0_292 = arith.constant 0 : index
    %c0_293 = arith.constant 0 : index
    %282 = vector.load %arg12[%c0_290, %c2_291, %c0_292, %c0_293] : memref<2x8x8x128xf32, #tpu.memory_space<vmem>>, vector<2x1x1x128xf32>
    %283 = vector.shape_cast %282 : vector<2x1x1x128xf32> to vector<2x128xf32>
    %c0_294 = arith.constant 0 : index
    %c2_295 = arith.constant 2 : index
    %c1_296 = arith.constant 1 : index
    %c0_297 = arith.constant 0 : index
    %284 = vector.load %arg12[%c0_294, %c2_295, %c1_296, %c0_297] : memref<2x8x8x128xf32, #tpu.memory_space<vmem>>, vector<2x1x1x128xf32>
    %285 = vector.shape_cast %284 : vector<2x1x1x128xf32> to vector<2x128xf32>
    %c0_298 = arith.constant 0 : index
    %c3_299 = arith.constant 3 : index
    %c0_300 = arith.constant 0 : index
    %c0_301 = arith.constant 0 : index
    %286 = vector.load %arg12[%c0_298, %c3_299, %c0_300, %c0_301] : memref<2x8x8x128xf32, #tpu.memory_space<vmem>>, vector<2x1x1x128xf32>
    %287 = vector.shape_cast %286 : vector<2x1x1x128xf32> to vector<2x128xf32>
    %c0_302 = arith.constant 0 : index
    %c3_303 = arith.constant 3 : index
    %c1_304 = arith.constant 1 : index
    %c0_305 = arith.constant 0 : index
    %288 = vector.load %arg12[%c0_302, %c3_303, %c1_304, %c0_305] : memref<2x8x8x128xf32, #tpu.memory_space<vmem>>, vector<2x1x1x128xf32>
    %289 = vector.shape_cast %288 : vector<2x1x1x128xf32> to vector<2x128xf32>
    %290 = arith.maximumf %283, %285 : vector<2x128xf32>
    %291 = arith.maximumf %287, %289 : vector<2x128xf32>
    %292 = arith.maximumf %290, %291 : vector<2x128xf32>
    %293 = arith.truncf %292 : vector<2x128xf32> to vector<2x128xbf16>
    %c512 = arith.constant 512 : index
    %c0_306 = arith.constant 0 : index
    %294 = vector.load %arg6[%c512, %c0_306] : memref<2048x512xbf16, #tpu.memory_space<vmem>>, vector<128x512xbf16>
    %cst_307 = arith.constant dense<0.000000e+00> : vector<2x512xf32>
    %295 = tpu.matmul %293, %294, %cst_307 {dimension_numbers = #tpu.dot_dimension_numbers<[1], [0], [0], [1], [0, 0, 1, 1], [], []>} : vector<2x128xbf16>, vector<128x512xbf16>, vector<2x512xf32> -> vector<2x512xf32>
    %296 = arith.addf %281, %295 : vector<2x512xf32>
    %c0_308 = arith.constant 0 : index
    %c2_309 = arith.constant 2 : index
    %c2_310 = arith.constant 2 : index
    %c0_311 = arith.constant 0 : index
    %297 = vector.load %arg12[%c0_308, %c2_309, %c2_310, %c0_311] : memref<2x8x8x128xf32, #tpu.memory_space<vmem>>, vector<2x1x1x128xf32>
    %298 = vector.shape_cast %297 : vector<2x1x1x128xf32> to vector<2x128xf32>
    %c0_312 = arith.constant 0 : index
    %c2_313 = arith.constant 2 : index
    %c3_314 = arith.constant 3 : index
    %c0_315 = arith.constant 0 : index
    %299 = vector.load %arg12[%c0_312, %c2_313, %c3_314, %c0_315] : memref<2x8x8x128xf32, #tpu.memory_space<vmem>>, vector<2x1x1x128xf32>
    %300 = vector.shape_cast %299 : vector<2x1x1x128xf32> to vector<2x128xf32>
    %c0_316 = arith.constant 0 : index
    %c3_317 = arith.constant 3 : index
    %c2_318 = arith.constant 2 : index
    %c0_319 = arith.constant 0 : index
    %301 = vector.load %arg12[%c0_316, %c3_317, %c2_318, %c0_319] : memref<2x8x8x128xf32, #tpu.memory_space<vmem>>, vector<2x1x1x128xf32>
    %302 = vector.shape_cast %301 : vector<2x1x1x128xf32> to vector<2x128xf32>
    %c0_320 = arith.constant 0 : index
    %c3_321 = arith.constant 3 : index
    %c3_322 = arith.constant 3 : index
    %c0_323 = arith.constant 0 : index
    %303 = vector.load %arg12[%c0_320, %c3_321, %c3_322, %c0_323] : memref<2x8x8x128xf32, #tpu.memory_space<vmem>>, vector<2x1x1x128xf32>
    %304 = vector.shape_cast %303 : vector<2x1x1x128xf32> to vector<2x128xf32>
    %305 = arith.maximumf %298, %300 : vector<2x128xf32>
    %306 = arith.maximumf %302, %304 : vector<2x128xf32>
    %307 = arith.maximumf %305, %306 : vector<2x128xf32>
    %308 = arith.truncf %307 : vector<2x128xf32> to vector<2x128xbf16>
    %c640 = arith.constant 640 : index
    %c0_324 = arith.constant 0 : index
    %309 = vector.load %arg6[%c640, %c0_324] : memref<2048x512xbf16, #tpu.memory_space<vmem>>, vector<128x512xbf16>
    %cst_325 = arith.constant dense<0.000000e+00> : vector<2x512xf32>
    %310 = tpu.matmul %308, %309, %cst_325 {dimension_numbers = #tpu.dot_dimension_numbers<[1], [0], [0], [1], [0, 0, 1, 1], [], []>} : vector<2x128xbf16>, vector<128x512xbf16>, vector<2x512xf32> -> vector<2x512xf32>
    %311 = arith.addf %296, %310 : vector<2x512xf32>
    %c0_326 = arith.constant 0 : index
    %c2_327 = arith.constant 2 : index
    %c4_328 = arith.constant 4 : index
    %c0_329 = arith.constant 0 : index
    %312 = vector.load %arg12[%c0_326, %c2_327, %c4_328, %c0_329] : memref<2x8x8x128xf32, #tpu.memory_space<vmem>>, vector<2x1x1x128xf32>
    %313 = vector.shape_cast %312 : vector<2x1x1x128xf32> to vector<2x128xf32>
    %c0_330 = arith.constant 0 : index
    %c2_331 = arith.constant 2 : index
    %c5_332 = arith.constant 5 : index
    %c0_333 = arith.constant 0 : index
    %314 = vector.load %arg12[%c0_330, %c2_331, %c5_332, %c0_333] : memref<2x8x8x128xf32, #tpu.memory_space<vmem>>, vector<2x1x1x128xf32>
    %315 = vector.shape_cast %314 : vector<2x1x1x128xf32> to vector<2x128xf32>
    %c0_334 = arith.constant 0 : index
    %c3_335 = arith.constant 3 : index
    %c4_336 = arith.constant 4 : index
    %c0_337 = arith.constant 0 : index
    %316 = vector.load %arg12[%c0_334, %c3_335, %c4_336, %c0_337] : memref<2x8x8x128xf32, #tpu.memory_space<vmem>>, vector<2x1x1x128xf32>
    %317 = vector.shape_cast %316 : vector<2x1x1x128xf32> to vector<2x128xf32>
    %c0_338 = arith.constant 0 : index
    %c3_339 = arith.constant 3 : index
    %c5_340 = arith.constant 5 : index
    %c0_341 = arith.constant 0 : index
    %318 = vector.load %arg12[%c0_338, %c3_339, %c5_340, %c0_341] : memref<2x8x8x128xf32, #tpu.memory_space<vmem>>, vector<2x1x1x128xf32>
    %319 = vector.shape_cast %318 : vector<2x1x1x128xf32> to vector<2x128xf32>
    %320 = arith.maximumf %313, %315 : vector<2x128xf32>
    %321 = arith.maximumf %317, %319 : vector<2x128xf32>
    %322 = arith.maximumf %320, %321 : vector<2x128xf32>
    %323 = arith.truncf %322 : vector<2x128xf32> to vector<2x128xbf16>
    %c768 = arith.constant 768 : index
    %c0_342 = arith.constant 0 : index
    %324 = vector.load %arg6[%c768, %c0_342] : memref<2048x512xbf16, #tpu.memory_space<vmem>>, vector<128x512xbf16>
    %cst_343 = arith.constant dense<0.000000e+00> : vector<2x512xf32>
    %325 = tpu.matmul %323, %324, %cst_343 {dimension_numbers = #tpu.dot_dimension_numbers<[1], [0], [0], [1], [0, 0, 1, 1], [], []>} : vector<2x128xbf16>, vector<128x512xbf16>, vector<2x512xf32> -> vector<2x512xf32>
    %326 = arith.addf %311, %325 : vector<2x512xf32>
    %c0_344 = arith.constant 0 : index
    %c2_345 = arith.constant 2 : index
    %c6_346 = arith.constant 6 : index
    %c0_347 = arith.constant 0 : index
    %327 = vector.load %arg12[%c0_344, %c2_345, %c6_346, %c0_347] : memref<2x8x8x128xf32, #tpu.memory_space<vmem>>, vector<2x1x1x128xf32>
    %328 = vector.shape_cast %327 : vector<2x1x1x128xf32> to vector<2x128xf32>
    %c0_348 = arith.constant 0 : index
    %c2_349 = arith.constant 2 : index
    %c7_350 = arith.constant 7 : index
    %c0_351 = arith.constant 0 : index
    %329 = vector.load %arg12[%c0_348, %c2_349, %c7_350, %c0_351] : memref<2x8x8x128xf32, #tpu.memory_space<vmem>>, vector<2x1x1x128xf32>
    %330 = vector.shape_cast %329 : vector<2x1x1x128xf32> to vector<2x128xf32>
    %c0_352 = arith.constant 0 : index
    %c3_353 = arith.constant 3 : index
    %c6_354 = arith.constant 6 : index
    %c0_355 = arith.constant 0 : index
    %331 = vector.load %arg12[%c0_352, %c3_353, %c6_354, %c0_355] : memref<2x8x8x128xf32, #tpu.memory_space<vmem>>, vector<2x1x1x128xf32>
    %332 = vector.shape_cast %331 : vector<2x1x1x128xf32> to vector<2x128xf32>
    %c0_356 = arith.constant 0 : index
    %c3_357 = arith.constant 3 : index
    %c7_358 = arith.constant 7 : index
    %c0_359 = arith.constant 0 : index
    %333 = vector.load %arg12[%c0_356, %c3_357, %c7_358, %c0_359] : memref<2x8x8x128xf32, #tpu.memory_space<vmem>>, vector<2x1x1x128xf32>
    %334 = vector.shape_cast %333 : vector<2x1x1x128xf32> to vector<2x128xf32>
    %335 = arith.maximumf %328, %330 : vector<2x128xf32>
    %336 = arith.maximumf %332, %334 : vector<2x128xf32>
    %337 = arith.maximumf %335, %336 : vector<2x128xf32>
    %338 = arith.truncf %337 : vector<2x128xf32> to vector<2x128xbf16>
    %c896 = arith.constant 896 : index
    %c0_360 = arith.constant 0 : index
    %339 = vector.load %arg6[%c896, %c0_360] : memref<2048x512xbf16, #tpu.memory_space<vmem>>, vector<128x512xbf16>
    %cst_361 = arith.constant dense<0.000000e+00> : vector<2x512xf32>
    %340 = tpu.matmul %338, %339, %cst_361 {dimension_numbers = #tpu.dot_dimension_numbers<[1], [0], [0], [1], [0, 0, 1, 1], [], []>} : vector<2x128xbf16>, vector<128x512xbf16>, vector<2x512xf32> -> vector<2x512xf32>
    %341 = arith.addf %326, %340 : vector<2x512xf32>
    %c0_362 = arith.constant 0 : index
    %c4_363 = arith.constant 4 : index
    %c0_364 = arith.constant 0 : index
    %c0_365 = arith.constant 0 : index
    %342 = vector.load %arg12[%c0_362, %c4_363, %c0_364, %c0_365] : memref<2x8x8x128xf32, #tpu.memory_space<vmem>>, vector<2x1x1x128xf32>
    %343 = vector.shape_cast %342 : vector<2x1x1x128xf32> to vector<2x128xf32>
    %c0_366 = arith.constant 0 : index
    %c4_367 = arith.constant 4 : index
    %c1_368 = arith.constant 1 : index
    %c0_369 = arith.constant 0 : index
    %344 = vector.load %arg12[%c0_366, %c4_367, %c1_368, %c0_369] : memref<2x8x8x128xf32, #tpu.memory_space<vmem>>, vector<2x1x1x128xf32>
    %345 = vector.shape_cast %344 : vector<2x1x1x128xf32> to vector<2x128xf32>
    %c0_370 = arith.constant 0 : index
    %c5_371 = arith.constant 5 : index
    %c0_372 = arith.constant 0 : index
    %c0_373 = arith.constant 0 : index
    %346 = vector.load %arg12[%c0_370, %c5_371, %c0_372, %c0_373] : memref<2x8x8x128xf32, #tpu.memory_space<vmem>>, vector<2x1x1x128xf32>
    %347 = vector.shape_cast %346 : vector<2x1x1x128xf32> to vector<2x128xf32>
    %c0_374 = arith.constant 0 : index
    %c5_375 = arith.constant 5 : index
    %c1_376 = arith.constant 1 : index
    %c0_377 = arith.constant 0 : index
    %348 = vector.load %arg12[%c0_374, %c5_375, %c1_376, %c0_377] : memref<2x8x8x128xf32, #tpu.memory_space<vmem>>, vector<2x1x1x128xf32>
    %349 = vector.shape_cast %348 : vector<2x1x1x128xf32> to vector<2x128xf32>
    %350 = arith.maximumf %343, %345 : vector<2x128xf32>
    %351 = arith.maximumf %347, %349 : vector<2x128xf32>
    %352 = arith.maximumf %350, %351 : vector<2x128xf32>
    %353 = arith.truncf %352 : vector<2x128xf32> to vector<2x128xbf16>
    %c1024 = arith.constant 1024 : index
    %c0_378 = arith.constant 0 : index
    %354 = vector.load %arg6[%c1024, %c0_378] : memref<2048x512xbf16, #tpu.memory_space<vmem>>, vector<128x512xbf16>
    %cst_379 = arith.constant dense<0.000000e+00> : vector<2x512xf32>
    %355 = tpu.matmul %353, %354, %cst_379 {dimension_numbers = #tpu.dot_dimension_numbers<[1], [0], [0], [1], [0, 0, 1, 1], [], []>} : vector<2x128xbf16>, vector<128x512xbf16>, vector<2x512xf32> -> vector<2x512xf32>
    %356 = arith.addf %341, %355 : vector<2x512xf32>
    %c0_380 = arith.constant 0 : index
    %c4_381 = arith.constant 4 : index
    %c2_382 = arith.constant 2 : index
    %c0_383 = arith.constant 0 : index
    %357 = vector.load %arg12[%c0_380, %c4_381, %c2_382, %c0_383] : memref<2x8x8x128xf32, #tpu.memory_space<vmem>>, vector<2x1x1x128xf32>
    %358 = vector.shape_cast %357 : vector<2x1x1x128xf32> to vector<2x128xf32>
    %c0_384 = arith.constant 0 : index
    %c4_385 = arith.constant 4 : index
    %c3_386 = arith.constant 3 : index
    %c0_387 = arith.constant 0 : index
    %359 = vector.load %arg12[%c0_384, %c4_385, %c3_386, %c0_387] : memref<2x8x8x128xf32, #tpu.memory_space<vmem>>, vector<2x1x1x128xf32>
    %360 = vector.shape_cast %359 : vector<2x1x1x128xf32> to vector<2x128xf32>
    %c0_388 = arith.constant 0 : index
    %c5_389 = arith.constant 5 : index
    %c2_390 = arith.constant 2 : index
    %c0_391 = arith.constant 0 : index
    %361 = vector.load %arg12[%c0_388, %c5_389, %c2_390, %c0_391] : memref<2x8x8x128xf32, #tpu.memory_space<vmem>>, vector<2x1x1x128xf32>
    %362 = vector.shape_cast %361 : vector<2x1x1x128xf32> to vector<2x128xf32>
    %c0_392 = arith.constant 0 : index
    %c5_393 = arith.constant 5 : index
    %c3_394 = arith.constant 3 : index
    %c0_395 = arith.constant 0 : index
    %363 = vector.load %arg12[%c0_392, %c5_393, %c3_394, %c0_395] : memref<2x8x8x128xf32, #tpu.memory_space<vmem>>, vector<2x1x1x128xf32>
    %364 = vector.shape_cast %363 : vector<2x1x1x128xf32> to vector<2x128xf32>
    %365 = arith.maximumf %358, %360 : vector<2x128xf32>
    %366 = arith.maximumf %362, %364 : vector<2x128xf32>
    %367 = arith.maximumf %365, %366 : vector<2x128xf32>
    %368 = arith.truncf %367 : vector<2x128xf32> to vector<2x128xbf16>
    %c1152 = arith.constant 1152 : index
    %c0_396 = arith.constant 0 : index
    %369 = vector.load %arg6[%c1152, %c0_396] : memref<2048x512xbf16, #tpu.memory_space<vmem>>, vector<128x512xbf16>
    %cst_397 = arith.constant dense<0.000000e+00> : vector<2x512xf32>
    %370 = tpu.matmul %368, %369, %cst_397 {dimension_numbers = #tpu.dot_dimension_numbers<[1], [0], [0], [1], [0, 0, 1, 1], [], []>} : vector<2x128xbf16>, vector<128x512xbf16>, vector<2x512xf32> -> vector<2x512xf32>
    %371 = arith.addf %356, %370 : vector<2x512xf32>
    %c0_398 = arith.constant 0 : index
    %c4_399 = arith.constant 4 : index
    %c4_400 = arith.constant 4 : index
    %c0_401 = arith.constant 0 : index
    %372 = vector.load %arg12[%c0_398, %c4_399, %c4_400, %c0_401] : memref<2x8x8x128xf32, #tpu.memory_space<vmem>>, vector<2x1x1x128xf32>
    %373 = vector.shape_cast %372 : vector<2x1x1x128xf32> to vector<2x128xf32>
    %c0_402 = arith.constant 0 : index
    %c4_403 = arith.constant 4 : index
    %c5_404 = arith.constant 5 : index
    %c0_405 = arith.constant 0 : index
    %374 = vector.load %arg12[%c0_402, %c4_403, %c5_404, %c0_405] : memref<2x8x8x128xf32, #tpu.memory_space<vmem>>, vector<2x1x1x128xf32>
    %375 = vector.shape_cast %374 : vector<2x1x1x128xf32> to vector<2x128xf32>
    %c0_406 = arith.constant 0 : index
    %c5_407 = arith.constant 5 : index
    %c4_408 = arith.constant 4 : index
    %c0_409 = arith.constant 0 : index
    %376 = vector.load %arg12[%c0_406, %c5_407, %c4_408, %c0_409] : memref<2x8x8x128xf32, #tpu.memory_space<vmem>>, vector<2x1x1x128xf32>
    %377 = vector.shape_cast %376 : vector<2x1x1x128xf32> to vector<2x128xf32>
    %c0_410 = arith.constant 0 : index
    %c5_411 = arith.constant 5 : index
    %c5_412 = arith.constant 5 : index
    %c0_413 = arith.constant 0 : index
    %378 = vector.load %arg12[%c0_410, %c5_411, %c5_412, %c0_413] : memref<2x8x8x128xf32, #tpu.memory_space<vmem>>, vector<2x1x1x128xf32>
    %379 = vector.shape_cast %378 : vector<2x1x1x128xf32> to vector<2x128xf32>
    %380 = arith.maximumf %373, %375 : vector<2x128xf32>
    %381 = arith.maximumf %377, %379 : vector<2x128xf32>
    %382 = arith.maximumf %380, %381 : vector<2x128xf32>
    %383 = arith.truncf %382 : vector<2x128xf32> to vector<2x128xbf16>
    %c1280 = arith.constant 1280 : index
    %c0_414 = arith.constant 0 : index
    %384 = vector.load %arg6[%c1280, %c0_414] : memref<2048x512xbf16, #tpu.memory_space<vmem>>, vector<128x512xbf16>
    %cst_415 = arith.constant dense<0.000000e+00> : vector<2x512xf32>
    %385 = tpu.matmul %383, %384, %cst_415 {dimension_numbers = #tpu.dot_dimension_numbers<[1], [0], [0], [1], [0, 0, 1, 1], [], []>} : vector<2x128xbf16>, vector<128x512xbf16>, vector<2x512xf32> -> vector<2x512xf32>
    %386 = arith.addf %371, %385 : vector<2x512xf32>
    %c0_416 = arith.constant 0 : index
    %c4_417 = arith.constant 4 : index
    %c6_418 = arith.constant 6 : index
    %c0_419 = arith.constant 0 : index
    %387 = vector.load %arg12[%c0_416, %c4_417, %c6_418, %c0_419] : memref<2x8x8x128xf32, #tpu.memory_space<vmem>>, vector<2x1x1x128xf32>
    %388 = vector.shape_cast %387 : vector<2x1x1x128xf32> to vector<2x128xf32>
    %c0_420 = arith.constant 0 : index
    %c4_421 = arith.constant 4 : index
    %c7_422 = arith.constant 7 : index
    %c0_423 = arith.constant 0 : index
    %389 = vector.load %arg12[%c0_420, %c4_421, %c7_422, %c0_423] : memref<2x8x8x128xf32, #tpu.memory_space<vmem>>, vector<2x1x1x128xf32>
    %390 = vector.shape_cast %389 : vector<2x1x1x128xf32> to vector<2x128xf32>
    %c0_424 = arith.constant 0 : index
    %c5_425 = arith.constant 5 : index
    %c6_426 = arith.constant 6 : index
    %c0_427 = arith.constant 0 : index
    %391 = vector.load %arg12[%c0_424, %c5_425, %c6_426, %c0_427] : memref<2x8x8x128xf32, #tpu.memory_space<vmem>>, vector<2x1x1x128xf32>
    %392 = vector.shape_cast %391 : vector<2x1x1x128xf32> to vector<2x128xf32>
    %c0_428 = arith.constant 0 : index
    %c5_429 = arith.constant 5 : index
    %c7_430 = arith.constant 7 : index
    %c0_431 = arith.constant 0 : index
    %393 = vector.load %arg12[%c0_428, %c5_429, %c7_430, %c0_431] : memref<2x8x8x128xf32, #tpu.memory_space<vmem>>, vector<2x1x1x128xf32>
    %394 = vector.shape_cast %393 : vector<2x1x1x128xf32> to vector<2x128xf32>
    %395 = arith.maximumf %388, %390 : vector<2x128xf32>
    %396 = arith.maximumf %392, %394 : vector<2x128xf32>
    %397 = arith.maximumf %395, %396 : vector<2x128xf32>
    %398 = arith.truncf %397 : vector<2x128xf32> to vector<2x128xbf16>
    %c1408 = arith.constant 1408 : index
    %c0_432 = arith.constant 0 : index
    %399 = vector.load %arg6[%c1408, %c0_432] : memref<2048x512xbf16, #tpu.memory_space<vmem>>, vector<128x512xbf16>
    %cst_433 = arith.constant dense<0.000000e+00> : vector<2x512xf32>
    %400 = tpu.matmul %398, %399, %cst_433 {dimension_numbers = #tpu.dot_dimension_numbers<[1], [0], [0], [1], [0, 0, 1, 1], [], []>} : vector<2x128xbf16>, vector<128x512xbf16>, vector<2x512xf32> -> vector<2x512xf32>
    %401 = arith.addf %386, %400 : vector<2x512xf32>
    %c0_434 = arith.constant 0 : index
    %c6_435 = arith.constant 6 : index
    %c0_436 = arith.constant 0 : index
    %c0_437 = arith.constant 0 : index
    %402 = vector.load %arg12[%c0_434, %c6_435, %c0_436, %c0_437] : memref<2x8x8x128xf32, #tpu.memory_space<vmem>>, vector<2x1x1x128xf32>
    %403 = vector.shape_cast %402 : vector<2x1x1x128xf32> to vector<2x128xf32>
    %c0_438 = arith.constant 0 : index
    %c6_439 = arith.constant 6 : index
    %c1_440 = arith.constant 1 : index
    %c0_441 = arith.constant 0 : index
    %404 = vector.load %arg12[%c0_438, %c6_439, %c1_440, %c0_441] : memref<2x8x8x128xf32, #tpu.memory_space<vmem>>, vector<2x1x1x128xf32>
    %405 = vector.shape_cast %404 : vector<2x1x1x128xf32> to vector<2x128xf32>
    %c0_442 = arith.constant 0 : index
    %c7_443 = arith.constant 7 : index
    %c0_444 = arith.constant 0 : index
    %c0_445 = arith.constant 0 : index
    %406 = vector.load %arg12[%c0_442, %c7_443, %c0_444, %c0_445] : memref<2x8x8x128xf32, #tpu.memory_space<vmem>>, vector<2x1x1x128xf32>
    %407 = vector.shape_cast %406 : vector<2x1x1x128xf32> to vector<2x128xf32>
    %c0_446 = arith.constant 0 : index
    %c7_447 = arith.constant 7 : index
    %c1_448 = arith.constant 1 : index
    %c0_449 = arith.constant 0 : index
    %408 = vector.load %arg12[%c0_446, %c7_447, %c1_448, %c0_449] : memref<2x8x8x128xf32, #tpu.memory_space<vmem>>, vector<2x1x1x128xf32>
    %409 = vector.shape_cast %408 : vector<2x1x1x128xf32> to vector<2x128xf32>
    %410 = arith.maximumf %403, %405 : vector<2x128xf32>
    %411 = arith.maximumf %407, %409 : vector<2x128xf32>
    %412 = arith.maximumf %410, %411 : vector<2x128xf32>
    %413 = arith.truncf %412 : vector<2x128xf32> to vector<2x128xbf16>
    %c1536 = arith.constant 1536 : index
    %c0_450 = arith.constant 0 : index
    %414 = vector.load %arg6[%c1536, %c0_450] : memref<2048x512xbf16, #tpu.memory_space<vmem>>, vector<128x512xbf16>
    %cst_451 = arith.constant dense<0.000000e+00> : vector<2x512xf32>
    %415 = tpu.matmul %413, %414, %cst_451 {dimension_numbers = #tpu.dot_dimension_numbers<[1], [0], [0], [1], [0, 0, 1, 1], [], []>} : vector<2x128xbf16>, vector<128x512xbf16>, vector<2x512xf32> -> vector<2x512xf32>
    %416 = arith.addf %401, %415 : vector<2x512xf32>
    %c0_452 = arith.constant 0 : index
    %c6_453 = arith.constant 6 : index
    %c2_454 = arith.constant 2 : index
    %c0_455 = arith.constant 0 : index
    %417 = vector.load %arg12[%c0_452, %c6_453, %c2_454, %c0_455] : memref<2x8x8x128xf32, #tpu.memory_space<vmem>>, vector<2x1x1x128xf32>
    %418 = vector.shape_cast %417 : vector<2x1x1x128xf32> to vector<2x128xf32>
    %c0_456 = arith.constant 0 : index
    %c6_457 = arith.constant 6 : index
    %c3_458 = arith.constant 3 : index
    %c0_459 = arith.constant 0 : index
    %419 = vector.load %arg12[%c0_456, %c6_457, %c3_458, %c0_459] : memref<2x8x8x128xf32, #tpu.memory_space<vmem>>, vector<2x1x1x128xf32>
    %420 = vector.shape_cast %419 : vector<2x1x1x128xf32> to vector<2x128xf32>
    %c0_460 = arith.constant 0 : index
    %c7_461 = arith.constant 7 : index
    %c2_462 = arith.constant 2 : index
    %c0_463 = arith.constant 0 : index
    %421 = vector.load %arg12[%c0_460, %c7_461, %c2_462, %c0_463] : memref<2x8x8x128xf32, #tpu.memory_space<vmem>>, vector<2x1x1x128xf32>
    %422 = vector.shape_cast %421 : vector<2x1x1x128xf32> to vector<2x128xf32>
    %c0_464 = arith.constant 0 : index
    %c7_465 = arith.constant 7 : index
    %c3_466 = arith.constant 3 : index
    %c0_467 = arith.constant 0 : index
    %423 = vector.load %arg12[%c0_464, %c7_465, %c3_466, %c0_467] : memref<2x8x8x128xf32, #tpu.memory_space<vmem>>, vector<2x1x1x128xf32>
    %424 = vector.shape_cast %423 : vector<2x1x1x128xf32> to vector<2x128xf32>
    %425 = arith.maximumf %418, %420 : vector<2x128xf32>
    %426 = arith.maximumf %422, %424 : vector<2x128xf32>
    %427 = arith.maximumf %425, %426 : vector<2x128xf32>
    %428 = arith.truncf %427 : vector<2x128xf32> to vector<2x128xbf16>
    %c1664 = arith.constant 1664 : index
    %c0_468 = arith.constant 0 : index
    %429 = vector.load %arg6[%c1664, %c0_468] : memref<2048x512xbf16, #tpu.memory_space<vmem>>, vector<128x512xbf16>
    %cst_469 = arith.constant dense<0.000000e+00> : vector<2x512xf32>
    %430 = tpu.matmul %428, %429, %cst_469 {dimension_numbers = #tpu.dot_dimension_numbers<[1], [0], [0], [1], [0, 0, 1, 1], [], []>} : vector<2x128xbf16>, vector<128x512xbf16>, vector<2x512xf32> -> vector<2x512xf32>
    %431 = arith.addf %416, %430 : vector<2x512xf32>
    %c0_470 = arith.constant 0 : index
    %c6_471 = arith.constant 6 : index
    %c4_472 = arith.constant 4 : index
    %c0_473 = arith.constant 0 : index
    %432 = vector.load %arg12[%c0_470, %c6_471, %c4_472, %c0_473] : memref<2x8x8x128xf32, #tpu.memory_space<vmem>>, vector<2x1x1x128xf32>
    %433 = vector.shape_cast %432 : vector<2x1x1x128xf32> to vector<2x128xf32>
    %c0_474 = arith.constant 0 : index
    %c6_475 = arith.constant 6 : index
    %c5_476 = arith.constant 5 : index
    %c0_477 = arith.constant 0 : index
    %434 = vector.load %arg12[%c0_474, %c6_475, %c5_476, %c0_477] : memref<2x8x8x128xf32, #tpu.memory_space<vmem>>, vector<2x1x1x128xf32>
    %435 = vector.shape_cast %434 : vector<2x1x1x128xf32> to vector<2x128xf32>
    %c0_478 = arith.constant 0 : index
    %c7_479 = arith.constant 7 : index
    %c4_480 = arith.constant 4 : index
    %c0_481 = arith.constant 0 : index
    %436 = vector.load %arg12[%c0_478, %c7_479, %c4_480, %c0_481] : memref<2x8x8x128xf32, #tpu.memory_space<vmem>>, vector<2x1x1x128xf32>
    %437 = vector.shape_cast %436 : vector<2x1x1x128xf32> to vector<2x128xf32>
    %c0_482 = arith.constant 0 : index
    %c7_483 = arith.constant 7 : index
    %c5_484 = arith.constant 5 : index
    %c0_485 = arith.constant 0 : index
    %438 = vector.load %arg12[%c0_482, %c7_483, %c5_484, %c0_485] : memref<2x8x8x128xf32, #tpu.memory_space<vmem>>, vector<2x1x1x128xf32>
    %439 = vector.shape_cast %438 : vector<2x1x1x128xf32> to vector<2x128xf32>
    %440 = arith.maximumf %433, %435 : vector<2x128xf32>
    %441 = arith.maximumf %437, %439 : vector<2x128xf32>
    %442 = arith.maximumf %440, %441 : vector<2x128xf32>
    %443 = arith.truncf %442 : vector<2x128xf32> to vector<2x128xbf16>
    %c1792 = arith.constant 1792 : index
    %c0_486 = arith.constant 0 : index
    %444 = vector.load %arg6[%c1792, %c0_486] : memref<2048x512xbf16, #tpu.memory_space<vmem>>, vector<128x512xbf16>
    %cst_487 = arith.constant dense<0.000000e+00> : vector<2x512xf32>
    %445 = tpu.matmul %443, %444, %cst_487 {dimension_numbers = #tpu.dot_dimension_numbers<[1], [0], [0], [1], [0, 0, 1, 1], [], []>} : vector<2x128xbf16>, vector<128x512xbf16>, vector<2x512xf32> -> vector<2x512xf32>
    %446 = arith.addf %431, %445 : vector<2x512xf32>
    %c0_488 = arith.constant 0 : index
    %c6_489 = arith.constant 6 : index
    %c6_490 = arith.constant 6 : index
    %c0_491 = arith.constant 0 : index
    %447 = vector.load %arg12[%c0_488, %c6_489, %c6_490, %c0_491] : memref<2x8x8x128xf32, #tpu.memory_space<vmem>>, vector<2x1x1x128xf32>
    %448 = vector.shape_cast %447 : vector<2x1x1x128xf32> to vector<2x128xf32>
    %c0_492 = arith.constant 0 : index
    %c6_493 = arith.constant 6 : index
    %c7_494 = arith.constant 7 : index
    %c0_495 = arith.constant 0 : index
    %449 = vector.load %arg12[%c0_492, %c6_493, %c7_494, %c0_495] : memref<2x8x8x128xf32, #tpu.memory_space<vmem>>, vector<2x1x1x128xf32>
    %450 = vector.shape_cast %449 : vector<2x1x1x128xf32> to vector<2x128xf32>
    %c0_496 = arith.constant 0 : index
    %c7_497 = arith.constant 7 : index
    %c6_498 = arith.constant 6 : index
    %c0_499 = arith.constant 0 : index
    %451 = vector.load %arg12[%c0_496, %c7_497, %c6_498, %c0_499] : memref<2x8x8x128xf32, #tpu.memory_space<vmem>>, vector<2x1x1x128xf32>
    %452 = vector.shape_cast %451 : vector<2x1x1x128xf32> to vector<2x128xf32>
    %c0_500 = arith.constant 0 : index
    %c7_501 = arith.constant 7 : index
    %c7_502 = arith.constant 7 : index
    %c0_503 = arith.constant 0 : index
    %453 = vector.load %arg12[%c0_500, %c7_501, %c7_502, %c0_503] : memref<2x8x8x128xf32, #tpu.memory_space<vmem>>, vector<2x1x1x128xf32>
    %454 = vector.shape_cast %453 : vector<2x1x1x128xf32> to vector<2x128xf32>
    %455 = arith.maximumf %448, %450 : vector<2x128xf32>
    %456 = arith.maximumf %452, %454 : vector<2x128xf32>
    %457 = arith.maximumf %455, %456 : vector<2x128xf32>
    %458 = arith.truncf %457 : vector<2x128xf32> to vector<2x128xbf16>
    %c1920 = arith.constant 1920 : index
    %c0_504 = arith.constant 0 : index
    %459 = vector.load %arg6[%c1920, %c0_504] : memref<2048x512xbf16, #tpu.memory_space<vmem>>, vector<128x512xbf16>
    %cst_505 = arith.constant dense<0.000000e+00> : vector<2x512xf32>
    %460 = tpu.matmul %458, %459, %cst_505 {dimension_numbers = #tpu.dot_dimension_numbers<[1], [0], [0], [1], [0, 0, 1, 1], [], []>} : vector<2x128xbf16>, vector<128x512xbf16>, vector<2x512xf32> -> vector<2x512xf32>
    %461 = arith.addf %446, %460 : vector<2x512xf32>
    %c0_506 = arith.constant 0 : index
    %c0_507 = arith.constant 0 : index
    %462 = vector.load %arg7[%c0_506, %c0_507] : memref<1x512xf32, #tpu.memory_space<vmem>>, vector<1x512xf32>
    %463 = vector.broadcast %462 : vector<1x512xf32> to vector<2x512xf32>
    %464 = arith.addf %461, %463 : vector<2x512xf32>
    %cst_508 = arith.constant 0.000000e+00 : f32
    %465 = vector.broadcast %cst_508 : f32 to vector<2x512xf32>
    %466 = arith.maximumf %464, %465 : vector<2x512xf32>
    %467 = arith.truncf %466 : vector<2x512xf32> to vector<2x512xbf16>
    %c0_509 = arith.constant 0 : index
    %c0_510 = arith.constant 0 : index
    %468 = vector.load %arg8[%c0_509, %c0_510] : memref<512x128xbf16, #tpu.memory_space<vmem>>, vector<512x128xbf16>
    %cst_511 = arith.constant dense<0.000000e+00> : vector<2x128xf32>
    %469 = tpu.matmul %467, %468, %cst_511 {dimension_numbers = #tpu.dot_dimension_numbers<[1], [0], [0], [1], [0, 0, 1, 1], [], []>} : vector<2x512xbf16>, vector<512x128xbf16>, vector<2x128xf32> -> vector<2x128xf32>
    %c0_512 = arith.constant 0 : index
    %c0_513 = arith.constant 0 : index
    %470 = vector.load %arg9[%c0_512, %c0_513] : memref<1x128xf32, #tpu.memory_space<vmem>>, vector<1x128xf32>
    %471 = vector.broadcast %470 : vector<1x128xf32> to vector<2x128xf32>
    %472 = arith.addf %469, %471 : vector<2x128xf32>
    %cst_514 = arith.constant dense<0xFF800000> : vector<2xf32>
    %473 = vector.multi_reduction <maximumf>, %472, %cst_514 [1] : vector<2x128xf32> to vector<2xf32>
    %474 = vector.shape_cast %473 : vector<2xf32> to vector<2x1xf32>
    %475 = vector.broadcast %474 : vector<2x1xf32> to vector<2x128xf32>
    %476 = arith.subf %472, %475 : vector<2x128xf32>
    %477 = math.exp %476 : vector<2x128xf32>
    %cst_515 = arith.constant dense<0.000000e+00> : vector<2xf32>
    %478 = vector.multi_reduction <add>, %477, %cst_515 [1] : vector<2x128xf32> to vector<2xf32>
    %479 = vector.shape_cast %478 : vector<2xf32> to vector<2x1xf32>
    %480 = math.log %479 : vector<2x1xf32>
    %481 = arith.addf %480, %474 : vector<2x1xf32>
    %482 = vector.broadcast %481 : vector<2x1xf32> to vector<2x128xf32>
    %483 = arith.subf %472, %482 : vector<2x128xf32>
    %c0_516 = arith.constant 0 : index
    %c0_517 = arith.constant 0 : index
    %484 = vector.load %arg10[%c0_516, %c0_517] : memref<2x128xf32, #tpu.memory_space<vmem>>, vector<2x128xf32>
    tpu.vector_store %arg10[%c0_516, %c0_517], %483 {strides = array<i32>} : memref<2x128xf32, #tpu.memory_space<vmem>>, vector<2x128xf32>,
    return
  }
  func.func @transform_0(%arg0: i32) -> (i32, i32, i32) {
    %c0_i32 = arith.constant 0 : i32
    %c0_i32_0 = arith.constant 0 : i32
    %c0_i32_1 = arith.constant 0 : i32
    %c0_i32_2 = arith.constant 0 : i32
    return %c0_i32, %c0_i32_0, %c0_i32_1 : i32, i32, i32
  }
  func.func @transform_1(%arg0: i32) -> (i32, i32) {
    %c0_i32 = arith.constant 0 : i32
    %c0_i32_0 = arith.constant 0 : i32
    %c0_i32_1 = arith.constant 0 : i32
    return %c0_i32, %c0_i32_0 : i32, i32
  }
  func.func @transform_2(%arg0: i32) -> (i32, i32) {
    %c0_i32 = arith.constant 0 : i32
    %c0_i32_0 = arith.constant 0 : i32
    %c0_i32_1 = arith.constant 0 : i32
    return %c0_i32, %c0_i32_0 : i32, i32
  }
  func.func @transform_3(%arg0: i32) -> (i32, i32, i32) {
    %c0_i32 = arith.constant 0 : i32
    %c0_i32_0 = arith.constant 0 : i32
    %c0_i32_1 = arith.constant 0 : i32
    %c0_i32_2 = arith.constant 0 : i32
    return %c0_i32, %c0_i32_0, %c0_i32_1 : i32, i32, i32
  }
  func.func @transform_4(%arg0: i32) -> (i32, i32) {
    %c0_i32 = arith.constant 0 : i32
    %c0_i32_0 = arith.constant 0 : i32
    %c0_i32_1 = arith.constant 0 : i32
    return %c0_i32, %c0_i32_0 : i32, i32
  }
  func.func @transform_5(%arg0: i32) -> (i32, i32) {
    %c0_i32 = arith.constant 0 : i32
    %c0_i32_0 = arith.constant 0 : i32
    %c0_i32_1 = arith.constant 0 : i32
    return %c0_i32, %c0_i32_0 : i32, i32
  }
  func.func @transform_6(%arg0: i32) -> (i32, i32) {
    %c0_i32 = arith.constant 0 : i32
    %c0_i32_0 = arith.constant 0 : i32
    %c0_i32_1 = arith.constant 0 : i32
    return %c0_i32, %c0_i32_0 : i32, i32
  }
  func.func @transform_7(%arg0: i32) -> (i32, i32) {
    %c0_i32 = arith.constant 0 : i32
    %c0_i32_0 = arith.constant 0 : i32
    %c0_i32_1 = arith.constant 0 : i32
    return %c0_i32, %c0_i32_0 : i32, i32
  }
  func.func @transform_8(%arg0: i32) -> (i32, i32) {
    %c0_i32 = arith.constant 0 : i32
    %c0_i32_0 = arith.constant 0 : i32
    %c0_i32_1 = arith.constant 0 : i32
    return %c0_i32, %c0_i32_0 : i32, i32
  }
  func.func @transform_9(%arg0: i32) -> (i32, i32) {
    %c0_i32 = arith.constant 0 : i32
    %c0_i32_0 = arith.constant 0 : i32
    %c0_i32_1 = arith.constant 0 : i32
    return %c0_i32, %c0_i32_0 : i32, i32
  }
}

</mosaic_0001>

<bundles_post_ra>
// kernel: net_forward.1
= control target key start
LH: loop header
LB: loop body
LE: loop exit
PB: predicated region body
PF: predicated region fallthrough
CT: control target
= control target key end

     0   :  { %vm225_vm0 = vcmask 261120   ;;  %s21472_s0 = inlined_call_operand.vmem [shape: bf16[4,384,32], index: 0, kind: input, shape index: {}]   ;;  %s21473_s1 = inlined_call_operand.vmem [shape: bf16[32,128], index: 1, kind: input, shape index: {}]   ;;  %s21474_s2 = inlined_call_operand.vmem [shape: f32[1,128], index: 2, kind: input, shape index: {}]   ;;  %s21475_s3 = inlined_call_operand.vmem [shape: bf16[25,128,128], index: 3, kind: input, shape index: {}]   ;;  %s21476_s4 = inlined_call_operand.vmem [shape: f32[1,128], index: 4, kind: input, shape index: {}]   ;;  %s21477_s5 = inlined_call_operand.vmem [shape: bf16[2048,512], index: 5, kind: input, shape index: {}]   ;;  %s21478_s6 = inlined_call_operand.vmem [shape: f32[1,512], index: 6, kind: input, shape index: {}]   ;;  %s21479_s7 = inlined_call_operand.vmem [shape: bf16[512,128], index: 7, kind: input, shape index: {}]   ;;  %s21480_s8 = inlined_call_operand.vmem [shape: f32[1,128], index: 8, kind: input, shape index: {}]   ;;  %s21481_s9 = inlined_call_operand.hbm [shape: f32[2,128], index: 9, kind: output, shape index: {}]  }
   0x1   :  { %v16034_v0 = vld [vmem:[%s21473_s1] sm:$0xff]   ;;  %v16035_v1 = vld [vmem:[%s21473_s1 + $0x8] sm:$0xff]   ;;  %v16040_v6 = vld [vmem:[%s21472_s0 + $0x10] sm:$0xff]  }
   0x2   :  { %14636 = vmatprep.subr.bf16.mxu0 %v16034_v0  ;;  %15644 = vmatprep.subr.bf16.mxu1 %v16034_v0  ;;  %v16036_v2 = vld [vmem:[%s21472_s0] sm:$0xff]   ;;  %v16038_v4 = vld [vmem:[%s21472_s0 + $0x8] sm:$0xff]   ;;  %v16041_v7 = vld [vmem:[%s21472_s0 + $0xb0] sm:$0xff]  }
   0x3   :  { %14637 = vmatpush3.bf16.msra.mxu0 %v16034_v0  ;;  %15646 = vmatpush3.bf16.msra.mxu1 %v16034_v0  ;;  %v16037_v3 = vld [vmem:[%s21472_s0 + $0xa0] sm:$0xff]   ;;  %v16039_v5 = vld [vmem:[%s21472_s0 + $0xa8] sm:$0xff]   ;;  %v16042_v8 = vld [vmem:[%s21472_s0 + $0x18] sm:$0xff]  }
   0x4   :  { %14638 = vmatprep.subr.bf16.mxu0 %v16035_v1  ;;  %15645 = vmatprep.subr.bf16.mxu1 %v16035_v1  ;;  %v16043_v9 = vld [vmem:[%s21472_s0 + $0xb8] sm:$0xff]   ;;  %v16044_v10 = vld [vmem:[%s21472_s0 + $0x20] sm:$0xff]   ;;  %v16046_v12 = vld [vmem:[%s21472_s0 + $0x28] sm:$0xff]  }
   0x5   :  { %14640 = vmatprep.mubr.msk.bf16.mxu0 %vm225_vm0, %v16036_v2  ;;  %14680 = vmatprep.mubr.msk.bf16.mxu1 %vm225_vm0, %v16037_v3  ;;  %v16045_v11 = vld [vmem:[%s21472_s0 + $0xc0] sm:$0xff]   ;;  %v16047_v13 = vld [vmem:[%s21472_s0 + $0xc8] sm:$0xff]   ;;  %v16048_v14 = vld [vmem:[%s21472_s0 + $0x30] sm:$0xff]  }
   0x6   :  { %v16049_v15 = vld [vmem:[%s21472_s0 + $0xd0] sm:$0xff]   ;;  %v16050_v16 = vld [vmem:[%s21472_s0 + $0x38] sm:$0xff]   ;;  %v16052_v18 = vld [vmem:[%s21472_s0 + $0x40] sm:$0xff]  }
   0x7   :  { %14639 = vmatpush3.bf16.msra.mxu0 %v16035_v1  ;;  %15647 = vmatpush3.bf16.msra.mxu1 %v16035_v1  ;;  %v16051_v17 = vld [vmem:[%s21472_s0 + $0xd8] sm:$0xff]   ;;  %v16053_v19 = vld [vmem:[%s21472_s0 + $0xe0] sm:$0xff]   ;;  %v16054_v20 = vld [vmem:[%s21472_s0 + $0x48] sm:$0xff]  }
   0x8   :  { %14688 = vmatprep.subr.bf16.mxu1 %v16034_v0  ;;  %14740 = vmatprep.subr.bf16.mxu0 %v16034_v0  ;;  %v16055_v21 = vld [vmem:[%s21472_s0 + $0xe8] sm:$0xff]   ;;  %v16056_v22 = vld [vmem:[%s21472_s0 + $0x50] sm:$0xff]   ;;  %v16058_v24 = vld [vmem:[%s21472_s0 + $0x58] sm:$0xff]  }
   0x9   :  { %v16057_v23 = vld [vmem:[%s21472_s0 + $0xf0] sm:$0xff]   ;;  %v16059_v25 = vld [vmem:[%s21472_s0 + $0xf8] sm:$0xff]   ;;  %v16060_v26 = vld [vmem:[%s21472_s0 + $0x60] sm:$0xff]  }
   0xa   :  { %14641 = vmatmul.mubr.msk.bf16.vlgmr.msra.gmra.mrb[0].mxu0 %vm225_vm0, %v16038_v4  ;;  %14681 = vmatmul.mubr.msk.bf16.vlgmr.msra.gmra.mrb[0].mxu1 %vm225_vm0, %v16039_v5  ;;  %v16061_v27 = vld [vmem:[%s21472_s0 + $0x100] sm:$0xff]   ;;  %v16062_v28 = vld [vmem:[%s21472_s0 + $0x68] sm:$0xff]   ;;  %v16064_v30 = vld [vmem:[%s21472_s0 + $0x70] sm:$0xff]  }
   0xb   :  { %14689 = vmatpush3.bf16.msra.mxu1 %v16034_v0  ;;  %14644 = vmatprep.mubr.msk.bf16.mxu0 %vm225_vm0, %v16040_v6  ;;  %v16063_v29 = vld [vmem:[%s21472_s0 + $0x108] sm:$0xff]   ;;  %v16065_v31 = vld [vmem:[%s21472_s0 + $0x110] sm:$0xff]   ;;  %v16066_v32 = vld [vmem:[%s21472_s0 + $0x78] sm:$0xff]  }
   0xc   :  { %14684 = vmatprep.mubr.msk.bf16.mxu1 %vm225_vm0, %v16041_v7  ;;  %14690 = vmatprep.subr.bf16.mxu1 %v16035_v1  ;;  %v16067_v33 = vld [vmem:[%s21472_s0 + $0x118] sm:$0xff]   ;;  %v16068_v34 = vld [vmem:[%s21472_s0 + $0x80] sm:$0xff]   ;;  %v16070_v36 = vld [vmem:[%s21472_s0 + $0x88] sm:$0xff]  }
   0xd   :  { %14741 = vmatpush3.bf16.msra.mxu0 %v16034_v0  ;;  %v16069_v35 = vld [vmem:[%s21472_s0 + $0x120] sm:$0xff]   ;;  %v16071_v37 = vld [vmem:[%s21472_s0 + $0x128] sm:$0xff]   ;;  %v16072_v38 = vld [vmem:[%s21472_s0 + $0x90] sm:$0xff]  }
   0xe   :  { %14742 = vmatprep.subr.bf16.mxu0 %v16035_v1  ;;  %v16073_v39 = vld [vmem:[%s21472_s0 + $0x130] sm:$0xff]   ;;  %v16074_v40 = vld [vmem:[%s21472_s0 + $0x98] sm:$0xff]   ;;  %v16076_v42 = vld [vmem:[%s21472_s0 + $0x140] sm:$0xff]  }
   0xf   :  { %14691 = vmatpush3.bf16.msra.mxu1 %v16035_v1  ;;  %v16075_v41 = vld [vmem:[%s21472_s0 + $0x138] sm:$0xff]   ;;  %v16077_v43 = vld [vmem:[%s21472_s0 + $0x180] sm:$0xff]   ;;  %v16078_v44 = vld [vmem:[%s21472_s0 + $0x148] sm:$0xff]  }
  0x10   :  { %14792 = vmatprep.subr.bf16.mxu1 %v16034_v0  ;;  %v16079_v45 = vld [vmem:[%s21472_s0 + $0x188] sm:$0xff]   ;;  %v16080_v46 = vld [vmem:[%s21472_s0 + $0x150] sm:$0xff]   ;;  %v16082_v48 = vld [vmem:[%s21472_s0 + $0x158] sm:$0xff]  }
  0x11   :  { %14743 = vmatpush3.bf16.msra.mxu0 %v16035_v1  ;;  %v16081_v47 = vld [vmem:[%s21472_s0 + $0x190] sm:$0xff]   ;;  %v16083_v49 = vld [vmem:[%s21472_s0 + $0x198] sm:$0xff]   ;;  %v16084_v50 = vld [vmem:[%s21472_s0 + $0x160] sm:$0xff]  }
  0x12   :  { %14645 = vmatmul.mubr.msk.bf16.gmra.mrb[4].mxu0 %vm225_vm0, %v16042_v8  ;;  %14685 = vmatmul.mubr.msk.bf16.gmra.mrb[4].mxu1 %vm225_vm0, %v16043_v9  ;;  %v16085_v51 = vld [vmem:[%s21472_s0 + $0x1a0] sm:$0xff]   ;;  %v16086_v52 = vld [vmem:[%s21472_s0 + $0x168] sm:$0xff]   ;;  %v16088_v54 = vld [vmem:[%s21472_s0 + $0x170] sm:$0xff]  }
  0x13   :  { %14648 = vmatprep.mubr.msk.bf16.mxu0 %vm225_vm0, %v16044_v10  ;;  %14692 = vmatprep.mubr.msk.bf16.mxu1 %vm225_vm0, %v16045_v11  ;;  %v16087_v53 = vld [vmem:[%s21472_s0 + $0x1a8] sm:$0xff]   ;;  %v16089_v55 = vld [vmem:[%s21472_s0 + $0x1b0] sm:$0xff]   ;;  %v16090_v56 = vld [vmem:[%s21472_s0 + $0x178] sm:$0xff]  }
  0x14   :  { %v16091_v57 = vld [vmem:[%s21472_s0 + $0x1b8] sm:$0xff]   ;;  %v16092_v58 = vld [vmem:[%s21472_s0 + $0x1c0] sm:$0xff]   ;;  %v16094_v60 = vld [vmem:[%s21472_s0 + $0x1c8] sm:$0xff]  }
  0x15   :  { %v16093_v59 = vld [vmem:[%s21472_s0 + $0x240] sm:$0xff]   ;;  %v16095_v61 = vld [vmem:[%s21472_s0 + $0x248] sm:$0xff]   ;;  %v16096_v62 = vld [vmem:[%s21472_s0 + $0x1d0] sm:$0xff]  }
  0x16   :  { %v16097_v63 = vld [vmem:[%s21472_s0 + $0x250] sm:$0xff]   ;;  %v16100_v2 = vld [vmem:[%s21472_s0 + $0x1e0] sm:$0xff]   ;;  %v16102_v4 = vld [vmem:[%s21472_s0 + $0x1e8] sm:$0xff]  }
  0x17   :  { %v16101_v3 = vld [vmem:[%s21472_s0 + $0x260] sm:$0xff]   ;;  %v16103_v5 = vld [vmem:[%s21472_s0 + $0x268] sm:$0xff]   ;;  %v16104_v6 = vld [vmem:[%s21472_s0 + $0x1f0] sm:$0xff]  }
  0x18   :  { %v16105_v7 = vld [vmem:[%s21472_s0 + $0x270] sm:$0xff]   ;;  %v16106_v8 = vld [vmem:[%s21472_s0 + $0x1f8] sm:$0xff]   ;;  %v16108_v10 = vld [vmem:[%s21472_s0 + $0x200] sm:$0xff]  }
  0x19   :  { %v16107_v9 = vld [vmem:[%s21472_s0 + $0x278] sm:$0xff]   ;;  %v16109_v11 = vld [vmem:[%s21472_s0 + $0x280] sm:$0xff]  }
  0x1a   :  { %14649 = vmatmul.mubr.msk.bf16.gmra.mrb[8].mxu0 %vm225_vm0, %v16046_v12  ;;  %14693 = vmatmul.mubr.msk.bf16.vlgmr.msra.gmra.mrb[8].mxu1 %vm225_vm0, %v16047_v13  ;;  %v16110_v12 = vld [vmem:[%s21472_s0 + $0x208] sm:$0xff]  }
  0x1b   :  { %14793 = vmatpush3.bf16.msra.mxu1 %v16034_v0  ;;  %14652 = vmatprep.mubr.msk.bf16.mxu0 %vm225_vm0, %v16048_v14  ;;  %v16098_v0 = vld [vmem:[%s21472_s0 + $0x1d8] sm:$0xff]   ;;  %v16111_v13 = vld [vmem:[%s21472_s0 + $0x288] sm:$0xff]   ;;  %v16112_v14 = vld [vmem:[%s21472_s0 + $0x210] sm:$0xff]  }
  0x1c   :  { %14696 = vmatprep.mubr.msk.bf16.mxu1 %vm225_vm0, %v16049_v15  ;;  %14794 = vmatprep.subr.bf16.mxu1 %v16035_v1  ;;  %v16113_v15 = vld [vmem:[%s21472_s0 + $0x290] sm:$0xff]  }
  0x1f   :  { %14795 = vmatpush3.bf16.msra.mxu1 %v16035_v1  ;;  %v16099_v1 = vld [vmem:[%s21472_s0 + $0x258] sm:$0xff]  }
  0x22   :  { %14653 = vmatmul.mubr.msk.bf16.gmra.mrb[12].mxu0 %vm225_vm0, %v16050_v16  ;;  %14697 = vmatmul.mubr.msk.bf16.gmra.mrb[12].mxu1 %vm225_vm0, %v16051_v17  ;;  %v16114_v16 = vld [vmem:[%s21472_s0 + $0x218] sm:$0xff]  }
  0x23   :  { %14656 = vmatprep.mubr.msk.bf16.mxu0 %vm225_vm0, %v16052_v18  ;;  %14700 = vmatprep.mubr.msk.bf16.mxu1 %vm225_vm0, %v16053_v19  ;;  %v16115_v17 = vld [vmem:[%s21472_s0 + $0x298] sm:$0xff]   ;;  %v16116_v18 = vld [vmem:[%s21472_s0 + $0x220] sm:$0xff]  }
  0x24   :  { %v16117_v19 = vld [vmem:[%s21472_s0 + $0x2a0] sm:$0xff]  }
  0x2a   :  { %14657 = vmatmul.mubr.msk.bf16.gmra.mrb[16].mxu0 %vm225_vm0, %v16054_v20  ;;  %14701 = vmatmul.mubr.msk.bf16.gmra.mrb[16].mxu1 %vm225_vm0, %v16055_v21  ;;  %v16118_v20 = vld [vmem:[%s21472_s0 + $0x228] sm:$0xff]  }
  0x2b   :  { %14660 = vmatprep.mubr.msk.bf16.mxu0 %vm225_vm0, %v16056_v22  ;;  %14704 = vmatprep.mubr.msk.bf16.mxu1 %vm225_vm0, %v16057_v23  ;;  %v16119_v21 = vld [vmem:[%s21472_s0 + $0x2a8] sm:$0xff]   ;;  %v16120_v22 = vld [vmem:[%s21472_s0 + $0x230] sm:$0xff]  }
  0x2c   :  { %v16121_v23 = vld [vmem:[%s21472_s0 + $0x2b0] sm:$0xff]  }
  0x32   :  { %14661 = vmatmul.mubr.msk.bf16.gmra.mrb[20].mxu0 %vm225_vm0, %v16058_v24  ;;  %14705 = vmatmul.mubr.msk.bf16.gmra.mrb[20].mxu1 %vm225_vm0, %v16059_v25  ;;  %v16122_v24 = vld [vmem:[%s21472_s0 + $0x238] sm:$0xff]  }
  0x33   :  { %14664 = vmatprep.mubr.msk.bf16.mxu0 %vm225_vm0, %v16060_v26  ;;  %14708 = vmatprep.mubr.msk.bf16.mxu1 %vm225_vm0, %v16061_v27  ;;  %v16123_v25 = vld [vmem:[%s21472_s0 + $0x2b8] sm:$0xff]   ;;  %v16124_v26 = vld [vmem:[%s21472_s0 + $0x2c0] sm:$0xff]   ;;  %v16125_v27 = vld [vmem:[%s21472_s0 + $0x2c8] sm:$0xff]  }
  0x3a   :  { %14665 = vmatmul.mubr.msk.bf16.gmra.mrb[24].mxu0 %vm225_vm0, %v16062_v28  ;;  %14709 = vmatmul.mubr.msk.bf16.gmra.mrb[24].mxu1 %vm225_vm0, %v16063_v29  ;;  %v16126_v28 = vld [vmem:[%s21472_s0 + $0x2d0] sm:$0xff]   ;;  %v16132_v29 = vld [vmem:[%s21475_s3 + $0x40] sm:$0xff]  }
  0x3b   :  { %14668 = vmatprep.mubr.msk.bf16.mxu0 %vm225_vm0, %v16064_v30  ;;  %14712 = vmatprep.mubr.msk.bf16.mxu1 %vm225_vm0, %v16065_v31  ;;  %v16127_v30 = vld [vmem:[%s21472_s0 + $0x2d8] sm:$0xff]   ;;  %v16128_v31 = vld [vmem:[%s21472_s0 + $0x2e0] sm:$0xff]  }
  0x3c   :  { %14844 = vmatprep.subr.bf16.mxu0 %v16132_v29 }
  0x42   :  { %14669 = vmatmul.mubr.msk.bf16.gmra.mrb[28].mxu0 %vm225_vm0, %v16066_v32  ;;  %14713 = vmatmul.mubr.msk.bf16.gmra.mrb[28].mxu1 %vm225_vm0, %v16067_v33  ;;  %v16133_v32 = vld [vmem:[%s21475_s3 + $0x48] sm:$0xff]  }
  0x43   :  { %14672 = vmatprep.mubr.msk.bf16.mxu0 %vm225_vm0, %v16068_v34  ;;  %14716 = vmatprep.mubr.msk.bf16.mxu1 %vm225_vm0, %v16069_v35  ;;  %v16129_v33 = vld [vmem:[%s21472_s0 + $0x2e8] sm:$0xff]   ;;  %v16130_v34 = vld [vmem:[%s21472_s0 + $0x2f0] sm:$0xff]   ;;  %v16131_v35 = vld [vmem:[%s21472_s0 + $0x2f8] sm:$0xff]  }
  0x4a   :  { %14673 = vmatmul.mubr.msk.bf16.gmra.mrb[32].mxu0 %vm225_vm0, %v16070_v36  ;;  %14717 = vmatmul.mubr.msk.bf16.gmra.mrb[32].mxu1 %vm225_vm0, %v16071_v37  ;;  %v16134_v36 = vld [vmem:[%s21475_s3 + $0x50] sm:$0xff]   ;;  %v16135_v37 = vld [vmem:[%s21475_s3 + $0x58] sm:$0xff]  }
  0x4b   :  { %14676 = vmatprep.mubr.msk.bf16.mxu0 %vm225_vm0, %v16072_v38  ;;  %14720 = vmatprep.mubr.msk.bf16.mxu1 %vm225_vm0, %v16073_v39  ;;  %v16136_v38 = vld [vmem:[%s21475_s3 + $0x60] sm:$0xff]   ;;  %v16137_v39 = vld [vmem:[%s21475_s3 + $0x68] sm:$0xff]  }
  0x52   :  { %14677 = vmatmul.mubr.msk.bf16.gmra.mrb[36].mxu0 %vm225_vm0, %v16074_v40  ;;  %14721 = vmatmul.mubr.msk.bf16.gmra.mrb[36].mxu1 %vm225_vm0, %v16075_v41 }
  0x53   :  { %14724 = vmatprep.mubr.msk.bf16.mxu1 %vm225_vm0, %v16076_v42  ;;  %14744 = vmatprep.mubr.msk.bf16.mxu0 %vm225_vm0, %v16077_v43 }
  0x5a   :  { %14725 = vmatmul.mubr.msk.bf16.gmra.mrb[40].mxu1 %vm225_vm0, %v16078_v44  ;;  %14745 = vmatmul.mubr.msk.bf16.vlgmr.msra.gmra.mrb[40].mxu0 %vm225_vm0, %v16079_v45 }
  0x5b   :  { %14728 = vmatprep.mubr.msk.bf16.mxu1 %vm225_vm0, %v16080_v46  ;;  %14748 = vmatprep.mubr.msk.bf16.mxu0 %vm225_vm0, %v16081_v47  ;;  %v16138_v46 = vld [vmem:[%s21475_s3 + $0x70] sm:$0xff]  }
  0x5c   :  { %14845 = vmatpush3.bf16.msra.mxu0 %v16132_v29 }
  0x5d   :  { %14846 = vmatprep.subr.bf16.mxu0 %v16133_v32 }
  0x60   :  { %14847 = vmatpush3.bf16.msra.mxu0 %v16133_v32 }
  0x61   :  { %14848 = vmatprep.subr.bf16.mxu0 %v16134_v36 }
  0x62   :  { %14729 = vmatmul.mubr.msk.bf16.gmra.mrb[44].mxu1 %vm225_vm0, %v16082_v48  ;;  %14749 = vmatmul.mubr.msk.bf16.gmra.mrb[44].mxu0 %vm225_vm0, %v16083_v49  ;;  %v16139_v49 = vld [vmem:[%s21475_s3 + $0x78] sm:$0xff]  }
  0x63   :  { %14732 = vmatprep.mubr.msk.bf16.mxu1 %vm225_vm0, %v16084_v50  ;;  %14752 = vmatprep.mubr.msk.bf16.mxu0 %vm225_vm0, %v16085_v51  ;;  %v17712_v50 = vld [vmem:[%s21474_s2] ss:$0 sm:$0xff] }
  0x64   :  { %14849 = vmatpush3.bf16.msra.mxu0 %v16134_v36 }
  0x65   :  { %14850 = vmatprep.subr.bf16.mxu0 %v16135_v37 }
  0x68   :  { %14851 = vmatpush3.bf16.msra.mxu0 %v16135_v37 }
  0x69   :  { %14852 = vmatprep.subr.bf16.mxu0 %v16136_v38 }
  0x6a   :  { %14733 = vmatmul.mubr.msk.bf16.gmra.mrb[48].mxu1 %vm225_vm0, %v16086_v52  ;;  %14753 = vmatmul.mubr.msk.bf16.gmra.mrb[48].mxu0 %vm225_vm0, %v16087_v53 }
  0x6b   :  { %14736 = vmatprep.mubr.msk.bf16.mxu1 %vm225_vm0, %v16088_v54  ;;  %14756 = vmatprep.mubr.msk.bf16.mxu0 %vm225_vm0, %v16089_v55 }
  0x6c   :  { %14853 = vmatpush3.bf16.msra.mxu0 %v16136_v38 }
  0x6d   :  { %14854 = vmatprep.subr.bf16.mxu0 %v16137_v39 }
  0x70   :  { %14855 = vmatpush3.bf16.msra.mxu0 %v16137_v39 }
  0x71   :  { %14856 = vmatprep.subr.bf16.mxu0 %v16138_v46 }
  0x72   :  { %14737 = vmatmul.mubr.msk.bf16.gmra.mrb[52].mxu1 %vm225_vm0, %v16090_v56  ;;  %14757 = vmatmul.mubr.msk.bf16.gmra.mrb[52].mxu0 %vm225_vm0, %v16091_v57 }
  0x73   :  { %14760 = vmatprep.mubr.msk.bf16.mxu0 %vm225_vm0, %v16092_v58  ;;  %14796 = vmatprep.mubr.msk.bf16.mxu1 %vm225_vm0, %v16093_v59 }
  0x74   :  { %14857 = vmatpush3.bf16.msra.mxu0 %v16138_v46 }
  0x75   :  { %14858 = vmatprep.subr.bf16.mxu0 %v16139_v49 }
  0x78   :  { %14859 = vmatpush3.bf16.msra.mxu0 %v16139_v49 }
  0x7a   :  { %14761 = vmatmul.mubr.msk.bf16.gmra.mrb[56].mxu0 %vm225_vm0, %v16094_v60  ;;  %14797 = vmatmul.mubr.msk.bf16.vlgmr.msra.gmra.mrb[56].mxu1 %vm225_vm0, %v16095_v61 }
  0x7b   :  { %14764 = vmatprep.mubr.msk.bf16.mxu0 %vm225_vm0, %v16096_v62  ;;  %14800 = vmatprep.mubr.msk.bf16.mxu1 %vm225_vm0, %v16097_v63 }
  0x82   :  { %14765 = vmatmul.mubr.msk.bf16.gmra.mrb[60].mxu0 %vm225_vm0, %v16098_v0  ;;  %14801 = vmatmul.mubr.msk.bf16.gmra.mrb[60].mxu1 %vm225_vm0, %v16099_v1 }
  0x83   :  { %14768 = vmatprep.mubr.msk.bf16.mxu0 %vm225_vm0, %v16100_v2  ;;  %14804 = vmatprep.mubr.msk.bf16.mxu1 %vm225_vm0, %v16101_v3 }
  0x8a   :  { %14769 = vmatmul.mubr.msk.bf16.gmra.mrb[64].mxu0 %vm225_vm0, %v16102_v4  ;;  %14805 = vmatmul.mubr.msk.bf16.gmra.mrb[64].mxu1 %vm225_vm0, %v16103_v5 }
  0x8b   :  { %14772 = vmatprep.mubr.msk.bf16.mxu0 %vm225_vm0, %v16104_v6  ;;  %14808 = vmatprep.mubr.msk.bf16.mxu1 %vm225_vm0, %v16105_v7 }
  0x92   :  { %14773 = vmatmul.mubr.msk.bf16.gmra.mrb[68].mxu0 %vm225_vm0, %v16106_v8  ;;  %14809 = vmatmul.mubr.msk.bf16.gmra.mrb[68].mxu1 %vm225_vm0, %v16107_v9 }
  0x93   :  { %14776 = vmatprep.mubr.msk.bf16.mxu0 %vm225_vm0, %v16108_v10  ;;  %14812 = vmatprep.mubr.msk.bf16.mxu1 %vm225_vm0, %v16109_v11 }
  0x9a   :  { %14777 = vmatmul.mubr.msk.bf16.gmra.mrb[72].mxu0 %vm225_vm0, %v16110_v12  ;;  %14813 = vmatmul.mubr.msk.bf16.gmra.mrb[72].mxu1 %vm225_vm0, %v16111_v13 }
  0x9b   :  { %14780 = vmatprep.mubr.msk.bf16.mxu0 %vm225_vm0, %v16112_v14  ;;  %14816 = vmatprep.mubr.msk.bf16.mxu1 %vm225_vm0, %v16113_v15 }
  0xa2   :  { %14781 = vmatmul.mubr.msk.bf16.gmra.mrb[76].mxu0 %vm225_vm0, %v16114_v16  ;;  %14817 = vmatmul.mubr.msk.bf16.gmra.mrb[76].mxu1 %vm225_vm0, %v16115_v17 }
  0xa3   :  { %14784 = vmatprep.mubr.msk.bf16.mxu0 %vm225_vm0, %v16116_v18  ;;  %14820 = vmatprep.mubr.msk.bf16.mxu1 %vm225_vm0, %v16117_v19 }
  0xaa   :  { %14785 = vmatmul.mubr.msk.bf16.gmra.mrb[80].mxu0 %vm225_vm0, %v16118_v20  ;;  %14821 = vmatmul.mubr.msk.bf16.gmra.mrb[80].mxu1 %vm225_vm0, %v16119_v21 }
  0xab   :  { %14788 = vmatprep.mubr.msk.bf16.mxu0 %vm225_vm0, %v16120_v22  ;;  %14824 = vmatprep.mubr.msk.bf16.mxu1 %vm225_vm0, %v16121_v23 }
  0xb2   :  { %14789 = vmatmul.mubr.msk.bf16.gmra.mrb[84].mxu0 %vm225_vm0, %v16122_v24  ;;  %14825 = vmatmul.mubr.msk.bf16.gmra.mrb[84].mxu1 %vm225_vm0, %v16123_v25 }
  0xb3   :  { %14828 = vmatprep.mubr.msk.bf16.mxu1 %vm225_vm0, %v16124_v26 }
  0xba   :  { %14829 = vmatmul.mubr.msk.bf16.gmra.mrb[88].mxu1 %vm225_vm0, %v16125_v27 }
  0xbb   :  { %14832 = vmatprep.mubr.msk.bf16.mxu1 %vm225_vm0, %v16126_v28 }
  0xc2   :  { %14833 = vmatmul.mubr.msk.bf16.gmra.mrb[92].mxu1 %vm225_vm0, %v16127_v30 }
  0xc3   :  { %14836 = vmatprep.mubr.msk.bf16.mxu1 %vm225_vm0, %v16128_v31 }
  0xca   :  { %14837 = vmatmul.mubr.msk.bf16.gmra.mrb[96].mxu1 %vm225_vm0, %v16129_v33 }
  0xcb   :  { %14840 = vmatprep.mubr.msk.bf16.mxu1 %vm225_vm0, %v16130_v34 }
  0xd2   :  { %14841 = vmatmul.mubr.msk.bf16.gmra.mrb[100].mxu1 %vm225_vm0, %v16131_v35 }
  0xdd   :  { %v17695_v40 = vpop.f32.mrb[0].mxu1  ;;  %v14642_v41 = vpop.f32.mrb[0].mxu0 }
  0xde   :  { %v17697_v42 = vpop.f32.mrb[1].mxu1  ;;  %v332_v43 = vpop.f32.mrb[1].mxu0  ;;  %v341_v56 = vadd.f32 %v14642_v41, %v17712_v50 }
  0xdf   :  { %v17699_v44 = vpop.f32.mrb[2].mxu1  ;;  %v14643_v45 = vpop.f32.mrb[2].mxu0  ;;  %v333_v57 = vadd.f32 %v17712_v50, %v332_v43 }
  0xe0   :  { %v17704_v47 = vpop.f32.mrb[3].mxu1  ;;  %v335_v48 = vpop.f32.mrb[3].mxu0  ;;  %v525_v61 = vmax.f32 %v341_v56, 0.0  ;;  %v344_v63 = vadd.f32 %v14643_v45, %v17712_v50 }
  0xe1   :  { %v523_v62 = vmax.f32 %v333_v57, 0.0  ;;  %v336_v1 = vadd.f32 %v17712_v50, %v335_v48 }
  0xe2   :  { %v526_v10 = vmax.f32 %v344_v63, 0.0 }
  0xe3   :  { %v524_v15 = vmax.f32 %v336_v1, 0.0 }
  0xe5   :  { %v17714_v51 = vpop.f32.mrb[4].mxu1  ;;  %v14646_v52 = vpop.f32.mrb[4].mxu0 }
  0xe6   :  { %v17716_v53 = vpop.f32.mrb[5].mxu1  ;;  %v348_v54 = vpop.f32.mrb[5].mxu0  ;;  %v357_v19 = vadd.f32 %v14646_v52, %v17712_v50 }
  0xe7   :  { %v17718_v55 = vpop.f32.mrb[6].mxu1  ;;  %v14647_v58 = vpop.f32.mrb[6].mxu0  ;;  %v349_v22 = vadd.f32 %v17712_v50, %v348_v54 }
  0xe8   :  { %v17722_v59 = vpop.f32.mrb[7].mxu1  ;;  %v351_v60 = vpop.f32.mrb[7].mxu0  ;;  %v360_v24 = vadd.f32 %v14647_v58, %v17712_v50  ;;  %v529_v29 = vmax.f32 %v357_v19, 0.0 }
  0xe9   :  { %v352_v27 = vadd.f32 %v17712_v50, %v351_v60  ;;  %v527_v33 = vmax.f32 %v349_v22, 0.0 }
  0xea   :  { %v530_v38 = vmax.f32 %v360_v24, 0.0 }
  0xeb   :  { %v528_v46 = vmax.f32 %v352_v27, 0.0 }
  0xed   :  { %v14694_v0 = vpop.f32.mrb[8].mxu1  ;;  %v14650_v2 = vpop.f32.mrb[8].mxu0 }
  0xee   :  { %v855_v3 = vadd.f32 %v14694_v0, %v17712_v50  ;;  %v846_v4 = vpop.f32.mrb[9].mxu1  ;;  %v364_v5 = vpop.f32.mrb[9].mxu0  ;;  %v373_v54 = vadd.f32 %v14650_v2, %v17712_v50 }
  0xef   :  { %v847_v6 = vadd.f32 %v17712_v50, %v846_v4  ;;  %v14695_v7 = vpop.f32.mrb[10].mxu1  ;;  %v14651_v8 = vpop.f32.mrb[10].mxu0  ;;  %v365_v58 = vadd.f32 %v17712_v50, %v364_v5 }
  0xf0   :  { %v1039_v9 = vmax.f32 %v855_v3, 0.0  ;;  %v858_v11 = vadd.f32 %v14695_v7, %v17712_v50  ;;  %v849_v12 = vpop.f32.mrb[11].mxu1  ;;  %v367_v13 = vpop.f32.mrb[11].mxu0  ;;  %v533_v3 = vmax.f32 %v373_v54, 0.0 }
  0xf1   :  { %v1037_v14 = vmax.f32 %v847_v6, 0.0  ;;  %v850_v16 = vadd.f32 %v17712_v50, %v849_v12  ;;  %v368_v0 = vadd.f32 %v17712_v50, %v367_v13  ;;  %v531_v7 = vmax.f32 %v365_v58, 0.0 }
  0xf2   :  { %v17730_v17 = vmax.f32 %v525_v61, %v1039_v9  ;;  %v1040_v18 = vmax.f32 %v858_v11, 0.0  ;;  %v376_v61 = vadd.f32 %v14651_v8, %v17712_v50 }
  0xf3   :  { %v17733_v20 = vmax.f32 %v523_v62, %v1037_v14  ;;  %v1038_v21 = vmax.f32 %v850_v16, 0.0 }
  0xf4   :  { %v17736_v23 = vmax.f32 %v526_v10, %v1040_v18  ;;  %v534_v12 = vmax.f32 %v376_v61, 0.0  ;;  %v532_v18 = vmax.f32 %v368_v0, 0.0 }
  0xf5   :  { %v17739_v25 = vmax.f32 %v524_v15, %v1038_v21  ;;  %v14698_v26 = vpop.f32.mrb[12].mxu1  ;;  %v14654_v28 = vpop.f32.mrb[12].mxu0 }
  0xf6   :  { %v871_v30 = vadd.f32 %v14698_v26, %v17712_v50  ;;  %v862_v31 = vpop.f32.mrb[13].mxu1  ;;  %v380_v32 = vpop.f32.mrb[13].mxu0  ;;  %v389_v22 = vadd.f32 %v14654_v28, %v17712_v50 }
  0xf7   :  { %v863_v34 = vadd.f32 %v17712_v50, %v862_v31  ;;  %v14699_v35 = vpop.f32.mrb[14].mxu1  ;;  %v14655_v36 = vpop.f32.mrb[14].mxu0  ;;  %v381_v27 = vadd.f32 %v17712_v50, %v380_v32 }
  0xf8   :  { %v1043_v37 = vmax.f32 %v871_v30, 0.0  ;;  %v874_v39 = vadd.f32 %v14699_v35, %v17712_v50  ;;  %v865_v41 = vpop.f32.mrb[15].mxu1  ;;  %v383_v43 = vpop.f32.mrb[15].mxu0  ;;  %v392_v30 = vadd.f32 %v14655_v36, %v17712_v50 }
  0xf9   :  { %v1041_v45 = vmax.f32 %v863_v34, 0.0  ;;  %v866_v48 = vadd.f32 %v17712_v50, %v865_v41  ;;  %v384_v34 = vadd.f32 %v17712_v50, %v383_v43  ;;  %v535_v41 = vmax.f32 %v381_v27, 0.0 }
  0xfa   :  { %v17746_v49 = vmax.f32 %v529_v29, %v1043_v37  ;;  %v1044_v52 = vmax.f32 %v874_v39, 0.0  ;;  %v537_v37 = vmax.f32 %v389_v22, 0.0 }
  0xfb   :  { %v17749_v56 = vmax.f32 %v527_v33, %v1041_v45  ;;  %v1042_v57 = vmax.f32 %v866_v48, 0.0  ;;  %v536_v61 = vmax.f32 %v384_v34, 0.0 }
  0xfc   :  { %v17752_v60 = vmax.f32 %v530_v38, %v1044_v52  ;;  %v538_v52 = vmax.f32 %v392_v30, 0.0 }
  0xfd   :  { %v17755_v62 = vmax.f32 %v528_v46, %v1042_v57  ;;  %v14702_v63 = vpop.f32.mrb[16].mxu1  ;;  %v14658_v1 = vpop.f32.mrb[16].mxu0 }
  0xfe   :  { %v887_v4 = vadd.f32 %v14702_v63, %v17712_v50  ;;  %v878_v6 = vpop.f32.mrb[17].mxu1  ;;  %v396_v2 = vpop.f32.mrb[17].mxu0 }
  0xff   :  { %v879_v9 = vadd.f32 %v17712_v50, %v878_v6  ;;  %v14703_v10 = vpop.f32.mrb[18].mxu1  ;;  %v14659_v5 = vpop.f32.mrb[18].mxu0 }
 0x100   :  { %v1047_v11 = vmax.f32 %v887_v4, 0.0  ;;  %v890_v8 = vadd.f32 %v14703_v10, %v17712_v50  ;;  %v881_v14 = vpop.f32.mrb[19].mxu1  ;;  %v399_v15 = vpop.f32.mrb[19].mxu0  ;;  %v408_v10 = vadd.f32 %v14659_v5, %v17712_v50  ;;  %v16140_v5 = vld [vmem:[%s21475_s3] sm:$0xff]  }
 0x101   :  { %v1045_v16 = vmax.f32 %v879_v9, 0.0  ;;  %v882_v13 = vadd.f32 %v17712_v50, %v881_v14  ;;  %14876 = vmatprep.subr.bf16.mxu0 %v16140_v5 }
 0x102   :  { %v17762_v19 = vmax.f32 %v533_v3, %v1047_v11  ;;  %v1048_v21 = vmax.f32 %v890_v8, 0.0  ;;  %v405_v3 = vadd.f32 %v14658_v1, %v17712_v50  ;;  %v400_v8 = vadd.f32 %v17712_v50, %v399_v15 }
 0x103   :  { %v17765_v24 = vmax.f32 %v531_v7, %v1045_v16  ;;  %v1046_v26 = vmax.f32 %v882_v13, 0.0  ;;  %v397_v7 = vadd.f32 %v17712_v50, %v396_v2  ;;  %v542_v30 = vmax.f32 %v408_v10, 0.0 }
 0x104   :  { %v17768_v29 = vmax.f32 %v534_v12, %v1048_v21  ;;  %v541_v16 = vmax.f32 %v405_v3, 0.0 }
 0x105   :  { %v17771_v31 = vmax.f32 %v532_v18, %v1046_v26  ;;  %v14706_v33 = vpop.f32.mrb[20].mxu1  ;;  %v14662_v35 = vpop.f32.mrb[20].mxu0  ;;  %v539_v21 = vmax.f32 %v397_v7, 0.0 }
 0x106   :  { %v903_v38 = vadd.f32 %v14706_v33, %v17712_v50  ;;  %v894_v39 = vpop.f32.mrb[21].mxu1  ;;  %v412_v28 = vpop.f32.mrb[21].mxu0 }
 0x107   :  { %v895_v45 = vadd.f32 %v17712_v50, %v894_v39  ;;  %v14707_v46 = vpop.f32.mrb[22].mxu1  ;;  %v14663_v32 = vpop.f32.mrb[22].mxu0 }
 0x108   :  { %v1051_v48 = vmax.f32 %v903_v38, 0.0  ;;  %v906_v36 = vadd.f32 %v14707_v46, %v17712_v50  ;;  %v897_v54 = vpop.f32.mrb[23].mxu1  ;;  %v415_v57 = vpop.f32.mrb[23].mxu0  ;;  %v540_v38 = vmax.f32 %v400_v8, 0.0  ;;  %v421_v46 = vadd.f32 %v14662_v35, %v17712_v50 }
 0x109   :  { %v1049_v58 = vmax.f32 %v895_v45, 0.0  ;;  %v898_v43 = vadd.f32 %v17712_v50, %v897_v54 }
 0x10a   :  { %v17778_v63 = vmax.f32 %v537_v37, %v1051_v48  ;;  %v1052_v0 = vmax.f32 %v906_v36, 0.0  ;;  %v413_v36 = vadd.f32 %v17712_v50, %v412_v28 }
 0x10b   :  { %v17781_v4 = vmax.f32 %v535_v41, %v1049_v58  ;;  %v1050_v6 = vmax.f32 %v898_v43, 0.0  ;;  %v424_v58 = vadd.f32 %v14663_v32, %v17712_v50 }
 0x10c   :  { %v17784_v9 = vmax.f32 %v538_v52, %v1052_v0  ;;  %v416_v0 = vadd.f32 %v17712_v50, %v415_v57 }
 0x10d   :  { %v17787_v11 = vmax.f32 %v536_v61, %v1050_v6  ;;  %v14710_v12 = vpop.f32.mrb[24].mxu1  ;;  %v14666_v14 = vpop.f32.mrb[24].mxu0  ;;  %v545_v6 = vmax.f32 %v421_v46, 0.0 }
 0x10e   :  { %v919_v18 = vadd.f32 %v14710_v12, %v17712_v50  ;;  %v910_v13 = vpop.f32.mrb[25].mxu1  ;;  %v428_v1 = vpop.f32.mrb[25].mxu0  ;;  %v543_v12 = vmax.f32 %v413_v36, 0.0  ;;  %v544_v5 = vmax.f32 %v416_v0, 0.0 }
 0x10f   :  { %v911_v22 = vadd.f32 %v17712_v50, %v910_v13  ;;  %v14711_v26 = vpop.f32.mrb[26].mxu1  ;;  %v14667_v2 = vpop.f32.mrb[26].mxu0  ;;  %v546_v13 = vmax.f32 %v424_v58, 0.0 }
 0x110   :  { %v1055_v27 = vmax.f32 %v919_v18, 0.0  ;;  %v922_v33 = vadd.f32 %v14711_v26, %v17712_v50  ;;  %v913_v15 = vpop.f32.mrb[27].mxu1  ;;  %v431_v34 = vpop.f32.mrb[27].mxu0 }
 0x111   :  { %v1053_v37 = vmax.f32 %v911_v22, 0.0  ;;  %v914_v39 = vadd.f32 %v17712_v50, %v913_v15  ;;  %v432_v36 = vadd.f32 %v17712_v50, %v431_v34 }
 0x112   :  { %v17797_v41 = vmax.f32 %v541_v16, %v1055_v27  ;;  %v1056_v45 = vmax.f32 %v922_v33, 0.0  ;;  %v437_v33 = vadd.f32 %v14666_v14, %v17712_v50 }
 0x113   :  { %v17800_v48 = vmax.f32 %v539_v21, %v1053_v37  ;;  %v1054_v52 = vmax.f32 %v914_v39, 0.0 }
 0x114   :  { %v17803_v54 = vmax.f32 %v542_v30, %v1056_v45  ;;  %v440_v45 = vadd.f32 %v14667_v2, %v17712_v50 }
 0x115   :  { %v17806_v61 = vmax.f32 %v540_v38, %v1054_v52  ;;  %v14714_v43 = vpop.f32.mrb[28].mxu1  ;;  %v14670_v3 = vpop.f32.mrb[28].mxu0  ;;  %v429_v38 = vadd.f32 %v17712_v50, %v428_v1 }
 0x116   :  { %v935_v7 = vadd.f32 %v14714_v43, %v17712_v50  ;;  %v926_v10 = vpop.f32.mrb[29].mxu1  ;;  %v444_v35 = vpop.f32.mrb[29].mxu0  ;;  %v549_v43 = vmax.f32 %v437_v33, 0.0 }
 0x117   :  { %v927_v8 = vadd.f32 %v17712_v50, %v926_v10  ;;  %v14715_v16 = vpop.f32.mrb[30].mxu1  ;;  %v14671_v28 = vpop.f32.mrb[30].mxu0 }
 0x118   :  { %v1059_v18 = vmax.f32 %v935_v7, 0.0  ;;  %v938_v32 = vadd.f32 %v14715_v16, %v17712_v50  ;;  %v929_v21 = vpop.f32.mrb[31].mxu1  ;;  %v447_v22 = vpop.f32.mrb[31].mxu0  ;;  %v547_v7 = vmax.f32 %v429_v38, 0.0  ;;  %v550_v16 = vmax.f32 %v440_v45, 0.0 }
 0x119   :  { %v1057_v26 = vmax.f32 %v927_v8, 0.0  ;;  %v930_v57 = vadd.f32 %v17712_v50, %v929_v21  ;;  %v548_v21 = vmax.f32 %v432_v36, 0.0  ;;  %v456_v38 = vadd.f32 %v14671_v28, %v17712_v50 }
 0x11a   :  { %v17813_v27 = vmax.f32 %v545_v6, %v1059_v18  ;;  %v1060_v30 = vmax.f32 %v938_v32, 0.0  ;;  %v448_v36 = vadd.f32 %v17712_v50, %v447_v22 }
 0x11b   :  { %v17816_v15 = vmax.f32 %v543_v12, %v1057_v26  ;;  %v1058_v37 = vmax.f32 %v930_v57, 0.0  ;;  %v453_v57 = vadd.f32 %v14670_v3, %v17712_v50 }
 0x11c   :  { %v17819_v39 = vmax.f32 %v546_v13, %v1060_v30 }
 0x11d   :  { %v17822_v46 = vmax.f32 %v544_v5, %v1058_v37  ;;  %v14718_v52 = vpop.f32.mrb[32].mxu1  ;;  %v14674_v58 = vpop.f32.mrb[32].mxu0  ;;  %v445_v37 = vadd.f32 %v17712_v50, %v444_v35 }
 0x11e   :  { %v951_v0 = vadd.f32 %v14718_v52, %v17712_v50  ;;  %v942_v6 = vpop.f32.mrb[33].mxu1  ;;  %v460_v14 = vpop.f32.mrb[33].mxu0 }
 0x11f   :  { %v943_v10 = vadd.f32 %v17712_v50, %v942_v6  ;;  %v14719_v12 = vpop.f32.mrb[34].mxu1  ;;  %v14675_v1 = vpop.f32.mrb[34].mxu0 }
 0x120   :  { %v1063_v8 = vmax.f32 %v951_v0, 0.0  ;;  %v954_v2 = vadd.f32 %v14719_v12, %v17712_v50  ;;  %v945_v18 = vpop.f32.mrb[35].mxu1  ;;  %v463_v13 = vpop.f32.mrb[35].mxu0  ;;  %v472_v22 = vadd.f32 %v14675_v1, %v17712_v50 }
 0x121   :  { %v1061_v32 = vmax.f32 %v943_v10, 0.0  ;;  %v946_v34 = vadd.f32 %v17712_v50, %v945_v18 }
 0x122   :  { %v17829_v26 = vmax.f32 %v549_v43, %v1063_v8  ;;  %v1064_v5 = vmax.f32 %v954_v2, 0.0  ;;  %v553_v43 = vmax.f32 %v453_v57, 0.0  ;;  %v554_v8 = vmax.f32 %v456_v38, 0.0 }
 0x123   :  { %v17832_v30 = vmax.f32 %v547_v7, %v1061_v32  ;;  %v1062_v33 = vmax.f32 %v946_v34, 0.0  ;;  %v551_v7 = vmax.f32 %v445_v37, 0.0  ;;  %v469_v2 = vadd.f32 %v14674_v58, %v17712_v50 }
 0x124   :  { %v17836_v45 = vmax.f32 %v550_v16, %v1064_v5  ;;  %v461_v32 = vadd.f32 %v17712_v50, %v460_v14  ;;  %v552_v57 = vmax.f32 %v448_v36, 0.0  ;;  %v464_v37 = vadd.f32 %v17712_v50, %v463_v13 }
 0x125   :  { %v17838_v52 = vmax.f32 %v548_v21, %v1062_v33  ;;  %v14722_v0 = vpop.f32.mrb[36].mxu1  ;;  %v14678_v6 = vpop.f32.mrb[36].mxu0 }
 0x126   :  { %21539 = vst [vmem:[#allocation7_spill] sm:$0xff] %v17836_v45  ;;  %v967_v10 = vadd.f32 %v14722_v0, %v17712_v50  ;;  %v958_v12 = vpop.f32.mrb[37].mxu1  ;;  %v476_v3 = vpop.f32.mrb[37].mxu0  ;;  %v555_v14 = vmax.f32 %v461_v32, 0.0  ;;  %v558_v45 = vmax.f32 %v472_v22, 0.0  ;;  %v556_v36 = vmax.f32 %v464_v37, 0.0 }
 0x127   :  { %21540 = vst [vmem:[#allocation8_spill] sm:$0xff] %v17838_v52  ;;  %v959_v35 = vadd.f32 %v17712_v50, %v958_v12  ;;  %v14723_v28 = vpop.f32.mrb[38].mxu1  ;;  %v14679_v16 = vpop.f32.mrb[38].mxu0  ;;  %v557_v52 = vmax.f32 %v469_v2, 0.0 }
 0x128   :  { %v1067_v18 = vmax.f32 %v967_v10, 0.0  ;;  %v970_v21 = vadd.f32 %v14723_v28, %v17712_v50  ;;  %v961_v34 = vpop.f32.mrb[39].mxu1  ;;  %v479_v5 = vpop.f32.mrb[39].mxu0  ;;  %v17857_v28 = vadd.f32 %v17695_v40, %v17712_v50  ;;  %v17870_v40 = vadd.f32 %v14679_v16, %v17712_v50 }
 0x129   :  { %v1065_v33 = vmax.f32 %v959_v35, 0.0  ;;  %v962_v38 = vadd.f32 %v17712_v50, %v961_v34  ;;  %v17873_v22 = vadd.f32 %v17712_v50, %v479_v5 }
 0x12a   :  { %v17849_v58 = vmax.f32 %v553_v43, %v1067_v18  ;;  %v1068_v0 = vmax.f32 %v970_v21, 0.0  ;;  %v17862_v43 = vadd.f32 %v14678_v6, %v17712_v50 }
 0x12b   :  { %v17851_v12 = vmax.f32 %v551_v7, %v1065_v33  ;;  %v1066_v10 = vmax.f32 %v962_v38, 0.0  ;;  %v17865_v7 = vadd.f32 %v17712_v50, %v476_v3 }
 0x12c   :  { %v17853_v1 = vmax.f32 %v554_v8, %v1068_v0 }
 0x12d   :  { %21541 = vst [vmem:[#allocation9_spill] sm:$0xff] %v17851_v12  ;;  %v17859_v35 = vmax.f32 %v552_v57, %v1066_v10  ;;  %v14726_v13 = vpop.f32.mrb[40].mxu1  ;;  %v14746_v34 = vpop.f32.mrb[40].mxu0 }
 0x12e   :  { %21542 = vst [vmem:[#allocation10_spill] sm:$0xff] %v17853_v1  ;;  %v983_v2 = vadd.f32 %v14726_v13, %v17712_v50  ;;  %v1417_v8 = vadd.f32 %v14746_v34, %v17712_v50  ;;  %v974_v18 = vpop.f32.mrb[41].mxu1  ;;  %v1408_v32 = vpop.f32.mrb[41].mxu0 }
 0x12f   :  { %21543 = vst [vmem:[#allocation11_spill] sm:$0xff] %v17859_v35  ;;  %v975_v21 = vadd.f32 %v17712_v50, %v974_v18  ;;  %v1409_v6 = vadd.f32 %v17712_v50, %v1408_v32  ;;  %v14727_v57 = vpop.f32.mrb[42].mxu1  ;;  %v14747_v33 = vpop.f32.mrb[42].mxu0 }
 0x130   :  { %v1071_v3 = vmax.f32 %v983_v2, 0.0  ;;  %v1601_v37 = vmax.f32 %v1417_v8, 0.0  ;;  %v986_v38 = vadd.f32 %v14727_v57, %v17712_v50  ;;  %v1420_v0 = vadd.f32 %v14747_v33, %v17712_v50  ;;  %v977_v10 = vpop.f32.mrb[43].mxu1  ;;  %v1411_v13 = vpop.f32.mrb[43].mxu0 }
 0x131   :  { %v1069_v34 = vmax.f32 %v975_v21, 0.0  ;;  %v1599_v16 = vmax.f32 %v1409_v6, 0.0  ;;  %v978_v35 = vadd.f32 %v17712_v50, %v977_v10  ;;  %v1412_v5 = vadd.f32 %v17712_v50, %v1411_v13 }
 0x132   :  { %v17881_v1 = vmax.f32 %v557_v52, %v1071_v3  ;;  %v17884_v18 = vmax.f32 %v17730_v17, %v1601_v37  ;;  %v1072_v32 = vmax.f32 %v986_v38, 0.0  ;;  %v1602_v2 = vmax.f32 %v1420_v0, 0.0 }
 0x133   :  { %v17886_v8 = vmax.f32 %v555_v14, %v1069_v34  ;;  %v17889_v57 = vmax.f32 %v17733_v20, %v1599_v16  ;;  %v1070_v33 = vmax.f32 %v978_v35, 0.0  ;;  %v1600_v12 = vmax.f32 %v1412_v5, 0.0 }
 0x134   :  { %v17894_v6 = vadd.f32 %v17712_v50, %v17697_v42  ;;  %v17896_v52 = vmax.f32 %v558_v45, %v1072_v32  ;;  %v17899_v17 = vmax.f32 %v17736_v23, %v1602_v2  ;;  %v17903_v14 = vadd.f32 %v17699_v44, %v17712_v50 }
 0x135   :  { %v561_v20 = vmax.f32 %v17862_v43, 0.0  ;;  %v17906_v3 = vmax.f32 %v556_v36, %v1070_v33  ;;  %v17909_v35 = vmax.f32 %v17739_v25, %v1600_v12  ;;  %v14730_v37 = vpop.f32.mrb[44].mxu1  ;;  %v14750_v38 = vpop.f32.mrb[44].mxu0  ;;  %v17913_v42 = vadd.f32 %v17712_v50, %v17704_v47  ;;  %v17923_v25 = vld [vmem:[%s21474_s2] ss:$0 sm:$0xff] }
 0x136   :  { %v559_v23 = vmax.f32 %v17865_v7, 0.0  ;;  %v999_v45 = vadd.f32 %v14730_v37, %v17712_v50  ;;  %v1433_v44 = vadd.f32 %v14750_v38, %v17712_v50  ;;  %v990_v0 = vpop.f32.mrb[45].mxu1  ;;  %v1424_v10 = vpop.f32.mrb[45].mxu0  ;;  %v562_v36 = vmax.f32 %v17870_v40, 0.0 }
 0x137   :  { %v560_v43 = vmax.f32 %v17873_v22, 0.0  ;;  %v991_v47 = vadd.f32 %v17923_v25, %v990_v0  ;;  %v1425_v12 = vadd.f32 %v17923_v25, %v1424_v10  ;;  %v14731_v7 = vpop.f32.mrb[46].mxu1  ;;  %v14751_v13 = vpop.f32.mrb[46].mxu0 }
 0x138   :  { %v1075_v34 = vmax.f32 %v999_v45, 0.0  ;;  %v1605_v16 = vmax.f32 %v1433_v44, 0.0  ;;  %v1002_v50 = vadd.f32 %v17923_v25, %v14731_v7  ;;  %v1436_v5 = vadd.f32 %v17923_v25, %v14751_v13  ;;  %v993_v40 = vpop.f32.mrb[47].mxu1  ;;  %v1427_v32 = vpop.f32.mrb[47].mxu0 }
 0x139   :  { %v1073_v22 = vmax.f32 %v991_v47, 0.0  ;;  %v1603_v2 = vmax.f32 %v1425_v12, 0.0  ;;  %v994_v33 = vadd.f32 %v17923_v25, %v993_v40  ;;  %v1428_v37 = vadd.f32 %v17923_v25, %v1427_v32 }
 0x13a   :  { %v17931_v38 = vmax.f32 %v561_v20, %v1075_v34  ;;  %v17934_v0 = vmax.f32 %v17746_v49, %v1605_v16  ;;  %v1076_v10 = vmax.f32 %v1002_v50, 0.0  ;;  %v1606_v45 = vmax.f32 %v1436_v5, 0.0 }
 0x13b   :  { %v17936_v44 = vmax.f32 %v559_v23, %v1073_v22  ;;  %v17939_v7 = vmax.f32 %v17749_v56, %v1603_v2  ;;  %v1074_v13 = vmax.f32 %v994_v33, 0.0  ;;  %v1604_v21 = vmax.f32 %v1428_v37, 0.0 }
 0x13c   :  { %v563_v47 = vmax.f32 %v17894_v6, 0.0  ;;  %v566_v12 = vmax.f32 %v17903_v14, 0.0  ;;  %v17943_v40 = vmax.f32 %v562_v36, %v1076_v10  ;;  %v17946_v20 = vmax.f32 %v17752_v60, %v1606_v45 }
 0x13d   :  { %v564_v49 = vmax.f32 %v17913_v42, 0.0  ;;  %v17949_v34 = vmax.f32 %v560_v43, %v1074_v13  ;;  %v17952_v23 = vmax.f32 %v17755_v62, %v1604_v21  ;;  %v14734_v56 = vpop.f32.mrb[48].mxu1  ;;  %v14754_v16 = vpop.f32.mrb[48].mxu0  ;;  %v517_v50 = vadd.f32 %v17923_v25, %v17714_v51 }
 0x13e   :  { %v509_v6 = vadd.f32 %v17923_v25, %v17716_v53  ;;  %v1015_v14 = vadd.f32 %v17923_v25, %v14734_v56  ;;  %v1449_v60 = vadd.f32 %v17923_v25, %v14754_v16  ;;  %v1006_v36 = vpop.f32.mrb[49].mxu1  ;;  %v1440_v5 = vpop.f32.mrb[49].mxu0  ;;  %v520_v42 = vadd.f32 %v17923_v25, %v17718_v55 }
 0x13f   :  { %v512_v62 = vadd.f32 %v17923_v25, %v17722_v59  ;;  %v1007_v21 = vadd.f32 %v17923_v25, %v1006_v36  ;;  %v1441_v43 = vadd.f32 %v17923_v25, %v1440_v5  ;;  %v14735_v51 = vpop.f32.mrb[50].mxu1  ;;  %v14755_v32 = vpop.f32.mrb[50].mxu0  ;;  %v21544_v56 = vmax.f32 %v17857_v28, 0.0 }
 0x140   :  { %v1079_v22 = vmax.f32 %v1015_v14, 0.0  ;;  %v1609_v53 = vmax.f32 %v1449_v60, 0.0  ;;  %v1018_v2 = vadd.f32 %v17923_v25, %v14735_v51  ;;  %v1452_v33 = vadd.f32 %v17923_v25, %v14755_v32  ;;  %v1009_v37 = vpop.f32.mrb[51].mxu1  ;;  %v1443_v10 = vpop.f32.mrb[51].mxu0 }
 0x141   :  { %v1077_v45 = vmax.f32 %v1007_v21, 0.0  ;;  %v1607_v13 = vmax.f32 %v1441_v43, 0.0  ;;  %v1010_v55 = vadd.f32 %v17923_v25, %v1009_v37  ;;  %v1444_v59 = vadd.f32 %v17923_v25, %v1443_v10 }
 0x142   :  { %v17972_v16 = vmax.f32 %v21544_v56, %v1079_v22  ;;  %v17975_v36 = vmax.f32 %v17762_v19, %v1609_v53  ;;  %v1080_v14 = vmax.f32 %v1018_v2, 0.0  ;;  %v1610_v60 = vmax.f32 %v1452_v33, 0.0 }
 0x143   :  { %v17977_v5 = vmax.f32 %v563_v47, %v1077_v45  ;;  %v17980_v51 = vmax.f32 %v17765_v24, %v1607_v13  ;;  %v1078_v21 = vmax.f32 %v1010_v55, 0.0  ;;  %v1608_v43 = vmax.f32 %v1444_v59, 0.0 }
 0x144   :  { %v17982_v32 = vmax.f32 %v566_v12, %v1080_v14  ;;  %v17985_v37 = vmax.f32 %v17768_v29, %v1610_v60  ;;  %v569_v28 = vmax.f32 %v517_v50, 0.0  ;;  %v567_v47 = vmax.f32 %v509_v6, 0.0 }
 0x145   :  { %v17987_v22 = vmax.f32 %v564_v49, %v1078_v21  ;;  %v17990_v19 = vmax.f32 %v17771_v31, %v1608_v43  ;;  %v14738_v53 = vpop.f32.mrb[52].mxu1  ;;  %v14758_v2 = vpop.f32.mrb[52].mxu0  ;;  %v570_v12 = vmax.f32 %v520_v42, 0.0  ;;  %v568_v13 = vmax.f32 %v512_v62, 0.0 }
 0x146   :  { %v1031_v33 = vadd.f32 %v17923_v25, %v14738_v53  ;;  %v1465_v24 = vadd.f32 %v17923_v25, %v14758_v2  ;;  %v1022_v10 = vpop.f32.mrb[53].mxu1  ;;  %v1456_v45 = vpop.f32.mrb[53].mxu0 }
 0x147   :  { %v1023_v29 = vadd.f32 %v17923_v25, %v1022_v10  ;;  %v1457_v50 = vadd.f32 %v17923_v25, %v1456_v45  ;;  %v14739_v49 = vpop.f32.mrb[54].mxu1  ;;  %v14759_v55 = vpop.f32.mrb[54].mxu0 }
 0x148   :  { %v1083_v59 = vmax.f32 %v1031_v33, 0.0  ;;  %v1613_v31 = vmax.f32 %v1465_v24, 0.0  ;;  %v1034_v56 = vadd.f32 %v17923_v25, %v14739_v49  ;;  %v1468_v6 = vadd.f32 %v17923_v25, %v14759_v55  ;;  %v1025_v14 = vpop.f32.mrb[55].mxu1  ;;  %v1459_v60 = vpop.f32.mrb[55].mxu0 }
 0x149   :  { %v1081_v21 = vmax.f32 %v1023_v29, 0.0  ;;  %v1611_v43 = vmax.f32 %v1457_v50, 0.0  ;;  %v1026_v53 = vadd.f32 %v17923_v25, %v1025_v14  ;;  %v1460_v42 = vadd.f32 %v17923_v25, %v1459_v60 }
 0x14a   :  { %v18000_v62 = vmax.f32 %v569_v28, %v1083_v59  ;;  %v18003_v2 = vmax.f32 %v17778_v63, %v1613_v31  ;;  %v1084_v10 = vmax.f32 %v1034_v56, 0.0  ;;  %v1614_v33 = vmax.f32 %v1468_v6, 0.0 }
 0x14b   :  { %v18005_v24 = vmax.f32 %v567_v47, %v1081_v21  ;;  %v18008_v45 = vmax.f32 %v17781_v4, %v1611_v43  ;;  %v1082_v49 = vmax.f32 %v1026_v53, 0.0  ;;  %v1612_v55 = vmax.f32 %v1460_v42, 0.0 }
 0x14c   :  { %v18010_v29 = vmax.f32 %v570_v12, %v1084_v10  ;;  %v18013_v50 = vmax.f32 %v17784_v9, %v1614_v33 }
 0x14d   :  { %v18015_v14 = vmax.f32 %v568_v13, %v1082_v49  ;;  %v18018_v28 = vmax.f32 %v17787_v11, %v1612_v55  ;;  %v14762_v63 = vpop.f32.mrb[56].mxu0  ;;  %v14798_v59 = vpop.f32.mrb[56].mxu1 }
 0x14e   :  { %v1481_v47 = vadd.f32 %v17923_v25, %v14762_v63  ;;  %v1979_v31 = vadd.f32 %v17923_v25, %v14798_v59  ;;  %v1472_v4 = vpop.f32.mrb[57].mxu0  ;;  %v1970_v56 = vpop.f32.mrb[57].mxu1 }
 0x14f   :  { %v1473_v6 = vadd.f32 %v17923_v25, %v1472_v4  ;;  %v1971_v12 = vadd.f32 %v17923_v25, %v1970_v56  ;;  %v14763_v60 = vpop.f32.mrb[58].mxu0  ;;  %v14799_v9 = vpop.f32.mrb[58].mxu1 }
 0x150   :  { %v1617_v21 = vmax.f32 %v1481_v47, 0.0  ;;  %v2163_v13 = vmax.f32 %v1979_v31, 0.0  ;;  %v1484_v43 = vadd.f32 %v17923_v25, %v14763_v60  ;;  %v1982_v11 = vadd.f32 %v17923_v25, %v14799_v9  ;;  %v1475_v53 = vpop.f32.mrb[59].mxu0  ;;  %v1973_v42 = vpop.f32.mrb[59].mxu1 }
 0x151   :  { %v1615_v10 = vmax.f32 %v1473_v6, 0.0  ;;  %v2161_v33 = vmax.f32 %v1971_v12, 0.0  ;;  %v1476_v49 = vadd.f32 %v17923_v25, %v1475_v53  ;;  %v1974_v55 = vadd.f32 %v17923_v25, %v1973_v42 }
 0x152   :  { %v18029_v63 = vmax.f32 %v17797_v41, %v1617_v21  ;;  %v18032_v59 = vmax.f32 %v17884_v18, %v2163_v13  ;;  %v1618_v47 = vmax.f32 %v1484_v43, 0.0  ;;  %v2164_v31 = vmax.f32 %v1982_v11, 0.0 }
 0x153   :  { %v18035_v4 = vmax.f32 %v17800_v48, %v1615_v10  ;;  %v18038_v56 = vmax.f32 %v17889_v57, %v2161_v33  ;;  %v1616_v6 = vmax.f32 %v1476_v49, 0.0  ;;  %v2162_v12 = vmax.f32 %v1974_v55, 0.0 }
 0x154   :  { %2259 = vst [vmem:[#allocation2 + $0x10] sm:$0xff] %v18032_v59  ;;  %v18042_v60 = vmax.f32 %v17803_v54, %v1618_v47  ;;  %v2212_v41 = vmax.f32 %v17899_v17, %v2164_v31 }
 0x155   :  { %2257 = vst [vmem:[#allocation2] sm:$0xff] %v18038_v56  ;;  %v18047_v18 = vmax.f32 %v17806_v61, %v1616_v6  ;;  %v2210_v48 = vmax.f32 %v17909_v35, %v2162_v12  ;;  %v14766_v9 = vpop.f32.mrb[60].mxu0  ;;  %v14802_v21 = vpop.f32.mrb[60].mxu1 }
 0x156   :  { %2260 = vst [vmem:[#allocation2 + $0x18] sm:$0xff] %v2212_v41  ;;  %v1497_v13 = vadd.f32 %v17923_v25, %v14766_v9  ;;  %v1995_v54 = vadd.f32 %v17923_v25, %v14802_v21  ;;  %v1488_v43 = vpop.f32.mrb[61].mxu0  ;;  %v1986_v11 = vpop.f32.mrb[61].mxu1 }
 0x157   :  { %2258 = vst [vmem:[#allocation2 + $0x8] sm:$0xff] %v2210_v48  ;;  %v1489_v17 = vadd.f32 %v17923_v25, %v1488_v43  ;;  %v1987_v61 = vadd.f32 %v17923_v25, %v1986_v11  ;;  %v14767_v53 = vpop.f32.mrb[62].mxu0  ;;  %v14803_v42 = vpop.f32.mrb[62].mxu1 }
 0x158   :  { %v1621_v35 = vmax.f32 %v1497_v13, 0.0  ;;  %v2167_v10 = vmax.f32 %v1995_v54, 0.0  ;;  %v1500_v33 = vadd.f32 %v17923_v25, %v14767_v53  ;;  %v1998_v49 = vadd.f32 %v17923_v25, %v14803_v42  ;;  %v1491_v55 = vpop.f32.mrb[63].mxu0  ;;  %v1989_v47 = vpop.f32.mrb[63].mxu1 }
 0x159   :  { %v1619_v31 = vmax.f32 %v1489_v17, 0.0  ;;  %v2165_v6 = vmax.f32 %v1987_v61, 0.0  ;;  %v1492_v12 = vadd.f32 %v17923_v25, %v1491_v55  ;;  %v1990_v41 = vadd.f32 %v17923_v25, %v1989_v47 }
 0x15a   :  { %v18061_v48 = vmax.f32 %v17813_v27, %v1621_v35  ;;  %v18064_v9 = vmax.f32 %v17934_v0, %v2167_v10  ;;  %v1622_v21 = vmax.f32 %v1500_v33, 0.0  ;;  %v2168_v13 = vmax.f32 %v1998_v49, 0.0 }
 0x15b   :  { %v18067_v54 = vmax.f32 %v17816_v15, %v1619_v31  ;;  %v18070_v43 = vmax.f32 %v17939_v7, %v2165_v6  ;;  %v1620_v11 = vmax.f32 %v1492_v12, 0.0  ;;  %v2166_v17 = vmax.f32 %v1990_v41, 0.0 }
 0x15c   :  { %2263 = vst [vmem:[#allocation2 + $0x30] sm:$0xff] %v18064_v9  ;;  %v18074_v61 = vmax.f32 %v17819_v39, %v1622_v21  ;;  %v2216_v27 = vmax.f32 %v17946_v20, %v2168_v13 }
 0x15d   :  { %2261 = vst [vmem:[#allocation2 + $0x20] sm:$0xff] %v18070_v43  ;;  %v18079_v0 = vmax.f32 %v17822_v46, %v1620_v11  ;;  %v2214_v15 = vmax.f32 %v17952_v23, %v2166_v17  ;;  %v14770_v53 = vpop.f32.mrb[64].mxu0  ;;  %v14806_v42 = vpop.f32.mrb[64].mxu1  ;;  %v2346_v7 = vld [vmem:[#allocation2 + $0x11] sm:$0xff] }
 0x15e   :  { %2264 = vst [vmem:[#allocation2 + $0x38] sm:$0xff] %v2216_v27  ;;  %v1513_v10 = vadd.f32 %v17923_v25, %v14770_v53  ;;  %v2011_v39 = vadd.f32 %v17923_v25, %v14806_v42  ;;  %v1504_v33 = vpop.f32.mrb[65].mxu0  ;;  %v2002_v20 = vpop.f32.mrb[65].mxu1  ;;  %v2345_v49 = vld [vmem:[#allocation2 + $0x1] sm:$0xff] }
 0x15f   :  { %2262 = vst [vmem:[#allocation2 + $0x28] sm:$0xff] %v2214_v15  ;;  %v1505_v46 = vadd.f32 %v17923_v25, %v1504_v33  ;;  %v2003_v55 = vadd.f32 %v17923_v25, %v2002_v20  ;;  %v14771_v23 = vpop.f32.mrb[66].mxu0  ;;  %v14807_v47 = vpop.f32.mrb[66].mxu1  ;;  %v2361_v31 = vpack.c.bf16 %v2346_v7, %v2345_v49 }
 0x160   :  { %v1625_v6 = vmax.f32 %v1513_v10, 0.0  ;;  %v2171_v12 = vmax.f32 %v2011_v39, 0.0  ;;  %v1516_v41 = vadd.f32 %v17923_v25, %v14771_v23  ;;  %v2014_v21 = vadd.f32 %v17923_v25, %v14807_v47  ;;  %v1507_v13 = vpop.f32.mrb[67].mxu0  ;;  %v2005_v11 = vpop.f32.mrb[67].mxu1  ;;  %v21546_v23 = vld [vmem:[#allocation7_spill] sm:$0xff] }
 0x161   :  { %v1623_v17 = vmax.f32 %v1505_v46, 0.0  ;;  %v2169_v27 = vmax.f32 %v2003_v55, 0.0  ;;  %v1508_v53 = vadd.f32 %v17923_v25, %v1507_v13  ;;  %v2006_v15 = vadd.f32 %v17923_v25, %v2005_v11  ;;  %14860 = vmatprep.mubr.bf16.mxu0 %v2361_v31 }
 0x162   :  { %v18093_v42 = vmax.f32 %v17829_v26, %v1625_v6  ;;  %v18096_v7 = vmax.f32 %v17975_v36, %v2171_v12  ;;  %v1626_v10 = vmax.f32 %v1516_v41, 0.0  ;;  %v2172_v39 = vmax.f32 %v2014_v21, 0.0 }
 0x163   :  { %v18099_v33 = vmax.f32 %v17832_v30, %v1623_v17  ;;  %v18102_v20 = vmax.f32 %v17980_v51, %v2169_v27  ;;  %v1624_v49 = vmax.f32 %v1508_v53, 0.0  ;;  %v2170_v46 = vmax.f32 %v2006_v15, 0.0  ;;  %v18104_v55 = vld [vmem:[#allocation2 + $0x30] sm:$0xff] }
 0x164   :  { %21545 = vst [vmem:[#allocation12_spill] sm:$0xff] %v18104_v55  ;;  %2267 = vst [vmem:[#allocation2 + $0x50] sm:$0xff] %v18096_v7  ;;  %v18108_v26 = vmax.f32 %v21546_v23, %v1626_v10  ;;  %v2220_v36 = vmax.f32 %v17985_v37, %v2172_v39  ;;  %v18111_v47 = vld [vmem:[#allocation2 + $0x20] sm:$0xff]  ;;  %v21548_v30 = vld [vmem:[#allocation8_spill] sm:$0xff] }
 0x165   :  { %21547 = vst [vmem:[#allocation7_spill] sm:$0xff] %v18111_v47  ;;  %2265 = vst [vmem:[#allocation2 + $0x40] sm:$0xff] %v18102_v20  ;;  %v18115_v31 = vmax.f32 %v21548_v30, %v1624_v49  ;;  %v2218_v51 = vmax.f32 %v17990_v19, %v2170_v46  ;;  %v14774_v6 = vpop.f32.mrb[68].mxu0  ;;  %v14810_v12 = vpop.f32.mrb[68].mxu1  ;;  %v2348_v41 = vld [vmem:[#allocation2 + $0x31] sm:$0xff]  ;;  %v16141_v46 = vld [vmem:[%s21475_s3 + $0x8] sm:$0xff]  }
 0x166   :  { %2268 = vst [vmem:[#allocation2 + $0x58] sm:$0xff] %v2220_v36  ;;  %v1529_v13 = vadd.f32 %v17923_v25, %v14774_v6  ;;  %v2027_v37 = vadd.f32 %v17923_v25, %v14810_v12  ;;  %v1520_v11 = vpop.f32.mrb[69].mxu0  ;;  %v2018_v17 = vpop.f32.mrb[69].mxu1  ;;  %v2347_v27 = vld [vmem:[#allocation2 + $0x21] sm:$0xff] }
 0x167   :  { %2266 = vst [vmem:[#allocation2 + $0x48] sm:$0xff] %v2218_v51  ;;  %v1521_v19 = vadd.f32 %v17923_v25, %v1520_v11  ;;  %v2019_v15 = vadd.f32 %v17923_v25, %v2018_v17  ;;  %v14775_v10 = vpop.f32.mrb[70].mxu0  ;;  %v14811_v39 = vpop.f32.mrb[70].mxu1  ;;  %v2362_v49 = vpack.c.bf16 %v2348_v41, %v2347_v27 }
 0x168   :  { %v1629_v23 = vmax.f32 %v1529_v13, 0.0  ;;  %v2175_v36 = vmax.f32 %v2027_v37, 0.0  ;;  %v1532_v30 = vadd.f32 %v17923_v25, %v14775_v10  ;;  %v2030_v6 = vadd.f32 %v17923_v25, %v14811_v39  ;;  %v1523_v12 = vpop.f32.mrb[71].mxu0  ;;  %v2021_v53 = vpop.f32.mrb[71].mxu1  ;;  %v17137_v10 = vld [vmem:[%s21475_s3] sm:$0xff]  }
 0x169   :  { %v1627_v51 = vmax.f32 %v1521_v19, 0.0  ;;  %v2173_v21 = vmax.f32 %v2019_v15, 0.0  ;;  %v1524_v11 = vadd.f32 %v17923_v25, %v1523_v12  ;;  %v2022_v17 = vadd.f32 %v17923_v25, %v2021_v53  ;;  %14861 = vmatmul.mubr.bf16.vlgmr.msra.gmra.mrb[88].mxu0 %v2362_v49  ;;  %v21549_v19 = vld [vmem:[#allocation9_spill] sm:$0xff] }
 0x16a   :  { %v18134_v41 = vmax.f32 %v17849_v58, %v1629_v23  ;;  %v18137_v27 = vmax.f32 %v18003_v2, %v2175_v36  ;;  %v1630_v13 = vmax.f32 %v1532_v30, 0.0  ;;  %v2176_v37 = vmax.f32 %v2030_v6, 0.0  ;;  %14877 = vmatpush3.bf16.msra.mxu0 %v17137_v10  ;;  %v16142_v58 = vld [vmem:[%s21475_s3 + $0x10] sm:$0xff]   ;;  %v18151_v2 = vld [vmem:[#allocation2 + $0x22] sm:$0xff]  ;;  %v21551_v23 = vld [vmem:[#allocation10_spill] sm:$0xff] }
 0x16b   :  { %v18143_v15 = vmax.f32 %v21549_v19, %v1627_v51  ;;  %v18146_v39 = vmax.f32 %v18008_v45, %v2173_v21  ;;  %v1628_v53 = vmax.f32 %v1524_v11, 0.0  ;;  %v2174_v49 = vmax.f32 %v2022_v17, 0.0  ;;  %14878 = vmatprep.subr.bf16.mxu0 %v16141_v46  ;;  %21550 = vst [vmem:[#allocation8_spill] sm:$0xff] %v18151_v2  ;;  %v21552_v45 = vld [vmem:[#allocation11_spill] sm:$0xff]  ;;  %v18165_v10 = vld [vmem:[#allocation2 + $0x12] sm:$0xff] }
 0x16c   :  { %2271 = vst [vmem:[#allocation2 + $0x70] sm:$0xff] %v18137_v27  ;;  %v18155_v36 = vmax.f32 %v21551_v23, %v1630_v13  ;;  %v2224_v30 = vmax.f32 %v18013_v50, %v2176_v37 }
 0x16d   :  { %2269 = vst [vmem:[#allocation2 + $0x60] sm:$0xff] %v18146_v39  ;;  %v18160_v21 = vmax.f32 %v21552_v45, %v1628_v53  ;;  %v2222_v6 = vmax.f32 %v18018_v28, %v2174_v49  ;;  %v14778_v12 = vpop.f32.mrb[72].mxu0  ;;  %v14814_v51 = vpop.f32.mrb[72].mxu1  ;;  %v2350_v11 = vld [vmem:[#allocation2 + $0x51] sm:$0xff] }
 0x16e   :  { %2272 = vst [vmem:[#allocation2 + $0x78] sm:$0xff] %v2224_v30  ;;  %v1545_v13 = vadd.f32 %v17923_v25, %v14778_v12  ;;  %v2043_v50 = vadd.f32 %v17923_v25, %v14814_v51  ;;  %v1536_v37 = vpop.f32.mrb[73].mxu0  ;;  %v2034_v19 = vpop.f32.mrb[73].mxu1  ;;  %v2349_v23 = vld [vmem:[#allocation2 + $0x41] sm:$0xff]  ;;  %14879 = vmatpush3.bf16.msra.mxu0 %v16141_v46  ;;  %v16143_v30 = vld [vmem:[%s21475_s3 + $0x18] sm:$0xff]  }
 0x16f   :  { %2270 = vst [vmem:[#allocation2 + $0x68] sm:$0xff] %v2222_v6  ;;  %v1537_v53 = vadd.f32 %v17923_v25, %v1536_v37  ;;  %v2035_v49 = vadd.f32 %v17923_v25, %v2034_v19  ;;  %v14779_v45 = vpop.f32.mrb[74].mxu0  ;;  %v14815_v17 = vpop.f32.mrb[74].mxu1  ;;  %v2363_v35 = vpack.c.bf16 %v2350_v11, %v2349_v23  ;;  %14880 = vmatprep.subr.bf16.mxu0 %v16142_v58 }
 0x170   :  { %v1633_v12 = vmax.f32 %v1545_v13, 0.0  ;;  %v2179_v51 = vmax.f32 %v2043_v50, 0.0  ;;  %v1548_v46 = vadd.f32 %v17923_v25, %v14779_v45  ;;  %v2046_v57 = vadd.f32 %v17923_v25, %v14815_v17  ;;  %v1539_v28 = vpop.f32.mrb[75].mxu0  ;;  %v2037_v6 = vpop.f32.mrb[75].mxu1 }
 0x171   :  { %v1631_v47 = vmax.f32 %v1537_v53, 0.0  ;;  %v2177_v37 = vmax.f32 %v2035_v49, 0.0  ;;  %v1540_v19 = vadd.f32 %v17923_v25, %v1539_v28  ;;  %v2038_v55 = vadd.f32 %v17923_v25, %v2037_v6  ;;  %14864 = vmatprep.mubr.bf16.mxu0 %v2363_v35  ;;  %v16144_v35 = vld [vmem:[%s21475_s3 + $0x20] sm:$0xff]  }
 0x172   :  { %v18181_v11 = vmax.f32 %v17881_v1, %v1633_v12  ;;  %v2227_v23 = vmax.f32 %v18029_v63, %v2179_v51  ;;  %v1634_v13 = vmax.f32 %v1548_v46, 0.0  ;;  %v2180_v50 = vmax.f32 %v2046_v57, 0.0  ;;  %14881 = vmatpush3.bf16.msra.mxu0 %v16142_v58  ;;  %v18191_v28 = vld [vmem:[#allocation2 + $0x42] sm:$0xff]  ;;  %v18203_v12 = vld [vmem:[#allocation2 + $0x32] sm:$0xff] }
 0x173   :  { %v18185_v45 = vmax.f32 %v17886_v8, %v1631_v47  ;;  %v2225_v17 = vmax.f32 %v18035_v4, %v2177_v37  ;;  %v1632_v53 = vmax.f32 %v1540_v19, 0.0  ;;  %v2178_v49 = vmax.f32 %v2038_v55, 0.0  ;;  %14882 = vmatprep.subr.bf16.mxu0 %v16143_v30  ;;  %v18193_v1 = vld [vmem:[#allocation2 + $0x23] sm:$0xff]  ;;  %v18205_v51 = vld [vmem:[#allocation2 + $0x13] sm:$0xff] }
 0x174   :  { %21553 = vst [vmem:[#allocation9_spill] sm:$0xff] %v18193_v1  ;;  %2275 = vst [vmem:[#allocation2 + $0x90] sm:$0xff] %v2227_v23  ;;  %v18196_v63 = vmax.f32 %v17896_v52, %v1634_v13  ;;  %v2228_v8 = vmax.f32 %v18042_v60, %v2180_v50 }
 0x175   :  { %2273 = vst [vmem:[#allocation2 + $0x80] sm:$0xff] %v2225_v17  ;;  %v18200_v4 = vmax.f32 %v17906_v3, %v1632_v53  ;;  %v2226_v57 = vmax.f32 %v18047_v18, %v2178_v49  ;;  %v14782_v55 = vpop.f32.mrb[76].mxu0  ;;  %v14818_v47 = vpop.f32.mrb[76].mxu1  ;;  %v2352_v58 = vld [vmem:[#allocation2 + $0x71] sm:$0xff]  ;;  %21554 = vst [vmem:[#allocation10_spill] sm:$0xff] %v18205_v51  ;;  %v16145_v53 = vld [vmem:[%s21475_s3 + $0x28] sm:$0xff]  }
 0x176   :  { %2276 = vst [vmem:[#allocation2 + $0x98] sm:$0xff] %v2228_v8  ;;  %v1561_v46 = vadd.f32 %v17923_v25, %v14782_v55  ;;  %v2059_v52 = vadd.f32 %v17923_v25, %v14818_v47  ;;  %v1552_v6 = vpop.f32.mrb[77].mxu0  ;;  %v2050_v60 = vpop.f32.mrb[77].mxu1  ;;  %v2351_v37 = vld [vmem:[#allocation2 + $0x61] sm:$0xff]  ;;  %14883 = vmatpush3.bf16.msra.mxu0 %v16143_v30 }
 0x177   :  { %2274 = vst [vmem:[#allocation2 + $0x88] sm:$0xff] %v2226_v57  ;;  %v1553_v19 = vadd.f32 %v17923_v25, %v1552_v6  ;;  %v2051_v23 = vadd.f32 %v17923_v25, %v2050_v60  ;;  %v14783_v13 = vpop.f32.mrb[78].mxu0  ;;  %v14819_v50 = vpop.f32.mrb[78].mxu1  ;;  %v2364_v17 = vpack.c.bf16 %v2352_v58, %v2351_v37  ;;  %14884 = vmatprep.subr.bf16.mxu0 %v16144_v35 }
 0x178   :  { %v1637_v30 = vmax.f32 %v1561_v46, 0.0  ;;  %v2183_v49 = vmax.f32 %v2059_v52, 0.0  ;;  %v1564_v8 = vadd.f32 %v17923_v25, %v14783_v13  ;;  %v2062_v55 = vadd.f32 %v17923_v25, %v14819_v50  ;;  %v1555_v47 = vpop.f32.mrb[79].mxu0  ;;  %v2053_v57 = vpop.f32.mrb[79].mxu1 }
 0x179   :  { %v1635_v18 = vmax.f32 %v1553_v19, 0.0  ;;  %v2181_v6 = vmax.f32 %v2051_v23, 0.0  ;;  %v1556_v60 = vadd.f32 %v17923_v25, %v1555_v47  ;;  %v2054_v3 = vadd.f32 %v17923_v25, %v2053_v57  ;;  %14865 = vmatmul.mubr.bf16.gmra.mrb[92].mxu0 %v2364_v17  ;;  %v16146_v17 = vld [vmem:[%s21475_s3 + $0x30] sm:$0xff]   ;;  %v18233_v47 = vld [vmem:[#allocation2 + $0x62] sm:$0xff] }
 0x17a   :  { %v18223_v58 = vmax.f32 %v17931_v38, %v1637_v30  ;;  %v2231_v37 = vmax.f32 %v18061_v48, %v2183_v49  ;;  %v1638_v46 = vmax.f32 %v1564_v8, 0.0  ;;  %v2184_v52 = vmax.f32 %v2062_v55, 0.0  ;;  %14885 = vmatpush3.bf16.msra.mxu0 %v16144_v35  ;;  %v18235_v38 = vld [vmem:[#allocation2 + $0x43] sm:$0xff]  ;;  %v18245_v30 = vld [vmem:[#allocation2 + $0x52] sm:$0xff] }
 0x17b   :  { %v18227_v13 = vmax.f32 %v17936_v44, %v1635_v18  ;;  %v2229_v50 = vmax.f32 %v18067_v54, %v2181_v6  ;;  %v1636_v19 = vmax.f32 %v1556_v60, 0.0  ;;  %v2182_v23 = vmax.f32 %v2054_v3, 0.0  ;;  %14886 = vmatprep.subr.bf16.mxu0 %v16145_v53  ;;  %21555 = vst [vmem:[#allocation11_spill] sm:$0xff] %v18235_v38  ;;  %v18247_v49 = vld [vmem:[#allocation2 + $0x33] sm:$0xff] }
 0x17c   :  { %2279 = vst [vmem:[#allocation2 + $0xb0] sm:$0xff] %v2231_v37  ;;  %v18238_v48 = vmax.f32 %v17943_v40, %v1638_v46  ;;  %v2232_v44 = vmax.f32 %v18074_v61, %v2184_v52  ;;  %21556 = vst [vmem:[#allocation13_spill] sm:$0xff] %v18247_v49  ;;  %v16147_v46 = vld [vmem:[%s21475_s3 + $0x38] sm:$0xff]  }
 0x17d   :  { %2277 = vst [vmem:[#allocation2 + $0xa0] sm:$0xff] %v2229_v50  ;;  %v18242_v54 = vmax.f32 %v17949_v34, %v1636_v19  ;;  %v2230_v35 = vmax.f32 %v18079_v0, %v2182_v23  ;;  %v14786_v3 = vpop.f32.mrb[80].mxu0  ;;  %v14822_v18 = vpop.f32.mrb[80].mxu1 }
 0x17e   :  { %2280 = vst [vmem:[#allocation2 + $0xb8] sm:$0xff] %v2232_v44  ;;  %v1577_v8 = vadd.f32 %v17923_v25, %v14786_v3  ;;  %v2075_v40 = vadd.f32 %v17923_v25, %v14822_v18  ;;  %v1568_v55 = vpop.f32.mrb[81].mxu0  ;;  %v2066_v57 = vpop.f32.mrb[81].mxu1  ;;  %14887 = vmatpush3.bf16.msra.mxu0 %v16145_v53 }
 0x17f   :  { %2278 = vst [vmem:[#allocation2 + $0xa8] sm:$0xff] %v2230_v35  ;;  %v1569_v0 = vadd.f32 %v17923_v25, %v1568_v55  ;;  %v2067_v6 = vadd.f32 %v17923_v25, %v2066_v57  ;;  %v14787_v60 = vpop.f32.mrb[82].mxu0  ;;  %v14823_v37 = vpop.f32.mrb[82].mxu1  ;;  %14888 = vmatprep.subr.bf16.mxu0 %v16146_v17  ;;  %v18264_v57 = vld [vmem:[#allocation2 + $0x63] sm:$0xff] }
 0x180   :  { %v1641_v52 = vmax.f32 %v1577_v8, 0.0  ;;  %v2187_v53 = vmax.f32 %v2075_v40, 0.0  ;;  %v1580_v50 = vadd.f32 %v17923_v25, %v14787_v60  ;;  %v2078_v19 = vadd.f32 %v17923_v25, %v14823_v37  ;;  %v1571_v23 = vpop.f32.mrb[83].mxu0  ;;  %v2069_v44 = vpop.f32.mrb[83].mxu1  ;;  %21557 = vst [vmem:[#allocation14_spill] sm:$0xff] %v18264_v57 }
 0x181   :  { %v1639_v35 = vmax.f32 %v1569_v0, 0.0  ;;  %v2185_v3 = vmax.f32 %v2067_v6, 0.0  ;;  %v1572_v18 = vadd.f32 %v17923_v25, %v1571_v23  ;;  %v2070_v55 = vadd.f32 %v17923_v25, %v2069_v44  ;;  %v18275_v0 = vld [vmem:[%s21475_s3 + $0x80] sm:$0xff]   ;;  %v18300_v23 = vld [vmem:[#allocation2 + $0x50] sm:$0xff] }
 0x182   :  { %v18267_v61 = vmax.f32 %v17972_v16, %v1641_v52  ;;  %v18270_v8 = vmax.f32 %v18093_v42, %v2187_v53  ;;  %v1642_v40 = vmax.f32 %v1580_v50, 0.0  ;;  %v2188_v60 = vmax.f32 %v2078_v19, 0.0  ;;  %14889 = vmatpush3.bf16.msra.mxu0 %v16146_v17  ;;  %v18277_v6 = vld [vmem:[#allocation2 + $0x24] sm:$0xff]  ;;  %v18285_v42 = vld [vmem:[#allocation2 + $0x53] sm:$0xff]  ;;  %21563 = vst [vmem:[#allocation20_spill] sm:$0xff] %v18300_v23 }
 0x183   :  { %21558 = vst [vmem:[#allocation15_spill] sm:$0xff] %v18277_v6  ;;  %v18280_v25 = vmax.f32 %v17977_v5, %v1639_v35  ;;  %v18283_v37 = vmax.f32 %v18099_v33, %v2185_v3  ;;  %v1640_v16 = vmax.f32 %v1572_v18, 0.0  ;;  %v2186_v52 = vmax.f32 %v2070_v55, 0.0  ;;  %14890 = vmatprep.subr.bf16.mxu0 %v16147_v46  ;;  %v18287_v53 = vld [vmem:[#allocation2 + $0x44] sm:$0xff]  ;;  %v18296_v19 = vld [vmem:[#allocation2 + $0x14] sm:$0xff] }
 0x184   :  { %21559 = vst [vmem:[#allocation16_spill] sm:$0xff] %v18287_v53  ;;  %v18289_v17 = vld [vmem:[#allocation2 + $0x64] sm:$0xff]  ;;  %2283 = vst [vmem:[#allocation2 + $0xd0] sm:$0xff] %v18270_v8  ;;  %v18293_v50 = vmax.f32 %v17982_v32, %v1642_v40  ;;  %v2236_v5 = vmax.f32 %v18108_v26, %v2188_v60  ;;  %v18311_v55 = vld [vmem:[#allocation2 + $0x34] sm:$0xff] }
 0x185   :  { %21560 = vst [vmem:[#allocation17_spill] sm:$0xff] %v18289_v17  ;;  %21561 = vst [vmem:[#allocation18_spill] sm:$0xff] %v18296_v19  ;;  %v18298_v33 = vld [vmem:[#allocation2 + $0x40] sm:$0xff]  ;;  %v18306_v35 = vmax.f32 %v17987_v22, %v1640_v16  ;;  %v2234_v3 = vmax.f32 %v18115_v31, %v2186_v52  ;;  %v14790_v32 = vpop.f32.mrb[84].mxu0  ;;  %v14826_v18 = vpop.f32.mrb[84].mxu1  ;;  %v18313_v40 = vld [vmem:[#allocation2 + $0x54] sm:$0xff] }
 0x186   :  { %21562 = vst [vmem:[#allocation19_spill] sm:$0xff] %v18298_v33  ;;  %2281 = vst [vmem:[#allocation2 + $0xc0] sm:$0xff] %v18283_v37  ;;  %v18320_v22 = vld [vmem:[%s21474_s2] ss:$0 sm:$0xff]  ;;  %v1584_v52 = vpop.f32.mrb[85].mxu0  ;;  %v2082_v44 = vpop.f32.mrb[85].mxu1  ;;  %14891 = vmatpush3.bf16.msra.mxu0 %v16147_v46 }
 0x187   :  { %21564 = vst [vmem:[#allocation21_spill] sm:$0xff] %v18311_v55  ;;  %21565 = vst [vmem:[#allocation22_spill] sm:$0xff] %v18313_v40  ;;  %v1593_v31 = vadd.f32 %v18320_v22, %v14790_v32  ;;  %v2091_v16 = vadd.f32 %v18320_v22, %v14826_v18  ;;  %v2083_v60 = vadd.f32 %v18320_v22, %v2082_v44  ;;  %v14791_v19 = vpop.f32.mrb[86].mxu0  ;;  %v14827_v6 = vpop.f32.mrb[86].mxu1  ;;  %14908 = vmatprep.subr.bf16.mxu0 %v18275_v0  ;;  %v18337_v17 = vld [vmem:[#allocation2 + $0x60] sm:$0xff]  ;;  %v18339_v53 = vld [vmem:[#allocation2 + $0x70] sm:$0xff] }
 0x188   :  { %2284 = vst [vmem:[#allocation2 + $0xd8] sm:$0xff] %v2236_v5  ;;  %2282 = vst [vmem:[#allocation2 + $0xc8] sm:$0xff] %v2234_v3  ;;  %v1585_v5 = vadd.f32 %v18320_v22, %v1584_v52  ;;  %v1596_v57 = vadd.f32 %v18320_v22, %v14791_v19  ;;  %v2094_v34 = vadd.f32 %v18320_v22, %v14827_v6  ;;  %v1587_v55 = vpop.f32.mrb[87].mxu0  ;;  %v2085_v26 = vpop.f32.mrb[87].mxu1 }
 0x189   :  { %v1645_v18 = vmax.f32 %v1593_v31, 0.0  ;;  %v2191_v46 = vmax.f32 %v2091_v16, 0.0  ;;  %v2189_v40 = vmax.f32 %v2083_v60, 0.0  ;;  %v1588_v52 = vadd.f32 %v18320_v22, %v1587_v55  ;;  %21566 = vst [vmem:[#allocation23_spill] sm:$0xff] %v18337_v17  ;;  %21567 = vst [vmem:[#allocation24_spill] sm:$0xff] %v18339_v53  ;;  %v18347_v16 = vld [vmem:[#allocation2 + $0x21] sm:$0xff] }
 0x18a   :  { %v1643_v3 = vmax.f32 %v1585_v5, 0.0  ;;  %v2086_v44 = vadd.f32 %v18320_v22, %v2085_v26  ;;  %v1646_v19 = vmax.f32 %v1596_v57, 0.0  ;;  %v2192_v6 = vmax.f32 %v2094_v34, 0.0  ;;  %21568 = vst [vmem:[#allocation25_spill] sm:$0xff] %v18347_v16  ;;  %v18349_v5 = vld [vmem:[#allocation2 + $0x31] sm:$0xff]  ;;  %v18351_v60 = vld [vmem:[#allocation2 + $0x41] sm:$0xff] }
 0x18b   :  { %v18342_v32 = vmax.f32 %v18000_v62, %v1645_v18  ;;  %v18345_v31 = vmax.f32 %v18134_v41, %v2191_v46  ;;  %21569 = vst [vmem:[#allocation26_spill] sm:$0xff] %v18349_v5  ;;  %21570 = vst [vmem:[#allocation27_spill] sm:$0xff] %v18351_v60  ;;  %v18357_v55 = vmax.f32 %v18143_v15, %v2189_v40  ;;  %v1644_v33 = vmax.f32 %v1588_v52, 0.0  ;;  %v18359_v18 = vld [vmem:[#allocation2 + $0x51] sm:$0xff]  ;;  %v18361_v41 = vld [vmem:[#allocation2 + $0x61] sm:$0xff] }
 0x18c   :  { %v18354_v26 = vmax.f32 %v18005_v24, %v1643_v3  ;;  %v2190_v62 = vmax.f32 %v2086_v44, 0.0  ;;  %21571 = vst [vmem:[#allocation28_spill] sm:$0xff] %v18359_v18  ;;  %21572 = vst [vmem:[#allocation29_spill] sm:$0xff] %v18361_v41  ;;  %v18363_v57 = vld [vmem:[#allocation2 + $0x71] sm:$0xff]  ;;  %v18367_v34 = vmax.f32 %v18010_v29, %v1646_v19  ;;  %v2240_v46 = vmax.f32 %v18155_v36, %v2192_v6 }
 0x18d   :  { %21573 = vst [vmem:[#allocation30_spill] sm:$0xff] %v18363_v57  ;;  %2287 = vst [vmem:[#allocation2 + $0xf0] sm:$0xff] %v18345_v31  ;;  %v18374_v15 = vmax.f32 %v18015_v14, %v1644_v33  ;;  %v14830_v3 = vpop.f32.mrb[88].mxu1 }
 0x18e   :  { %2285 = vst [vmem:[#allocation2 + $0xe0] sm:$0xff] %v18357_v55  ;;  %v2238_v40 = vmax.f32 %v18160_v21, %v2190_v62  ;;  %2288 = vst [vmem:[#allocation2 + $0xf8] sm:$0xff] %v2240_v46  ;;  %v2107_v29 = vadd.f32 %v18320_v22, %v14830_v3  ;;  %v2098_v36 = vpop.f32.mrb[89].mxu1 }
 0x18f   :  { %v18377_v52 = vld [vmem:[#allocation2 + $0xd1] sm:$0xff]  ;;  %v2353_v19 = vld [vmem:[#allocation2 + $0xc1] sm:$0xff]  ;;  %v2099_v33 = vadd.f32 %v18320_v22, %v2098_v36  ;;  %v14831_v62 = vpop.f32.mrb[90].mxu1 }
 0x190   :  { %2286 = vst [vmem:[#allocation2 + $0xe8] sm:$0xff] %v2238_v40  ;;  %v2365_v24 = vpack.c.bf16 %v18377_v52, %v2353_v19  ;;  %v2195_v46 = vmax.f32 %v2107_v29, 0.0  ;;  %v2110_v3 = vadd.f32 %v18320_v22, %v14831_v62  ;;  %v2101_v44 = vpop.f32.mrb[91].mxu1  ;;  %v18428_v41 = vld [vmem:[#allocation2 + $0xd4] sm:$0xff] }
 0x191   :  { %v2193_v17 = vmax.f32 %v2099_v33, 0.0  ;;  %v2102_v53 = vadd.f32 %v18320_v22, %v2101_v44  ;;  %21575 = vst [vmem:[#allocation32_spill] sm:$0xff] %v18428_v41 }
 0x192   :  { %14868 = vmatprep.mubr.bf16.mxu0 %v2365_v24  ;;  %v18393_v6 = vmax.f32 %v18181_v11, %v2195_v46  ;;  %v2196_v14 = vmax.f32 %v2110_v3, 0.0  ;;  %v18423_v24 = vld [vmem:[#allocation2 + $0xd3] sm:$0xff] }
 0x193   :  { %v18396_v21 = vmax.f32 %v18185_v45, %v2193_v17  ;;  %v2194_v40 = vmax.f32 %v2102_v53, 0.0 }
 0x194   :  { %2291 = vst [vmem:[#allocation2 + $0x110] sm:$0xff] %v18393_v6  ;;  %v2244_v36 = vmax.f32 %v18196_v63, %v2196_v14 }
 0x195   :  { %2289 = vst [vmem:[#allocation2 + $0x100] sm:$0xff] %v18396_v21  ;;  %v2242_v29 = vmax.f32 %v18200_v4, %v2194_v40  ;;  %v14834_v19 = vpop.f32.mrb[92].mxu1  ;;  %v18402_v33 = vld [vmem:[#allocation2 + $0xf1] sm:$0xff] }
 0x196   :  { %2292 = vst [vmem:[#allocation2 + $0x118] sm:$0xff] %v2244_v36  ;;  %v2123_v45 = vadd.f32 %v18320_v22, %v14834_v19  ;;  %v2114_v53 = vpop.f32.mrb[93].mxu1  ;;  %v18421_v19 = vld [vmem:[#allocation2 + $0xd2] sm:$0xff] }
 0x197   :  { %v18409_v17 = vld [vmem:[#allocation2 + $0xe1] sm:$0xff]  ;;  %2290 = vst [vmem:[#allocation2 + $0x108] sm:$0xff] %v2242_v29  ;;  %v2115_v4 = vadd.f32 %v18320_v22, %v2114_v53  ;;  %v14835_v14 = vpop.f32.mrb[94].mxu1  ;;  %v18471_v23 = vld [vmem:[#allocation2 + $0xf2] sm:$0xff] }
 0x198   :  { %v18411_v63 = vld [vmem:[#allocation2 + $0xe2] sm:$0xff]  ;;  %v2366_v62 = vpack.c.bf16 %v18402_v33, %v18409_v17  ;;  %v2199_v3 = vmax.f32 %v2123_v45, 0.0  ;;  %v2126_v40 = vadd.f32 %v18320_v22, %v14835_v14  ;;  %v2117_v36 = vpop.f32.mrb[95].mxu1  ;;  %v18473_v41 = vld [vmem:[#allocation2 + $0xf3] sm:$0xff] }
 0x199   :  { %v18413_v44 = vld [vmem:[#allocation2 + $0xe3] sm:$0xff]  ;;  %v2197_v29 = vmax.f32 %v2115_v4, 0.0  ;;  %v2118_v53 = vadd.f32 %v18320_v22, %v2117_v36 }
 0x19a   :  { %v18418_v46 = vld [vmem:[#allocation2 + $0xe4] sm:$0xff]  ;;  %14869 = vmatmul.mubr.bf16.gmra.mrb[96].mxu0 %v2366_v62  ;;  %v18435_v14 = vmax.f32 %v18223_v58, %v2199_v3  ;;  %v2200_v60 = vmax.f32 %v2126_v40, 0.0 }
 0x19b   :  { %21574 = vst [vmem:[#allocation31_spill] sm:$0xff] %v18418_v46  ;;  %v18440_v4 = vmax.f32 %v18227_v13, %v2197_v29  ;;  %v2198_v36 = vmax.f32 %v2118_v53, 0.0  ;;  %v18454_v29 = vld [vmem:[#allocation2 + $0xf0] sm:$0xff] }
 0x19c   :  { %2295 = vst [vmem:[#allocation2 + $0x130] sm:$0xff] %v18435_v14  ;;  %v2248_v62 = vmax.f32 %v18238_v48, %v2200_v60  ;;  %v18444_v11 = vld [vmem:[#allocation2 + $0x100] sm:$0xff]  ;;  %21577 = vst [vmem:[#allocation34_spill] sm:$0xff] %v18454_v29  ;;  %v18478_v29 = vld [vmem:[#allocation2 + $0xf4] sm:$0xff] }
 0x19d   :  { %21576 = vst [vmem:[#allocation33_spill] sm:$0xff] %v18444_v11  ;;  %2293 = vst [vmem:[#allocation2 + $0x120] sm:$0xff] %v18440_v4  ;;  %v2246_v45 = vmax.f32 %v18242_v54, %v2198_v36  ;;  %v14838_v58 = vpop.f32.mrb[96].mxu1  ;;  %v18448_v3 = vld [vmem:[#allocation2 + $0x111] sm:$0xff] }
 0x19e   :  { %2296 = vst [vmem:[#allocation2 + $0x138] sm:$0xff] %v2248_v62  ;;  %v2139_v48 = vadd.f32 %v18320_v22, %v14838_v58  ;;  %v2130_v60 = vpop.f32.mrb[97].mxu1  ;;  %v18457_v53 = vld [vmem:[#allocation2 + $0x101] sm:$0xff]  ;;  %21579 = vst [vmem:[#allocation36_spill] sm:$0xff] %v18478_v29  ;;  %v18493_v38 = vld [vmem:[#allocation2 + $0x110] sm:$0xff] }
 0x19f   :  { %v18459_v18 = vld [vmem:[#allocation2 + $0x102] sm:$0xff]  ;;  %2294 = vst [vmem:[#allocation2 + $0x128] sm:$0xff] %v2246_v45  ;;  %v2131_v57 = vadd.f32 %v18320_v22, %v2130_v60  ;;  %v14839_v40 = vpop.f32.mrb[98].mxu1  ;;  %v2367_v13 = vpack.c.bf16 %v18448_v3, %v18457_v53  ;;  %21581 = vst [vmem:[#allocation38_spill] sm:$0xff] %v18493_v38  ;;  %v18547_v51 = vld [vmem:[#allocation2 + $0x111] sm:$0xff] }
 0x1a0   :  { %v18461_v54 = vld [vmem:[#allocation2 + $0x103] sm:$0xff]  ;;  %v2203_v58 = vmax.f32 %v2139_v48, 0.0  ;;  %v2142_v16 = vadd.f32 %v18320_v22, %v14839_v40  ;;  %v2133_v5 = vpop.f32.mrb[99].mxu1  ;;  %21589 = vst [vmem:[#allocation45_spill] sm:$0xff] %v18547_v51 }
 0x1a1   :  { %v18468_v62 = vld [vmem:[#allocation2 + $0x104] sm:$0xff]  ;;  %v2201_v45 = vmax.f32 %v2131_v57, 0.0  ;;  %v2134_v60 = vadd.f32 %v18320_v22, %v2133_v5  ;;  %14872 = vmatprep.mubr.bf16.mxu0 %v2367_v13 }
 0x1a2   :  { %21578 = vst [vmem:[#allocation35_spill] sm:$0xff] %v18468_v62  ;;  %v2251_v48 = vmax.f32 %v18267_v61, %v2203_v58  ;;  %v2204_v46 = vmax.f32 %v2142_v16, 0.0  ;;  %v18490_v5 = vld [vmem:[#allocation2 + $0x101] sm:$0xff]  ;;  %v18521_v62 = vld [vmem:[#allocation2 + $0x113] sm:$0xff] }
 0x1a3   :  { %v18488_v36 = vmax.f32 %v18280_v25, %v2201_v45  ;;  %v2202_v57 = vmax.f32 %v2134_v60, 0.0  ;;  %21580 = vst [vmem:[#allocation37_spill] sm:$0xff] %v18490_v5  ;;  %v18501_v45 = vld [vmem:[#allocation2 + $0xf1] sm:$0xff]  ;;  %v18549_v2 = vld [vmem:[#allocation2 + $0x102] sm:$0xff] }
 0x1a4   :  { %2299 = vst [vmem:[#allocation2 + $0x150] sm:$0xff] %v2251_v48  ;;  %v2252_v13 = vmax.f32 %v18293_v50, %v2204_v46  ;;  %v18495_v11 = vld [vmem:[#allocation2 + $0x120] sm:$0xff]  ;;  %21583 = vst [vmem:[#allocation40_spill] sm:$0xff] %v18501_v45 }
 0x1a5   :  { %21582 = vst [vmem:[#allocation39_spill] sm:$0xff] %v18495_v11  ;;  %2297 = vst [vmem:[#allocation2 + $0x140] sm:$0xff] %v18488_v36  ;;  %v2250_v61 = vmax.f32 %v18306_v35, %v2202_v57  ;;  %v14842_v16 = vpop.f32.mrb[100].mxu1  ;;  %v2360_v58 = vld [vmem:[#allocation2 + $0x131] sm:$0xff]  ;;  %v18534_v45 = vld [vmem:[#allocation2 + $0x42] sm:$0xff] }
 0x1a6   :  { %2300 = vst [vmem:[#allocation2 + $0x158] sm:$0xff] %v2252_v13  ;;  %v2155_v50 = vadd.f32 %v18320_v22, %v14842_v16  ;;  %v2146_v46 = vpop.f32.mrb[101].mxu1  ;;  %v18506_v48 = vld [vmem:[#allocation2 + $0x121] sm:$0xff]  ;;  %v18519_v11 = vld [vmem:[#allocation2 + $0x112] sm:$0xff]  ;;  %21585 = vst [vmem:[#allocation42_spill] sm:$0xff] %v18534_v45 }
 0x1a7   :  { %v18508_v49 = vld [vmem:[#allocation2 + $0x122] sm:$0xff]  ;;  %2298 = vst [vmem:[#allocation2 + $0x148] sm:$0xff] %v2250_v61  ;;  %v2147_v57 = vadd.f32 %v18320_v22, %v2146_v46  ;;  %v14843_v25 = vpop.f32.mrb[102].mxu1  ;;  %v2368_v29 = vpack.c.bf16 %v2360_v58, %v18506_v48  ;;  %v18526_v46 = vld [vmem:[#allocation2 + $0x114] sm:$0xff]  ;;  %21590 = vst [vmem:[#allocation46_spill] sm:$0xff] %v18549_v2 }
 0x1a8   :  { %v18510_v40 = vld [vmem:[#allocation2 + $0x123] sm:$0xff]  ;;  %v2207_v13 = vmax.f32 %v2155_v50, 0.0  ;;  %v2158_v16 = vadd.f32 %v18320_v22, %v14843_v25  ;;  %v2149_v38 = vpop.f32.mrb[103].mxu1  ;;  %v16150_v2 = vld [vmem:[%s21475_s3 + $0x90] sm:$0xff]  }
 0x1a9   :  { %v18516_v60 = vld [vmem:[#allocation2 + $0x124] sm:$0xff]  ;;  %v2205_v35 = vmax.f32 %v2147_v57, 0.0  ;;  %v2150_v61 = vadd.f32 %v18320_v22, %v2149_v38  ;;  %14873 = vmatmul.mubr.bf16.gmra.mrb[100].mxu0 %v2368_v29  ;;  %v21586_v57 = vpack.c.bf16 %v18032_v59, %v18038_v56  ;;  %v18542_v22 = vld [vmem:[#allocation2 + $0x32] sm:$0xff] }
 0x1aa   :  { %v18532_v50 = vld [vmem:[#allocation2 + $0x121] sm:$0xff]  ;;  %v2255_v5 = vmax.f32 %v18342_v32, %v2207_v13  ;;  %v2208_v1 = vmax.f32 %v2158_v16, 0.0  ;;  %21587 = vst [vmem:[#allocation43_spill] sm:$0xff] %v18542_v22  ;;  %v18554_v56 = vld [vmem:[#allocation2 + $0x130] sm:$0xff] }
 0x1ab   :  { %21584 = vst [vmem:[#allocation41_spill] sm:$0xff] %v18532_v50  ;;  %14892 = vmatprep.mubr.bf16.mxu0 %v21586_v57  ;;  %v18544_v29 = vld [vmem:[#allocation2 + $0x62] sm:$0xff]  ;;  %v2253_v25 = vmax.f32 %v18354_v26, %v2205_v35  ;;  %v2206_v58 = vmax.f32 %v2150_v61, 0.0  ;;  %21592 = vst [vmem:[#allocation48_spill] sm:$0xff] %v18554_v56  ;;  %v18558_v16 = vld [vmem:[#allocation2 + $0x52] sm:$0xff]  ;;  %v21602_v50 = vpack.c.bf16 %v18096_v7, %v18102_v20 }
 0x1ac   :  { %21588 = vst [vmem:[#allocation44_spill] sm:$0xff] %v18544_v29  ;;  %v18551_v32 = vld [vmem:[#allocation2 + $0x122] sm:$0xff]  ;;  %2303 = vst [vmem:[#allocation2 + $0x170] sm:$0xff] %v2255_v5  ;;  %v2256_v59 = vmax.f32 %v18367_v34, %v2208_v1  ;;  %v18568_v1 = vld [vmem:[#allocation2 + $0xf2] sm:$0xff] }
 0x1ad   :  { %21591 = vst [vmem:[#allocation47_spill] sm:$0xff] %v18551_v32  ;;  %v18556_v13 = vld [vmem:[#allocation2 + $0x140] sm:$0xff]  ;;  %21593 = vst [vmem:[#allocation49_spill] sm:$0xff] %v18558_v16  ;;  %v2254_v35 = vmax.f32 %v18374_v15, %v2206_v58  ;;  %v16149_v5 = vld [vmem:[%s21475_s3 + $0x88] sm:$0xff]  }
 0x1ae   :  { %2301 = vst [vmem:[#allocation2 + $0x160] sm:$0xff] %v2253_v25  ;;  %21594 = vst [vmem:[#allocation50_spill] sm:$0xff] %v18568_v1  ;;  %v18570_v34 = vld [vmem:[#allocation2 + $0x112] sm:$0xff]  ;;  %v18578_v25 = vld [vmem:[#allocation2 + $0x43] sm:$0xff] }
 0x1af   :  { %21595 = vst [vmem:[#allocation51_spill] sm:$0xff] %v18570_v34  ;;  %2304 = vst [vmem:[#allocation2 + $0x178] sm:$0xff] %v2256_v59  ;;  %v18576_v38 = vld [vmem:[#allocation2 + $0x33] sm:$0xff]  ;;  %v18580_v15 = vld [vmem:[#allocation2 + $0x63] sm:$0xff] }
 0x1b0   :  { %21596 = vst [vmem:[#allocation52_spill] sm:$0xff] %v18576_v38  ;;  %21597 = vst [vmem:[#allocation53_spill] sm:$0xff] %v18580_v15  ;;  %v18586_v22 = vld [vmem:[#allocation2 + $0x53] sm:$0xff]  ;;  %v18588_v61 = vld [vmem:[#allocation2 + $0x103] sm:$0xff] }
 0x1b1   :  { %2302 = vst [vmem:[#allocation2 + $0x168] sm:$0xff] %v2254_v35  ;;  %21598 = vst [vmem:[#allocation54_spill] sm:$0xff] %v18586_v22  ;;  %v18590_v45 = vld [vmem:[#allocation2 + $0x44] sm:$0xff]  ;;  %v18594_v57 = vld [vmem:[#allocation2 + $0x34] sm:$0xff]  ;;  %v21600_v35 = vpack.c.bf16 %v18064_v9, %v18070_v43 }
 0x1b2   :  { %21599 = vst [vmem:[#allocation55_spill] sm:$0xff] %v18588_v61  ;;  %v18592_v59 = vld [vmem:[#allocation2 + $0x123] sm:$0xff]  ;;  %v18596_v16 = vld [vmem:[#allocation2 + $0x54] sm:$0xff] }
 0x1b3   :  { %v18598_v29 = vld [vmem:[#allocation2 + $0x64] sm:$0xff]  ;;  %v18602_v58 = vld [vmem:[#allocation2 + $0x50] sm:$0xff]  ;;  %14893 = vmatmul.mubr.bf16.vlgmr.msra.gmra.mrb[88].mxu0 %v21600_v35  ;;  %v16151_v56 = vld [vmem:[%s21475_s3 + $0x98] sm:$0xff]  }
 0x1b4   :  { %v18600_v51 = vld [vmem:[#allocation2 + $0x40] sm:$0xff]  ;;  %v18607_v26 = vld [vmem:[#allocation2 + $0xf3] sm:$0xff]  ;;  %14896 = vmatprep.mubr.bf16.mxu0 %v21602_v50  ;;  %14909 = vmatpush3.bf16.msra.mxu0 %v18275_v0  ;;  %v21611_v0 = vpack.c.bf16 %v18270_v8, %v18283_v37 }
 0x1b5   :  { %21601 = vst [vmem:[#allocation56_spill] sm:$0xff] %v18607_v26  ;;  %v18609_v34 = vld [vmem:[#allocation2 + $0x104] sm:$0xff]  ;;  %v18621_v9 = vld [vmem:[#allocation2 + $0x113] sm:$0xff]  ;;  %14910 = vmatprep.subr.bf16.mxu0 %v16149_v5 }
 0x1b6   :  { %v18611_v32 = vld [vmem:[#allocation2 + $0x124] sm:$0xff]  ;;  %v18625_v35 = vld [vmem:[#allocation2 + $0x70] sm:$0xff]  ;;  %v16155_v37 = vld [vmem:[%s21475_s3 + $0xb8] sm:$0xff]  }
 0x1b7   :  { %v18623_v43 = vld [vmem:[#allocation2 + $0x60] sm:$0xff]  ;;  %21604 = vst [vmem:[#allocation58_spill] sm:$0xff] %v18625_v35  ;;  %v18632_v1 = vld [vmem:[#allocation2 + $0xf4] sm:$0xff]  ;;  %v16153_v26 = vld [vmem:[%s21475_s3 + $0xa8] sm:$0xff]  }
 0x1b8   :  { %21603 = vst [vmem:[#allocation57_spill] sm:$0xff] %v18623_v43  ;;  %v18634_v7 = vld [vmem:[#allocation2 + $0x114] sm:$0xff]  ;;  %v18642_v22 = vld [vmem:[#allocation2 + $0x41] sm:$0xff]  ;;  %14911 = vmatpush3.bf16.msra.mxu0 %v16149_v5 }
 0x1b9   :  { %21605 = vst [vmem:[#allocation59_spill] sm:$0xff] %v18634_v7  ;;  %21606 = vst [vmem:[#allocation60_spill] sm:$0xff] %v18642_v22  ;;  %v18648_v61 = vld [vmem:[#allocation2 + $0x51] sm:$0xff]  ;;  %v18650_v15 = vld [vmem:[#allocation2 + $0x61] sm:$0xff]  ;;  %14912 = vmatprep.subr.bf16.mxu0 %v16150_v2  ;;  %v21610_v7 = vpack.c.bf16 %v18137_v27, %v18146_v39  ;;  %v21612_v27 = vpack.c.bf16 %v18345_v31, %v18357_v55  ;;  %v21613_v39 = vpack.c.bf16 %v18393_v6, %v18396_v21 }
 0x1ba   :  { %21607 = vst [vmem:[#allocation61_spill] sm:$0xff] %v18648_v61  ;;  %21608 = vst [vmem:[#allocation62_spill] sm:$0xff] %v18650_v15  ;;  %v18652_v38 = vld [vmem:[#allocation2 + $0x71] sm:$0xff]  ;;  %v16152_v5 = vld [vmem:[%s21475_s3 + $0xa0] sm:$0xff]  }
 0x1bb   :  { %21609 = vst [vmem:[#allocation63_spill] sm:$0xff] %v18652_v38  ;;  %14897 = vmatmul.mubr.bf16.gmra.mrb[92].mxu0 %v21610_v7  ;;  %v2676_v8 = vld [vmem:[#allocation2 + $0x2] sm:$0xff]  ;;  %v17142_v20 = vld [vmem:[#allocation2 + $0x33] sm:$0xff] }
 0x1bc   :  { %14900 = vmatprep.mubr.bf16.mxu0 %v21611_v0  ;;  %14913 = vmatpush3.bf16.msra.mxu0 %v16150_v2  ;;  %v16154_v2 = vld [vmem:[%s21475_s3 + $0xb0] sm:$0xff]   ;;  %v2692_v55 = vpack.c.bf16 %v18165_v10, %v2676_v8  ;;  %v16156_v7 = vld [vmem:[%s21475_s3 + $0xc0] sm:$0xff]   ;;  %v16157_v0 = vld [vmem:[%s21475_s3 + $0xc8] sm:$0xff]  }
 0x1bd   :  { %14914 = vmatprep.subr.bf16.mxu0 %v16151_v56  ;;  %v2684_v8 = vld [vmem:[#allocation2 + $0xc2] sm:$0xff]  ;;  %v17149_v61 = vld [vmem:[#allocation2 + $0x54] sm:$0xff] }
 0x1be   :  { %v17143_v15 = vld [vmem:[#allocation2 + $0x43] sm:$0xff] }
 0x1bf   :  { %v17148_v22 = vld [vmem:[#allocation2 + $0x44] sm:$0xff] }
 0x1c0   :  { %14915 = vmatpush3.bf16.msra.mxu0 %v16151_v56  ;;  %v21614_v56 = vpack.c.bf16 %v18435_v14, %v18440_v4 }
 0x1c1   :  { %14916 = vmatprep.subr.bf16.mxu0 %v16152_v5 }
 0x1c3   :  { %14901 = vmatmul.mubr.bf16.gmra.mrb[96].mxu0 %v21612_v27  ;;  %v2694_v27 = vpack.c.bf16 %v18245_v30, %v18191_v28 }
 0x1c4   :  { %14904 = vmatprep.mubr.bf16.mxu0 %v21613_v39  ;;  %14917 = vmatpush3.bf16.msra.mxu0 %v16152_v5  ;;  %v16158_v39 = vld [vmem:[%s21475_s3 + $0xd0] sm:$0xff]  }
 0x1c5   :  { %14918 = vmatprep.subr.bf16.mxu0 %v16153_v26 }
 0x1c8   :  { %14919 = vmatpush3.bf16.msra.mxu0 %v16153_v26  ;;  %v17139_v26 = vld [vmem:[#allocation2 + $0x22] sm:$0xff] }
 0x1c9   :  { %14920 = vmatprep.subr.bf16.mxu0 %v16154_v2  ;;  %v2693_v5 = vpack.c.bf16 %v18203_v12, %v17139_v26  ;;  %v16161_v26 = vld [vmem:[%s21475_s3 + $0xe8] sm:$0xff]  }
 0x1cb   :  { %14905 = vmatmul.mubr.bf16.gmra.mrb[100].mxu0 %v21614_v56  ;;  %v2696_v56 = vpack.c.bf16 %v18421_v19, %v2684_v8  ;;  %v2878_v8 = vld [vmem:[#allocation2 + $0x3] sm:$0xff] }
 0x1cc   :  { %14921 = vmatpush3.bf16.msra.mxu0 %v16154_v2  ;;  %14924 = vmatprep.mubr.bf16.mxu0 %v2692_v55  ;;  %v18705_v2 = vld [vmem:[#allocation2 + $0x72] sm:$0xff] }
 0x1cd   :  { %14922 = vmatprep.subr.bf16.mxu0 %v16155_v37  ;;  %v2695_v55 = vpack.c.bf16 %v18705_v2, %v18233_v47 }
 0x1d0   :  { %14923 = vmatpush3.bf16.msra.mxu0 %v16155_v37  ;;  %v16159_v37 = vld [vmem:[%s21475_s3 + $0xd8] sm:$0xff]  }
 0x1d1   :  { %14940 = vmatprep.subr.bf16.mxu0 %v16156_v7 }
 0x1d3   :  { %14925 = vmatmul.mubr.bf16.vlgmr.msra.gmra.mrb[88].mxu0 %v2693_v5  ;;  %v2698_v5 = vpack.c.bf16 %v18519_v11, %v18459_v18 }
 0x1d4   :  { %14928 = vmatprep.mubr.bf16.mxu0 %v2694_v27  ;;  %14941 = vmatpush3.bf16.msra.mxu0 %v16156_v7  ;;  %v16160_v7 = vld [vmem:[%s21475_s3 + $0xe0] sm:$0xff]   ;;  %v16162_v27 = vld [vmem:[%s21475_s3 + $0xf0] sm:$0xff]  }
 0x1d5   :  { %14942 = vmatprep.subr.bf16.mxu0 %v16157_v0 }
 0x1d8   :  { %14943 = vmatpush3.bf16.msra.mxu0 %v16157_v0  ;;  %v2697_v0 = vpack.c.bf16 %v18471_v23, %v18411_v63 }
 0x1d9   :  { %14944 = vmatprep.subr.bf16.mxu0 %v16158_v39 }
 0x1db   :  { %14929 = vmatmul.mubr.bf16.gmra.mrb[92].mxu0 %v2695_v55 }
 0x1dc   :  { %14932 = vmatprep.mubr.bf16.mxu0 %v2696_v56  ;;  %14945 = vmatpush3.bf16.msra.mxu0 %v16158_v39  ;;  %v18726_v39 = vld [vmem:[#allocation2 + $0x132] sm:$0xff] }
 0x1dd   :  { %14946 = vmatprep.subr.bf16.mxu0 %v16159_v37  ;;  %v2699_v55 = vpack.c.bf16 %v18726_v39, %v18508_v49  ;;  %v17140_v56 = vld [vmem:[#allocation2 + $0x13] sm:$0xff] }
 0x1e0   :  { %14947 = vmatpush3.bf16.msra.mxu0 %v16159_v37  ;;  %v16163_v37 = vld [vmem:[%s21475_s3 + $0xf8] sm:$0xff]  }
 0x1e1   :  { %14948 = vmatprep.subr.bf16.mxu0 %v16160_v7 }
 0x1e3   :  { %14933 = vmatmul.mubr.bf16.gmra.mrb[96].mxu0 %v2697_v0  ;;  %v2894_v0 = vpack.c.bf16 %v17140_v56, %v2878_v8  ;;  %v2896_v8 = vpack.c.bf16 %v18285_v42, %v17143_v15  ;;  %v2886_v56 = vld [vmem:[#allocation2 + $0xc3] sm:$0xff] }
 0x1e4   :  { %14936 = vmatprep.mubr.bf16.mxu0 %v2698_v5  ;;  %14949 = vmatpush3.bf16.msra.mxu0 %v16160_v7  ;;  %v16164_v7 = vld [vmem:[%s21475_s3 + $0x100] sm:$0xff]   ;;  %v16165_v5 = vld [vmem:[%s21475_s3 + $0x108] sm:$0xff]   ;;  %v2898_v15 = vpack.c.bf16 %v18423_v24, %v2886_v56 }
 0x1e5   :  { %14950 = vmatprep.subr.bf16.mxu0 %v16161_v26  ;;  %v3080_v56 = vld [vmem:[#allocation2 + $0x4] sm:$0xff] }
 0x1e8   :  { %14951 = vmatpush3.bf16.msra.mxu0 %v16161_v26  ;;  %v17141_v26 = vld [vmem:[#allocation2 + $0x23] sm:$0xff] }
 0x1e9   :  { %14952 = vmatprep.subr.bf16.mxu0 %v16162_v27  ;;  %v2895_v50 = vpack.c.bf16 %v17142_v20, %v17141_v26  ;;  %v17144_v20 = vld [vmem:[#allocation2 + $0x63] sm:$0xff]  ;;  %v2900_v26 = vpack.c.bf16 %v18521_v62, %v18461_v54 }
 0x1eb   :  { %14937 = vmatmul.mubr.bf16.gmra.mrb[100].mxu0 %v2699_v55  ;;  %v16166_v55 = vld [vmem:[%s21475_s3 + $0x110] sm:$0xff]  }
 0x1ec   :  { %14953 = vmatpush3.bf16.msra.mxu0 %v16162_v27  ;;  %14956 = vmatprep.mubr.bf16.mxu0 %v2894_v0  ;;  %v18740_v27 = vld [vmem:[#allocation2 + $0x73] sm:$0xff] }
 0x1ed   :  { %14954 = vmatprep.subr.bf16.mxu0 %v16163_v37  ;;  %v2897_v0 = vpack.c.bf16 %v18740_v27, %v17144_v20 }
 0x1f0   :  { %14955 = vmatpush3.bf16.msra.mxu0 %v16163_v37  ;;  %v16167_v37 = vld [vmem:[%s21475_s3 + $0x118] sm:$0xff]  }
 0x1f1   :  { %14972 = vmatprep.subr.bf16.mxu0 %v16164_v7 }
 0x1f3   :  { %14957 = vmatmul.mubr.bf16.vlgmr.msra.gmra.mrb[88].mxu0 %v2895_v50  ;;  %v16168_v50 = vld [vmem:[%s21475_s3 + $0x120] sm:$0xff]  }
 0x1f4   :  { %14960 = vmatprep.mubr.bf16.mxu0 %v2896_v8  ;;  %14973 = vmatpush3.bf16.msra.mxu0 %v16164_v7  ;;  %v16169_v7 = vld [vmem:[%s21475_s3 + $0x128] sm:$0xff]   ;;  %v16170_v8 = vld [vmem:[%s21475_s3 + $0x130] sm:$0xff]  }
 0x1f5   :  { %14974 = vmatprep.subr.bf16.mxu0 %v16165_v5 }
 0x1f8   :  { %14975 = vmatpush3.bf16.msra.mxu0 %v16165_v5  ;;  %v2899_v5 = vpack.c.bf16 %v18473_v41, %v18413_v44 }
 0x1f9   :  { %14976 = vmatprep.subr.bf16.mxu0 %v16166_v55 }
 0x1fb   :  { %14961 = vmatmul.mubr.bf16.gmra.mrb[92].mxu0 %v2897_v0  ;;  %v17145_v0 = vld [vmem:[#allocation2 + $0x14] sm:$0xff] }
 0x1fc   :  { %14964 = vmatprep.mubr.bf16.mxu0 %v2898_v15  ;;  %14977 = vmatpush3.bf16.msra.mxu0 %v16166_v55  ;;  %v18763_v55 = vld [vmem:[#allocation2 + $0x133] sm:$0xff]  ;;  %v3096_v15 = vpack.c.bf16 %v17145_v0, %v3080_v56  ;;  %v3098_v56 = vpack.c.bf16 %v17149_v61, %v17148_v22  ;;  %v3088_v0 = vld [vmem:[#allocation2 + $0xc4] sm:$0xff] }
 0x1fd   :  { %14978 = vmatprep.subr.bf16.mxu0 %v16167_v37  ;;  %v2901_v20 = vpack.c.bf16 %v18763_v55, %v18510_v40 }
 0x200   :  { %14979 = vmatpush3.bf16.msra.mxu0 %v16167_v37  ;;  %v16171_v37 = vld [vmem:[%s21475_s3 + $0x138] sm:$0xff]  }
 0x201   :  { %14980 = vmatprep.subr.bf16.mxu0 %v16168_v50 }
 0x203   :  { %14965 = vmatmul.mubr.bf16.gmra.mrb[96].mxu0 %v2899_v5  ;;  %v16173_v5 = vld [vmem:[%s21475_s3 + $0x148] sm:$0xff]  }
 0x204   :  { %14968 = vmatprep.mubr.bf16.mxu0 %v2900_v26  ;;  %14981 = vmatpush3.bf16.msra.mxu0 %v16168_v50  ;;  %v16172_v50 = vld [vmem:[%s21475_s3 + $0x140] sm:$0xff]   ;;  %v17147_v26 = vld [vmem:[#allocation2 + $0x34] sm:$0xff] }
 0x205   :  { %14982 = vmatprep.subr.bf16.mxu0 %v16169_v7 }
 0x208   :  { %14983 = vmatpush3.bf16.msra.mxu0 %v16169_v7  ;;  %v17146_v7 = vld [vmem:[#allocation2 + $0x24] sm:$0xff] }
 0x209   :  { %14984 = vmatprep.subr.bf16.mxu0 %v16170_v8  ;;  %v3097_v38 = vpack.c.bf16 %v17147_v26, %v17146_v7 }
 0x20b   :  { %14969 = vmatmul.mubr.bf16.gmra.mrb[100].mxu0 %v2901_v20  ;;  %v16174_v20 = vld [vmem:[%s21475_s3 + $0x150] sm:$0xff]  }
 0x20c   :  { %14985 = vmatpush3.bf16.msra.mxu0 %v16170_v8  ;;  %14988 = vmatprep.mubr.bf16.mxu0 %v3096_v15  ;;  %v18776_v8 = vld [vmem:[#allocation2 + $0x74] sm:$0xff]  ;;  %v17150_v15 = vld [vmem:[#allocation2 + $0x64] sm:$0xff] }
 0x20d   :  { %14986 = vmatprep.subr.bf16.mxu0 %v16171_v37  ;;  %v3099_v7 = vpack.c.bf16 %v18776_v8, %v17150_v15 }
 0x210   :  { %14987 = vmatpush3.bf16.msra.mxu0 %v16171_v37  ;;  %v16175_v37 = vld [vmem:[%s21475_s3 + $0x158] sm:$0xff]  }
 0x211   :  { %15004 = vmatprep.subr.bf16.mxu0 %v16172_v50 }
 0x213   :  { %14989 = vmatmul.mubr.bf16.vlgmr.msra.gmra.mrb[88].mxu0 %v3097_v38  ;;  %v17151_v38 = vld [vmem:[#allocation2 + $0xd4] sm:$0xff] }
 0x214   :  { %14992 = vmatprep.mubr.bf16.mxu0 %v3098_v56  ;;  %15005 = vmatpush3.bf16.msra.mxu0 %v16172_v50  ;;  %v3100_v22 = vpack.c.bf16 %v17151_v38, %v3088_v0 }
 0x215   :  { %15006 = vmatprep.subr.bf16.mxu0 %v16173_v5 }
 0x218   :  { %15007 = vmatpush3.bf16.msra.mxu0 %v16173_v5 }
 0x219   :  { %15008 = vmatprep.subr.bf16.mxu0 %v16174_v20 }
 0x21b   :  { %14993 = vmatmul.mubr.bf16.gmra.mrb[92].mxu0 %v3099_v7 }
 0x21c   :  { %14 = vsyncpa [#allocation5], 0  ;;  %14996 = vmatprep.mubr.bf16.mxu0 %v3100_v22  ;;  %15009 = vmatpush3.bf16.msra.mxu0 %v16174_v20  ;;  %v16176_v61 = vld [vmem:[%s21475_s3 + $0x160] sm:$0xff]   ;;  %v17153_v26 = vld [vmem:[#allocation2 + $0xf4] sm:$0xff]  ;;  %vm7483_vm1 = vcmask 1041409   ;;  %vm12590_vm2 = vcmask 1041408  }
 0x21d   :  { %15010 = vmatprep.subr.bf16.mxu0 %v16175_v37  ;;  %v17152_v50 = vld [vmem:[#allocation2 + $0xe4] sm:$0xff]  ;;  %v16178_v20 = vld [vmem:[%s21475_s3 + $0x170] sm:$0xff]   ;;  %v16179_v22 = vld [vmem:[%s21475_s3 + $0x178] sm:$0xff]  }
 0x21e   :  { %v3101_v56 = vpack.c.bf16 %v17153_v26, %v17152_v50  ;;  %v16177_v5 = vld [vmem:[%s21475_s3 + $0x168] sm:$0xff]   ;;  %v3283_v38 = vld [vmem:[#allocation2 + $0x10] sm:$0xff]  ;;  %v17155_v50 = vld [vmem:[#allocation2 + $0x20] sm:$0xff] }
 0x21f   :  { %v17154_v15 = vld [vmem:[#allocation2 + $0x104] sm:$0xff]  ;;  %v3299_v26 = vpack.c.bf16 %v17155_v50, %v3283_v38  ;;  %v17158_v43 = vld [vmem:[#allocation2 + $0x50] sm:$0xff] }
 0x220   :  { %15011 = vmatpush3.bf16.msra.mxu0 %v16175_v37  ;;  %v3102_v0 = vpack.c.bf16 %v18526_v46, %v17154_v15  ;;  %v18795_v37 = vld [vmem:[#allocation2 + $0x134] sm:$0xff]  ;;  %v17159_v35 = vld [vmem:[#allocation2 + $0x60] sm:$0xff] }
 0x221   :  { %15012 = vmatprep.subr.bf16.mxu0 %v16176_v61  ;;  %v3103_v7 = vpack.c.bf16 %v18795_v37, %v18516_v60  ;;  %v3301_v38 = vpack.c.bf16 %v17159_v35, %v17158_v43  ;;  %v17160_v50 = vld [vmem:[#allocation2 + $0x70] sm:$0xff]  ;;  %v16183_v43 = vld [vmem:[%s21475_s3 + $0x198] sm:$0xff]   ;;  %v17161_v35 = vld [vmem:[#allocation2 + $0xe0] sm:$0xff] }
 0x223   :  { %14997 = vmatmul.mubr.bf16.gmra.mrb[96].mxu0 %v3101_v56  ;;  %v17156_v56 = vld [vmem:[#allocation2 + $0x30] sm:$0xff] }
 0x224   :  { %15000 = vmatprep.mubr.bf16.mxu0 %v3102_v0  ;;  %15013 = vmatpush3.bf16.msra.mxu0 %v16176_v61  ;;  %v16180_v61 = vld [vmem:[%s21475_s3 + $0x180] sm:$0xff]   ;;  %v16181_v0 = vld [vmem:[%s21475_s3 + $0x188] sm:$0xff]  }
 0x225   :  { %15014 = vmatprep.subr.bf16.mxu0 %v16177_v5 }
 0x228   :  { %15015 = vmatpush3.bf16.msra.mxu0 %v16177_v5  ;;  %v17157_v5 = vld [vmem:[#allocation2 + $0x40] sm:$0xff] }
 0x229   :  { %15016 = vmatprep.subr.bf16.mxu0 %v16178_v20  ;;  %v3300_v15 = vpack.c.bf16 %v17157_v5, %v17156_v56  ;;  %v16185_v5 = vld [vmem:[%s21475_s3 + $0x1a8] sm:$0xff]  }
 0x22b   :  { %15001 = vmatmul.mubr.bf16.gmra.mrb[100].mxu0 %v3103_v7  ;;  %v18811_v7 = vld [vmem:[#allocation2 + $0x80] sm:$0xff] }
 0x22c   :  { %15017 = vmatpush3.bf16.msra.mxu0 %v16178_v20  ;;  %15020 = vmatprep.mubr.bf16.mxu0 %v3299_v26  ;;  %v16182_v20 = vld [vmem:[%s21475_s3 + $0x190] sm:$0xff]   ;;  %v3302_v26 = vpack.c.bf16 %v18811_v7, %v17160_v50  ;;  %v17162_v50 = vld [vmem:[#allocation2 + $0x21] sm:$0xff] }
 0x22d   :  { %15018 = vmatprep.subr.bf16.mxu0 %v16179_v22 }
 0x230   :  { %15019 = vmatpush3.bf16.msra.mxu0 %v16179_v22  ;;  %v3291_v22 = vld [vmem:[#allocation2 + $0xd0] sm:$0xff] }
 0x231   :  { %15036 = vmatprep.subr.bf16.mxu0 %v16180_v61  ;;  %v3303_v56 = vpack.c.bf16 %v17161_v35, %v3291_v22  ;;  %v16187_v22 = vld [vmem:[%s21475_s3 + $0x1b8] sm:$0xff]   ;;  %v16189_v35 = vld [vmem:[%s21475_s3 + $0x1c8] sm:$0xff]  }
 0x233   :  { %15021 = vmatmul.mubr.bf16.vlgmr.msra.gmra.mrb[88].mxu0 %v3300_v15  ;;  %v21615_v15 = vpack.c.bf16 %v18396_v21, %v18345_v31  ;;  %v21617_v21 = vpack.c.bf16 %v18488_v36, %v18435_v14  ;;  %v16190_v36 = vld [vmem:[%s21475_s3 + $0x1d0] sm:$0xff]  }
 0x234   :  { %15024 = vmatprep.mubr.bf16.mxu0 %v3301_v38  ;;  %15037 = vmatpush3.bf16.msra.mxu0 %v16180_v61  ;;  %v16184_v61 = vld [vmem:[%s21475_s3 + $0x1a0] sm:$0xff]   ;;  %v16186_v38 = vld [vmem:[%s21475_s3 + $0x1b0] sm:$0xff]  }
 0x235   :  { %15038 = vmatprep.subr.bf16.mxu0 %v16181_v0 }
 0x238   :  { %15039 = vmatpush3.bf16.msra.mxu0 %v16181_v0  ;;  %v21616_v0 = vpack.c.bf16 %v18440_v4, %v18393_v6  ;;  %v16188_v6 = vld [vmem:[%s21475_s3 + $0x1c0] sm:$0xff]   ;;  %v17163_v4 = vld [vmem:[#allocation2 + $0x31] sm:$0xff] }
 0x239   :  { %15040 = vmatprep.subr.bf16.mxu0 %v16182_v20 }
 0x23b   :  { %15025 = vmatmul.mubr.bf16.gmra.mrb[92].mxu0 %v3302_v26  ;;  %v17164_v26 = vld [vmem:[#allocation2 + $0x41] sm:$0xff] }
 0x23c   :  { %15028 = vmatprep.mubr.bf16.mxu0 %v3303_v56  ;;  %15041 = vmatpush3.bf16.msra.mxu0 %v16182_v20  ;;  %v3485_v20 = vld [vmem:[#allocation2 + $0x11] sm:$0xff] }
 0x23d   :  { %15042 = vmatprep.subr.bf16.mxu0 %v16183_v43  ;;  %v3501_v31 = vpack.c.bf16 %v17162_v50, %v3485_v20  ;;  %v17165_v56 = vld [vmem:[#allocation2 + $0x51] sm:$0xff]  ;;  %v21618_v20 = vpack.c.bf16 %v18409_v17, %v18377_v52  ;;  %v16193_v50 = vld [vmem:[%s21475_s3 + $0x1e8] sm:$0xff]   ;;  %v21620_v52 = vpack.c.bf16 %v18506_v48, %v18448_v3  ;;  %v16196_v48 = vld [vmem:[%s21475_s3 + $0x200] sm:$0xff]  }
 0x23e   :  { %v16194_v17 = vld [vmem:[%s21475_s3 + $0x1f0] sm:$0xff]  }
 0x23f   :  { %v21621_v3 = vld [vmem:[#allocation8_spill] sm:$0xff] }
 0x240   :  { %15043 = vmatpush3.bf16.msra.mxu0 %v16183_v43  ;;  %v3502_v43 = vpack.c.bf16 %v17164_v26, %v17163_v4  ;;  %v16197_v26 = vld [vmem:[%s21475_s3 + $0x208] sm:$0xff]  }
 0x241   :  { %15044 = vmatprep.subr.bf16.mxu0 %v16184_v61 }
 0x243   :  { %15029 = vmatmul.mubr.bf16.gmra.mrb[96].mxu0 %v21615_v15  ;;  %v17167_v15 = vld [vmem:[#allocation2 + $0x71] sm:$0xff] }
 0x244   :  { %15032 = vmatprep.mubr.bf16.mxu0 %v21616_v0  ;;  %15045 = vmatpush3.bf16.msra.mxu0 %v16184_v61  ;;  %v17166_v61 = vld [vmem:[#allocation2 + $0x61] sm:$0xff] }
 0x245   :  { %15046 = vmatprep.subr.bf16.mxu0 %v16185_v5  ;;  %v3503_v14 = vpack.c.bf16 %v17166_v61, %v17165_v56  ;;  %v18895_v56 = vld [vmem:[#allocation2 + $0x82] sm:$0xff] }
 0x246   :  { %v3706_v61 = vpack.c.bf16 %v18895_v56, %v18705_v2  ;;  %v21626_v2 = vpack.c.bf16 %v18459_v18, %v18471_v23  ;;  %v16203_v23 = vld [vmem:[%s21475_s3 + $0x238] sm:$0xff]  }
 0x247   :  { %v21629_v18 = vld [vmem:[#allocation10_spill] sm:$0xff] }
 0x248   :  { %15047 = vmatpush3.bf16.msra.mxu0 %v16185_v5  ;;  %v18847_v5 = vld [vmem:[#allocation2 + $0x81] sm:$0xff] }
 0x249   :  { %15048 = vmatprep.subr.bf16.mxu0 %v16186_v38  ;;  %v3504_v0 = vpack.c.bf16 %v18847_v5, %v17167_v15  ;;  %v16204_v15 = vld [vmem:[%s21475_s3 + $0x240] sm:$0xff]  }
 0x24b   :  { %15033 = vmatmul.mubr.bf16.gmra.mrb[100].mxu0 %v21617_v21  ;;  %v18871_v21 = vld [vmem:[#allocation2 + $0x141] sm:$0xff] }
 0x24c   :  { %15049 = vmatpush3.bf16.msra.mxu0 %v16186_v38  ;;  %15052 = vmatprep.mubr.bf16.mxu0 %v3501_v31  ;;  %v16191_v38 = vld [vmem:[%s21475_s3 + $0x1d8] sm:$0xff]   ;;  %v21619_v31 = vpack.c.bf16 %v18457_v53, %v18402_v33  ;;  %v21622_v53 = vpack.c.bf16 %v21621_v3, %v18165_v10  ;;  %v16198_v10 = vld [vmem:[%s21475_s3 + $0x210] sm:$0xff]   ;;  %v18970_v3 = vld [vmem:[#allocation2 + $0x143] sm:$0xff] }
 0x24d   :  { %15050 = vmatprep.subr.bf16.mxu0 %v16187_v22  ;;  %v16195_v33 = vld [vmem:[%s21475_s3 + $0x1f8] sm:$0xff]  }
 0x250   :  { %15051 = vmatpush3.bf16.msra.mxu0 %v16187_v22  ;;  %v16192_v22 = vld [vmem:[%s21475_s3 + $0x1e0] sm:$0xff]  }
 0x251   :  { %15068 = vmatprep.subr.bf16.mxu0 %v16188_v6 }
 0x253   :  { %15053 = vmatmul.mubr.bf16.vlgmr.msra.gmra.mrb[88].mxu0 %v3502_v43  ;;  %v21623_v43 = vpack.c.bf16 %v18191_v28, %v18203_v12  ;;  %v16199_v28 = vld [vmem:[%s21475_s3 + $0x218] sm:$0xff]   ;;  %v21625_v12 = vpack.c.bf16 %v18411_v63, %v18421_v19  ;;  %v21627_v63 = vpack.c.bf16 %v18508_v49, %v18519_v11  ;;  %v16202_v19 = vld [vmem:[%s21475_s3 + $0x230] sm:$0xff]  }
 0x254   :  { %15056 = vmatprep.mubr.bf16.mxu0 %v3503_v14  ;;  %15069 = vmatpush3.bf16.msra.mxu0 %v16188_v6  ;;  %v17168_v6 = vld [vmem:[#allocation2 + $0x131] sm:$0xff]  ;;  %v18920_v14 = vld [vmem:[#allocation2 + $0x142] sm:$0xff] }
 0x255   :  { %15070 = vmatprep.subr.bf16.mxu0 %v16189_v35  ;;  %v3508_v4 = vpack.c.bf16 %v18871_v21, %v17168_v6  ;;  %v21628_v49 = vld [vmem:[#allocation9_spill] sm:$0xff] }
 0x256   :  { %v21630_v11 = vpack.c.bf16 %v21628_v49, %v21629_v18  ;;  %v16207_v6 = vld [vmem:[%s21475_s3 + $0x258] sm:$0xff]   ;;  %v21651_v49 = vld [vmem:[#allocation35_spill] sm:$0xff]  ;;  %v21652_v18 = vld [vmem:[#allocation36_spill] sm:$0xff] }
 0x258   :  { %15071 = vmatpush3.bf16.msra.mxu0 %v16189_v35  ;;  %v21624_v35 = vpack.c.bf16 %v18233_v47, %v18245_v30  ;;  %v16200_v47 = vld [vmem:[%s21475_s3 + $0x220] sm:$0xff]   ;;  %v16201_v30 = vld [vmem:[%s21475_s3 + $0x228] sm:$0xff]  }
 0x259   :  { %15072 = vmatprep.subr.bf16.mxu0 %v16190_v36 }
 0x25b   :  { %15057 = vmatmul.mubr.bf16.gmra.mrb[92].mxu0 %v3504_v0  ;;  %v21631_v0 = vld [vmem:[#allocation11_spill] sm:$0xff] }
 0x25c   :  { %15060 = vmatprep.mubr.bf16.mxu0 %v21618_v20  ;;  %15073 = vmatpush3.bf16.msra.mxu0 %v16190_v36  ;;  %v3710_v36 = vpack.c.bf16 %v18920_v14, %v18726_v39  ;;  %v16205_v39 = vld [vmem:[%s21475_s3 + $0x248] sm:$0xff]  }
 0x25d   :  { %15074 = vmatprep.subr.bf16.mxu0 %v16191_v38 }
 0x260   :  { %15075 = vmatpush3.bf16.msra.mxu0 %v16191_v38  ;;  %v21632_v38 = vld [vmem:[#allocation13_spill] sm:$0xff] }
 0x261   :  { %15076 = vmatprep.subr.bf16.mxu0 %v16192_v22  ;;  %v21633_v20 = vpack.c.bf16 %v21631_v0, %v21632_v38  ;;  %v19020_v0 = vld [vmem:[#allocation2 + $0x144] sm:$0xff] }
 0x262   :  { %v4114_v38 = vpack.c.bf16 %v19020_v0, %v18795_v37  ;;  %v16221_v37 = vld [vmem:[%s21475_s3 + $0x2c8] sm:$0xff]  }
 0x263   :  { %15061 = vmatmul.mubr.bf16.gmra.mrb[96].mxu0 %v21619_v31  ;;  %v16206_v31 = vld [vmem:[%s21475_s3 + $0x250] sm:$0xff]  }
 0x264   :  { %15064 = vmatprep.mubr.bf16.mxu0 %v21620_v52  ;;  %15077 = vmatpush3.bf16.msra.mxu0 %v16192_v22  ;;  %v21634_v22 = vld [vmem:[#allocation14_spill] sm:$0xff]  ;;  %v18945_v52 = vld [vmem:[#allocation2 + $0x83] sm:$0xff] }
 0x265   :  { %15078 = vmatprep.subr.bf16.mxu0 %v16193_v50 }
 0x268   :  { %15079 = vmatpush3.bf16.msra.mxu0 %v16193_v50  ;;  %v21635_v50 = vpack.c.bf16 %v21634_v22, %v18285_v42  ;;  %v21636_v42 = vpack.c.bf16 %v18413_v44, %v18423_v24  ;;  %v21638_v24 = vpack.c.bf16 %v18510_v40, %v18521_v62  ;;  %v16210_v44 = vld [vmem:[%s21475_s3 + $0x270] sm:$0xff]   ;;  %v21640_v62 = vld [vmem:[#allocation18_spill] sm:$0xff] }
 0x269   :  { %15080 = vmatprep.subr.bf16.mxu0 %v16194_v17 }
 0x26b   :  { %15065 = vmatmul.mubr.bf16.gmra.mrb[100].mxu0 %v3508_v4  ;;  %v16208_v4 = vld [vmem:[%s21475_s3 + $0x260] sm:$0xff]  }
 0x26c   :  { %15081 = vmatpush3.bf16.msra.mxu0 %v16194_v17  ;;  %15084 = vmatprep.mubr.bf16.mxu0 %v21622_v53  ;;  %v3908_v17 = vpack.c.bf16 %v18945_v52, %v18740_v27  ;;  %v16209_v27 = vld [vmem:[%s21475_s3 + $0x268] sm:$0xff]   ;;  %v3912_v53 = vpack.c.bf16 %v18970_v3, %v18763_v55 }
 0x26d   :  { %15082 = vmatprep.subr.bf16.mxu0 %v16195_v33  ;;  %v16213_v55 = vld [vmem:[%s21475_s3 + $0x288] sm:$0xff]  }
 0x270   :  { %15083 = vmatpush3.bf16.msra.mxu0 %v16195_v33  ;;  %v21637_v33 = vpack.c.bf16 %v18461_v54, %v18473_v41  ;;  %v16211_v41 = vld [vmem:[%s21475_s3 + $0x278] sm:$0xff]   ;;  %v21639_v54 = vld [vmem:[#allocation15_spill] sm:$0xff] }
 0x271   :  { %15100 = vmatprep.subr.bf16.mxu0 %v16196_v48  ;;  %v21641_v40 = vpack.c.bf16 %v21639_v54, %v21640_v62  ;;  %v17169_v54 = vld [vmem:[#allocation2 + $0xf0] sm:$0xff] }
 0x273   :  { %15085 = vmatmul.mubr.bf16.vlgmr.msra.gmra.mrb[88].mxu0 %v21623_v43  ;;  %v21643_v43 = vld [vmem:[#allocation21_spill] sm:$0xff] }
 0x274   :  { %15088 = vmatprep.mubr.bf16.mxu0 %v21624_v35  ;;  %15101 = vmatpush3.bf16.msra.mxu0 %v16196_v48  ;;  %v16212_v48 = vld [vmem:[%s21475_s3 + $0x280] sm:$0xff]  }
 0x275   :  { %15102 = vmatprep.subr.bf16.mxu0 %v16197_v26 }
 0x278   :  { %15103 = vmatpush3.bf16.msra.mxu0 %v16197_v26  ;;  %v21642_v26 = vld [vmem:[#allocation16_spill] sm:$0xff] }
 0x279   :  { %15104 = vmatprep.subr.bf16.mxu0 %v16198_v10  ;;  %v21644_v35 = vpack.c.bf16 %v21642_v26, %v21643_v43  ;;  %v17172_v43 = vld [vmem:[#allocation2 + $0x120] sm:$0xff] }
 0x27b   :  { %15089 = vmatmul.mubr.bf16.gmra.mrb[92].mxu0 %v3706_v61  ;;  %v21646_v61 = vld [vmem:[#allocation22_spill] sm:$0xff] }
 0x27c   :  { %15092 = vmatprep.mubr.bf16.mxu0 %v21625_v12  ;;  %15105 = vmatpush3.bf16.msra.mxu0 %v16198_v10  ;;  %v21645_v10 = vld [vmem:[#allocation17_spill] sm:$0xff] }
 0x27d   :  { %15106 = vmatprep.subr.bf16.mxu0 %v16199_v28  ;;  %v16214_v12 = vld [vmem:[%s21475_s3 + $0x290] sm:$0xff]  }
 0x280   :  { %15107 = vmatpush3.bf16.msra.mxu0 %v16199_v28  ;;  %v21647_v28 = vpack.c.bf16 %v21645_v10, %v21646_v61  ;;  %v16226_v61 = vld [vmem:[%s21475_s3 + $0x2f0] sm:$0xff]  }
 0x281   :  { %15108 = vmatprep.subr.bf16.mxu0 %v16200_v47 }
 0x283   :  { %15093 = vmatmul.mubr.bf16.gmra.mrb[96].mxu0 %v21626_v2  ;;  %v16215_v2 = vld [vmem:[%s21475_s3 + $0x298] sm:$0xff]  }
 0x284   :  { %15096 = vmatprep.mubr.bf16.mxu0 %v21627_v63  ;;  %15109 = vmatpush3.bf16.msra.mxu0 %v16200_v47  ;;  %v18995_v47 = vld [vmem:[#allocation2 + $0x84] sm:$0xff] }
 0x285   :  { %15110 = vmatprep.subr.bf16.mxu0 %v16201_v30  ;;  %v21648_v63 = vld [vmem:[#allocation31_spill] sm:$0xff] }
 0x288   :  { %15111 = vmatpush3.bf16.msra.mxu0 %v16201_v30  ;;  %v4110_v30 = vpack.c.bf16 %v18995_v47, %v18776_v8  ;;  %v16217_v8 = vld [vmem:[%s21475_s3 + $0x2a8] sm:$0xff]  }
 0x289   :  { %15112 = vmatprep.subr.bf16.mxu0 %v16202_v19 }
 0x28b   :  { %15097 = vmatmul.mubr.bf16.gmra.mrb[100].mxu0 %v3710_v36 }
 0x28c   :  { %15113 = vmatpush3.bf16.msra.mxu0 %v16202_v19  ;;  %15116 = vmatprep.mubr.bf16.mxu0 %v21630_v11  ;;  %v21649_v19 = vld [vmem:[#allocation32_spill] sm:$0xff]  ;;  %v21653_v11 = vpack.c.bf16 %v21651_v49, %v21652_v18  ;;  %v21668_v18 = vld [vmem:[#allocation27_spill] sm:$0xff] }
 0x28d   :  { %15114 = vmatprep.subr.bf16.mxu0 %v16203_v23  ;;  %v21650_v36 = vpack.c.bf16 %v21648_v63, %v21649_v19  ;;  %v21664_v63 = vld [vmem:[#allocation26_spill] sm:$0xff]  ;;  %v21665_v19 = vld [vmem:[#allocation25_spill] sm:$0xff]  ;;  %v21667_v49 = vld [vmem:[#allocation28_spill] sm:$0xff] }
 0x290   :  { %15115 = vmatpush3.bf16.msra.mxu0 %v16203_v23  ;;  %v16216_v23 = vld [vmem:[%s21475_s3 + $0x2a0] sm:$0xff]  }
 0x291   :  { %15132 = vmatprep.subr.bf16.mxu0 %v16204_v15 }
 0x293   :  { %15117 = vmatmul.mubr.bf16.vlgmr.msra.gmra.mrb[88].mxu0 %v21633_v20  ;;  %v16219_v20 = vld [vmem:[%s21475_s3 + $0x2b8] sm:$0xff]  }
 0x294   :  { %15120 = vmatprep.mubr.bf16.mxu0 %v21635_v50  ;;  %15133 = vmatpush3.bf16.msra.mxu0 %v16204_v15  ;;  %v21654_v15 = vpack.c.bf16 %v18516_v60, %v18526_v46  ;;  %v21655_v60 = vld [vmem:[#allocation12_spill] sm:$0xff]  ;;  %v21656_v46 = vld [vmem:[#allocation7_spill] sm:$0xff] }
 0x295   :  { %15134 = vmatprep.subr.bf16.mxu0 %v16205_v39  ;;  %v21657_v22 = vpack.c.bf16 %v21655_v60, %v21656_v46  ;;  %v16220_v50 = vld [vmem:[%s21475_s3 + $0x2c0] sm:$0xff]   ;;  %v19085_v60 = vld [vmem:[#allocation2 + $0x91] sm:$0xff] }
 0x296   :  { %v4504_v46 = vld [vmem:[#allocation2 + $0xe1] sm:$0xff] }
 0x298   :  { %15135 = vmatpush3.bf16.msra.mxu0 %v16205_v39  ;;  %v16218_v39 = vld [vmem:[%s21475_s3 + $0x2b0] sm:$0xff]  }
 0x299   :  { %15136 = vmatprep.subr.bf16.mxu0 %v16206_v31 }
 0x29b   :  { %15121 = vmatmul.mubr.bf16.gmra.mrb[92].mxu0 %v3908_v17  ;;  %v21659_v17 = vld [vmem:[#allocation19_spill] sm:$0xff] }
 0x29c   :  { %15124 = vmatprep.mubr.bf16.mxu0 %v21636_v42  ;;  %15137 = vmatpush3.bf16.msra.mxu0 %v16206_v31  ;;  %v21658_v31 = vld [vmem:[#allocation20_spill] sm:$0xff] }
 0x29d   :  { %15138 = vmatprep.subr.bf16.mxu0 %v16207_v6  ;;  %v21661_v42 = vld [vmem:[#allocation24_spill] sm:$0xff] }
 0x2a0   :  { %15139 = vmatpush3.bf16.msra.mxu0 %v16207_v6  ;;  %v21660_v6 = vpack.c.bf16 %v21658_v31, %v21659_v17  ;;  %v16232_v17 = vld [vmem:[%s21475_s3 + $0x320] sm:$0xff]  }
 0x2a1   :  { %15140 = vmatprep.subr.bf16.mxu0 %v16208_v4 }
 0x2a3   :  { %15125 = vmatmul.mubr.bf16.gmra.mrb[96].mxu0 %v21637_v33  ;;  %v16222_v33 = vld [vmem:[%s21475_s3 + $0x2d0] sm:$0xff]  }
 0x2a4   :  { %15128 = vmatprep.mubr.bf16.mxu0 %v21638_v24  ;;  %15141 = vmatpush3.bf16.msra.mxu0 %v16208_v4  ;;  %v21662_v4 = vld [vmem:[#allocation23_spill] sm:$0xff]  ;;  %v19045_v24 = vld [vmem:[#allocation2 + $0x90] sm:$0xff] }
 0x2a5   :  { %15142 = vmatprep.subr.bf16.mxu0 %v16209_v27 }
 0x2a8   :  { %15143 = vmatpush3.bf16.msra.mxu0 %v16209_v27  ;;  %v21663_v27 = vpack.c.bf16 %v21661_v42, %v21662_v4  ;;  %v17176_v42 = vld [vmem:[#allocation2 + $0x101] sm:$0xff] }
 0x2a9   :  { %15144 = vmatprep.subr.bf16.mxu0 %v16210_v44 }
 0x2ab   :  { %15129 = vmatmul.mubr.bf16.gmra.mrb[100].mxu0 %v3912_v53  ;;  %v4313_v53 = vpack.c.bf16 %v19045_v24, %v18811_v7  ;;  %v16225_v7 = vld [vmem:[%s21475_s3 + $0x2e8] sm:$0xff]  }
 0x2ac   :  { %15145 = vmatpush3.bf16.msra.mxu0 %v16210_v44  ;;  %15148 = vmatprep.mubr.bf16.mxu0 %v21641_v40  ;;  %v4302_v44 = vld [vmem:[#allocation2 + $0xe0] sm:$0xff] }
 0x2ad   :  { %15146 = vmatprep.subr.bf16.mxu0 %v16211_v41  ;;  %v4314_v62 = vpack.c.bf16 %v17169_v54, %v4302_v44  ;;  %v16224_v40 = vld [vmem:[%s21475_s3 + $0x2e0] sm:$0xff]  }
 0x2ae   :  { %v4698_v54 = vld [vmem:[#allocation2 + $0x22] sm:$0xff] }
 0x2b0   :  { %15147 = vmatpush3.bf16.msra.mxu0 %v16211_v41  ;;  %v16223_v41 = vld [vmem:[%s21475_s3 + $0x2d8] sm:$0xff]  }
 0x2b1   :  { %15164 = vmatprep.subr.bf16.mxu0 %v16212_v48 }
 0x2b3   :  { %15149 = vmatmul.mubr.bf16.vlgmr.msra.gmra.mrb[88].mxu0 %v21644_v35  ;;  %v17173_v35 = vld [vmem:[#allocation2 + $0x130] sm:$0xff] }
 0x2b4   :  { %15152 = vmatprep.mubr.bf16.mxu0 %v21647_v28  ;;  %15165 = vmatpush3.bf16.msra.mxu0 %v16212_v48  ;;  %v17170_v48 = vld [vmem:[#allocation2 + $0x100] sm:$0xff]  ;;  %v4316_v10 = vpack.c.bf16 %v17173_v35, %v17172_v43  ;;  %v19061_v28 = vld [vmem:[#allocation2 + $0x150] sm:$0xff] }
 0x2b5   :  { %15166 = vmatprep.subr.bf16.mxu0 %v16213_v55  ;;  %v17180_v43 = vld [vmem:[#allocation2 + $0x42] sm:$0xff] }
 0x2b8   :  { %15167 = vmatpush3.bf16.msra.mxu0 %v16213_v55  ;;  %v17171_v55 = vld [vmem:[#allocation2 + $0x110] sm:$0xff] }
 0x2b9   :  { %15168 = vmatprep.subr.bf16.mxu0 %v16214_v12  ;;  %v4315_v26 = vpack.c.bf16 %v17171_v55, %v17170_v48  ;;  %v17179_v48 = vld [vmem:[#allocation2 + $0x32] sm:$0xff] }
 0x2ba   :  { %v4714_v55 = vpack.c.bf16 %v17179_v48, %v4698_v54  ;;  %v4908_v48 = vld [vmem:[#allocation2 + $0xe3] sm:$0xff] }
 0x2bb   :  { %15153 = vmatmul.mubr.bf16.gmra.mrb[92].mxu0 %v4110_v30 }
 0x2bc   :  { %15156 = vmatprep.mubr.bf16.mxu0 %v21650_v36  ;;  %15169 = vmatpush3.bf16.msra.mxu0 %v16214_v12  ;;  %v17174_v12 = vld [vmem:[#allocation2 + $0x140] sm:$0xff]  ;;  %v21666_v36 = vpack.c.bf16 %v21664_v63, %v21665_v19 }
 0x2bd   :  { %15170 = vmatprep.subr.bf16.mxu0 %v16215_v2  ;;  %v4317_v30 = vpack.c.bf16 %v19061_v28, %v17174_v12  ;;  %v4706_v63 = vld [vmem:[#allocation2 + $0xe2] sm:$0xff] }
 0x2c0   :  { %15171 = vmatpush3.bf16.msra.mxu0 %v16215_v2  ;;  %v16227_v2 = vld [vmem:[%s21475_s3 + $0x2f8] sm:$0xff]  }
 0x2c1   :  { %15172 = vmatprep.subr.bf16.mxu0 %v16216_v23 }
 0x2c3   :  { %15157 = vmatmul.mubr.bf16.gmra.mrb[96].mxu0 %v21653_v11  ;;  %v21669_v11 = vpack.c.bf16 %v21667_v49, %v21668_v18  ;;  %v16240_v49 = vld [vmem:[%s21475_s3 + $0x360] sm:$0xff]   ;;  %v19133_v18 = vld [vmem:[#allocation2 + $0x132] sm:$0xff] }
 0x2c4   :  { %15160 = vmatprep.mubr.bf16.mxu0 %v21654_v15  ;;  %15173 = vmatpush3.bf16.msra.mxu0 %v16216_v23  ;;  %v16228_v23 = vld [vmem:[%s21475_s3 + $0x300] sm:$0xff]  }
 0x2c5   :  { %15174 = vmatprep.subr.bf16.mxu0 %v16217_v8  ;;  %v21670_v15 = vld [vmem:[#allocation30_spill] sm:$0xff] }
 0x2c8   :  { %15175 = vmatpush3.bf16.msra.mxu0 %v16217_v8  ;;  %v16229_v8 = vld [vmem:[%s21475_s3 + $0x308] sm:$0xff]  }
 0x2c9   :  { %15176 = vmatprep.subr.bf16.mxu0 %v16218_v39 }
 0x2cb   :  { %15161 = vmatmul.mubr.bf16.gmra.mrb[100].mxu0 %v4114_v38 }
 0x2cc   :  { %15177 = vmatpush3.bf16.msra.mxu0 %v16218_v39  ;;  %15180 = vmatprep.mubr.bf16.mxu0 %v21657_v22  ;;  %v21671_v39 = vld [vmem:[#allocation29_spill] sm:$0xff]  ;;  %v4515_v22 = vpack.c.bf16 %v19085_v60, %v18847_v5 }
 0x2cd   :  { %15178 = vmatprep.subr.bf16.mxu0 %v16219_v20  ;;  %v21672_v38 = vpack.c.bf16 %v21670_v15, %v21671_v39  ;;  %v17177_v5 = vld [vmem:[#allocation2 + $0x111] sm:$0xff]  ;;  %v16241_v39 = vld [vmem:[%s21475_s3 + $0x368] sm:$0xff]  }
 0x2ce   :  { %v4517_v4 = vpack.c.bf16 %v17177_v5, %v17176_v42  ;;  %v16244_v5 = vld [vmem:[%s21475_s3 + $0x380] sm:$0xff]  }
 0x2d0   :  { %15179 = vmatpush3.bf16.msra.mxu0 %v16219_v20  ;;  %v16230_v20 = vld [vmem:[%s21475_s3 + $0x310] sm:$0xff]  }
 0x2d1   :  { %15196 = vmatprep.subr.bf16.mxu0 %v16220_v50 }
 0x2d3   :  { %15181 = vmatmul.mubr.bf16.vlgmr.msra.gmra.mrb[88].mxu0 %v21660_v6  ;;  %v19095_v6 = vld [vmem:[#allocation2 + $0x131] sm:$0xff] }
 0x2d4   :  { %15184 = vmatprep.mubr.bf16.mxu0 %v21663_v27  ;;  %15197 = vmatpush3.bf16.msra.mxu0 %v16220_v50  ;;  %v16231_v50 = vld [vmem:[%s21475_s3 + $0x318] sm:$0xff]   ;;  %v16233_v27 = vld [vmem:[%s21475_s3 + $0x328] sm:$0xff]  }
 0x2d5   :  { %15198 = vmatprep.subr.bf16.mxu0 %v16221_v37 }
 0x2d8   :  { %15199 = vmatpush3.bf16.msra.mxu0 %v16221_v37  ;;  %v17175_v37 = vld [vmem:[#allocation2 + $0xf1] sm:$0xff] }
 0x2d9   :  { %15200 = vmatprep.subr.bf16.mxu0 %v16222_v33  ;;  %v4516_v31 = vpack.c.bf16 %v17175_v37, %v4504_v46  ;;  %v16242_v46 = vld [vmem:[%s21475_s3 + $0x370] sm:$0xff]  }
 0x2db   :  { %15185 = vmatmul.mubr.bf16.gmra.mrb[92].mxu0 %v4313_v53  ;;  %v16234_v53 = vld [vmem:[%s21475_s3 + $0x330] sm:$0xff]  }
 0x2dc   :  { %15188 = vmatprep.mubr.bf16.mxu0 %v4314_v62  ;;  %15201 = vmatpush3.bf16.msra.mxu0 %v16222_v33  ;;  %v17178_v33 = vld [vmem:[#allocation2 + $0x121] sm:$0xff] }
 0x2dd   :  { %15202 = vmatprep.subr.bf16.mxu0 %v16223_v41  ;;  %v4518_v44 = vpack.c.bf16 %v19095_v6, %v17178_v33 }
 0x2e0   :  { %15203 = vmatpush3.bf16.msra.mxu0 %v16223_v41  ;;  %v19104_v41 = vld [vmem:[#allocation2 + $0x151] sm:$0xff] }
 0x2e1   :  { %15204 = vmatprep.subr.bf16.mxu0 %v16224_v40  ;;  %v4519_v62 = vpack.c.bf16 %v19104_v41, %v18871_v21  ;;  %v17181_v21 = vld [vmem:[#allocation2 + $0x52] sm:$0xff] }
 0x2e2   :  { %v4715_v35 = vpack.c.bf16 %v17181_v21, %v17180_v43  ;;  %v17191_v43 = vld [vmem:[#allocation2 + $0xf3] sm:$0xff] }
 0x2e3   :  { %15189 = vmatmul.mubr.bf16.gmra.mrb[96].mxu0 %v4315_v26  ;;  %v16236_v26 = vld [vmem:[%s21475_s3 + $0x340] sm:$0xff]   ;;  %v4920_v21 = vpack.c.bf16 %v17191_v43, %v4908_v48 }
 0x2e4   :  { %15192 = vmatprep.mubr.bf16.mxu0 %v4316_v10  ;;  %15205 = vmatpush3.bf16.msra.mxu0 %v16224_v40  ;;  %v16235_v40 = vld [vmem:[%s21475_s3 + $0x338] sm:$0xff]   ;;  %v16237_v10 = vld [vmem:[%s21475_s3 + $0x348] sm:$0xff]  }
 0x2e5   :  { %15206 = vmatprep.subr.bf16.mxu0 %v16225_v7 }
 0x2e8   :  { %15207 = vmatpush3.bf16.msra.mxu0 %v16225_v7  ;;  %v19114_v7 = vld [vmem:[#allocation2 + $0x72] sm:$0xff] }
 0x2e9   :  { %15208 = vmatprep.subr.bf16.mxu0 %v16226_v61 }
 0x2eb   :  { %15193 = vmatmul.mubr.bf16.gmra.mrb[100].mxu0 %v4317_v30  ;;  %v16238_v30 = vld [vmem:[%s21475_s3 + $0x350] sm:$0xff]  }
 0x2ec   :  { %15209 = vmatpush3.bf16.msra.mxu0 %v16226_v61  ;;  %15212 = vmatprep.mubr.bf16.mxu0 %v21666_v36  ;;  %v17182_v61 = vld [vmem:[#allocation2 + $0x62] sm:$0xff]  ;;  %v16239_v36 = vld [vmem:[%s21475_s3 + $0x358] sm:$0xff]  }
 0x2ed   :  { %15210 = vmatprep.subr.bf16.mxu0 %v16227_v2  ;;  %v4716_v12 = vpack.c.bf16 %v19114_v7, %v17182_v61  ;;  %v17192_v61 = vld [vmem:[#allocation2 + $0x103] sm:$0xff] }
 0x2f0   :  { %15211 = vmatpush3.bf16.msra.mxu0 %v16227_v2  ;;  %v19123_v2 = vld [vmem:[#allocation2 + $0x92] sm:$0xff] }
 0x2f1   :  { %15228 = vmatprep.subr.bf16.mxu0 %v16228_v23  ;;  %v4717_v19 = vpack.c.bf16 %v19123_v2, %v18895_v56  ;;  %v17185_v56 = vld [vmem:[#allocation2 + $0x112] sm:$0xff] }
 0x2f3   :  { %15213 = vmatmul.mubr.bf16.vlgmr.msra.gmra.mrb[88].mxu0 %v21669_v11  ;;  %v17184_v11 = vld [vmem:[#allocation2 + $0x102] sm:$0xff] }
 0x2f4   :  { %15216 = vmatprep.mubr.bf16.mxu0 %v21672_v38  ;;  %15229 = vmatpush3.bf16.msra.mxu0 %v16228_v23  ;;  %v17183_v23 = vld [vmem:[#allocation2 + $0xf2] sm:$0xff]  ;;  %v4719_v15 = vpack.c.bf16 %v17185_v56, %v17184_v11  ;;  %v17186_v38 = vld [vmem:[#allocation2 + $0x122] sm:$0xff] }
 0x2f5   :  { %15230 = vmatprep.subr.bf16.mxu0 %v16229_v8  ;;  %v16251_v11 = vld [vmem:[%s21475_s3 + $0x3b8] sm:$0xff]  }
 0x2f6   :  { %v17195_v56 = vld [vmem:[#allocation2 + $0x34] sm:$0xff] }
 0x2f8   :  { %15231 = vmatpush3.bf16.msra.mxu0 %v16229_v8  ;;  %v4718_v8 = vpack.c.bf16 %v17183_v23, %v4706_v63  ;;  %v17194_v63 = vld [vmem:[#allocation2 + $0x123] sm:$0xff]  ;;  %v19180_v23 = vld [vmem:[#allocation2 + $0x153] sm:$0xff] }
 0x2f9   :  { %15232 = vmatprep.subr.bf16.mxu0 %v16230_v20 }
 0x2fb   :  { %15217 = vmatmul.mubr.bf16.gmra.mrb[92].mxu0 %v4515_v22  ;;  %v19142_v22 = vld [vmem:[#allocation2 + $0x152] sm:$0xff] }
 0x2fc   :  { %15220 = vmatprep.mubr.bf16.mxu0 %v4516_v31  ;;  %15233 = vmatpush3.bf16.msra.mxu0 %v16230_v20  ;;  %v4720_v20 = vpack.c.bf16 %v19133_v18, %v17186_v38  ;;  %v4721_v37 = vpack.c.bf16 %v19142_v22, %v18920_v14  ;;  %v16243_v31 = vld [vmem:[%s21475_s3 + $0x378] sm:$0xff]  }
 0x2fd   :  { %15234 = vmatprep.subr.bf16.mxu0 %v16231_v50  ;;  %v17189_v14 = vld [vmem:[#allocation2 + $0x53] sm:$0xff] }
 0x2fe   :  { %v19190_v38 = vld [vmem:[#allocation2 + $0x74] sm:$0xff] }
 0x300   :  { %15235 = vmatpush3.bf16.msra.mxu0 %v16231_v50  ;;  %v4900_v50 = vld [vmem:[#allocation2 + $0x23] sm:$0xff] }
 0x301   :  { %15236 = vmatprep.subr.bf16.mxu0 %v16232_v17 }
 0x303   :  { %15221 = vmatmul.mubr.bf16.gmra.mrb[96].mxu0 %v4517_v4  ;;  %v19152_v4 = vld [vmem:[#allocation2 + $0x73] sm:$0xff] }
 0x304   :  { %15224 = vmatprep.mubr.bf16.mxu0 %v4518_v44  ;;  %15237 = vmatpush3.bf16.msra.mxu0 %v16232_v17  ;;  %v17187_v17 = vld [vmem:[#allocation2 + $0x33] sm:$0xff]  ;;  %v16245_v44 = vld [vmem:[%s21475_s3 + $0x388] sm:$0xff]  }
 0x305   :  { %15238 = vmatprep.subr.bf16.mxu0 %v16233_v27  ;;  %v4916_v42 = vpack.c.bf16 %v17187_v17, %v4900_v50  ;;  %v16253_v50 = vld [vmem:[%s21475_s3 + $0x3c8] sm:$0xff]   ;;  %v16254_v17 = vld [vmem:[%s21475_s3 + $0x3d0] sm:$0xff]  }
 0x308   :  { %15239 = vmatpush3.bf16.msra.mxu0 %v16233_v27  ;;  %v17188_v27 = vld [vmem:[#allocation2 + $0x43] sm:$0xff] }
 0x309   :  { %15240 = vmatprep.subr.bf16.mxu0 %v16234_v53  ;;  %v4917_v33 = vpack.c.bf16 %v17189_v14, %v17188_v27  ;;  %v16255_v14 = vld [vmem:[%s21475_s3 + $0x3d8] sm:$0xff]  }
 0x30b   :  { %15225 = vmatmul.mubr.bf16.gmra.mrb[100].mxu0 %v4519_v62  ;;  %v16246_v62 = vld [vmem:[%s21475_s3 + $0x390] sm:$0xff]  }
 0x30c   :  { %15241 = vmatpush3.bf16.msra.mxu0 %v16234_v53  ;;  %15244 = vmatprep.mubr.bf16.mxu0 %v4714_v55  ;;  %v17190_v53 = vld [vmem:[#allocation2 + $0x63] sm:$0xff] }
 0x30d   :  { %15242 = vmatprep.subr.bf16.mxu0 %v16235_v40  ;;  %v4918_v54 = vpack.c.bf16 %v19152_v4, %v17190_v53  ;;  %v16256_v53 = vld [vmem:[%s21475_s3 + $0x3e0] sm:$0xff]  }
 0x310   :  { %15243 = vmatpush3.bf16.msra.mxu0 %v16235_v40  ;;  %v19161_v40 = vld [vmem:[#allocation2 + $0x93] sm:$0xff] }
 0x311   :  { %15260 = vmatprep.subr.bf16.mxu0 %v16236_v26  ;;  %v4919_v55 = vpack.c.bf16 %v19161_v40, %v18945_v52  ;;  %v17193_v52 = vld [vmem:[#allocation2 + $0x113] sm:$0xff] }
 0x313   :  { %15245 = vmatmul.mubr.bf16.vlgmr.msra.gmra.mrb[88].mxu0 %v4715_v35  ;;  %v16248_v35 = vld [vmem:[%s21475_s3 + $0x3a0] sm:$0xff]  }
 0x314   :  { %15248 = vmatprep.mubr.bf16.mxu0 %v4716_v12  ;;  %15261 = vmatpush3.bf16.msra.mxu0 %v16236_v26  ;;  %v16247_v26 = vld [vmem:[%s21475_s3 + $0x398] sm:$0xff]   ;;  %v4921_v12 = vpack.c.bf16 %v17193_v52, %v17192_v61  ;;  %v5305_v52 = vld [vmem:[#allocation2 + $0x30] sm:$0xff] }
 0x315   :  { %15262 = vmatprep.subr.bf16.mxu0 %v16237_v10 }
 0x318   :  { %15263 = vmatpush3.bf16.msra.mxu0 %v16237_v10  ;;  %v19171_v10 = vld [vmem:[#allocation2 + $0x133] sm:$0xff] }
 0x319   :  { %15264 = vmatprep.subr.bf16.mxu0 %v16238_v30 }
 0x31b   :  { %15249 = vmatmul.mubr.bf16.gmra.mrb[92].mxu0 %v4717_v19  ;;  %v4922_v19 = vpack.c.bf16 %v19171_v10, %v17194_v63 }
 0x31c   :  { %15252 = vmatprep.mubr.bf16.mxu0 %v4718_v8  ;;  %15265 = vmatpush3.bf16.msra.mxu0 %v16238_v30  ;;  %v16249_v30 = vld [vmem:[%s21475_s3 + $0x3a8] sm:$0xff]  }
 0x31d   :  { %15266 = vmatprep.subr.bf16.mxu0 %v16239_v36  ;;  %v5102_v8 = vld [vmem:[#allocation2 + $0x24] sm:$0xff] }
 0x320   :  { %15267 = vmatpush3.bf16.msra.mxu0 %v16239_v36  ;;  %v16250_v36 = vld [vmem:[%s21475_s3 + $0x3b0] sm:$0xff]  }
 0x321   :  { %15268 = vmatprep.subr.bf16.mxu0 %v16240_v49 }
 0x323   :  { %15253 = vmatmul.mubr.bf16.gmra.mrb[96].mxu0 %v4719_v15  ;;  %v5118_v15 = vpack.c.bf16 %v17195_v56, %v5102_v8  ;;  %v17205_v8 = vld [vmem:[#allocation2 + $0x60] sm:$0xff]  ;;  %v17206_v56 = vld [vmem:[#allocation2 + $0x70] sm:$0xff] }
 0x324   :  { %15256 = vmatprep.mubr.bf16.mxu0 %v4720_v20  ;;  %15269 = vmatpush3.bf16.msra.mxu0 %v16240_v49  ;;  %v4923_v49 = vpack.c.bf16 %v19180_v23, %v18970_v3  ;;  %v17196_v20 = vld [vmem:[#allocation2 + $0x44] sm:$0xff]  ;;  %v17197_v3 = vld [vmem:[#allocation2 + $0x54] sm:$0xff] }
 0x325   :  { %15270 = vmatprep.subr.bf16.mxu0 %v16241_v39 }
 0x328   :  { %15271 = vmatpush3.bf16.msra.mxu0 %v16241_v39  ;;  %v16252_v39 = vld [vmem:[%s21475_s3 + $0x3c0] sm:$0xff]  }
 0x329   :  { %15272 = vmatprep.subr.bf16.mxu0 %v16242_v46 }
 0x32b   :  { %15257 = vmatmul.mubr.bf16.gmra.mrb[100].mxu0 %v4721_v37  ;;  %v17198_v37 = vld [vmem:[#allocation2 + $0x64] sm:$0xff] }
 0x32c   :  { %15273 = vmatpush3.bf16.msra.mxu0 %v16242_v46  ;;  %15276 = vmatprep.mubr.bf16.mxu0 %v4916_v42  ;;  %v5119_v46 = vpack.c.bf16 %v17197_v3, %v17196_v20  ;;  %v19199_v42 = vld [vmem:[#allocation2 + $0x94] sm:$0xff]  ;;  %v19237_v20 = vld [vmem:[#allocation2 + $0xa0] sm:$0xff] }
 0x32d   :  { %15274 = vmatprep.subr.bf16.mxu0 %v16243_v31  ;;  %v5121_v27 = vpack.c.bf16 %v19199_v42, %v18995_v47  ;;  %v17201_v47 = vld [vmem:[#allocation2 + $0x114] sm:$0xff]  ;;  %v5324_v3 = vpack.c.bf16 %v19237_v20, %v19045_v24  ;;  %v16265_v24 = vld [vmem:[%s21475_s3 + $0x428] sm:$0xff]  }
 0x330   :  { %15275 = vmatpush3.bf16.msra.mxu0 %v16243_v31  ;;  %v5120_v31 = vpack.c.bf16 %v19190_v38, %v17198_v37  ;;  %v21674_v37 = vld [vmem:[#allocation34_spill] sm:$0xff] }
 0x331   :  { %15292 = vmatprep.subr.bf16.mxu0 %v16244_v5 }
 0x333   :  { %15277 = vmatmul.mubr.bf16.vlgmr.msra.gmra.mrb[88].mxu0 %v4917_v33  ;;  %v17199_v33 = vld [vmem:[#allocation2 + $0xf4] sm:$0xff] }
 0x334   :  { %15280 = vmatprep.mubr.bf16.mxu0 %v4918_v54  ;;  %15293 = vmatpush3.bf16.msra.mxu0 %v16244_v5  ;;  %v5110_v5 = vld [vmem:[#allocation2 + $0xe4] sm:$0xff]  ;;  %v19209_v54 = vld [vmem:[#allocation2 + $0x134] sm:$0xff] }
 0x335   :  { %15294 = vmatprep.subr.bf16.mxu0 %v16245_v44 }
 0x338   :  { %15295 = vmatpush3.bf16.msra.mxu0 %v16245_v44  ;;  %v5122_v44 = vpack.c.bf16 %v17199_v33, %v5110_v5  ;;  %v21676_v5 = vld [vmem:[#allocation39_spill] sm:$0xff]  ;;  %v21679_v33 = vld [vmem:[#allocation48_spill] sm:$0xff] }
 0x339   :  { %15296 = vmatprep.subr.bf16.mxu0 %v16246_v62 }
 0x33b   :  { %15281 = vmatmul.mubr.bf16.gmra.mrb[92].mxu0 %v4919_v55  ;;  %v16257_v55 = vld [vmem:[%s21475_s3 + $0x3e8] sm:$0xff]  }
 0x33c   :  { %15284 = vmatprep.mubr.bf16.mxu0 %v4920_v21  ;;  %15297 = vmatpush3.bf16.msra.mxu0 %v16246_v62  ;;  %v17200_v62 = vld [vmem:[#allocation2 + $0x104] sm:$0xff]  ;;  %v16258_v21 = vld [vmem:[%s21475_s3 + $0x3f0] sm:$0xff]  }
 0x33d   :  { %15298 = vmatprep.subr.bf16.mxu0 %v16247_v26  ;;  %v5123_v48 = vpack.c.bf16 %v17201_v47, %v17200_v62  ;;  %v19262_v62 = vld [vmem:[#allocation2 + $0x160] sm:$0xff] }
 0x33e   :  { %v5328_v47 = vpack.c.bf16 %v19262_v62, %v19061_v28  ;;  %v17208_v28 = vld [vmem:[#allocation2 + $0x51] sm:$0xff] }
 0x340   :  { %15299 = vmatpush3.bf16.msra.mxu0 %v16247_v26  ;;  %v17202_v26 = vld [vmem:[#allocation2 + $0x124] sm:$0xff] }
 0x341   :  { %15300 = vmatprep.subr.bf16.mxu0 %v16248_v35  ;;  %v5124_v43 = vpack.c.bf16 %v19209_v54, %v17202_v26 }
 0x343   :  { %15285 = vmatmul.mubr.bf16.gmra.mrb[96].mxu0 %v4921_v12  ;;  %v16259_v12 = vld [vmem:[%s21475_s3 + $0x3f8] sm:$0xff]  }
 0x344   :  { %15288 = vmatprep.mubr.bf16.mxu0 %v4922_v19  ;;  %15301 = vmatpush3.bf16.msra.mxu0 %v16248_v35  ;;  %v19218_v35 = vld [vmem:[#allocation2 + $0x154] sm:$0xff]  ;;  %v16260_v19 = vld [vmem:[%s21475_s3 + $0x400] sm:$0xff]  }
 0x345   :  { %15302 = vmatprep.subr.bf16.mxu0 %v16249_v30  ;;  %v5125_v61 = vpack.c.bf16 %v19218_v35, %v19020_v0  ;;  %v17204_v0 = vld [vmem:[#allocation2 + $0x50] sm:$0xff] }
 0x348   :  { %15303 = vmatpush3.bf16.msra.mxu0 %v16249_v30  ;;  %v17203_v30 = vld [vmem:[#allocation2 + $0x40] sm:$0xff] }
 0x349   :  { %15304 = vmatprep.subr.bf16.mxu0 %v16250_v36  ;;  %v5321_v63 = vpack.c.bf16 %v17203_v30, %v5305_v52  ;;  %v17210_v30 = vld [vmem:[#allocation2 + $0x71] sm:$0xff] }
 0x34b   :  { %15289 = vmatmul.mubr.bf16.gmra.mrb[100].mxu0 %v4923_v49  ;;  %v5322_v49 = vpack.c.bf16 %v17205_v8, %v17204_v0  ;;  %v19281_v0 = vld [vmem:[#allocation2 + $0xa1] sm:$0xff] }
 0x34c   :  { %15305 = vmatpush3.bf16.msra.mxu0 %v16250_v36  ;;  %15308 = vmatprep.mubr.bf16.mxu0 %v5118_v15  ;;  %v19228_v36 = vld [vmem:[#allocation2 + $0x80] sm:$0xff]  ;;  %v5526_v8 = vpack.c.bf16 %v19281_v0, %v19085_v60  ;;  %v16273_v60 = vld [vmem:[%s21475_s3 + $0x468] sm:$0xff]  }
 0x34d   :  { %15306 = vmatprep.subr.bf16.mxu0 %v16251_v11  ;;  %v5323_v15 = vpack.c.bf16 %v19228_v36, %v17206_v56  ;;  %v21682_v56 = vld [vmem:[#allocation40_spill] sm:$0xff] }
 0x350   :  { %15307 = vmatpush3.bf16.msra.mxu0 %v16251_v11  ;;  %v16261_v11 = vld [vmem:[%s21475_s3 + $0x408] sm:$0xff]  }
 0x351   :  { %15324 = vmatprep.subr.bf16.mxu0 %v16252_v39 }
 0x353   :  { %15309 = vmatmul.mubr.bf16.vlgmr.msra.gmra.mrb[88].mxu0 %v5119_v46  ;;  %v16263_v46 = vld [vmem:[%s21475_s3 + $0x418] sm:$0xff]  }
 0x354   :  { %15312 = vmatprep.mubr.bf16.mxu0 %v5120_v31  ;;  %15325 = vmatpush3.bf16.msra.mxu0 %v16252_v39  ;;  %v16262_v39 = vld [vmem:[%s21475_s3 + $0x410] sm:$0xff]  }
 0x355   :  { %15326 = vmatprep.subr.bf16.mxu0 %v16253_v50 }
 0x358   :  { %15327 = vmatpush3.bf16.msra.mxu0 %v16253_v50  ;;  %v21673_v50 = vld [vmem:[#allocation33_spill] sm:$0xff] }
 0x359   :  { %15328 = vmatprep.subr.bf16.mxu0 %v16254_v17  ;;  %v21675_v31 = vpack.c.bf16 %v21673_v50, %v21674_v37  ;;  %v21684_v50 = vld [vmem:[#allocation41_spill] sm:$0xff] }
 0x35a   :  { %v21685_v37 = vld [vmem:[#allocation45_spill] sm:$0xff] }
 0x35b   :  { %15313 = vmatmul.mubr.bf16.gmra.mrb[92].mxu0 %v5121_v27  ;;  %v21677_v27 = vld [vmem:[#allocation38_spill] sm:$0xff] }
 0x35c   :  { %15316 = vmatprep.mubr.bf16.mxu0 %v5122_v44  ;;  %15329 = vmatpush3.bf16.msra.mxu0 %v16254_v17  ;;  %v16264_v17 = vld [vmem:[%s21475_s3 + $0x420] sm:$0xff]   ;;  %v21680_v44 = vpack.c.bf16 %v18556_v13, %v21679_v33 }
 0x35d   :  { %15330 = vmatprep.subr.bf16.mxu0 %v16255_v14  ;;  %v17207_v13 = vld [vmem:[#allocation2 + $0x41] sm:$0xff] }
 0x360   :  { %15331 = vmatpush3.bf16.msra.mxu0 %v16255_v14  ;;  %v21678_v14 = vpack.c.bf16 %v21676_v5, %v21677_v27  ;;  %v21687_v27 = vld [vmem:[#allocation42_spill] sm:$0xff] }
 0x361   :  { %15332 = vmatprep.subr.bf16.mxu0 %v16256_v53 }
 0x363   :  { %15317 = vmatmul.mubr.bf16.gmra.mrb[96].mxu0 %v5123_v48  ;;  %v5507_v48 = vld [vmem:[#allocation2 + $0x31] sm:$0xff] }
 0x364   :  { %15320 = vmatprep.mubr.bf16.mxu0 %v5124_v43  ;;  %15333 = vmatpush3.bf16.msra.mxu0 %v16256_v53  ;;  %v16266_v53 = vld [vmem:[%s21475_s3 + $0x430] sm:$0xff]   ;;  %v5523_v26 = vpack.c.bf16 %v17207_v13, %v5507_v48  ;;  %v16268_v43 = vld [vmem:[%s21475_s3 + $0x440] sm:$0xff]  }
 0x365   :  { %15334 = vmatprep.subr.bf16.mxu0 %v16257_v55  ;;  %v21690_v48 = vld [vmem:[#allocation44_spill] sm:$0xff] }
 0x368   :  { %15335 = vmatpush3.bf16.msra.mxu0 %v16257_v55  ;;  %v16267_v55 = vld [vmem:[%s21475_s3 + $0x438] sm:$0xff]  }
 0x369   :  { %15336 = vmatprep.subr.bf16.mxu0 %v16258_v21 }
 0x36b   :  { %15321 = vmatmul.mubr.bf16.gmra.mrb[100].mxu0 %v5125_v61  ;;  %v17209_v61 = vld [vmem:[#allocation2 + $0x61] sm:$0xff] }
 0x36c   :  { %15337 = vmatpush3.bf16.msra.mxu0 %v16258_v21  ;;  %15340 = vmatprep.mubr.bf16.mxu0 %v5321_v63  ;;  %v19272_v21 = vld [vmem:[#allocation2 + $0x81] sm:$0xff]  ;;  %v5524_v52 = vpack.c.bf16 %v17209_v61, %v17208_v28 }
 0x36d   :  { %15338 = vmatprep.subr.bf16.mxu0 %v16259_v12  ;;  %v5525_v63 = vpack.c.bf16 %v19272_v21, %v17210_v30  ;;  %v21693_v61 = vld [vmem:[#allocation46_spill] sm:$0xff] }
 0x36e   :  { %v16280_v30 = vld [vmem:[%s21475_s3 + $0x4a0] sm:$0xff]  }
 0x370   :  { %15339 = vmatpush3.bf16.msra.mxu0 %v16259_v12  ;;  %v16269_v12 = vld [vmem:[%s21475_s3 + $0x448] sm:$0xff]  }
 0x371   :  { %15356 = vmatprep.subr.bf16.mxu0 %v16260_v19 }
 0x373   :  { %15341 = vmatmul.mubr.bf16.vlgmr.msra.gmra.mrb[88].mxu0 %v5322_v49  ;;  %v16271_v49 = vld [vmem:[%s21475_s3 + $0x458] sm:$0xff]  }
 0x374   :  { %15344 = vmatprep.mubr.bf16.mxu0 %v5323_v15  ;;  %15357 = vmatpush3.bf16.msra.mxu0 %v16260_v19  ;;  %v16270_v19 = vld [vmem:[%s21475_s3 + $0x450] sm:$0xff]  }
 0x375   :  { %15358 = vmatprep.subr.bf16.mxu0 %v16261_v11 }
 0x378   :  { %15359 = vmatpush3.bf16.msra.mxu0 %v16261_v11  ;;  %v21681_v11 = vld [vmem:[#allocation37_spill] sm:$0xff] }
 0x379   :  { %15360 = vmatprep.subr.bf16.mxu0 %v16262_v39  ;;  %v21683_v15 = vpack.c.bf16 %v21681_v11, %v21682_v56  ;;  %v16282_v56 = vld [vmem:[%s21475_s3 + $0x4b0] sm:$0xff]  }
 0x37b   :  { %15345 = vmatmul.mubr.bf16.gmra.mrb[92].mxu0 %v5324_v3  ;;  %v19294_v3 = vld [vmem:[#allocation2 + $0x141] sm:$0xff] }
 0x37c   :  { %15348 = vmatprep.mubr.bf16.mxu0 %v21675_v31  ;;  %15361 = vmatpush3.bf16.msra.mxu0 %v16262_v39  ;;  %v16272_v39 = vld [vmem:[%s21475_s3 + $0x460] sm:$0xff]   ;;  %v21686_v31 = vpack.c.bf16 %v21684_v50, %v21685_v37 }
 0x37d   :  { %15362 = vmatprep.subr.bf16.mxu0 %v16263_v46  ;;  %v16284_v50 = vld [vmem:[%s21475_s3 + $0x4c0] sm:$0xff]  }
 0x37e   :  { %v19372_v37 = vld [vmem:[#allocation2 + $0x83] sm:$0xff] }
 0x380   :  { %15363 = vmatpush3.bf16.msra.mxu0 %v16263_v46  ;;  %v5529_v46 = vpack.c.bf16 %v19294_v3, %v19095_v6  ;;  %v16275_v6 = vld [vmem:[%s21475_s3 + $0x478] sm:$0xff]  }
 0x381   :  { %15364 = vmatprep.subr.bf16.mxu0 %v16264_v17 }
 0x383   :  { %15349 = vmatmul.mubr.bf16.gmra.mrb[96].mxu0 %v21678_v14  ;;  %v21688_v14 = vld [vmem:[#allocation43_spill] sm:$0xff] }
 0x384   :  { %15352 = vmatprep.mubr.bf16.mxu0 %v21680_v44  ;;  %15365 = vmatpush3.bf16.msra.mxu0 %v16264_v17  ;;  %v16274_v17 = vld [vmem:[%s21475_s3 + $0x470] sm:$0xff]   ;;  %v21689_v33 = vpack.c.bf16 %v21687_v27, %v21688_v14  ;;  %v16276_v44 = vld [vmem:[%s21475_s3 + $0x480] sm:$0xff]  }
 0x385   :  { %15366 = vmatprep.subr.bf16.mxu0 %v16265_v24  ;;  %v19385_v27 = vld [vmem:[#allocation2 + $0xa3] sm:$0xff] }
 0x386   :  { %v5930_v14 = vpack.c.bf16 %v19385_v27, %v19161_v40  ;;  %v16289_v40 = vld [vmem:[%s21475_s3 + $0x4e8] sm:$0xff]  }
 0x388   :  { %15367 = vmatpush3.bf16.msra.mxu0 %v16265_v24  ;;  %v19307_v24 = vld [vmem:[#allocation2 + $0x161] sm:$0xff] }
 0x389   :  { %15368 = vmatprep.subr.bf16.mxu0 %v16266_v53  ;;  %v5530_v5 = vpack.c.bf16 %v19307_v24, %v19104_v41  ;;  %v16277_v41 = vld [vmem:[%s21475_s3 + $0x488] sm:$0xff]  }
 0x38b   :  { %15353 = vmatmul.mubr.bf16.gmra.mrb[100].mxu0 %v5328_v47 }
 0x38c   :  { %15369 = vmatpush3.bf16.msra.mxu0 %v16266_v53  ;;  %15372 = vmatprep.mubr.bf16.mxu0 %v5523_v26  ;;  %v19320_v53 = vld [vmem:[#allocation2 + $0x82] sm:$0xff]  ;;  %v16278_v26 = vld [vmem:[%s21475_s3 + $0x490] sm:$0xff]  }
 0x38d   :  { %15370 = vmatprep.subr.bf16.mxu0 %v16267_v55  ;;  %v5727_v47 = vpack.c.bf16 %v19320_v53, %v19114_v7  ;;  %v16279_v7 = vld [vmem:[%s21475_s3 + $0x498] sm:$0xff]  }
 0x390   :  { %15371 = vmatpush3.bf16.msra.mxu0 %v16267_v55  ;;  %v21691_v55 = vld [vmem:[#allocation49_spill] sm:$0xff] }
 0x391   :  { %15388 = vmatprep.subr.bf16.mxu0 %v16268_v43  ;;  %v21692_v13 = vpack.c.bf16 %v21690_v48, %v21691_v55  ;;  %v19398_v48 = vld [vmem:[#allocation2 + $0x143] sm:$0xff] }
 0x392   :  { %v5933_v55 = vpack.c.bf16 %v19398_v48, %v19171_v10  ;;  %v16291_v10 = vld [vmem:[%s21475_s3 + $0x4f8] sm:$0xff]  }
 0x393   :  { %15373 = vmatmul.mubr.bf16.vlgmr.msra.gmra.mrb[88].mxu0 %v5524_v52  ;;  %v21694_v52 = vld [vmem:[#allocation50_spill] sm:$0xff] }
 0x394   :  { %15376 = vmatprep.mubr.bf16.mxu0 %v5525_v63  ;;  %15389 = vmatpush3.bf16.msra.mxu0 %v16268_v43  ;;  %v19333_v43 = vld [vmem:[#allocation2 + $0xa2] sm:$0xff] }
 0x395   :  { %15390 = vmatprep.subr.bf16.mxu0 %v16269_v12  ;;  %v5728_v28 = vpack.c.bf16 %v19333_v43, %v19123_v2  ;;  %v19346_v63 = vld [vmem:[#allocation2 + $0x142] sm:$0xff] }
 0x396   :  { %v16281_v2 = vld [vmem:[%s21475_s3 + $0x4a8] sm:$0xff]  }
 0x398   :  { %15391 = vmatpush3.bf16.msra.mxu0 %v16269_v12  ;;  %v21695_v12 = vpack.c.bf16 %v21693_v61, %v21694_v52  ;;  %v19424_v61 = vld [vmem:[#allocation2 + $0x84] sm:$0xff] }
 0x399   :  { %15392 = vmatprep.subr.bf16.mxu0 %v16270_v19  ;;  %v6131_v52 = vpack.c.bf16 %v19424_v61, %v19190_v38  ;;  %v16295_v38 = vld [vmem:[%s21475_s3 + $0x518] sm:$0xff]  }
 0x39b   :  { %15377 = vmatmul.mubr.bf16.gmra.mrb[92].mxu0 %v5526_v8  ;;  %v21696_v8 = vld [vmem:[#allocation47_spill] sm:$0xff] }
 0x39c   :  { %15380 = vmatprep.mubr.bf16.mxu0 %v21683_v15  ;;  %15393 = vmatpush3.bf16.msra.mxu0 %v16270_v19  ;;  %v5731_v19 = vpack.c.bf16 %v19346_v63, %v19133_v18  ;;  %v19359_v15 = vld [vmem:[#allocation2 + $0x162] sm:$0xff]  ;;  %v16283_v18 = vld [vmem:[%s21475_s3 + $0x4b8] sm:$0xff]  }
 0x39d   :  { %15394 = vmatprep.subr.bf16.mxu0 %v16271_v49 }
 0x3a0   :  { %15395 = vmatpush3.bf16.msra.mxu0 %v16271_v49  ;;  %v21697_v49 = vld [vmem:[#allocation51_spill] sm:$0xff] }
 0x3a1   :  { %15396 = vmatprep.subr.bf16.mxu0 %v16272_v39  ;;  %v21698_v11 = vpack.c.bf16 %v21696_v8, %v21697_v49  ;;  %v16298_v8 = vld [vmem:[%s21475_s3 + $0x530] sm:$0xff]   ;;  %v19463_v49 = vld [vmem:[#allocation2 + $0x164] sm:$0xff] }
 0x3a3   :  { %15381 = vmatmul.mubr.bf16.gmra.mrb[96].mxu0 %v21686_v31  ;;  %v5929_v31 = vpack.c.bf16 %v19372_v37, %v19152_v4  ;;  %v16287_v4 = vld [vmem:[%s21475_s3 + $0x4d8] sm:$0xff]  }
 0x3a4   :  { %15384 = vmatprep.mubr.bf16.mxu0 %v5529_v46  ;;  %15397 = vmatpush3.bf16.msra.mxu0 %v16272_v39  ;;  %v5732_v39 = vpack.c.bf16 %v19359_v15, %v19142_v22  ;;  %v16285_v22 = vld [vmem:[%s21475_s3 + $0x4c8] sm:$0xff]  }
 0x3a5   :  { %15398 = vmatprep.subr.bf16.mxu0 %v16273_v60 }
 0x3a8   :  { %15399 = vmatpush3.bf16.msra.mxu0 %v16273_v60  ;;  %v21699_v60 = vld [vmem:[#allocation52_spill] sm:$0xff] }
 0x3a9   :  { %15400 = vmatprep.subr.bf16.mxu0 %v16274_v17  ;;  %v21700_v46 = vpack.c.bf16 %v18578_v25, %v21699_v60  ;;  %v21714_v60 = vld [vmem:[#allocation58_spill] sm:$0xff] }
 0x3ab   :  { %15385 = vmatmul.mubr.bf16.gmra.mrb[100].mxu0 %v5530_v5  ;;  %v21702_v5 = vld [vmem:[#allocation54_spill] sm:$0xff] }
 0x3ac   :  { %15401 = vmatpush3.bf16.msra.mxu0 %v16274_v17  ;;  %15404 = vmatprep.mubr.bf16.mxu0 %v21689_v33  ;;  %v21701_v17 = vld [vmem:[#allocation53_spill] sm:$0xff]  ;;  %v21704_v33 = vld [vmem:[#allocation55_spill] sm:$0xff] }
 0x3ad   :  { %15402 = vmatprep.subr.bf16.mxu0 %v16275_v6  ;;  %v21703_v25 = vpack.c.bf16 %v21701_v17, %v21702_v5 }
 0x3b0   :  { %15403 = vmatpush3.bf16.msra.mxu0 %v16275_v6  ;;  %v16286_v6 = vld [vmem:[%s21475_s3 + $0x4d0] sm:$0xff]  }
 0x3b1   :  { %15420 = vmatprep.subr.bf16.mxu0 %v16276_v44 }
 0x3b3   :  { %15405 = vmatmul.mubr.bf16.vlgmr.msra.gmra.mrb[88].mxu0 %v21692_v13  ;;  %v21707_v13 = vpack.c.bf16 %v18592_v59, %v18621_v9  ;;  %v21708_v59 = vpack.c.bf16 %v18590_v45, %v18594_v57  ;;  %v16292_v9 = vld [vmem:[%s21475_s3 + $0x500] sm:$0xff]   ;;  %v21709_v45 = vpack.c.bf16 %v18598_v29, %v18596_v16  ;;  %v16294_v57 = vld [vmem:[%s21475_s3 + $0x510] sm:$0xff]   ;;  %v21710_v29 = vpack.c.bf16 %v18609_v34, %v18632_v1 }
 0x3b4   :  { %15408 = vmatprep.mubr.bf16.mxu0 %v5727_v47  ;;  %15421 = vmatpush3.bf16.msra.mxu0 %v16276_v44  ;;  %v21705_v44 = vld [vmem:[#allocation56_spill] sm:$0xff]  ;;  %v16288_v47 = vld [vmem:[%s21475_s3 + $0x4e0] sm:$0xff]  }
 0x3b5   :  { %15422 = vmatprep.subr.bf16.mxu0 %v16277_v41  ;;  %v16296_v16 = vld [vmem:[%s21475_s3 + $0x520] sm:$0xff]  }
 0x3b6   :  { %v21711_v1 = vld [vmem:[#allocation59_spill] sm:$0xff] }
 0x3b7   :  { %v21712_v34 = vpack.c.bf16 %v18611_v32, %v21711_v1  ;;  %v21713_v32 = vpack.c.bf16 %v18602_v58, %v18600_v51  ;;  %v16302_v51 = vld [vmem:[%s21475_s3 + $0x550] sm:$0xff]  }
 0x3b8   :  { %15423 = vmatpush3.bf16.msra.mxu0 %v16277_v41  ;;  %v21706_v41 = vpack.c.bf16 %v21704_v33, %v21705_v44  ;;  %v6323_v58 = vld [vmem:[#allocation2 + $0xb0] sm:$0xff]  ;;  %v16305_v44 = vld [vmem:[%s21475_s3 + $0x568] sm:$0xff]  }
 0x3b9   :  { %15424 = vmatprep.subr.bf16.mxu0 %v16278_v26  ;;  %v6335_v17 = vpack.c.bf16 %v6323_v58, %v19237_v20  ;;  %v6329_v33 = vld [vmem:[#allocation2 + $0x150] sm:$0xff]  ;;  %v16313_v58 = vld [vmem:[%s21475_s3 + $0x5a8] sm:$0xff]  }
 0x3ba   :  { %v16343_v1 = vld [vmem:[%s21477_s5 + $0x164] ss:$16 sps:$4 sm:$0xff]  }
 0x3bb   :  { %15409 = vmatmul.mubr.bf16.gmra.mrb[92].mxu0 %v5728_v28  ;;  %v19411_v28 = vld [vmem:[#allocation2 + $0x163] sm:$0xff] }
 0x3bc   :  { %15412 = vmatprep.mubr.bf16.mxu0 %v21695_v12  ;;  %15425 = vmatpush3.bf16.msra.mxu0 %v16278_v26  ;;  %v16290_v26 = vld [vmem:[%s21475_s3 + $0x4f0] sm:$0xff]   ;;  %v19437_v12 = vld [vmem:[#allocation2 + $0xa4] sm:$0xff] }
 0x3bd   :  { %15426 = vmatprep.subr.bf16.mxu0 %v16279_v7 }
 0x3c0   :  { %15427 = vmatpush3.bf16.msra.mxu0 %v16279_v7  ;;  %v5934_v7 = vpack.c.bf16 %v19411_v28, %v19180_v23  ;;  %v16293_v23 = vld [vmem:[%s21475_s3 + $0x508] sm:$0xff]  }
 0x3c1   :  { %15428 = vmatprep.subr.bf16.mxu0 %v16280_v30 }
 0x3c3   :  { %15413 = vmatmul.mubr.bf16.gmra.mrb[96].mxu0 %v21698_v11  ;;  %v6136_v11 = vpack.c.bf16 %v19463_v49, %v19218_v35  ;;  %v16301_v35 = vld [vmem:[%s21475_s3 + $0x548] sm:$0xff]  }
 0x3c4   :  { %15416 = vmatprep.mubr.bf16.mxu0 %v5731_v19  ;;  %15429 = vmatpush3.bf16.msra.mxu0 %v16280_v30  ;;  %v6132_v30 = vpack.c.bf16 %v19437_v12, %v19199_v42  ;;  %v16297_v42 = vld [vmem:[%s21475_s3 + $0x528] sm:$0xff]  }
 0x3c5   :  { %15430 = vmatprep.subr.bf16.mxu0 %v16281_v2 }
 0x3c8   :  { %15431 = vmatpush3.bf16.msra.mxu0 %v16281_v2  ;;  %v19450_v2 = vld [vmem:[#allocation2 + $0x144] sm:$0xff] }
 0x3c9   :  { %15432 = vmatprep.subr.bf16.mxu0 %v16282_v56  ;;  %v6135_v19 = vpack.c.bf16 %v19450_v2, %v19209_v54  ;;  %v16299_v54 = vld [vmem:[%s21475_s3 + $0x538] sm:$0xff]  }
 0x3cb   :  { %15417 = vmatmul.mubr.bf16.gmra.mrb[100].mxu0 %v5732_v39  ;;  %v6321_v39 = vld [vmem:[#allocation2 + $0x90] sm:$0xff] }
 0x3cc   :  { %15433 = vmatpush3.bf16.msra.mxu0 %v16282_v56  ;;  %15436 = vmatprep.mubr.bf16.mxu0 %v21700_v46  ;;  %v16300_v56 = vld [vmem:[%s21475_s3 + $0x540] sm:$0xff]   ;;  %v21715_v46 = vld [vmem:[#allocation57_spill] sm:$0xff] }
 0x3cd   :  { %15434 = vmatprep.subr.bf16.mxu0 %v16283_v18 }
 0x3d0   :  { %15435 = vmatpush3.bf16.msra.mxu0 %v16283_v18  ;;  %v6334_v18 = vpack.c.bf16 %v6321_v39, %v19228_v36  ;;  %v16303_v36 = vld [vmem:[%s21475_s3 + $0x558] sm:$0xff]  }
 0x3d1   :  { %15452 = vmatprep.subr.bf16.mxu0 %v16284_v50  ;;  %v16311_v39 = vld [vmem:[%s21475_s3 + $0x598] sm:$0xff]  }
 0x3d3   :  { %15437 = vmatmul.mubr.bf16.vlgmr.msra.gmra.mrb[88].mxu0 %v21703_v25  ;;  %v16304_v25 = vld [vmem:[%s21475_s3 + $0x560] sm:$0xff]  }
 0x3d4   :  { %15440 = vmatprep.mubr.bf16.mxu0 %v5929_v31  ;;  %15453 = vmatpush3.bf16.msra.mxu0 %v16284_v50  ;;  %v21716_v50 = vpack.c.bf16 %v21714_v60, %v21715_v46  ;;  %v6325_v31 = vld [vmem:[#allocation2 + $0x110] sm:$0xff]  ;;  %v6528_v60 = vld [vmem:[#allocation2 + $0x121] sm:$0xff] }
 0x3d5   :  { %15454 = vmatprep.subr.bf16.mxu0 %v16285_v22  ;;  %v6529_v46 = vld [vmem:[#allocation2 + $0x131] sm:$0xff] }
 0x3d8   :  { %15455 = vmatpush3.bf16.msra.mxu0 %v16285_v22  ;;  %v6324_v22 = vld [vmem:[#allocation2 + $0x100] sm:$0xff] }
 0x3d9   :  { %15456 = vmatprep.subr.bf16.mxu0 %v16286_v6  ;;  %v6336_v5 = vpack.c.bf16 %v6325_v31, %v6324_v22  ;;  %v16314_v31 = vld [vmem:[%s21475_s3 + $0x5b0] sm:$0xff]  }
 0x3db   :  { %15441 = vmatmul.mubr.bf16.gmra.mrb[92].mxu0 %v5930_v14  ;;  %v6327_v14 = vld [vmem:[#allocation2 + $0x130] sm:$0xff] }
 0x3dc   :  { %15444 = vmatprep.mubr.bf16.mxu0 %v21706_v41  ;;  %15457 = vmatpush3.bf16.msra.mxu0 %v16286_v6  ;;  %v6326_v6 = vld [vmem:[#allocation2 + $0x120] sm:$0xff] }
 0x3dd   :  { %15458 = vmatprep.subr.bf16.mxu0 %v16287_v4  ;;  %v6337_v20 = vpack.c.bf16 %v6327_v14, %v6326_v6  ;;  %v16315_v6 = vld [vmem:[%s21475_s3 + $0x5b8] sm:$0xff]   ;;  %v16316_v14 = vld [vmem:[%s21475_s3 + $0x5c0] sm:$0xff]  }
 0x3e0   :  { %15459 = vmatpush3.bf16.msra.mxu0 %v16287_v4  ;;  %v6328_v4 = vld [vmem:[#allocation2 + $0x140] sm:$0xff] }
 0x3e1   :  { %15460 = vmatprep.subr.bf16.mxu0 %v16288_v47  ;;  %v6338_v41 = vpack.c.bf16 %v6329_v33, %v6328_v4  ;;  %v6722_v4 = vld [vmem:[#allocation2 + $0x62] sm:$0xff]  ;;  %v6723_v33 = vld [vmem:[#allocation2 + $0x72] sm:$0xff] }
 0x3e3   :  { %15445 = vmatmul.mubr.bf16.gmra.mrb[96].mxu0 %v21707_v13  ;;  %v16307_v13 = vld [vmem:[%s21475_s3 + $0x578] sm:$0xff]  }
 0x3e4   :  { %15448 = vmatprep.mubr.bf16.mxu0 %v5933_v55  ;;  %15461 = vmatpush3.bf16.msra.mxu0 %v16288_v47  ;;  %v16306_v47 = vld [vmem:[%s21475_s3 + $0x570] sm:$0xff]  }
 0x3e5   :  { %15462 = vmatprep.subr.bf16.mxu0 %v16289_v40 }
 0x3e8   :  { %15463 = vmatpush3.bf16.msra.mxu0 %v16289_v40  ;;  %v6331_v40 = vld [vmem:[#allocation2 + $0x170] sm:$0xff] }
 0x3e9   :  { %15464 = vmatprep.subr.bf16.mxu0 %v16290_v26  ;;  %v6339_v55 = vpack.c.bf16 %v6331_v40, %v19262_v62  ;;  %v16337_v62 = vld [vmem:[%s21477_s5 + $0x124] ss:$16 sps:$4 sm:$0xff]  }
 0x3ea   :  { %v6727_v40 = vld [vmem:[#allocation2 + $0xb2] sm:$0xff] }
 0x3eb   :  { %15449 = vmatmul.mubr.bf16.gmra.mrb[100].mxu0 %v5934_v7  ;;  %v16334_v7 = vld [vmem:[%s21477_s5 + $0x104] ss:$16 sps:$4 sm:$0xff]  }
 0x3ec   :  { %15465 = vmatpush3.bf16.msra.mxu0 %v16290_v26  ;;  %15468 = vmatprep.mubr.bf16.mxu0 %v21708_v59  ;;  %v16332_v26 = vld [vmem:[%s21477_s5 + $0x100] ss:$16 sps:$4 sm:$0xff]  }
 0x3ed   :  { %15466 = vmatprep.subr.bf16.mxu0 %v16291_v10  ;;  %v21718_v59 = vld [vmem:[#allocation60_spill] sm:$0xff]  ;;  %7647 = vmatprep.subr.bf16.mxu1 %v16334_v7  ;;  %v16319_v7 = vld [vmem:[%s21475_s3 + $0x5d8] sm:$0xff]  }
 0x3ee   :  { %7648 = vmatpush1.bf16.msra.mxu1 %v16332_v26  ;;  %v6739_v26 = vpack.c.bf16 %v6727_v40, %v19333_v43  ;;  %v16321_v43 = vld [vmem:[%s21475_s3 + $0x5e8] sm:$0xff]   ;;  %v7137_v40 = vld [vmem:[#allocation2 + $0x154] sm:$0xff] }
 0x3ef   :  { %7649 = vmatprep.subr.bf16.mxu1 %v16337_v62  ;;  %v6733_v62 = vld [vmem:[#allocation2 + $0x152] sm:$0xff] }
 0x3f0   :  { %15467 = vmatpush3.bf16.msra.mxu0 %v16291_v10  ;;  %v21717_v10 = vld [vmem:[#allocation61_spill] sm:$0xff] }
 0x3f1   :  { %15484 = vmatprep.subr.bf16.mxu0 %v16292_v9 }
 0x3f3   :  { %15469 = vmatmul.mubr.bf16.vlgmr.msra.gmra.mrb[88].mxu0 %v21709_v45  ;;  %v6523_v45 = vld [vmem:[#allocation2 + $0x91] sm:$0xff] }
 0x3f4   :  { %15472 = vmatprep.mubr.bf16.mxu0 %v6131_v52  ;;  %15485 = vmatpush3.bf16.msra.mxu0 %v16292_v9  ;;  %v21719_v9 = vpack.c.bf16 %v21717_v10, %v21718_v59  ;;  %v16335_v52 = vld [vmem:[%s21477_s5 + $0x120] ss:$16 sps:$4 sm:$0xff]  }
 0x3f5   :  { %15486 = vmatprep.subr.bf16.mxu0 %v16293_v23  ;;  %7650 = vmatpush1.bf16.msra.mxu1 %v16335_v52  ;;  %v16320_v10 = vld [vmem:[%s21475_s3 + $0x5e0] sm:$0xff]   ;;  %v6742_v52 = vpack.c.bf16 %v6733_v62, %v19346_v63  ;;  %v16359_v62 = vld [vmem:[%s21477_s5 + $0xc48] ss:$16 sps:$4 sm:$0xff]  }
 0x3f6   :  { %v6730_v59 = vld [vmem:[#allocation2 + $0x122] sm:$0xff] }
 0x3f8   :  { %15487 = vmatpush3.bf16.msra.mxu0 %v16293_v23  ;;  %v16308_v23 = vld [vmem:[%s21475_s3 + $0x580] sm:$0xff]  }
 0x3f9   :  { %15488 = vmatprep.subr.bf16.mxu0 %v16294_v57 }
 0x3fb   :  { %15473 = vmatmul.mubr.bf16.gmra.mrb[92].mxu0 %v6132_v30  ;;  %v16309_v30 = vld [vmem:[%s21475_s3 + $0x588] sm:$0xff]  }
 0x3fc   :  { %15476 = vmatprep.mubr.bf16.mxu0 %v21710_v29  ;;  %15489 = vmatpush3.bf16.msra.mxu0 %v16294_v57  ;;  %v16340_v57 = vld [vmem:[%s21477_s5 + $0x144] ss:$16 sps:$4 sm:$0xff]   ;;  %v16338_v29 = vld [vmem:[%s21477_s5 + $0x140] ss:$16 sps:$4 sm:$0xff]  }
 0x3fd   :  { %15490 = vmatprep.subr.bf16.mxu0 %v16295_v38  ;;  %7651 = vmatprep.subr.bf16.mxu1 %v16340_v57  ;;  %v6735_v57 = vld [vmem:[#allocation2 + $0x172] sm:$0xff] }
 0x3fe   :  { %7652 = vmatpush1.bf16.msra.mxu1 %v16338_v29  ;;  %v6743_v29 = vpack.c.bf16 %v6735_v57, %v19359_v15  ;;  %v16325_v15 = vld [vmem:[%s21475_s3 + $0x608] sm:$0xff]  }
 0x3ff   :  { %7653 = vmatprep.subr.bf16.mxu1 %v16343_v1  ;;  %v6925_v1 = vld [vmem:[#allocation2 + $0x73] sm:$0xff] }
 0x400   :  { %15491 = vmatpush3.bf16.msra.mxu0 %v16295_v38  ;;  %v6536_v38 = vpack.c.bf16 %v6523_v45, %v19272_v21  ;;  %v16310_v21 = vld [vmem:[%s21475_s3 + $0x590] sm:$0xff]   ;;  %v16362_v57 = vld [vmem:[%s21477_s5 + $0xc68] ss:$16 sps:$4 sm:$0xff]  }
 0x401   :  { %15492 = vmatprep.subr.bf16.mxu0 %v16296_v16  ;;  %v16322_v45 = vld [vmem:[%s21475_s3 + $0x5f0] sm:$0xff]  }
 0x403   :  { %15477 = vmatmul.mubr.bf16.gmra.mrb[96].mxu0 %v21712_v34  ;;  %v6525_v34 = vld [vmem:[#allocation2 + $0xb1] sm:$0xff] }
 0x404   :  { %15480 = vmatprep.mubr.bf16.mxu0 %v6135_v19  ;;  %15493 = vmatpush3.bf16.msra.mxu0 %v16296_v16  ;;  %v21720_v16 = vld [vmem:[#allocation63_spill] sm:$0xff] }
 0x405   :  { %15494 = vmatprep.subr.bf16.mxu0 %v16297_v42 }
 0x408   :  { %15495 = vmatpush3.bf16.msra.mxu0 %v16297_v42  ;;  %v21721_v42 = vld [vmem:[#allocation62_spill] sm:$0xff] }
 0x409   :  { %15496 = vmatprep.subr.bf16.mxu0 %v16298_v8  ;;  %v21722_v19 = vpack.c.bf16 %v21720_v16, %v21721_v42  ;;  %v16323_v16 = vld [vmem:[%s21475_s3 + $0x5f8] sm:$0xff]   ;;  %v16324_v42 = vld [vmem:[%s21475_s3 + $0x600] sm:$0xff]  }
 0x40b   :  { %15481 = vmatmul.mubr.bf16.gmra.mrb[100].mxu0 %v6136_v11  ;;  %v6526_v11 = vld [vmem:[#allocation2 + $0x101] sm:$0xff] }
 0x40c   :  { %15497 = vmatpush3.bf16.msra.mxu0 %v16298_v8  ;;  %15500 = vmatprep.mubr.bf16.mxu0 %v21713_v32  ;;  %v16341_v8 = vld [vmem:[%s21477_s5 + $0x160] ss:$16 sps:$4 sm:$0xff]   ;;  %v16346_v32 = vld [vmem:[%s21477_s5 + $0x184] ss:$16 sps:$4 sm:$0xff]  }
 0x40d   :  { %15498 = vmatprep.subr.bf16.mxu0 %v16299_v54  ;;  %7654 = vmatpush1.bf16.msra.mxu1 %v16341_v8 }
 0x40e   :  { %7655 = vmatprep.subr.bf16.mxu1 %v16346_v32  ;;  %v6930_v32 = vld [vmem:[#allocation2 + $0x103] sm:$0xff] }
 0x410   :  { %15499 = vmatpush3.bf16.msra.mxu0 %v16299_v54  ;;  %v6527_v54 = vld [vmem:[#allocation2 + $0x111] sm:$0xff] }
 0x411   :  { %15516 = vmatprep.subr.bf16.mxu0 %v16300_v56 }
 0x413   :  { %15501 = vmatmul.mubr.bf16.vlgmr.msra.gmra.mrb[88].mxu0 %v21716_v50  ;;  %v6531_v50 = vld [vmem:[#allocation2 + $0x151] sm:$0xff] }
 0x414   :  { %15504 = vmatprep.mubr.bf16.mxu0 %v6334_v18  ;;  %15517 = vmatpush3.bf16.msra.mxu0 %v16300_v56  ;;  %v6537_v56 = vpack.c.bf16 %v6525_v34, %v19281_v0  ;;  %v16344_v18 = vld [vmem:[%s21477_s5 + $0x180] ss:$16 sps:$4 sm:$0xff]   ;;  %v6540_v22 = vpack.c.bf16 %v6531_v50, %v19294_v3 }
 0x415   :  { %15518 = vmatprep.subr.bf16.mxu0 %v16301_v35  ;;  %v16312_v0 = vld [vmem:[%s21475_s3 + $0x5a0] sm:$0xff]   ;;  %7656 = vmatpush1.bf16.msra.mxu1 %v16344_v18 }
 0x416   :  { %v16328_v18 = vld [vmem:[%s21475_s3 + $0x620] sm:$0xff]  }
 0x418   :  { %15519 = vmatpush3.bf16.msra.mxu0 %v16301_v35  ;;  %v6538_v35 = vpack.c.bf16 %v6527_v54, %v6526_v11  ;;  %v16326_v11 = vld [vmem:[%s21475_s3 + $0x610] sm:$0xff]  }
 0x419   :  { %15520 = vmatprep.subr.bf16.mxu0 %v16302_v51  ;;  %v6929_v54 = vld [vmem:[#allocation2 + $0xb3] sm:$0xff] }
 0x41b   :  { %15505 = vmatmul.mubr.bf16.gmra.mrb[92].mxu0 %v6335_v17  ;;  %v6533_v17 = vld [vmem:[#allocation2 + $0x171] sm:$0xff] }
 0x41c   :  { %15508 = vmatprep.mubr.bf16.mxu0 %v6336_v5  ;;  %15521 = vmatpush3.bf16.msra.mxu0 %v16302_v51  ;;  %v6539_v51 = vpack.c.bf16 %v6529_v46, %v6528_v60  ;;  %v6721_v5 = vld [vmem:[#allocation2 + $0x52] sm:$0xff] }
 0x41d   :  { %15522 = vmatprep.subr.bf16.mxu0 %v16303_v36  ;;  %v6933_v60 = vld [vmem:[#allocation2 + $0x133] sm:$0xff] }
 0x41e   :  { %v6935_v46 = vld [vmem:[#allocation2 + $0x153] sm:$0xff] }
 0x420   :  { %15523 = vmatpush3.bf16.msra.mxu0 %v16303_v36  ;;  %v6720_v36 = vld [vmem:[#allocation2 + $0x42] sm:$0xff] }
 0x421   :  { %15524 = vmatprep.subr.bf16.mxu0 %v16304_v25  ;;  %v6736_v3 = vpack.c.bf16 %v6721_v5, %v6720_v36  ;;  %v16331_v5 = vld [vmem:[%s21475_s3 + $0x638] sm:$0xff]  }
 0x423   :  { %15509 = vmatmul.mubr.bf16.gmra.mrb[96].mxu0 %v6337_v20  ;;  %v6725_v20 = vld [vmem:[#allocation2 + $0x92] sm:$0xff] }
 0x424   :  { %15512 = vmatprep.mubr.bf16.mxu0 %v6338_v41  ;;  %15525 = vmatpush3.bf16.msra.mxu0 %v16304_v25  ;;  %v6541_v25 = vpack.c.bf16 %v6533_v17, %v19307_v24  ;;  %v16317_v24 = vld [vmem:[%s21475_s3 + $0x5c8] sm:$0xff]   ;;  %v6738_v41 = vpack.c.bf16 %v6725_v20, %v19320_v53  ;;  %v7125_v17 = vld [vmem:[#allocation2 + $0x54] sm:$0xff] }
 0x425   :  { %15526 = vmatprep.subr.bf16.mxu0 %v16305_v44  ;;  %v7133_v20 = vld [vmem:[#allocation2 + $0x114] sm:$0xff] }
 0x428   :  { %15527 = vmatpush3.bf16.msra.mxu0 %v16305_v44  ;;  %v6737_v44 = vpack.c.bf16 %v6723_v33, %v6722_v4  ;;  %v7132_v33 = vld [vmem:[#allocation2 + $0x104] sm:$0xff] }
 0x429   :  { %15528 = vmatprep.subr.bf16.mxu0 %v16306_v47 }
 0x42b   :  { %15513 = vmatmul.mubr.bf16.gmra.mrb[100].mxu0 %v6339_v55  ;;  %v6728_v55 = vld [vmem:[#allocation2 + $0x102] sm:$0xff] }
 0x42c   :  { %15529 = vmatpush3.bf16.msra.mxu0 %v16306_v47  ;;  %15532 = vmatprep.mubr.bf16.mxu0 %v21719_v9  ;;  %v16318_v47 = vld [vmem:[%s21475_s3 + $0x5d0] sm:$0xff]  }
 0x42d   :  { %15530 = vmatprep.subr.bf16.mxu0 %v16307_v13  ;;  %v6731_v9 = vld [vmem:[#allocation2 + $0x132] sm:$0xff] }
 0x430   :  { %15531 = vmatpush3.bf16.msra.mxu0 %v16307_v13  ;;  %v6729_v13 = vld [vmem:[#allocation2 + $0x112] sm:$0xff] }
 0x431   :  { %15548 = vmatprep.subr.bf16.mxu0 %v16308_v23  ;;  %v6740_v53 = vpack.c.bf16 %v6729_v13, %v6728_v55  ;;  %v7146_v13 = vpack.c.bf16 %v7137_v40, %v19450_v2  ;;  %v16350_v2 = vld [vmem:[%s21477_s5 + $0xc08] ss:$16 sps:$4 sm:$0xff]  }
 0x433   :  { %15533 = vmatmul.mubr.bf16.vlgmr.msra.gmra.mrb[88].mxu0 %v21722_v19  ;;  %v6924_v19 = vld [vmem:[#allocation2 + $0x63] sm:$0xff] }
 0x434   :  { %15536 = vmatprep.mubr.bf16.mxu0 %v6536_v38  ;;  %15549 = vmatpush3.bf16.msra.mxu0 %v16308_v23  ;;  %v6741_v23 = vpack.c.bf16 %v6731_v9, %v6730_v59  ;;  %v6923_v38 = vld [vmem:[#allocation2 + $0x53] sm:$0xff]  ;;  %v6939_v34 = vpack.c.bf16 %v6925_v1, %v6924_v19  ;;  %v16358_v59 = vld [vmem:[%s21477_s5 + $0xc2c] ss:$16 sps:$4 sm:$0xff]  }
 0x435   :  { %15550 = vmatprep.subr.bf16.mxu0 %v16309_v30  ;;  %v16356_v9 = vld [vmem:[%s21477_s5 + $0xc28] ss:$16 sps:$4 sm:$0xff]   ;;  %v16376_v19 = vld [vmem:[%s21477_s5 + $0xccc] ss:$16 sps:$4 sm:$0xff]  }
 0x436   :  { %v16374_v1 = vld [vmem:[%s21477_s5 + $0xcc8] ss:$16 sps:$4 sm:$0xff]  }
 0x438   :  { %15551 = vmatpush3.bf16.msra.mxu0 %v16309_v30  ;;  %v6922_v30 = vld [vmem:[#allocation2 + $0x43] sm:$0xff] }
 0x439   :  { %15552 = vmatprep.subr.bf16.mxu0 %v16310_v21  ;;  %v6938_v63 = vpack.c.bf16 %v6923_v38, %v6922_v30  ;;  %v16370_v30 = vld [vmem:[%s21477_s5 + $0xc8c] ss:$16 sps:$4 sm:$0xff]  }
 0x43a   :  { %v16379_v38 = vld [vmem:[%s21477_s5 + $0x10c] ss:$16 sps:$4 sm:$0xff]  }
 0x43b   :  { %15537 = vmatmul.mubr.bf16.gmra.mrb[92].mxu0 %v6537_v56  ;;  %v6931_v56 = vld [vmem:[#allocation2 + $0x113] sm:$0xff] }
 0x43c   :  { %15540 = vmatprep.mubr.bf16.mxu0 %v6538_v35  ;;  %15553 = vmatpush3.bf16.msra.mxu0 %v16310_v21  ;;  %v6927_v21 = vld [vmem:[#allocation2 + $0x93] sm:$0xff] }
 0x43d   :  { %15554 = vmatprep.subr.bf16.mxu0 %v16311_v39  ;;  %v6940_v8 = vpack.c.bf16 %v6927_v21, %v19372_v37  ;;  %v16327_v35 = vld [vmem:[%s21475_s3 + $0x618] sm:$0xff]   ;;  %v6942_v37 = vpack.c.bf16 %v6931_v56, %v6930_v32 }
 0x43e   :  { %v16382_v21 = vld [vmem:[%s21477_s5 + $0xcec] ss:$16 sps:$4 sm:$0xff]  }
 0x440   :  { %15555 = vmatpush3.bf16.msra.mxu0 %v16311_v39  ;;  %v6941_v39 = vpack.c.bf16 %v6929_v54, %v19385_v27  ;;  %v16329_v27 = vld [vmem:[%s21475_s3 + $0x628] sm:$0xff]  }
 0x441   :  { %15556 = vmatprep.subr.bf16.mxu0 %v16312_v0 }
 0x443   :  { %15541 = vmatmul.mubr.bf16.gmra.mrb[96].mxu0 %v6539_v51  ;;  %v6944_v51 = vpack.c.bf16 %v6935_v46, %v19398_v48 }
 0x444   :  { %15544 = vmatprep.mubr.bf16.mxu0 %v6540_v22  ;;  %15557 = vmatpush3.bf16.msra.mxu0 %v16312_v0  ;;  %v6932_v0 = vld [vmem:[#allocation2 + $0x123] sm:$0xff]  ;;  %v6937_v22 = vld [vmem:[#allocation2 + $0x173] sm:$0xff] }
 0x445   :  { %15558 = vmatprep.subr.bf16.mxu0 %v16313_v58  ;;  %v6943_v50 = vpack.c.bf16 %v6933_v60, %v6932_v0  ;;  %v6945_v36 = vpack.c.bf16 %v6937_v22, %v19411_v28  ;;  %v7131_v28 = vld [vmem:[#allocation2 + $0xb4] sm:$0xff] }
 0x448   :  { %15559 = vmatpush3.bf16.msra.mxu0 %v16313_v58  ;;  %v16330_v58 = vld [vmem:[%s21475_s3 + $0x630] sm:$0xff]  }
 0x449   :  { %15560 = vmatprep.subr.bf16.mxu0 %v16314_v31 }
 0x44b   :  { %15545 = vmatmul.mubr.bf16.gmra.mrb[100].mxu0 %v6541_v25  ;;  %v7126_v25 = vld [vmem:[#allocation2 + $0x64] sm:$0xff] }
 0x44c   :  { %15561 = vmatpush3.bf16.msra.mxu0 %v16314_v31  ;;  %15564 = vmatprep.mubr.bf16.mxu0 %v6736_v3  ;;  %v7124_v31 = vld [vmem:[#allocation2 + $0x44] sm:$0xff]  ;;  %v7129_v3 = vld [vmem:[#allocation2 + $0x94] sm:$0xff] }
 0x44d   :  { %15562 = vmatprep.subr.bf16.mxu0 %v16315_v6  ;;  %v7140_v48 = vpack.c.bf16 %v7125_v17, %v7124_v31  ;;  %v7142_v4 = vpack.c.bf16 %v7129_v3, %v19424_v61 }
 0x450   :  { %15563 = vmatpush3.bf16.msra.mxu0 %v16315_v6  ;;  %v7127_v6 = vld [vmem:[#allocation2 + $0x74] sm:$0xff] }
 0x451   :  { %15580 = vmatprep.subr.bf16.mxu0 %v16316_v14 }
 0x453   :  { %15565 = vmatmul.mubr.bf16.vlgmr.msra.gmra.mrb[88].mxu0 %v6737_v44  ;;  %v7143_v44 = vpack.c.bf16 %v7131_v28, %v19437_v12  ;;  %v16349_v12 = vld [vmem:[%s21477_s5 + $0x1a4] ss:$16 sps:$4 sm:$0xff]  }
 0x454   :  { %15568 = vmatprep.mubr.bf16.mxu0 %v6738_v41  ;;  %15581 = vmatpush3.bf16.msra.mxu0 %v16316_v14  ;;  %v7141_v14 = vpack.c.bf16 %v7127_v6, %v7126_v25  ;;  %v7134_v41 = vld [vmem:[#allocation2 + $0x124] sm:$0xff] }
 0x455   :  { %15582 = vmatprep.subr.bf16.mxu0 %v16317_v24  ;;  %7657 = vmatprep.subr.bf16.mxu1 %v16349_v12 }
 0x458   :  { %15583 = vmatpush3.bf16.msra.mxu0 %v16317_v24  ;;  %v7144_v24 = vpack.c.bf16 %v7133_v20, %v7132_v33 }
 0x459   :  { %15584 = vmatprep.subr.bf16.mxu0 %v16318_v47 }
 0x45b   :  { %15569 = vmatmul.mubr.bf16.gmra.mrb[92].mxu0 %v6739_v26  ;;  %v7139_v26 = vld [vmem:[#allocation2 + $0x174] sm:$0xff] }
 0x45c   :  { %15572 = vmatprep.mubr.bf16.mxu0 %v6740_v53  ;;  %15585 = vmatpush3.bf16.msra.mxu0 %v16318_v47  ;;  %v7135_v47 = vld [vmem:[#allocation2 + $0x134] sm:$0xff]  ;;  %v7147_v61 = vpack.c.bf16 %v7139_v26, %v19463_v49  ;;  %v16352_v53 = vld [vmem:[%s21477_s5 + $0xc0c] ss:$16 sps:$4 sm:$0xff]   ;;  %v16353_v49 = vld [vmem:[%s21477_s5 + $0x1c0] ss:$16 sps:$4 sm:$0xff]  }
 0x45d   :  { %15586 = vmatprep.subr.bf16.mxu0 %v16319_v7  ;;  %v7145_v55 = vpack.c.bf16 %v7135_v47, %v7134_v41 }
 0x460   :  { %15587 = vmatpush3.bf16.msra.mxu0 %v16319_v7  ;;  %v16347_v7 = vld [vmem:[%s21477_s5 + $0x1a0] ss:$16 sps:$4 sm:$0xff]  }
 0x461   :  { %15588 = vmatprep.subr.bf16.mxu0 %v16320_v10  ;;  %7658 = vmatpush1.bf16.msra.mxu1 %v16347_v7 }
 0x463   :  { %15573 = vmatmul.mubr.bf16.gmra.mrb[96].mxu0 %v6741_v23  ;;  %v16361_v23 = vld [vmem:[%s21477_s5 + $0xc4c] ss:$16 sps:$4 sm:$0xff]  }
 0x464   :  { %15576 = vmatprep.mubr.bf16.mxu0 %v6742_v52  ;;  %15589 = vmatpush3.bf16.msra.mxu0 %v16320_v10  ;;  %v16355_v10 = vld [vmem:[%s21477_s5 + $0x1c4] ss:$16 sps:$4 sm:$0xff]   ;;  %v16365_v52 = vld [vmem:[%s21477_s5 + $0x1e0] ss:$16 sps:$4 sm:$0xff]  }
 0x465   :  { %15590 = vmatprep.subr.bf16.mxu0 %v16321_v43  ;;  %7659 = vmatprep.subr.bf16.mxu1 %v16355_v10 }
 0x466   :  { %7660 = vmatpush1.bf16.msra.mxu1 %v16353_v49 }
 0x468   :  { %15591 = vmatpush3.bf16.msra.mxu0 %v16321_v43  ;;  %v16364_v43 = vld [vmem:[%s21477_s5 + $0xc6c] ss:$16 sps:$4 sm:$0xff]  }
 0x469   :  { %15592 = vmatprep.subr.bf16.mxu0 %v16322_v45 }
 0x46b   :  { %15577 = vmatmul.mubr.bf16.gmra.mrb[100].mxu0 %v6743_v29  ;;  %v17235_v29 = vmov 0  }
 0x46c   :  { %15593 = vmatpush3.bf16.msra.mxu0 %v16322_v45  ;;  %15596 = vmatprep.mubr.bf16.mxu0 %v6938_v63  ;;  %v16367_v45 = vld [vmem:[%s21477_s5 + $0x1e4] ss:$16 sps:$4 sm:$0xff]   ;;  %v16373_v63 = vld [vmem:[%s21477_s5 + $0xcac] ss:$16 sps:$4 sm:$0xff]  }
 0x46d   :  { %15594 = vmatprep.subr.bf16.mxu0 %v16323_v16  ;;  %7661 = vmatprep.subr.bf16.mxu1 %v16367_v45 }
 0x46e   :  { %7662 = vmatpush1.bf16.msra.mxu1 %v16365_v52  ;;  %7679 = vmatprep.mubr.bf16.mxu1 %v17235_v29 }
 0x46f   :  { %7688 = vmatprep.subr.bf16.mxu1 %v16379_v38 }
 0x470   :  { %15595 = vmatpush3.bf16.msra.mxu0 %v16323_v16  ;;  %v16368_v16 = vld [vmem:[%s21477_s5 + $0xc88] ss:$16 sps:$4 sm:$0xff]  }
 0x471   :  { %15612 = vmatprep.subr.bf16.mxu0 %v16324_v42 }
 0x473   :  { %15597 = vmatmul.mubr.bf16.vlgmr.msra.gmra.mrb[88].mxu0 %v6939_v34  ;;  %v16380_v34 = vld [vmem:[%s21477_s5 + $0xce8] ss:$16 sps:$4 sm:$0xff]  }
 0x474   :  { %15600 = vmatprep.mubr.bf16.mxu0 %v6940_v8  ;;  %15613 = vmatpush3.bf16.msra.mxu0 %v16324_v42  ;;  %v16371_v42 = vld [vmem:[%s21477_s5 + $0xca8] ss:$16 sps:$4 sm:$0xff]   ;;  %v13542_v8 = vld [vmem:[%s21476_s4] ss:$0 sm:$0xff] }
 0x475   :  { %15614 = vmatprep.subr.bf16.mxu0 %v16325_v15 }
 0x478   :  { %15615 = vmatpush3.bf16.msra.mxu0 %v16325_v15  ;;  %v16388_v15 = vld [vmem:[%s21477_s5 + $0xd0c] ss:$16 sps:$4 sm:$0xff]  }
 0x479   :  { %15616 = vmatprep.subr.bf16.mxu0 %v16326_v11 }
 0x47b   :  { %15601 = vmatmul.mubr.bf16.gmra.mrb[92].mxu0 %v6941_v39 }
 0x47c   :  { %15604 = vmatprep.mubr.bf16.mxu0 %v6942_v37  ;;  %15617 = vmatpush3.bf16.msra.mxu0 %v16326_v11 }
 0x47d   :  { %15618 = vmatprep.subr.bf16.mxu0 %v16327_v35 }
 0x480   :  { %15619 = vmatpush3.bf16.msra.mxu0 %v16327_v35 }
 0x481   :  { %15620 = vmatprep.subr.bf16.mxu0 %v16328_v18 }
 0x483   :  { %15605 = vmatmul.mubr.bf16.gmra.mrb[96].mxu0 %v6943_v50 }
 0x484   :  { %15608 = vmatprep.mubr.bf16.mxu0 %v6944_v51  ;;  %15621 = vmatpush3.bf16.msra.mxu0 %v16328_v18 }
 0x485   :  { %15622 = vmatprep.subr.bf16.mxu0 %v16329_v27 }
 0x488   :  { %15623 = vmatpush3.bf16.msra.mxu0 %v16329_v27 }
 0x489   :  { %15624 = vmatprep.subr.bf16.mxu0 %v16330_v58 }
 0x48b   :  { %15609 = vmatmul.mubr.bf16.gmra.mrb[100].mxu0 %v6945_v36 }
 0x48c   :  { %15625 = vmatpush3.bf16.msra.mxu0 %v16330_v58  ;;  %15628 = vmatprep.mubr.bf16.mxu0 %v7140_v48 }
 0x48d   :  { %15626 = vmatprep.subr.bf16.mxu0 %v16331_v5 }
 0x490   :  { %15627 = vmatpush3.bf16.msra.mxu0 %v16331_v5 }
 0x491   :  { %11262 = vmatprep.subr.bf16.mxu0 %v16352_v53 }
 0x493   :  { %15629 = vmatmul.mubr.bf16.vlgmr.msra.gmra.mrb[88].mxu0 %v7141_v14 }
 0x494   :  { %15632 = vmatprep.mubr.bf16.mxu0 %v7142_v4  ;;  %11263 = vmatpush1.bf16.msra.mxu0 %v16350_v2 }
 0x495   :  { %11264 = vmatprep.subr.bf16.mxu0 %v16358_v59 }
 0x498   :  { %11265 = vmatpush1.bf16.msra.mxu0 %v16356_v9 }
 0x499   :  { %11266 = vmatprep.subr.bf16.mxu0 %v16361_v23 }
 0x49b   :  { %15633 = vmatmul.mubr.bf16.gmra.mrb[92].mxu0 %v7143_v44 }
 0x49c   :  { %15636 = vmatprep.mubr.bf16.mxu0 %v7144_v24  ;;  %11267 = vmatpush1.bf16.msra.mxu0 %v16359_v62 }
 0x49d   :  { %11268 = vmatprep.subr.bf16.mxu0 %v16364_v43 }
 0x4a0   :  { %11269 = vmatpush1.bf16.msra.mxu0 %v16362_v57 }
 0x4a1   :  { %11270 = vmatprep.subr.bf16.mxu0 %v16370_v30 }
 0x4a3   :  { %15637 = vmatmul.mubr.bf16.gmra.mrb[96].mxu0 %v7145_v55 }
 0x4a4   :  { %15640 = vmatprep.mubr.bf16.mxu0 %v7146_v13  ;;  %11271 = vmatpush1.bf16.msra.mxu0 %v16368_v16 }
 0x4a5   :  { %11272 = vmatprep.subr.bf16.mxu0 %v16373_v63 }
 0x4a8   :  { %11273 = vmatpush1.bf16.msra.mxu0 %v16371_v42 }
 0x4a9   :  { %11274 = vmatprep.subr.bf16.mxu0 %v16376_v19 }
 0x4ab   :  { %15641 = vmatmul.mubr.bf16.gmra.mrb[100].mxu0 %v7147_v61 }
 0x4ac   :  { %11294 = vmatprep.mubr.bf16.mxu0 %v17235_v29  ;;  %11275 = vmatpush1.bf16.msra.mxu0 %v16374_v1 }
 0x4ad   :  { %11276 = vmatprep.subr.bf16.mxu0 %v16382_v21 }
 0x4b0   :  { %11277 = vmatpush1.bf16.msra.mxu0 %v16380_v34 }
 0x4b1   :  { %11564 = vmatprep.subr.bf16.mxu0 %v16388_v15 }
 0x566   :  { %v15630_v11 = vpop.f32.mrb[88].mxu0 }
 0x567   :  { %v7335_v54 = vadd.f32 %v15630_v11, %v13542_v8  ;;  %v7247_v32 = vpop.f32.mrb[89].mxu0 }
 0x568   :  { %v7333_v56 = vadd.f32 %v13542_v8, %v7247_v32  ;;  %v15631_v39 = vpop.f32.mrb[90].mxu0 }
 0x569   :  { %v7351_v35 = vmax.f32 %v7335_v54, 0.0  ;;  %v7336_v37 = vadd.f32 %v15631_v39, %v13542_v8  ;;  %v7250_v18 = vpop.f32.mrb[91].mxu0 }
 0x56a   :  { %v7349_v0 = vmax.f32 %v7333_v56, 0.0  ;;  %v7334_v60 = vadd.f32 %v13542_v8, %v7250_v18 }
 0x56b   :  { %7367 = vst [vmem:[#allocation3 + $0x10] sm:$0xff] %v7351_v35  ;;  %v7352_v46 = vmax.f32 %v7336_v37, 0.0 }
 0x56c   :  { %7365 = vst [vmem:[#allocation3] sm:$0xff] %v7349_v0  ;;  %v7350_v50 = vmax.f32 %v7334_v60, 0.0 }
 0x56d   :  { %7368 = vst [vmem:[#allocation3 + $0x18] sm:$0xff] %v7352_v46 }
 0x56e   :  { %7366 = vst [vmem:[#allocation3 + $0x8] sm:$0xff] %v7350_v50  ;;  %v15634_v27 = vpop.f32.mrb[92].mxu0 }
 0x56f   :  { %v7339_v51 = vadd.f32 %v15634_v27, %v13542_v8  ;;  %v7263_v58 = vpop.f32.mrb[93].mxu0 }
 0x570   :  { %v7337_v22 = vadd.f32 %v13542_v8, %v7263_v58  ;;  %v15635_v31 = vpop.f32.mrb[94].mxu0 }
 0x571   :  { %v7355_v17 = vmax.f32 %v7339_v51, 0.0  ;;  %v7340_v36 = vadd.f32 %v15635_v31, %v13542_v8  ;;  %v7266_v5 = vpop.f32.mrb[95].mxu0 }
 0x572   :  { %v7353_v48 = vmax.f32 %v7337_v22, 0.0  ;;  %v7338_v25 = vadd.f32 %v13542_v8, %v7266_v5 }
 0x573   :  { %7371 = vst [vmem:[#allocation3 + $0x30] sm:$0xff] %v7355_v17  ;;  %v7356_v6 = vmax.f32 %v7340_v36, 0.0  ;;  %v7430_v62 = vld [vmem:[#allocation3 + $0x2] sm:$0x1]  ;;  %v7432_v23 = vld [vmem:[#allocation3 + $0x3] sm:$0x1] }
 0x574   :  { %7369 = vst [vmem:[#allocation3 + $0x20] sm:$0xff] %v7353_v48  ;;  %v7354_v3 = vmax.f32 %v7338_v25, 0.0  ;;  %v7438_v63 = vmax.f32 %v7430_v62, %v7432_v23  ;;  %v16377_v36 = vld [vmem:[%s21477_s5 + $0x108] ss:$16 sps:$4 sm:$0xff]   ;;  %v16385_v25 = vld [vmem:[%s21477_s5 + $0x12c] ss:$16 sps:$4 sm:$0xff]  }
 0x575   :  { %7372 = vst [vmem:[#allocation3 + $0x38] sm:$0xff] %v7356_v6  ;;  %v7434_v12 = vld [vmem:[#allocation3 + $0xa] sm:$0x1]  ;;  %v7436_v2 = vld [vmem:[#allocation3 + $0xb] sm:$0x1] }
 0x576   :  { %7370 = vst [vmem:[#allocation3 + $0x28] sm:$0xff] %v7354_v3  ;;  %v15638_v14 = vpop.f32.mrb[96].mxu0  ;;  %v7440_v45 = vmax.f32 %v7434_v12, %v7436_v2  ;;  %v16409_v62 = vld [vmem:[%s21477_s5 + $0x1ac] ss:$16 sps:$4 sm:$0xff]  }
 0x577   :  { %v7343_v4 = vadd.f32 %v15638_v14, %v13542_v8  ;;  %v7279_v28 = vpop.f32.mrb[97].mxu0 }
 0x578   :  { %v7341_v33 = vadd.f32 %v13542_v8, %v7279_v28  ;;  %v15639_v20 = vpop.f32.mrb[98].mxu0  ;;  %v7442_v34 = vmax.f32 %v7438_v63, %v7440_v45  ;;  %v16391_v28 = vld [vmem:[%s21477_s5 + $0x14c] ss:$16 sps:$4 sm:$0xff]  }
 0x579   :  { %v7359_v44 = vmax.f32 %v7343_v4, 0.0  ;;  %v7344_v24 = vadd.f32 %v15639_v20, %v13542_v8  ;;  %v7282_v41 = vpop.f32.mrb[99].mxu0  ;;  %v16383_v4 = vld [vmem:[%s21477_s5 + $0x128] ss:$16 sps:$4 sm:$0xff]  }
 0x57a   :  { %v7357_v47 = vmax.f32 %v7341_v33, 0.0  ;;  %v7342_v40 = vadd.f32 %v13542_v8, %v7282_v41  ;;  %v11004_v32 = vld [vmem:[#allocation3 + $0x30] sm:$0x1]  ;;  %v7444_v39 = vpack.c.bf16 %v7442_v34, %v7442_v34  ;;  %v16389_v41 = vld [vmem:[%s21477_s5 + $0x148] ss:$16 sps:$4 sm:$0xff]  }
 0x57b   :  { %7375 = vst [vmem:[#allocation3 + $0x50] sm:$0xff] %v7359_v44  ;;  %v7360_v55 = vmax.f32 %v7344_v24, 0.0  ;;  %v16386_v44 = vld [vmem:[%s21477_s5 + $0xd08] ss:$16 sps:$4 sm:$0xff]  }
 0x57c   :  { %7373 = vst [vmem:[#allocation3 + $0x40] sm:$0xff] %v7357_v47  ;;  %v7358_v13 = vmax.f32 %v7342_v40, 0.0  ;;  %v11009_v15 = vld [vmem:[#allocation3 + $0x38] sm:$0x1]  ;;  %v11011_v11 = vld [vmem:[#allocation3 + $0x39] sm:$0x1]  ;;  %v7480_v22 = vunpack.c.l.b16 %v7444_v39 }
 0x57d   :  { %7376 = vst [vmem:[#allocation3 + $0x58] sm:$0xff] %v7360_v55  ;;  %v11015_v56 = vmax.f32 %v11009_v15, %v11011_v11  ;;  %v16394_v40 = vld [vmem:[%s21477_s5 + $0xd2c] ss:$16 sps:$4 sm:$0xff]   ;;  %v16413_v34 = vld [vmem:[%s21477_s5 + $0x1c8] ss:$16 sps:$4 sm:$0xff]  }
 0x57e   :  { %7374 = vst [vmem:[#allocation3 + $0x48] sm:$0xff] %v7358_v13  ;;  %v15642_v26 = vpop.f32.mrb[100].mxu0  ;;  %v16397_v55 = vld [vmem:[%s21477_s5 + $0x16c] ss:$16 sps:$4 sm:$0xff]   ;;  %v16392_v13 = vld [vmem:[%s21477_s5 + $0xd28] ss:$16 sps:$4 sm:$0xff]  }
 0x57f   :  { %v7347_v61 = vadd.f32 %v15642_v26, %v13542_v8  ;;  %v7295_v7 = vpop.f32.mrb[101].mxu0  ;;  %v16395_v26 = vld [vmem:[%s21477_s5 + $0x168] ss:$16 sps:$4 sm:$0xff]   ;;  %v16418_v15 = vld [vmem:[%s21477_s5 + $0xdac] ss:$16 sps:$4 sm:$0xff]  }
 0x580   :  { %v7345_v53 = vadd.f32 %v13542_v8, %v7295_v7  ;;  %v15643_v49 = vpop.f32.mrb[102].mxu0  ;;  %v16403_v7 = vld [vmem:[%s21477_s5 + $0x18c] ss:$16 sps:$4 sm:$0xff]   ;;  %v16419_v39 = vld [vmem:[%s21477_s5 + $0x1e8] ss:$16 sps:$4 sm:$0xff]  }
 0x581   :  { %v7363_v10 = vmax.f32 %v7347_v61, 0.0  ;;  %v7348_v59 = vadd.f32 %v15643_v49, %v13542_v8  ;;  %v7298_v9 = vpop.f32.mrb[103].mxu0  ;;  %v16400_v61 = vld [vmem:[%s21477_s5 + $0xd4c] ss:$16 sps:$4 sm:$0xff]   ;;  %v16401_v49 = vld [vmem:[%s21477_s5 + $0x188] ss:$16 sps:$4 sm:$0xff]  }
 0x582   :  { %v7361_v43 = vmax.f32 %v7345_v53, 0.0  ;;  %v7346_v52 = vadd.f32 %v13542_v8, %v7298_v9  ;;  %v11006_v8 = vld [vmem:[#allocation3 + $0x31] sm:$0x1]  ;;  %v16398_v53 = vld [vmem:[%s21477_s5 + $0xd48] ss:$16 sps:$4 sm:$0xff]  }
 0x583   :  { %7379 = vst [vmem:[#allocation3 + $0x70] sm:$0xff] %v7363_v10  ;;  %v7364_v57 = vmax.f32 %v7348_v59, 0.0  ;;  %v7431_v30 = vld [vmem:[#allocation3 + $0x42] sm:$0x1]  ;;  %v7433_v38 = vld [vmem:[#allocation3 + $0x43] sm:$0x1]  ;;  %v11013_v0 = vmax.f32 %v11004_v32, %v11006_v8 }
 0x584   :  { %7377 = vst [vmem:[#allocation3 + $0x60] sm:$0xff] %v7361_v43  ;;  %v7362_v16 = vmax.f32 %v7346_v52, 0.0  ;;  %v7439_v1 = vmax.f32 %v7431_v30, %v7433_v38  ;;  %v16406_v10 = vld [vmem:[%s21477_s5 + $0xd6c] ss:$16 sps:$4 sm:$0xff]   ;;  %v16404_v43 = vld [vmem:[%s21477_s5 + $0xd68] ss:$16 sps:$4 sm:$0xff]  }
 0x585   :  { %7380 = vst [vmem:[#allocation3 + $0x78] sm:$0xff] %v7364_v57  ;;  %v7435_v42 = vld [vmem:[#allocation3 + $0x4a] sm:$0x1]  ;;  %v7437_v19 = vld [vmem:[#allocation3 + $0x4b] sm:$0x1]  ;;  %v11017_v58 = vmax.f32 %v11013_v0, %v11015_v56 }
 0x586   :  { %7378 = vst [vmem:[#allocation3 + $0x68] sm:$0xff] %v7362_v16  ;;  %v7441_v21 = vmax.f32 %v7435_v42, %v7437_v19  ;;  %v16407_v52 = vld [vmem:[%s21477_s5 + $0x1a8] ss:$16 sps:$4 sm:$0xff]   ;;  %v16412_v57 = vld [vmem:[%s21477_s5 + $0xd8c] ss:$16 sps:$4 sm:$0xff]  }
 0x587   :  { %v11019_v6 = vpack.c.bf16 %v11017_v58, %v11017_v58  ;;  %v11311_v30 = vld [vmem:[#allocation3 + $0x3a] sm:$0x1]  ;;  %v11313_v38 = vld [vmem:[#allocation3 + $0x3b] sm:$0x1]  ;;  %v16415_v16 = vld [vmem:[%s21477_s5 + $0x1cc] ss:$16 sps:$4 sm:$0xff]  }
 0x588   :  { %v7443_v54 = vmax.f32 %v7439_v1, %v7441_v21  ;;  %v11307_v42 = vld [vmem:[#allocation3 + $0x32] sm:$0x1]  ;;  %v11309_v19 = vld [vmem:[#allocation3 + $0x33] sm:$0x1]  ;;  %v16410_v1 = vld [vmem:[%s21477_s5 + $0xd88] ss:$16 sps:$4 sm:$0xff]   ;;  %v11317_v21 = vmax.f32 %v11311_v30, %v11313_v38 }
 0x589   :  { %v11055_v33 = vunpack.c.l.b16 %v11019_v6  ;;  %v16421_v11 = vld [vmem:[%s21477_s5 + $0x1ec] ss:$16 sps:$4 sm:$0xff]   ;;  %v16416_v8 = vld [vmem:[%s21477_s5 + $0xda8] ss:$16 sps:$4 sm:$0xff]  }
 0x58a   :  { %v7445_v35 = vpack.c.bf16 %v7443_v54, %v7443_v54  ;;  %v11005_v37 = vld [vmem:[#allocation3 + $0x70] sm:$0x1]  ;;  %v11007_v18 = vld [vmem:[#allocation3 + $0x71] sm:$0x1]  ;;  %v11308_v59 = vld [vmem:[#allocation3 + $0x72] sm:$0x1]  ;;  %v11315_v54 = vmax.f32 %v11307_v42, %v11309_v19 }
 0x58b   :  { %v11014_v27 = vmax.f32 %v11005_v37, %v11007_v18  ;;  %v11310_v9 = vld [vmem:[#allocation3 + $0x73] sm:$0x1]  ;;  %v16427_v37 = vld [vmem:[%s21477_s5 + $0x4] ss:$16 sps:$4 sm:$0xff]   ;;  %v16422_v0 = vld [vmem:[%s21477_s5 + $0xdc8] ss:$16 sps:$4 sm:$0xff]  }
 0x58c   :  { %v7481_v60 = vunpack.c.l.b16 %v7445_v35  ;;  %v11010_v46 = vld [vmem:[#allocation3 + $0x78] sm:$0x1]  ;;  %v11012_v50 = vld [vmem:[#allocation3 + $0x79] sm:$0x1]  ;;  %v11312_v12 = vld [vmem:[#allocation3 + $0x7a] sm:$0x1]  ;;  %v11316_v45 = vmax.f32 %v11308_v59, %v11310_v9  ;;  %v11319_v56 = vmax.f32 %v11315_v54, %v11317_v21 }
 0x58d   :  { %v11016_v51 = vmax.f32 %v11010_v46, %v11012_v50  ;;  %v11314_v2 = vld [vmem:[#allocation3 + $0x7b] sm:$0x1]  ;;  %v16424_v35 = vld [vmem:[%s21477_s5 + $0xdcc] ss:$16 sps:$4 sm:$0xff]   ;;  %v16425_v46 = vld [vmem:[%s21477_s5] ss:$16 sps:$4 sm:$0xff]  }
 0x58e   :  { %v7482_v31 = vrot.slane %v7481_v60, 7  ;;  %v11318_v23 = vmax.f32 %v11312_v12, %v11314_v2  ;;  %v11321_v60 = vpack.c.bf16 %v11319_v56, %v11319_v56  ;;  %v16430_v50 = vld [vmem:[%s21477_s5 + $0xdec] ss:$16 sps:$4 sm:$0xff]   ;;  %v16428_v58 = vld [vmem:[%s21477_s5 + $0xde8] ss:$16 sps:$4 sm:$0xff]  }
 0x58f   :  { %v11018_v17 = vmax.f32 %v11014_v27, %v11016_v51  ;;  %v16433_v27 = vld [vmem:[%s21477_s5 + $0x24] ss:$16 sps:$4 sm:$0xff]   ;;  %v7389_v6 = vld [vmem:[#allocation3 + $0x49] sm:$0x1]  ;;  %v11614_v2 = vld [vmem:[#allocation3 + $0x7c] sm:$0x1] }
 0x590   :  { %v7484_v5 = vsel %vm7483_vm1, %v7482_v31, %v7480_v22  ;;  %v11320_v63 = vmax.f32 %v11316_v45, %v11318_v23  ;;  %v11357_v22 = vunpack.c.l.b16 %v11321_v60  ;;  %v16431_v31 = vld [vmem:[%s21477_s5 + $0x20] ss:$16 sps:$4 sm:$0xff]   ;;  %v16454_v9 = vld [vmem:[%s21477_s5 + $0xe6c] ss:$16 sps:$4 sm:$0xff]   ;;  %v11610_v23 = vld [vmem:[#allocation3 + $0x74] sm:$0x1] }
 0x591   :  { %v19708_v48 = vpack.c.b16 %v7484_v5, %v7484_v5  ;;  %v11020_v3 = vpack.c.bf16 %v11018_v17, %v11018_v17  ;;  %v16436_v17 = vld [vmem:[%s21477_s5 + $0xe0c] ss:$16 sps:$4 sm:$0xff]   ;;  %v16439_v5 = vld [vmem:[%s21477_s5 + $0x44] ss:$16 sps:$4 sm:$0xff]   ;;  %v7383_v59 = vld [vmem:[#allocation3 + $0x1] sm:$0x1] }
 0x592   :  { %v11322_v32 = vpack.c.bf16 %v11320_v63, %v11320_v63  ;;  %v16452_v38 = vld [vmem:[%s21477_s5 + $0xe68] ss:$16 sps:$4 sm:$0xff]   ;;  %v16460_v42 = vld [vmem:[%s21477_s5 + $0xe8c] ss:$16 sps:$4 sm:$0xff]   ;;  %v11609_v54 = vld [vmem:[#allocation3 + $0x34] sm:$0x1] }
 0x593   :  { %7680 = vmatmul.mubr.bf16.vlgmr.msra.gmra.mrb[104].mxu1 %v19708_v48  ;;  %v11056_v14 = vunpack.c.l.b16 %v11020_v3  ;;  %v11615_v21 = vld [vmem:[#allocation3 + $0x3d] sm:$0x1] }
 0x594   :  { %7689 = vmatpush1.bf16.msra.mxu1 %v16377_v36  ;;  %7720 = vmatprep.mubr.bf16.mxu1 %v17235_v29  ;;  %v11358_v18 = vunpack.c.l.b16 %v11322_v32  ;;  %v11611_v32 = vld [vmem:[#allocation3 + $0x35] sm:$0x1] }
 0x595   :  { %7690 = vmatprep.subr.bf16.mxu1 %v16385_v25  ;;  %v11057_v20 = vrot.slane %v11056_v14, 7  ;;  %v7387_v25 = vld [vmem:[#allocation3 + $0x48] sm:$0x1]  ;;  %v16437_v14 = vld [vmem:[%s21477_s5 + $0x40] ss:$16 sps:$4 sm:$0xff]  }
 0x596   :  { %v11359_v51 = vrot.slane %v11358_v18, 7  ;;  %v16469_v18 = vld [vmem:[%s21477_s5 + $0xe4] ss:$16 sps:$4 sm:$0xff]  }
 0x597   :  { %v11058_v24 = vsel %vm7483_vm1, %v11057_v20, %v11055_v33  ;;  %v7382_v33 = vld [vmem:[#allocation3 + $0x40] sm:$0x1]  ;;  %v7384_v20 = vld [vmem:[#allocation3 + $0x41] sm:$0x1] }
 0x598   :  { %7691 = vmatpush1.bf16.msra.mxu1 %v16383_v4  ;;  %v19728_v47 = vpack.c.b16 %v11058_v24, %v11058_v24  ;;  %v11360_v36 = vsel %vm7483_vm1, %v11359_v51, %v11357_v22  ;;  %v16442_v4 = vld [vmem:[%s21477_s5 + $0xe2c] ss:$16 sps:$4 sm:$0xff]   ;;  %v16440_v24 = vld [vmem:[%s21477_s5 + $0xe28] ss:$16 sps:$4 sm:$0xff]   ;;  %v16467_v51 = vld [vmem:[%s21477_s5 + $0xe0] ss:$16 sps:$4 sm:$0xff]  }
 0x599   :  { %7692 = vmatprep.subr.bf16.mxu1 %v16391_v28  ;;  %v19828_v3 = vpack.c.b16 %v11360_v36, %v11360_v36  ;;  %v16445_v28 = vld [vmem:[%s21477_s5 + $0x64] ss:$16 sps:$4 sm:$0xff]  }
 0x59a   :  { %11295 = vmatmul.mubr.bf16.vlgmr.msra.gmra.mrb[104].mxu0 %v19728_v47 }
 0x59b   :  { %11565 = vmatpush1.bf16.msra.mxu0 %v16386_v44  ;;  %11596 = vmatprep.mubr.bf16.mxu0 %v17235_v29  ;;  %v7393_v44 = vmax.f32 %v7387_v25, %v7389_v6  ;;  %v16473_v25 = vld [vmem:[%s21477_s5 + $0x8] ss:$16 sps:$4 sm:$0xff]   ;;  %v16478_v6 = vld [vmem:[%s21477_s5 + $0xeec] ss:$16 sps:$4 sm:$0xff]  }
 0x59c   :  { %7693 = vmatpush1.bf16.msra.mxu1 %v16389_v41  ;;  %11566 = vmatprep.subr.bf16.mxu0 %v16394_v40  ;;  %v16443_v41 = vld [vmem:[%s21477_s5 + $0x60] ss:$16 sps:$4 sm:$0xff]   ;;  %v16448_v40 = vld [vmem:[%s21477_s5 + $0xe4c] ss:$16 sps:$4 sm:$0xff]  }
 0x59d   :  { %7694 = vmatprep.subr.bf16.mxu1 %v16397_v55  ;;  %v7391_v55 = vmax.f32 %v7382_v33, %v7384_v20  ;;  %v16476_v33 = vld [vmem:[%s21477_s5 + $0xee8] ss:$16 sps:$4 sm:$0xff]  }
 0x59f   :  { %11567 = vmatpush1.bf16.msra.mxu0 %v16392_v13  ;;  %v16451_v13 = vld [vmem:[%s21477_s5 + $0x84] ss:$16 sps:$4 sm:$0xff]   ;;  %v7395_v12 = vmax.f32 %v7391_v55, %v7393_v44  ;;  %v16479_v44 = vld [vmem:[%s21477_s5 + $0x28] ss:$16 sps:$4 sm:$0xff]  }
 0x5a0   :  { %7695 = vmatpush1.bf16.msra.mxu1 %v16395_v26  ;;  %11568 = vmatprep.subr.bf16.mxu0 %v16400_v61  ;;  %v7386_v26 = vld [vmem:[#allocation3 + $0x8] sm:$0x1]  ;;  %v7388_v61 = vld [vmem:[#allocation3 + $0x9] sm:$0x1] }
 0x5a1   :  { %7696 = vmatprep.subr.bf16.mxu1 %v16403_v7  ;;  %v16446_v7 = vld [vmem:[%s21477_s5 + $0xe48] ss:$16 sps:$4 sm:$0xff]   ;;  %v7397_v30 = vpack.c.bf16 %v7395_v12, %v7395_v12 }
 0x5a2   :  { %v16482_v55 = vld [vmem:[%s21477_s5 + $0xf08] ss:$16 sps:$4 sm:$0xff]  }
 0x5a3   :  { %11569 = vmatpush1.bf16.msra.mxu0 %v16398_v53  ;;  %v11616_v53 = vld [vmem:[#allocation3 + $0x7d] sm:$0x1]  ;;  %v16488_v12 = vld [vmem:[%s21477_s5 + $0xf28] ss:$16 sps:$4 sm:$0xff]  }
 0x5a4   :  { %7697 = vmatpush1.bf16.msra.mxu1 %v16401_v49  ;;  %11570 = vmatprep.subr.bf16.mxu0 %v16406_v10  ;;  %v16449_v49 = vld [vmem:[%s21477_s5 + $0x80] ss:$16 sps:$4 sm:$0xff]   ;;  %v11620_v45 = vmax.f32 %v11614_v2, %v11616_v53  ;;  %v16491_v2 = vld [vmem:[%s21477_s5 + $0x68] ss:$16 sps:$4 sm:$0xff]   ;;  %v16496_v53 = vld [vmem:[%s21477_s5 + $0xf4c] ss:$16 sps:$4 sm:$0xff]  }
 0x5a5   :  { %7698 = vmatprep.subr.bf16.mxu1 %v16409_v62  ;;  %v7381_v10 = vld [vmem:[#allocation3] sm:$0x1]  ;;  %v7392_v62 = vmax.f32 %v7386_v26, %v7388_v61  ;;  %v16485_v26 = vld [vmem:[%s21477_s5 + $0x48] ss:$16 sps:$4 sm:$0xff]   ;;  %v16490_v61 = vld [vmem:[%s21477_s5 + $0xf2c] ss:$16 sps:$4 sm:$0xff]  }
 0x5a7   :  { %11571 = vmatpush1.bf16.msra.mxu0 %v16404_v43  ;;  %v11612_v43 = vld [vmem:[#allocation3 + $0x75] sm:$0x1] }
 0x5a8   :  { %7699 = vmatpush1.bf16.msra.mxu1 %v16407_v52  ;;  %11572 = vmatprep.subr.bf16.mxu0 %v16412_v57  ;;  %v16457_v52 = vld [vmem:[%s21477_s5 + $0xa4] ss:$16 sps:$4 sm:$0xff]   ;;  %v7390_v57 = vmax.f32 %v7381_v10, %v7383_v59  ;;  %v11618_v63 = vmax.f32 %v11610_v23, %v11612_v43  ;;  %v11916_v10 = vld [vmem:[#allocation3 + $0x7e] sm:$0x1]  ;;  %v11918_v59 = vld [vmem:[#allocation3 + $0x7f] sm:$0x1] }
 0x5a9   :  { %7700 = vmatprep.subr.bf16.mxu1 %v16415_v16  ;;  %v16455_v16 = vld [vmem:[%s21477_s5 + $0xa0] ss:$16 sps:$4 sm:$0xff]   ;;  %v16502_v23 = vld [vmem:[%s21477_s5 + $0xf6c] ss:$16 sps:$4 sm:$0xff]   ;;  %v11912_v43 = vld [vmem:[#allocation3 + $0x76] sm:$0x1] }
 0x5aa   :  { %v7394_v19 = vmax.f32 %v7390_v57, %v7392_v62  ;;  %v16497_v62 = vld [vmem:[%s21477_s5 + $0x88] ss:$16 sps:$4 sm:$0xff]   ;;  %v11922_v57 = vmax.f32 %v11916_v10, %v11918_v59  ;;  %v16541_v59 = vld [vmem:[%s21477_s5 + $0x2a4] ss:$16 sps:$4 sm:$0xff]  }
 0x5ab   :  { %11573 = vmatpush1.bf16.msra.mxu0 %v16410_v1  ;;  %v11613_v1 = vld [vmem:[#allocation3 + $0x3c] sm:$0x1] }
 0x5ac   :  { %7701 = vmatpush1.bf16.msra.mxu1 %v16413_v34  ;;  %11574 = vmatprep.subr.bf16.mxu0 %v16418_v15  ;;  %v16463_v34 = vld [vmem:[%s21477_s5 + $0xc4] ss:$16 sps:$4 sm:$0xff]   ;;  %v11622_v15 = vmax.f32 %v11618_v63, %v11620_v45  ;;  %v11619_v56 = vmax.f32 %v11613_v1, %v11615_v21  ;;  %v16505_v45 = vld [vmem:[%s21477_s5 + $0xac] ss:$16 sps:$4 sm:$0xff]  }
 0x5ad   :  { %7702 = vmatprep.subr.bf16.mxu1 %v16421_v11  ;;  %v7732_v11 = vunpack.c.l.b16 %v7397_v30  ;;  %v16500_v30 = vld [vmem:[%s21477_s5 + $0xf68] ss:$16 sps:$4 sm:$0xff]   ;;  %v16508_v63 = vld [vmem:[%s21477_s5 + $0xf8c] ss:$16 sps:$4 sm:$0xff]  }
 0x5ae   :  { %v11624_v60 = vpack.c.bf16 %v11622_v15, %v11622_v15  ;;  %v16511_v1 = vld [vmem:[%s21477_s5 + $0xcc] ss:$16 sps:$4 sm:$0xff]   ;;  %v11913_v15 = vld [vmem:[#allocation3 + $0x37] sm:$0x1] }
 0x5af   :  { %11575 = vmatpush1.bf16.msra.mxu0 %v16416_v8  ;;  %v16458_v8 = vld [vmem:[%s21477_s5 + $0xe88] ss:$16 sps:$4 sm:$0xff]  }
 0x5b0   :  { %7703 = vmatpush1.bf16.msra.mxu1 %v16419_v39  ;;  %11576 = vmatprep.subr.bf16.mxu0 %v16424_v35  ;;  %v16461_v39 = vld [vmem:[%s21477_s5 + $0xc0] ss:$16 sps:$4 sm:$0xff]   ;;  %v16466_v35 = vld [vmem:[%s21477_s5 + $0xeac] ss:$16 sps:$4 sm:$0xff]  }
 0x5b1   :  { %7897 = vmatprep.subr.bf16.mxu1 %v16427_v37  ;;  %v7396_v37 = vpack.c.bf16 %v7394_v19, %v7394_v19  ;;  %v11917_v19 = vld [vmem:[#allocation3 + $0x3f] sm:$0x1] }
 0x5b3   :  { %7721 = vmatmul.mubr.bf16.vlgmr.msra.gmra.mrb[108].mxu1 %v19708_v48  ;;  %11577 = vmatpush1.bf16.msra.mxu0 %v16422_v0  ;;  %v16434_v48 = vld [vmem:[%s21477_s5 + $0xe08] ss:$16 sps:$4 sm:$0xff]   ;;  %v11617_v0 = vmax.f32 %v11609_v54, %v11611_v32  ;;  %v7731_v22 = vunpack.c.l.b16 %v7396_v37 }
 0x5b4   :  { %7898 = vmatpush1.bf16.msra.mxu1 %v16425_v46  ;;  %11578 = vmatprep.subr.bf16.mxu0 %v16430_v50  ;;  %v7733_v46 = vrot.slane %v7732_v11, 7  ;;  %v16464_v50 = vld [vmem:[%s21477_s5 + $0xea8] ss:$16 sps:$4 sm:$0xff]  }
 0x5b5   :  { %7899 = vmatprep.subr.bf16.mxu1 %v16433_v27  ;;  %7929 = vmatprep.mubr.bf16.mxu1 %v17235_v29  ;;  %v11621_v27 = vmax.f32 %v11617_v0, %v11619_v56  ;;  %v16506_v11 = vld [vmem:[%s21477_s5 + $0xf88] ss:$16 sps:$4 sm:$0xff]   ;;  %v16517_v56 = vld [vmem:[%s21477_s5 + $0xec] ss:$16 sps:$4 sm:$0xff]  }
 0x5b6   :  { %v7734_v36 = vsel %vm7483_vm1, %v7733_v46, %v7731_v22  ;;  %v16509_v32 = vld [vmem:[%s21477_s5 + $0xc8] ss:$16 sps:$4 sm:$0xff]   ;;  %v16523_v46 = vld [vmem:[%s21477_s5 + $0x204] ss:$16 sps:$4 sm:$0xff]   ;;  %v16526_v22 = vld [vmem:[%s21477_s5 + $0xfec] ss:$16 sps:$4 sm:$0xff]  }
 0x5b7   :  { %11579 = vmatpush1.bf16.msra.mxu0 %v16428_v58  ;;  %v16472_v58 = vld [vmem:[%s21477_s5 + $0xecc] ss:$16 sps:$4 sm:$0xff]   ;;  %v16512_v37 = vld [vmem:[%s21477_s5 + $0xfa8] ss:$16 sps:$4 sm:$0xff]  }
 0x5b8   :  { %7900 = vmatpush1.bf16.msra.mxu1 %v16431_v31  ;;  %11866 = vmatprep.subr.bf16.mxu0 %v16436_v17  ;;  %v16475_v31 = vld [vmem:[%s21477_s5 + $0xc] ss:$16 sps:$4 sm:$0xff]   ;;  %v11660_v17 = vunpack.c.l.b16 %v11624_v60  ;;  %v16515_v0 = vld [vmem:[%s21477_s5 + $0xe8] ss:$16 sps:$4 sm:$0xff]  }
 0x5b9   :  { %7901 = vmatprep.subr.bf16.mxu1 %v16439_v5  ;;  %v16470_v5 = vld [vmem:[%s21477_s5 + $0xec8] ss:$16 sps:$4 sm:$0xff]   ;;  %v16520_v60 = vld [vmem:[%s21477_s5 + $0xfcc] ss:$16 sps:$4 sm:$0xff]  }
 0x5ba   :  { %11597 = vmatmul.mubr.bf16.vlgmr.msra.gmra.mrb[108].mxu0 %v19828_v3 }
 0x5bb   :  { %11867 = vmatpush1.bf16.msra.mxu0 %v16434_v48  ;;  %11898 = vmatprep.mubr.bf16.mxu0 %v17235_v29  ;;  %v11623_v48 = vpack.c.bf16 %v11621_v27, %v11621_v27  ;;  %v16518_v27 = vld [vmem:[%s21477_s5 + $0xfc8] ss:$16 sps:$4 sm:$0xff]  }
 0x5bc   :  { %7902 = vmatpush1.bf16.msra.mxu1 %v16437_v14  ;;  %11868 = vmatprep.subr.bf16.mxu0 %v16442_v4  ;;  %v19911_v14 = vpack.c.b16 %v7734_v36, %v7734_v36  ;;  %v16481_v4 = vld [vmem:[%s21477_s5 + $0x2c] ss:$16 sps:$4 sm:$0xff]   ;;  %v16524_v36 = vld [vmem:[%s21477_s5 + $0xfe8] ss:$16 sps:$4 sm:$0xff]  }
 0x5bd   :  { %7903 = vmatprep.subr.bf16.mxu1 %v16445_v28  ;;  %v11661_v28 = vrot.slane %v11660_v17, 7  ;;  %v11659_v20 = vunpack.c.l.b16 %v11623_v48  ;;  %v16527_v48 = vld [vmem:[%s21477_s5 + $0x220] ss:$16 sps:$4 sm:$0xff]  }
 0x5bf   :  { %11869 = vmatpush1.bf16.msra.mxu0 %v16440_v24  ;;  %v16484_v24 = vld [vmem:[%s21477_s5 + $0xf0c] ss:$16 sps:$4 sm:$0xff]  }
 0x5c0   :  { %7904 = vmatpush1.bf16.msra.mxu1 %v16443_v41  ;;  %11870 = vmatprep.subr.bf16.mxu0 %v16448_v40  ;;  %v11662_v41 = vsel %vm7483_vm1, %v11661_v28, %v11659_v20  ;;  %v16487_v40 = vld [vmem:[%s21477_s5 + $0x4c] ss:$16 sps:$4 sm:$0xff]   ;;  %v16535_v20 = vld [vmem:[%s21477_s5 + $0x264] ss:$16 sps:$4 sm:$0xff]  }
 0x5c1   :  { %7905 = vmatprep.subr.bf16.mxu1 %v16451_v13  ;;  %v19934_v13 = vpack.c.b16 %v11662_v41, %v11662_v41 }
 0x5c3   :  { %11871 = vmatpush1.bf16.msra.mxu0 %v16446_v7  ;;  %v16493_v7 = vld [vmem:[%s21477_s5 + $0x6c] ss:$16 sps:$4 sm:$0xff]  }
 0x5c4   :  { %7906 = vmatpush1.bf16.msra.mxu1 %v16449_v49  ;;  %11872 = vmatprep.subr.bf16.mxu0 %v16454_v9  ;;  %v16499_v49 = vld [vmem:[%s21477_s5 + $0x8c] ss:$16 sps:$4 sm:$0xff]   ;;  %v16494_v9 = vld [vmem:[%s21477_s5 + $0xf48] ss:$16 sps:$4 sm:$0xff]  }
 0x5c5   :  { %7907 = vmatprep.subr.bf16.mxu1 %v16457_v52  ;;  %v11914_v52 = vld [vmem:[#allocation3 + $0x77] sm:$0x1] }
 0x5c7   :  { %11873 = vmatpush1.bf16.msra.mxu0 %v16452_v38  ;;  %v16503_v38 = vld [vmem:[%s21477_s5 + $0xa8] ss:$16 sps:$4 sm:$0xff]  }
 0x5c8   :  { %7908 = vmatpush1.bf16.msra.mxu1 %v16455_v16  ;;  %11874 = vmatprep.subr.bf16.mxu0 %v16460_v42  ;;  %v11920_v16 = vmax.f32 %v11912_v43, %v11914_v52  ;;  %v11915_v42 = vld [vmem:[#allocation3 + $0x3e] sm:$0x1]  ;;  %v16544_v52 = vld [vmem:[%s21477_s5 + $0x2c4] ss:$16 sps:$4 sm:$0xff]  }
 0x5c9   :  { %7909 = vmatprep.subr.bf16.mxu1 %v16463_v34  ;;  %v11911_v34 = vld [vmem:[#allocation3 + $0x36] sm:$0x1]  ;;  %v11921_v54 = vmax.f32 %v11915_v42, %v11917_v19  ;;  %v16550_v19 = vld [vmem:[%s21477_s5 + $0x20c] ss:$16 sps:$4 sm:$0xff]  }
 0x5ca   :  { %v11924_v21 = vmax.f32 %v11920_v16, %v11922_v57  ;;  %v16542_v57 = vld [vmem:[%s21477_s5 + $0x2c0] ss:$16 sps:$4 sm:$0xff]  }
 0x5cb   :  { %11875 = vmatpush1.bf16.msra.mxu0 %v16458_v8  ;;  %v16514_v8 = vld [vmem:[%s21477_s5 + $0xfac] ss:$16 sps:$4 sm:$0xff]  }
 0x5cc   :  { %7910 = vmatpush1.bf16.msra.mxu1 %v16461_v39  ;;  %11876 = vmatprep.subr.bf16.mxu0 %v16466_v35  ;;  %v11919_v39 = vmax.f32 %v11911_v34, %v11913_v15  ;;  %v11926_v35 = vpack.c.bf16 %v11924_v21, %v11924_v21  ;;  %v16548_v21 = vld [vmem:[%s21477_s5 + $0x208] ss:$16 sps:$4 sm:$0xff]   ;;  %v16553_v15 = vld [vmem:[%s21477_s5 + $0x22c] ss:$16 sps:$4 sm:$0xff]  }
 0x5cd   :  { %7911 = vmatprep.subr.bf16.mxu1 %v16469_v18 }
 0x5ce   :  { %v11923_v18 = vmax.f32 %v11919_v39, %v11921_v54  ;;  %v16556_v54 = vld [vmem:[%s21477_s5 + $0x24c] ss:$16 sps:$4 sm:$0xff]  }
 0x5cf   :  { %11877 = vmatpush1.bf16.msra.mxu0 %v16464_v50  ;;  %v11962_v50 = vunpack.c.l.b16 %v11926_v35  ;;  %v16562_v39 = vld [vmem:[%s21477_s5 + $0x28c] ss:$16 sps:$4 sm:$0xff]   ;;  %v16560_v35 = vld [vmem:[%s21477_s5 + $0x288] ss:$16 sps:$4 sm:$0xff]  }
 0x5d0   :  { %7912 = vmatpush1.bf16.msra.mxu1 %v16467_v51  ;;  %11878 = vmatprep.subr.bf16.mxu0 %v16472_v58  ;;  %v11925_v51 = vpack.c.bf16 %v11923_v18, %v11923_v18  ;;  %v16521_v58 = vld [vmem:[%s21477_s5 + $0x200] ss:$16 sps:$4 sm:$0xff]   ;;  %v16563_v18 = vld [vmem:[%s21477_s5 + $0x2a8] ss:$16 sps:$4 sm:$0xff]  }
 0x5d1   :  { %7938 = vmatprep.subr.bf16.mxu1 %v16475_v31  ;;  %v16529_v31 = vld [vmem:[%s21477_s5 + $0x224] ss:$16 sps:$4 sm:$0xff]   ;;  %v11963_v17 = vrot.slane %v11962_v50, 7  ;;  %v16569_v50 = vld [vmem:[%s21477_s5 + $0x2e8] ss:$16 sps:$4 sm:$0xff]  }
 0x5d3   :  { %7930 = vmatmul.mubr.bf16.vlgmr.msra.gmra.mrb[112].mxu1 %v19911_v14  ;;  %11879 = vmatpush1.bf16.msra.mxu0 %v16470_v5  ;;  %v11961_v5 = vunpack.c.l.b16 %v11925_v51  ;;  %v16572_v51 = vld [vmem:[%s21477_s5 + $0x300] ss:$16 sps:$4 sm:$0xff]  }
 0x5d4   :  { %7939 = vmatpush1.bf16.msra.mxu1 %v16473_v25  ;;  %11880 = vmatprep.subr.bf16.mxu0 %v16478_v6  ;;  %v16532_v6 = vld [vmem:[%s21477_s5 + $0x244] ss:$16 sps:$4 sm:$0xff]  }
 0x5d5   :  { %7940 = vmatprep.subr.bf16.mxu1 %v16481_v4  ;;  %7970 = vmatprep.mubr.bf16.mxu1 %v17235_v29  ;;  %v11964_v25 = vsel %vm7483_vm1, %v11963_v17, %v11961_v5  ;;  %v7986_v4 = vld [vmem:[#allocation3 + $0x4d] sm:$0x1]  ;;  %v8286_v17 = vld [vmem:[#allocation3 + $0x4e] sm:$0x1]  ;;  %v16578_v5 = vld [vmem:[%s21477_s5 + $0x340] ss:$16 sps:$4 sm:$0xff]  }
 0x5d6   :  { %v20031_v28 = vpack.c.b16 %v11964_v25, %v11964_v25  ;;  %v8282_v25 = vld [vmem:[#allocation3 + $0x46] sm:$0x1] }
 0x5d7   :  { %11881 = vmatpush1.bf16.msra.mxu0 %v16476_v33  ;;  %v16530_v33 = vld [vmem:[%s21477_s5 + $0x240] ss:$16 sps:$4 sm:$0xff]  }
 0x5d8   :  { %7941 = vmatpush1.bf16.msra.mxu1 %v16479_v44  ;;  %12168 = vmatprep.subr.bf16.mxu0 %v16484_v24  ;;  %v7980_v44 = vld [vmem:[#allocation3 + $0x44] sm:$0x1]  ;;  %v7982_v24 = vld [vmem:[#allocation3 + $0x45] sm:$0x1] }
 0x5d9   :  { %7942 = vmatprep.subr.bf16.mxu1 %v16487_v40  ;;  %v16533_v40 = vld [vmem:[%s21477_s5 + $0x260] ss:$16 sps:$4 sm:$0xff]  }
 0x5da   :  { %11899 = vmatmul.mubr.bf16.vlgmr.msra.gmra.mrb[112].mxu0 %v19934_v13 }
 0x5db   :  { %12169 = vmatpush1.bf16.msra.mxu0 %v16482_v55  ;;  %12200 = vmatprep.mubr.bf16.mxu0 %v17235_v29  ;;  %v7988_v55 = vmax.f32 %v7980_v44, %v7982_v24  ;;  %v8285_v44 = vld [vmem:[#allocation3 + $0xe] sm:$0x1]  ;;  %v8287_v24 = vld [vmem:[#allocation3 + $0xf] sm:$0x1] }
 0x5dc   :  { %7943 = vmatpush1.bf16.msra.mxu1 %v16485_v26  ;;  %12170 = vmatprep.subr.bf16.mxu0 %v16490_v61  ;;  %v16538_v26 = vld [vmem:[%s21477_s5 + $0x284] ss:$16 sps:$4 sm:$0xff]   ;;  %v7983_v61 = vld [vmem:[#allocation3 + $0xc] sm:$0x1] }
 0x5dd   :  { %7944 = vmatprep.subr.bf16.mxu1 %v16493_v7  ;;  %v7985_v7 = vld [vmem:[#allocation3 + $0xd] sm:$0x1] }
 0x5de   :  { %v7989_v10 = vmax.f32 %v7983_v61, %v7985_v7  ;;  %v8291_v61 = vmax.f32 %v8285_v44, %v8287_v24  ;;  %v16589_v7 = vld [vmem:[%s21477_s5 + $0x3a4] ss:$16 sps:$4 sm:$0xff]  }
 0x5df   :  { %12171 = vmatpush1.bf16.msra.mxu0 %v16488_v12  ;;  %v16634_v24 = vld [vmem:[%s21477_s5 + $0x484] ss:$16 sps:$4 sm:$0xff]  }
 0x5e0   :  { %7945 = vmatpush1.bf16.msra.mxu1 %v16491_v2  ;;  %12172 = vmatprep.subr.bf16.mxu0 %v16496_v53  ;;  %v7979_v2 = vld [vmem:[#allocation3 + $0x4] sm:$0x1]  ;;  %v7981_v53 = vld [vmem:[#allocation3 + $0x5] sm:$0x1] }
 0x5e1   :  { %7946 = vmatprep.subr.bf16.mxu1 %v16499_v49  ;;  %v16536_v49 = vld [vmem:[%s21477_s5 + $0x280] ss:$16 sps:$4 sm:$0xff]  }
 0x5e3   :  { %12173 = vmatpush1.bf16.msra.mxu0 %v16494_v9  ;;  %v7987_v9 = vmax.f32 %v7979_v2, %v7981_v53  ;;  %v16587_v53 = vld [vmem:[%s21477_s5 + $0x3a0] ss:$16 sps:$4 sm:$0xff]  }
 0x5e4   :  { %7947 = vmatpush1.bf16.msra.mxu1 %v16497_v62  ;;  %12174 = vmatprep.subr.bf16.mxu0 %v16502_v23  ;;  %v16539_v23 = vld [vmem:[%s21477_s5 + $0x2a0] ss:$16 sps:$4 sm:$0xff]  }
 0x5e5   :  { %7948 = vmatprep.subr.bf16.mxu1 %v16505_v45  ;;  %v7991_v43 = vmax.f32 %v7987_v9, %v7989_v10  ;;  %v16592_v10 = vld [vmem:[%s21477_s5 + $0x3c4] ss:$16 sps:$4 sm:$0xff]   ;;  %v16590_v9 = vld [vmem:[%s21477_s5 + $0x3c0] ss:$16 sps:$4 sm:$0xff]  }
 0x5e7   :  { %12175 = vmatpush1.bf16.msra.mxu0 %v16500_v30  ;;  %v7993_v30 = vpack.c.bf16 %v7991_v43, %v7991_v43 }
 0x5e8   :  { %7949 = vmatpush1.bf16.msra.mxu1 %v16503_v38  ;;  %12176 = vmatprep.subr.bf16.mxu0 %v16508_v63  ;;  %v16547_v38 = vld [vmem:[%s21477_s5 + $0x2e4] ss:$16 sps:$4 sm:$0xff]   ;;  %v16545_v63 = vld [vmem:[%s21477_s5 + $0x2e0] ss:$16 sps:$4 sm:$0xff]  }
 0x5e9   :  { %7950 = vmatprep.subr.bf16.mxu1 %v16511_v1  ;;  %v8029_v42 = vunpack.c.l.b16 %v7993_v30 }
 0x5eb   :  { %12177 = vmatpush1.bf16.msra.mxu0 %v16506_v11  ;;  %v16551_v11 = vld [vmem:[%s21477_s5 + $0x228] ss:$16 sps:$4 sm:$0xff]  }
 0x5ec   :  { %7951 = vmatpush1.bf16.msra.mxu1 %v16509_v32  ;;  %12178 = vmatprep.subr.bf16.mxu0 %v16514_v8  ;;  %v16554_v32 = vld [vmem:[%s21477_s5 + $0x248] ss:$16 sps:$4 sm:$0xff]   ;;  %v16559_v8 = vld [vmem:[%s21477_s5 + $0x26c] ss:$16 sps:$4 sm:$0xff]  }
 0x5ed   :  { %7952 = vmatprep.subr.bf16.mxu1 %v16517_v56  ;;  %v16557_v56 = vld [vmem:[%s21477_s5 + $0x268] ss:$16 sps:$4 sm:$0xff]  }
 0x5ef   :  { %12179 = vmatpush1.bf16.msra.mxu0 %v16512_v37  ;;  %v16565_v37 = vld [vmem:[%s21477_s5 + $0x2ac] ss:$16 sps:$4 sm:$0xff]  }
 0x5f0   :  { %7953 = vmatpush1.bf16.msra.mxu1 %v16515_v0  ;;  %12180 = vmatprep.subr.bf16.mxu0 %v16520_v60  ;;  %v16568_v0 = vld [vmem:[%s21477_s5 + $0x2cc] ss:$16 sps:$4 sm:$0xff]   ;;  %v16566_v60 = vld [vmem:[%s21477_s5 + $0x2c8] ss:$16 sps:$4 sm:$0xff]  }
 0x5f1   :  { %8195 = vmatprep.subr.bf16.mxu1 %v16523_v46  ;;  %v16571_v46 = vld [vmem:[%s21477_s5 + $0x2ec] ss:$16 sps:$4 sm:$0xff]  }
 0x5f3   :  { %7971 = vmatmul.mubr.bf16.vlgmr.msra.gmra.mrb[116].mxu1 %v19911_v14  ;;  %12181 = vmatpush1.bf16.msra.mxu0 %v16518_v27  ;;  %v7984_v14 = vld [vmem:[#allocation3 + $0x4c] sm:$0x1]  ;;  %v16574_v27 = vld [vmem:[%s21477_s5 + $0x304] ss:$16 sps:$4 sm:$0xff]  }
 0x5f4   :  { %8196 = vmatpush1.bf16.msra.mxu1 %v16521_v58  ;;  %12182 = vmatprep.subr.bf16.mxu0 %v16526_v22  ;;  %v7990_v41 = vmax.f32 %v7984_v14, %v7986_v4  ;;  %v16577_v58 = vld [vmem:[%s21477_s5 + $0x324] ss:$16 sps:$4 sm:$0xff]   ;;  %v16575_v22 = vld [vmem:[%s21477_s5 + $0x320] ss:$16 sps:$4 sm:$0xff]  }
 0x5f5   :  { %8197 = vmatprep.subr.bf16.mxu1 %v16529_v31  ;;  %8227 = vmatprep.mubr.bf16.mxu1 %v17235_v29  ;;  %v16580_v31 = vld [vmem:[%s21477_s5 + $0x344] ss:$16 sps:$4 sm:$0xff]   ;;  %v16581_v4 = vld [vmem:[%s21477_s5 + $0x360] ss:$16 sps:$4 sm:$0xff]  }
 0x5f6   :  { %v7992_v12 = vmax.f32 %v7988_v55, %v7990_v41  ;;  %v8283_v55 = vld [vmem:[#allocation3 + $0x7] sm:$0x1] }
 0x5f7   :  { %12183 = vmatpush1.bf16.msra.mxu0 %v16524_v36  ;;  %v8288_v36 = vld [vmem:[#allocation3 + $0x4f] sm:$0x1] }
 0x5f8   :  { %8198 = vmatpush1.bf16.msra.mxu1 %v16527_v48  ;;  %v7994_v62 = vpack.c.bf16 %v7992_v12, %v7992_v12  ;;  %v16583_v48 = vld [vmem:[%s21477_s5 + $0x364] ss:$16 sps:$4 sm:$0xff]   ;;  %v8292_v14 = vmax.f32 %v8286_v17, %v8288_v36  ;;  %v16623_v17 = vld [vmem:[%s21477_s5 + $0x420] ss:$16 sps:$4 sm:$0xff]  }
 0x5f9   :  { %8199 = vmatprep.subr.bf16.mxu1 %v16532_v6  ;;  %v8284_v6 = vld [vmem:[#allocation3 + $0x47] sm:$0x1] }
 0x5fa   :  { %12201 = vmatmul.mubr.bf16.vlgmr.msra.gmra.mrb[116].mxu0 %v20031_v28  ;;  %v8030_v45 = vunpack.c.l.b16 %v7994_v62  ;;  %v16628_v36 = vld [vmem:[%s21477_s5 + $0x444] ss:$16 sps:$4 sm:$0xff]  }
 0x5fc   :  { %8200 = vmatpush1.bf16.msra.mxu1 %v16530_v33  ;;  %v8031_v16 = vrot.slane %v8030_v45, 7  ;;  %v8290_v33 = vmax.f32 %v8282_v25, %v8284_v6  ;;  %v16626_v25 = vld [vmem:[%s21477_s5 + $0x440] ss:$16 sps:$4 sm:$0xff]   ;;  %v16631_v6 = vld [vmem:[%s21477_s5 + $0x464] ss:$16 sps:$4 sm:$0xff]  }
 0x5fd   :  { %8201 = vmatprep.subr.bf16.mxu1 %v16535_v20  ;;  %v16586_v20 = vld [vmem:[%s21477_s5 + $0x384] ss:$16 sps:$4 sm:$0xff]  }
 0x5fe   :  { %v8032_v1 = vsel %vm7483_vm1, %v8031_v16, %v8029_v42  ;;  %v8294_v41 = vmax.f32 %v8290_v33, %v8292_v14  ;;  %v16599_v42 = vld [vmem:[%s21477_s5 + $0x328] ss:$16 sps:$4 sm:$0xff]   ;;  %v8585_v14 = vld [vmem:[#allocation3 + $0x50] sm:$0x1] }
 0x5ff   :  { %v8033_v34 = vpack.c.b16 %v8032_v1, %v8032_v1  ;;  %v16602_v1 = vld [vmem:[%s21477_s5 + $0x348] ss:$16 sps:$4 sm:$0xff]  }
 0x600   :  { %8202 = vmatpush1.bf16.msra.mxu1 %v16533_v40  ;;  %v8281_v40 = vld [vmem:[#allocation3 + $0x6] sm:$0x1]  ;;  %v8296_v2 = vpack.c.bf16 %v8294_v41, %v8294_v41  ;;  %v8589_v41 = vld [vmem:[#allocation3 + $0x18] sm:$0x1] }
 0x601   :  { %8203 = vmatprep.subr.bf16.mxu1 %v16538_v26  ;;  %v16584_v26 = vld [vmem:[%s21477_s5 + $0x380] ss:$16 sps:$4 sm:$0xff]   ;;  %v8289_v12 = vmax.f32 %v8281_v40, %v8283_v55  ;;  %v8591_v40 = vld [vmem:[#allocation3 + $0x19] sm:$0x1] }
 0x604   :  { %8204 = vmatpush1.bf16.msra.mxu1 %v16536_v49  ;;  %v8293_v49 = vmax.f32 %v8289_v12, %v8291_v61  ;;  %v8586_v61 = vld [vmem:[#allocation3 + $0x11] sm:$0x1]  ;;  %v8595_v12 = vmax.f32 %v8589_v41, %v8591_v40  ;;  %v16673_v40 = vld [vmem:[%s21477_s5 + $0x524] ss:$16 sps:$4 sm:$0xff]  }
 0x605   :  { %8205 = vmatprep.subr.bf16.mxu1 %v16541_v59  ;;  %v8332_v59 = vunpack.c.l.b16 %v8296_v2  ;;  %v16637_v2 = vld [vmem:[%s21477_s5 + $0x4a4] ss:$16 sps:$4 sm:$0xff]   ;;  %v16668_v41 = vld [vmem:[%s21477_s5 + $0x500] ss:$16 sps:$4 sm:$0xff]  }
 0x606   :  { %v8295_v62 = vpack.c.bf16 %v8293_v49, %v8293_v49 }
 0x607   :  { %v8333_v43 = vrot.slane %v8332_v59, 7 }
 0x608   :  { %8206 = vmatpush1.bf16.msra.mxu1 %v16539_v23  ;;  %v16595_v23 = vld [vmem:[%s21477_s5 + $0x3e4] ss:$16 sps:$4 sm:$0xff]   ;;  %v8331_v45 = vunpack.c.l.b16 %v8295_v62 }
 0x609   :  { %8207 = vmatprep.subr.bf16.mxu1 %v16544_v52  ;;  %v16593_v52 = vld [vmem:[%s21477_s5 + $0x3e0] ss:$16 sps:$4 sm:$0xff]  }
 0x60a   :  { %v8334_v30 = vsel %vm7483_vm1, %v8333_v43, %v8331_v45  ;;  %v16638_v45 = vld [vmem:[%s21477_s5 + $0x4c0] ss:$16 sps:$4 sm:$0xff]  }
 0x60b   :  { %v8335_v16 = vpack.c.b16 %v8334_v30, %v8334_v30 }
 0x60c   :  { %8208 = vmatpush1.bf16.msra.mxu1 %v16542_v57  ;;  %v16598_v57 = vld [vmem:[%s21477_s5 + $0x30c] ss:$16 sps:$4 sm:$0xff]  }
 0x60d   :  { %8209 = vmatprep.subr.bf16.mxu1 %v16547_v38  ;;  %v16596_v38 = vld [vmem:[%s21477_s5 + $0x308] ss:$16 sps:$4 sm:$0xff]  }
 0x610   :  { %8210 = vmatpush1.bf16.msra.mxu1 %v16545_v63  ;;  %v16601_v63 = vld [vmem:[%s21477_s5 + $0x32c] ss:$16 sps:$4 sm:$0xff]  }
 0x611   :  { %8236 = vmatprep.subr.bf16.mxu1 %v16550_v19  ;;  %v16604_v19 = vld [vmem:[%s21477_s5 + $0x34c] ss:$16 sps:$4 sm:$0xff]  }
 0x613   :  { %8228 = vmatmul.mubr.bf16.vlgmr.msra.gmra.mrb[120].mxu1 %v8033_v34 }
 0x614   :  { %8237 = vmatpush1.bf16.msra.mxu1 %v16548_v21  ;;  %8268 = vmatprep.mubr.bf16.mxu1 %v17235_v29  ;;  %v16607_v21 = vld [vmem:[%s21477_s5 + $0x36c] ss:$16 sps:$4 sm:$0xff]  }
 0x615   :  { %8238 = vmatprep.subr.bf16.mxu1 %v16553_v15  ;;  %v16610_v15 = vld [vmem:[%s21477_s5 + $0x38c] ss:$16 sps:$4 sm:$0xff]  }
 0x618   :  { %8239 = vmatpush1.bf16.msra.mxu1 %v16551_v11  ;;  %v16608_v11 = vld [vmem:[%s21477_s5 + $0x388] ss:$16 sps:$4 sm:$0xff]  }
 0x619   :  { %8240 = vmatprep.subr.bf16.mxu1 %v16556_v54  ;;  %v16613_v54 = vld [vmem:[%s21477_s5 + $0x3ac] ss:$16 sps:$4 sm:$0xff]  }
 0x61c   :  { %8241 = vmatpush1.bf16.msra.mxu1 %v16554_v32  ;;  %v16611_v32 = vld [vmem:[%s21477_s5 + $0x3a8] ss:$16 sps:$4 sm:$0xff]  }
 0x61d   :  { %8242 = vmatprep.subr.bf16.mxu1 %v16559_v8  ;;  %v16616_v8 = vld [vmem:[%s21477_s5 + $0x3cc] ss:$16 sps:$4 sm:$0xff]  }
 0x620   :  { %8243 = vmatpush1.bf16.msra.mxu1 %v16557_v56 }
 0x621   :  { %8244 = vmatprep.subr.bf16.mxu1 %v16562_v39 }
 0x624   :  { %8245 = vmatpush1.bf16.msra.mxu1 %v16560_v35 }
 0x625   :  { %8246 = vmatprep.subr.bf16.mxu1 %v16565_v37  ;;  %v16614_v37 = vld [vmem:[%s21477_s5 + $0x3c8] ss:$16 sps:$4 sm:$0xff]  }
 0x628   :  { %8247 = vmatpush1.bf16.msra.mxu1 %v16563_v18 }
 0x629   :  { %8248 = vmatprep.subr.bf16.mxu1 %v16568_v0  ;;  %v16619_v0 = vld [vmem:[%s21477_s5 + $0x3ec] ss:$16 sps:$4 sm:$0xff]  }
 0x62c   :  { %8249 = vmatpush1.bf16.msra.mxu1 %v16566_v60  ;;  %v16617_v60 = vld [vmem:[%s21477_s5 + $0x3e8] ss:$16 sps:$4 sm:$0xff]  }
 0x62d   :  { %8250 = vmatprep.subr.bf16.mxu1 %v16571_v46 }
 0x630   :  { %8251 = vmatpush1.bf16.msra.mxu1 %v16569_v50  ;;  %v16622_v50 = vld [vmem:[%s21477_s5 + $0x404] ss:$16 sps:$4 sm:$0xff]  }
 0x631   :  { %8497 = vmatprep.subr.bf16.mxu1 %v16574_v27 }
 0x633   :  { %8269 = vmatmul.mubr.bf16.vlgmr.msra.gmra.mrb[124].mxu1 %v8033_v34  ;;  %v16605_v34 = vld [vmem:[%s21477_s5 + $0x368] ss:$16 sps:$4 sm:$0xff]  }
 0x634   :  { %8498 = vmatpush1.bf16.msra.mxu1 %v16572_v51  ;;  %8529 = vmatprep.mubr.bf16.mxu1 %v17235_v29 }
 0x635   :  { %8499 = vmatprep.subr.bf16.mxu1 %v16577_v58 }
 0x638   :  { %8500 = vmatpush1.bf16.msra.mxu1 %v16575_v22  ;;  %v16620_v22 = vld [vmem:[%s21477_s5 + $0x400] ss:$16 sps:$4 sm:$0xff]  }
 0x639   :  { %8501 = vmatprep.subr.bf16.mxu1 %v16580_v31  ;;  %v16625_v31 = vld [vmem:[%s21477_s5 + $0x424] ss:$16 sps:$4 sm:$0xff]  }
 0x63c   :  { %8502 = vmatpush1.bf16.msra.mxu1 %v16578_v5  ;;  %v8590_v5 = vld [vmem:[#allocation3 + $0x58] sm:$0x1] }
 0x63d   :  { %8503 = vmatprep.subr.bf16.mxu1 %v16583_v48  ;;  %v8592_v48 = vld [vmem:[#allocation3 + $0x59] sm:$0x1] }
 0x63e   :  { %v8596_v33 = vmax.f32 %v8590_v5, %v8592_v48 }
 0x640   :  { %8504 = vmatpush1.bf16.msra.mxu1 %v16581_v4  ;;  %v8587_v4 = vld [vmem:[#allocation3 + $0x51] sm:$0x1] }
 0x641   :  { %8505 = vmatprep.subr.bf16.mxu1 %v16586_v20  ;;  %v16629_v20 = vld [vmem:[%s21477_s5 + $0x460] ss:$16 sps:$4 sm:$0xff]   ;;  %v8594_v44 = vmax.f32 %v8585_v14, %v8587_v4  ;;  %v16667_v4 = vld [vmem:[%s21477_s5 + $0x4ec] ss:$16 sps:$4 sm:$0xff]  }
 0x643   :  { %v8598_v55 = vmax.f32 %v8594_v44, %v8596_v33 }
 0x644   :  { %8506 = vmatpush1.bf16.msra.mxu1 %v16584_v26  ;;  %v8584_v26 = vld [vmem:[#allocation3 + $0x10] sm:$0x1] }
 0x645   :  { %8507 = vmatprep.subr.bf16.mxu1 %v16589_v7  ;;  %v16632_v7 = vld [vmem:[%s21477_s5 + $0x480] ss:$16 sps:$4 sm:$0xff]   ;;  %v8600_v49 = vpack.c.bf16 %v8598_v55, %v8598_v55 }
 0x646   :  { %v16671_v55 = vld [vmem:[%s21477_s5 + $0x520] ss:$16 sps:$4 sm:$0xff]  }
 0x648   :  { %8508 = vmatpush1.bf16.msra.mxu1 %v16587_v53  ;;  %v8593_v53 = vmax.f32 %v8584_v26, %v8586_v61  ;;  %v16676_v26 = vld [vmem:[%s21477_s5 + $0x544] ss:$16 sps:$4 sm:$0xff]   ;;  %v8892_v61 = vld [vmem:[#allocation3 + $0x5a] sm:$0x1] }
 0x649   :  { %8509 = vmatprep.subr.bf16.mxu1 %v16592_v10  ;;  %v16635_v10 = vld [vmem:[%s21477_s5 + $0x4a0] ss:$16 sps:$4 sm:$0xff]  }
 0x64a   :  { %v8597_v59 = vmax.f32 %v8593_v53, %v8595_v12  ;;  %v16674_v12 = vld [vmem:[%s21477_s5 + $0x540] ss:$16 sps:$4 sm:$0xff]  }
 0x64b   :  { %v8888_v53 = vld [vmem:[#allocation3 + $0x52] sm:$0x1] }
 0x64c   :  { %8510 = vmatpush1.bf16.msra.mxu1 %v16590_v9  ;;  %v16640_v9 = vld [vmem:[%s21477_s5 + $0x4c4] ss:$16 sps:$4 sm:$0xff]  }
 0x64d   :  { %8511 = vmatprep.subr.bf16.mxu1 %v16595_v23  ;;  %v8636_v23 = vunpack.c.l.b16 %v8600_v49  ;;  %v8890_v49 = vld [vmem:[#allocation3 + $0x53] sm:$0x1] }
 0x650   :  { %8512 = vmatpush1.bf16.msra.mxu1 %v16593_v52 }
 0x651   :  { %8538 = vmatprep.subr.bf16.mxu1 %v16598_v57  ;;  %v8599_v57 = vpack.c.bf16 %v8597_v59, %v8597_v59  ;;  %v16677_v59 = vld [vmem:[%s21477_s5 + $0x560] ss:$16 sps:$4 sm:$0xff]  }
 0x653   :  { %8530 = vmatmul.mubr.bf16.vlgmr.msra.gmra.mrb[128].mxu1 %v8335_v16 }
 0x654   :  { %8539 = vmatpush1.bf16.msra.mxu1 %v16596_v38  ;;  %8570 = vmatprep.mubr.bf16.mxu1 %v17235_v29  ;;  %v16643_v38 = vld [vmem:[%s21477_s5 + $0x4e4] ss:$16 sps:$4 sm:$0xff]  }
 0x655   :  { %8540 = vmatprep.subr.bf16.mxu1 %v16601_v63  ;;  %v16641_v63 = vld [vmem:[%s21477_s5 + $0x4e0] ss:$16 sps:$4 sm:$0xff]  }
 0x658   :  { %8541 = vmatpush1.bf16.msra.mxu1 %v16599_v42  ;;  %v8635_v42 = vunpack.c.l.b16 %v8599_v57 }
 0x659   :  { %8542 = vmatprep.subr.bf16.mxu1 %v16604_v19 }
 0x65c   :  { %8543 = vmatpush1.bf16.msra.mxu1 %v16602_v1  ;;  %v16646_v1 = vld [vmem:[%s21477_s5 + $0x40c] ss:$16 sps:$4 sm:$0xff]  }
 0x65d   :  { %8544 = vmatprep.subr.bf16.mxu1 %v16607_v21 }
 0x660   :  { %8545 = vmatpush1.bf16.msra.mxu1 %v16605_v34 }
 0x661   :  { %8546 = vmatprep.subr.bf16.mxu1 %v16610_v15 }
 0x664   :  { %8547 = vmatpush1.bf16.msra.mxu1 %v16608_v11 }
 0x665   :  { %8548 = vmatprep.subr.bf16.mxu1 %v16613_v54  ;;  %v16644_v54 = vld [vmem:[%s21477_s5 + $0x408] ss:$16 sps:$4 sm:$0xff]  }
 0x666   :  { %v20207_v56 = vpop.f32.mrb[104].mxu1 }
 0x667   :  { %v20209_v39 = vpop.f32.mrb[105].mxu1 }
 0x668   :  { %8549 = vmatpush1.bf16.msra.mxu1 %v16611_v32  ;;  %v7685_v35 = vpop.f32.mrb[106].mxu1 }
 0x669   :  { %v7686_v18 = vpop.f32.mrb[107].mxu1  ;;  %8550 = vmatprep.subr.bf16.mxu1 %v16616_v8  ;;  %v16649_v8 = vld [vmem:[%s21477_s5 + $0x42c] ss:$16 sps:$4 sm:$0xff]   ;;  %v16647_v35 = vld [vmem:[%s21477_s5 + $0x428] ss:$16 sps:$4 sm:$0xff]  }
 0x66a   :  { %v16650_v18 = vld [vmem:[%s21477_s5 + $0x448] ss:$16 sps:$4 sm:$0xff]  }
 0x66c   :  { %8551 = vmatpush1.bf16.msra.mxu1 %v16614_v37  ;;  %v16652_v37 = vld [vmem:[%s21477_s5 + $0x44c] ss:$16 sps:$4 sm:$0xff]  }
 0x66d   :  { %v20220_v46 = vpop.f32.mrb[104].mxu0  ;;  %8552 = vmatprep.subr.bf16.mxu1 %v16619_v0  ;;  %v16655_v0 = vld [vmem:[%s21477_s5 + $0x46c] ss:$16 sps:$4 sm:$0xff]  }
 0x66e   :  { %v20225_v27 = vpop.f32.mrb[105].mxu0 }
 0x66f   :  { %v11300_v51 = vpop.f32.mrb[106].mxu0 }
 0x670   :  { %8553 = vmatpush1.bf16.msra.mxu1 %v16617_v60  ;;  %v11301_v58 = vpop.f32.mrb[107].mxu0  ;;  %v16653_v60 = vld [vmem:[%s21477_s5 + $0x468] ss:$16 sps:$4 sm:$0xff]  }
 0x671   :  { %8801 = vmatprep.subr.bf16.mxu1 %v16622_v50  ;;  %v16658_v50 = vld [vmem:[%s21477_s5 + $0x48c] ss:$16 sps:$4 sm:$0xff]   ;;  %v16656_v51 = vld [vmem:[%s21477_s5 + $0x488] ss:$16 sps:$4 sm:$0xff]  }
 0x672   :  { %v16661_v58 = vld [vmem:[%s21477_s5 + $0x4ac] ss:$16 sps:$4 sm:$0xff]  }
 0x673   :  { %8571 = vmatmul.mubr.bf16.vlgmr.msra.gmra.mrb[132].mxu1 %v8335_v16  ;;  %v8637_v16 = vrot.slane %v8636_v23, 7  ;;  %v16682_v23 = vld [vmem:[%s21477_s5 + $0x584] ss:$16 sps:$4 sm:$0xff]  }
 0x674   :  { %8802 = vmatpush1.bf16.msra.mxu1 %v16620_v22  ;;  %8833 = vmatprep.mubr.bf16.mxu1 %v17235_v29  ;;  %v16659_v22 = vld [vmem:[%s21477_s5 + $0x4a8] ss:$16 sps:$4 sm:$0xff]  }
 0x675   :  { %8803 = vmatprep.subr.bf16.mxu1 %v16625_v31  ;;  %v8638_v34 = vsel %vm7483_vm1, %v8637_v16, %v8635_v42  ;;  %v16664_v31 = vld [vmem:[%s21477_s5 + $0x4cc] ss:$16 sps:$4 sm:$0xff]   ;;  %v16680_v16 = vld [vmem:[%s21477_s5 + $0x580] ss:$16 sps:$4 sm:$0xff]   ;;  %v16685_v42 = vld [vmem:[%s21477_s5 + $0x5a4] ss:$16 sps:$4 sm:$0xff]  }
 0x676   :  { %v8639_v32 = vpack.c.b16 %v8638_v34, %v8638_v34 }
 0x678   :  { %8804 = vmatpush1.bf16.msra.mxu1 %v16623_v17 }
 0x679   :  { %8805 = vmatprep.subr.bf16.mxu1 %v16628_v36 }
 0x67c   :  { %8806 = vmatpush1.bf16.msra.mxu1 %v16626_v25 }
 0x67d   :  { %8807 = vmatprep.subr.bf16.mxu1 %v16631_v6  ;;  %v16662_v6 = vld [vmem:[%s21477_s5 + $0x4c8] ss:$16 sps:$4 sm:$0xff]  }
 0x680   :  { %8808 = vmatpush1.bf16.msra.mxu1 %v16629_v20 }
 0x681   :  { %8809 = vmatprep.subr.bf16.mxu1 %v16634_v24 }
 0x684   :  { %8810 = vmatpush1.bf16.msra.mxu1 %v16632_v7  ;;  %v8894_v7 = vld [vmem:[#allocation3 + $0x5b] sm:$0x1] }
 0x685   :  { %8811 = vmatprep.subr.bf16.mxu1 %v16637_v2  ;;  %v16679_v2 = vld [vmem:[%s21477_s5 + $0x564] ss:$16 sps:$4 sm:$0xff]  }
 0x686   :  { %v20264_v62 = vpop.f32.mrb[108].mxu1 }
 0x687   :  { %v20266_v43 = vpop.f32.mrb[109].mxu1 }
 0x688   :  { %v7726_v52 = vpop.f32.mrb[110].mxu1  ;;  %8812 = vmatpush1.bf16.msra.mxu1 %v16635_v10  ;;  %v8898_v10 = vmax.f32 %v8892_v61, %v8894_v7  ;;  %v16704_v61 = vld [vmem:[%s21477_s5 + $0x588] ss:$16 sps:$4 sm:$0xff]   ;;  %v16709_v7 = vld [vmem:[%s21477_s5 + $0x5ac] ss:$16 sps:$4 sm:$0xff]  }
 0x689   :  { %v7727_v30 = vpop.f32.mrb[111].mxu1  ;;  %8813 = vmatprep.subr.bf16.mxu1 %v16640_v9  ;;  %v8896_v9 = vmax.f32 %v8888_v53, %v8890_v49  ;;  %v8891_v52 = vld [vmem:[#allocation3 + $0x1a] sm:$0x1] }
 0x68a   :  { %v8887_v30 = vld [vmem:[#allocation3 + $0x12] sm:$0x1] }
 0x68b   :  { %v8900_v57 = vmax.f32 %v8896_v9, %v8898_v10 }
 0x68c   :  { %8814 = vmatpush1.bf16.msra.mxu1 %v16638_v45  ;;  %v8893_v45 = vld [vmem:[#allocation3 + $0x1b] sm:$0x1] }
 0x68d   :  { %v20277_v19 = vpop.f32.mrb[108].mxu0  ;;  %8815 = vmatprep.subr.bf16.mxu1 %v16643_v38  ;;  %v8889_v38 = vld [vmem:[#allocation3 + $0x13] sm:$0x1]  ;;  %v8902_v34 = vpack.c.bf16 %v8900_v57, %v8900_v57 }
 0x68e   :  { %v20282_v21 = vpop.f32.mrb[109].mxu0  ;;  %v16716_v57 = vld [vmem:[%s21477_s5 + $0x600] ss:$16 sps:$4 sm:$0xff]  }
 0x68f   :  { %v11602_v15 = vpop.f32.mrb[110].mxu0 }
 0x690   :  { %8816 = vmatpush1.bf16.msra.mxu1 %v16641_v63  ;;  %v11603_v11 = vpop.f32.mrb[111].mxu0  ;;  %v8897_v63 = vmax.f32 %v8891_v52, %v8893_v45  ;;  %v16683_v15 = vld [vmem:[%s21477_s5 + $0x5a0] ss:$16 sps:$4 sm:$0xff]   ;;  %v16715_v45 = vld [vmem:[%s21477_s5 + $0x5ec] ss:$16 sps:$4 sm:$0xff]  }
 0x691   :  { %8842 = vmatprep.subr.bf16.mxu1 %v16646_v1  ;;  %v8895_v1 = vmax.f32 %v8887_v30, %v8889_v38  ;;  %v16721_v30 = vld [vmem:[%s21477_s5 + $0x624] ss:$16 sps:$4 sm:$0xff]   ;;  %v16719_v38 = vld [vmem:[%s21477_s5 + $0x620] ss:$16 sps:$4 sm:$0xff]  }
 0x693   :  { %8834 = vmatmul.mubr.bf16.vlgmr.msra.gmra.mrb[136].mxu1 %v8639_v32  ;;  %v8899_v11 = vmax.f32 %v8895_v1, %v8897_v63  ;;  %v9194_v63 = vld [vmem:[#allocation3 + $0x5c] sm:$0x1]  ;;  %v16722_v1 = vld [vmem:[%s21477_s5 + $0x640] ss:$16 sps:$4 sm:$0xff]  }
 0x694   :  { %8843 = vmatpush1.bf16.msra.mxu1 %v16644_v54  ;;  %8874 = vmatprep.mubr.bf16.mxu1 %v17235_v29  ;;  %v16688_v54 = vld [vmem:[%s21477_s5 + $0x5c4] ss:$16 sps:$4 sm:$0xff]  }
 0x695   :  { %8844 = vmatprep.subr.bf16.mxu1 %v16649_v8  ;;  %v8938_v8 = vunpack.c.l.b16 %v8902_v34  ;;  %v16727_v34 = vld [vmem:[%s21477_s5 + $0x664] ss:$16 sps:$4 sm:$0xff]  }
 0x698   :  { %8845 = vmatpush1.bf16.msra.mxu1 %v16647_v35 }
 0x699   :  { %8846 = vmatprep.subr.bf16.mxu1 %v16652_v37 }
 0x69c   :  { %8847 = vmatpush1.bf16.msra.mxu1 %v16650_v18 }
 0x69d   :  { %8848 = vmatprep.subr.bf16.mxu1 %v16655_v0 }
 0x6a0   :  { %8849 = vmatpush1.bf16.msra.mxu1 %v16653_v60  ;;  %v16686_v60 = vld [vmem:[%s21477_s5 + $0x5c0] ss:$16 sps:$4 sm:$0xff]  }
 0x6a1   :  { %8850 = vmatprep.subr.bf16.mxu1 %v16658_v50  ;;  %v8901_v50 = vpack.c.bf16 %v8899_v11, %v8899_v11  ;;  %v9192_v11 = vld [vmem:[#allocation3 + $0x55] sm:$0x1] }
 0x6a4   :  { %8851 = vmatpush1.bf16.msra.mxu1 %v16656_v51 }
 0x6a5   :  { %8852 = vmatprep.subr.bf16.mxu1 %v16661_v58  ;;  %v16691_v58 = vld [vmem:[%s21477_s5 + $0x5e4] ss:$16 sps:$4 sm:$0xff]  }
 0x6a6   :  { %v7931_v17 = vpop.f32.mrb[112].mxu1 }
 0x6a7   :  { %v20323_v36 = vadd.f32 %v7931_v17, %v20207_v56  ;;  %v7933_v5 = vpop.f32.mrb[113].mxu1  ;;  %v16665_v56 = vld [vmem:[%s21477_s5 + $0x4e8] ss:$16 sps:$4 sm:$0xff]   ;;  %v16694_v17 = vld [vmem:[%s21477_s5 + $0x50c] ss:$16 sps:$4 sm:$0xff]  }
 0x6a8   :  { %v20326_v48 = vadd.f32 %v7933_v5, %v20209_v39  ;;  %v7935_v25 = vpop.f32.mrb[114].mxu1  ;;  %8853 = vmatpush1.bf16.msra.mxu1 %v16659_v22  ;;  %v16670_v39 = vld [vmem:[%s21477_s5 + $0x504] ss:$16 sps:$4 sm:$0xff]   ;;  %v8939_v22 = vrot.slane %v8938_v8, 7 }
 0x6a9   :  { %v7936_v14 = vpop.f32.mrb[115].mxu1  ;;  %8854 = vmatprep.subr.bf16.mxu1 %v16664_v31 }
 0x6ac   :  { %8855 = vmatpush1.bf16.msra.mxu1 %v16662_v6 }
 0x6ad   :  { %v20337_v33 = vpop.f32.mrb[112].mxu0  ;;  %8856 = vmatprep.subr.bf16.mxu1 %v16667_v4  ;;  %v16692_v4 = vld [vmem:[%s21477_s5 + $0x508] ss:$16 sps:$4 sm:$0xff]  }
 0x6ae   :  { %v20342_v20 = vpop.f32.mrb[113].mxu0 }
 0x6af   :  { %v11904_v44 = vpop.f32.mrb[114].mxu0 }
 0x6b0   :  { %8857 = vmatpush1.bf16.msra.mxu1 %v16665_v56  ;;  %v11905_v24 = vpop.f32.mrb[115].mxu0  ;;  %v16695_v44 = vld [vmem:[%s21477_s5 + $0x528] ss:$16 sps:$4 sm:$0xff]  }
 0x6b1   :  { %9103 = vmatprep.subr.bf16.mxu1 %v16670_v39  ;;  %v16697_v39 = vld [vmem:[%s21477_s5 + $0x52c] ss:$16 sps:$4 sm:$0xff]  }
 0x6b2   :  { %v16700_v24 = vld [vmem:[%s21477_s5 + $0x54c] ss:$16 sps:$4 sm:$0xff]  }
 0x6b3   :  { %8875 = vmatmul.mubr.bf16.vlgmr.msra.gmra.mrb[140].mxu1 %v8639_v32 }
 0x6b4   :  { %9104 = vmatpush1.bf16.msra.mxu1 %v16668_v41  ;;  %9135 = vmatprep.mubr.bf16.mxu1 %v17235_v29  ;;  %v16698_v41 = vld [vmem:[%s21477_s5 + $0x548] ss:$16 sps:$4 sm:$0xff]  }
 0x6b5   :  { %9105 = vmatprep.subr.bf16.mxu1 %v16673_v40  ;;  %v16703_v40 = vld [vmem:[%s21477_s5 + $0x56c] ss:$16 sps:$4 sm:$0xff]  }
 0x6b8   :  { %9106 = vmatpush1.bf16.msra.mxu1 %v16671_v55  ;;  %v16701_v55 = vld [vmem:[%s21477_s5 + $0x568] ss:$16 sps:$4 sm:$0xff]  }
 0x6b9   :  { %9107 = vmatprep.subr.bf16.mxu1 %v16676_v26  ;;  %v16706_v26 = vld [vmem:[%s21477_s5 + $0x58c] ss:$16 sps:$4 sm:$0xff]  }
 0x6bc   :  { %9108 = vmatpush1.bf16.msra.mxu1 %v16674_v12  ;;  %v16707_v12 = vld [vmem:[%s21477_s5 + $0x5a8] ss:$16 sps:$4 sm:$0xff]  }
 0x6bd   :  { %9109 = vmatprep.subr.bf16.mxu1 %v16679_v2  ;;  %v16712_v2 = vld [vmem:[%s21477_s5 + $0x5cc] ss:$16 sps:$4 sm:$0xff]  }
 0x6c0   :  { %9110 = vmatpush1.bf16.msra.mxu1 %v16677_v59 }
 0x6c1   :  { %9111 = vmatprep.subr.bf16.mxu1 %v16682_v23  ;;  %v16710_v23 = vld [vmem:[%s21477_s5 + $0x5c8] ss:$16 sps:$4 sm:$0xff]  }
 0x6c4   :  { %9112 = vmatpush1.bf16.msra.mxu1 %v16680_v16  ;;  %v16724_v16 = vld [vmem:[%s21477_s5 + $0x644] ss:$16 sps:$4 sm:$0xff]  }
 0x6c5   :  { %9113 = vmatprep.subr.bf16.mxu1 %v16685_v42  ;;  %v9196_v42 = vld [vmem:[#allocation3 + $0x5d] sm:$0x1] }
 0x6c6   :  { %v7972_v32 = vpop.f32.mrb[116].mxu1 }
 0x6c7   :  { %v20382_v35 = vadd.f32 %v7972_v32, %v20264_v62  ;;  %v7974_v37 = vpop.f32.mrb[117].mxu1  ;;  %v16689_v62 = vld [vmem:[%s21477_s5 + $0x5e0] ss:$16 sps:$4 sm:$0xff]  }
 0x6c8   :  { %v20385_v18 = vadd.f32 %v7974_v37, %v20266_v43  ;;  %v7976_v0 = vpop.f32.mrb[118].mxu1  ;;  %9114 = vmatpush1.bf16.msra.mxu1 %v16683_v15  ;;  %v8937_v43 = vunpack.c.l.b16 %v8901_v50  ;;  %v9190_v15 = vld [vmem:[#allocation3 + $0x54] sm:$0x1]  ;;  %v16725_v32 = vld [vmem:[%s21477_s5 + $0x660] ss:$16 sps:$4 sm:$0xff]  }
 0x6c9   :  { %v7977_v51 = vpop.f32.mrb[119].mxu1  ;;  %9115 = vmatprep.subr.bf16.mxu1 %v16688_v54  ;;  %v9200_v54 = vmax.f32 %v9194_v63, %v9196_v42  ;;  %v9198_v8 = vmax.f32 %v9190_v15, %v9192_v11  ;;  %v16730_v37 = vld [vmem:[%s21477_s5 + $0x684] ss:$16 sps:$4 sm:$0xff]   ;;  %v9193_v0 = vld [vmem:[#allocation3 + $0x1c] sm:$0x1] }
 0x6ca   :  { %v8940_v25 = vsel %vm7483_vm1, %v8939_v22, %v8937_v43  ;;  %v9189_v51 = vld [vmem:[#allocation3 + $0x14] sm:$0x1]  ;;  %v16728_v22 = vld [vmem:[%s21477_s5 + $0x680] ss:$16 sps:$4 sm:$0xff]   ;;  %v16755_v63 = vld [vmem:[%s21477_s5 + $0x6a8] ss:$16 sps:$4 sm:$0xff]  }
 0x6cb   :  { %v8941_v56 = vpack.c.b16 %v8940_v25, %v8940_v25  ;;  %v9202_v50 = vmax.f32 %v9198_v8, %v9200_v54  ;;  %v16733_v43 = vld [vmem:[%s21477_s5 + $0x6a4] ss:$16 sps:$4 sm:$0xff]   ;;  %v16760_v42 = vld [vmem:[%s21477_s5 + $0x6cc] ss:$16 sps:$4 sm:$0xff]  }
 0x6cc   :  { %9116 = vmatpush1.bf16.msra.mxu1 %v16686_v60  ;;  %v9195_v60 = vld [vmem:[#allocation3 + $0x1d] sm:$0x1] }
 0x6cd   :  { %v20396_v31 = vpop.f32.mrb[116].mxu0  ;;  %9117 = vmatprep.subr.bf16.mxu1 %v16691_v58  ;;  %v9191_v58 = vld [vmem:[#allocation3 + $0x15] sm:$0x1]  ;;  %v9204_v25 = vpack.c.bf16 %v9202_v50, %v9202_v50  ;;  %v16767_v50 = vld [vmem:[%s21477_s5 + $0x720] ss:$16 sps:$4 sm:$0xff]  }
 0x6ce   :  { %v20401_v5 = vpop.f32.mrb[117].mxu0 }
 0x6cf   :  { %v12206_v6 = vpop.f32.mrb[118].mxu0 }
 0x6d0   :  { %9118 = vmatpush1.bf16.msra.mxu1 %v16689_v62  ;;  %v12207_v14 = vpop.f32.mrb[119].mxu0  ;;  %v9199_v62 = vmax.f32 %v9193_v0, %v9195_v60  ;;  %v16731_v6 = vld [vmem:[%s21477_s5 + $0x6a0] ss:$16 sps:$4 sm:$0xff]   ;;  %v16769_v60 = vld [vmem:[%s21477_s5 + $0x724] ss:$16 sps:$4 sm:$0xff]  }
 0x6d1   :  { %9144 = vmatprep.subr.bf16.mxu1 %v16694_v17  ;;  %v9197_v17 = vmax.f32 %v9189_v51, %v9191_v58  ;;  %v16764_v0 = vld [vmem:[%s21477_s5 + $0x700] ss:$16 sps:$4 sm:$0xff]   ;;  %v16772_v51 = vld [vmem:[%s21477_s5 + $0x744] ss:$16 sps:$4 sm:$0xff]   ;;  %v9496_v58 = vld [vmem:[#allocation3 + $0x5e] sm:$0x1] }
 0x6d3   :  { %9136 = vmatmul.mubr.bf16.vlgmr.msra.gmra.mrb[144].mxu1 %v8941_v56  ;;  %v9201_v14 = vmax.f32 %v9197_v17, %v9199_v62  ;;  %v16770_v62 = vld [vmem:[%s21477_s5 + $0x740] ss:$16 sps:$4 sm:$0xff]   ;;  %v9492_v17 = vld [vmem:[#allocation3 + $0x56] sm:$0x1] }
 0x6d4   :  { %9145 = vmatpush1.bf16.msra.mxu1 %v16692_v4  ;;  %9176 = vmatprep.mubr.bf16.mxu1 %v17235_v29  ;;  %v16736_v4 = vld [vmem:[%s21477_s5 + $0x6c4] ss:$16 sps:$4 sm:$0xff]  }
 0x6d5   :  { %9146 = vmatprep.subr.bf16.mxu1 %v16697_v39  ;;  %v9240_v39 = vunpack.c.l.b16 %v9204_v25  ;;  %v9494_v25 = vld [vmem:[#allocation3 + $0x57] sm:$0x1] }
 0x6d8   :  { %9147 = vmatpush1.bf16.msra.mxu1 %v16695_v44 }
 0x6d9   :  { %9148 = vmatprep.subr.bf16.mxu1 %v16700_v24 }
 0x6dc   :  { %9149 = vmatpush1.bf16.msra.mxu1 %v16698_v41 }
 0x6dd   :  { %9150 = vmatprep.subr.bf16.mxu1 %v16703_v40 }
 0x6e0   :  { %9151 = vmatpush1.bf16.msra.mxu1 %v16701_v55  ;;  %v16734_v55 = vld [vmem:[%s21477_s5 + $0x6c0] ss:$16 sps:$4 sm:$0xff]  }
 0x6e1   :  { %9152 = vmatprep.subr.bf16.mxu1 %v16706_v26  ;;  %v9203_v26 = vpack.c.bf16 %v9201_v14, %v9201_v14  ;;  %v16773_v14 = vld [vmem:[%s21477_s5 + $0x760] ss:$16 sps:$4 sm:$0xff]  }
 0x6e4   :  { %9153 = vmatpush1.bf16.msra.mxu1 %v16704_v61 }
 0x6e5   :  { %9154 = vmatprep.subr.bf16.mxu1 %v16709_v7  ;;  %v16739_v7 = vld [vmem:[%s21477_s5 + $0x6e4] ss:$16 sps:$4 sm:$0xff]  }
 0x6e6   :  { %v8229_v53 = vpop.f32.mrb[120].mxu1 }
 0x6e7   :  { %v20442_v49 = vadd.f32 %v8229_v53, %v20323_v36  ;;  %v8231_v10 = vpop.f32.mrb[121].mxu1  ;;  %v16713_v36 = vld [vmem:[%s21477_s5 + $0x5e8] ss:$16 sps:$4 sm:$0xff]  }
 0x6e8   :  { %v20445_v59 = vadd.f32 %v8231_v10, %v20326_v48  ;;  %v8233_v9 = vpop.f32.mrb[122].mxu1  ;;  %9155 = vmatpush1.bf16.msra.mxu1 %v16707_v12  ;;  %v16718_v48 = vld [vmem:[%s21477_s5 + $0x604] ss:$16 sps:$4 sm:$0xff]   ;;  %v9241_v12 = vrot.slane %v9240_v39, 7  ;;  %v16740_v10 = vld [vmem:[%s21477_s5 + $0x608] ss:$16 sps:$4 sm:$0xff]  }
 0x6e9   :  { %v8234_v52 = vpop.f32.mrb[123].mxu1  ;;  %9156 = vmatprep.subr.bf16.mxu1 %v16712_v2  ;;  %v16742_v2 = vld [vmem:[%s21477_s5 + $0x60c] ss:$16 sps:$4 sm:$0xff]  }
 0x6ea   :  { %v16743_v52 = vld [vmem:[%s21477_s5 + $0x628] ss:$16 sps:$4 sm:$0xff]   ;;  %v9495_v39 = vld [vmem:[#allocation3 + $0x1e] sm:$0x1] }
 0x6ec   :  { %9157 = vmatpush1.bf16.msra.mxu1 %v16710_v23  ;;  %v16745_v23 = vld [vmem:[%s21477_s5 + $0x62c] ss:$16 sps:$4 sm:$0xff]  }
 0x6ed   :  { %9158 = vmatprep.subr.bf16.mxu1 %v16715_v45  ;;  %v16748_v45 = vld [vmem:[%s21477_s5 + $0x64c] ss:$16 sps:$4 sm:$0xff]  }
 0x6f0   :  { %9159 = vmatpush1.bf16.msra.mxu1 %v16713_v36  ;;  %v16746_v36 = vld [vmem:[%s21477_s5 + $0x648] ss:$16 sps:$4 sm:$0xff]  }
 0x6f1   :  { %9405 = vmatprep.subr.bf16.mxu1 %v16718_v48  ;;  %v16751_v48 = vld [vmem:[%s21477_s5 + $0x66c] ss:$16 sps:$4 sm:$0xff]  }
 0x6f3   :  { %9177 = vmatmul.mubr.bf16.vlgmr.msra.gmra.mrb[148].mxu1 %v8941_v56 }
 0x6f4   :  { %9406 = vmatpush1.bf16.msra.mxu1 %v16716_v57  ;;  %9437 = vmatprep.mubr.bf16.mxu1 %v17235_v29  ;;  %v16749_v57 = vld [vmem:[%s21477_s5 + $0x668] ss:$16 sps:$4 sm:$0xff]  }
 0x6f5   :  { %9407 = vmatprep.subr.bf16.mxu1 %v16721_v30  ;;  %v16754_v30 = vld [vmem:[%s21477_s5 + $0x68c] ss:$16 sps:$4 sm:$0xff]  }
 0x6f8   :  { %9408 = vmatpush1.bf16.msra.mxu1 %v16719_v38  ;;  %v16752_v38 = vld [vmem:[%s21477_s5 + $0x688] ss:$16 sps:$4 sm:$0xff]  }
 0x6f9   :  { %9409 = vmatprep.subr.bf16.mxu1 %v16724_v16  ;;  %v16757_v16 = vld [vmem:[%s21477_s5 + $0x6ac] ss:$16 sps:$4 sm:$0xff]  }
 0x6fc   :  { %9410 = vmatpush1.bf16.msra.mxu1 %v16722_v1 }
 0x6fd   :  { %9411 = vmatprep.subr.bf16.mxu1 %v16727_v34 }
 0x700   :  { %9412 = vmatpush1.bf16.msra.mxu1 %v16725_v32  ;;  %v16758_v32 = vld [vmem:[%s21477_s5 + $0x6c8] ss:$16 sps:$4 sm:$0xff]  }
 0x701   :  { %9413 = vmatprep.subr.bf16.mxu1 %v16730_v37  ;;  %v16763_v37 = vld [vmem:[%s21477_s5 + $0x6ec] ss:$16 sps:$4 sm:$0xff]  }
 0x704   :  { %9414 = vmatpush1.bf16.msra.mxu1 %v16728_v22  ;;  %v9498_v22 = vld [vmem:[#allocation3 + $0x5f] sm:$0x1] }
 0x705   :  { %9415 = vmatprep.subr.bf16.mxu1 %v16733_v43  ;;  %v16775_v43 = vld [vmem:[%s21477_s5 + $0x764] ss:$16 sps:$4 sm:$0xff]  }
 0x706   :  { %v8270_v56 = vpop.f32.mrb[124].mxu1 }
 0x707   :  { %v20497_v44 = vadd.f32 %v8270_v56, %v20382_v35  ;;  %v8272_v24 = vpop.f32.mrb[125].mxu1  ;;  %v16737_v35 = vld [vmem:[%s21477_s5 + $0x6e0] ss:$16 sps:$4 sm:$0xff]   ;;  %v16778_v56 = vld [vmem:[%s21477_s5 + $0x784] ss:$16 sps:$4 sm:$0xff]  }
 0x708   :  { %v20500_v41 = vadd.f32 %v8272_v24, %v20385_v18  ;;  %v8274_v40 = vpop.f32.mrb[126].mxu1  ;;  %9416 = vmatpush1.bf16.msra.mxu1 %v16731_v6  ;;  %v9239_v18 = vunpack.c.l.b16 %v9203_v26  ;;  %v9502_v6 = vmax.f32 %v9496_v58, %v9498_v22  ;;  %v9497_v24 = vld [vmem:[#allocation3 + $0x1f] sm:$0x1]  ;;  %v9493_v26 = vld [vmem:[#allocation3 + $0x17] sm:$0x1] }
 0x709   :  { %v8275_v61 = vpop.f32.mrb[127].mxu1  ;;  %9417 = vmatprep.subr.bf16.mxu1 %v16736_v4  ;;  %v9500_v4 = vmax.f32 %v9492_v17, %v9494_v25  ;;  %v16803_v58 = vld [vmem:[%s21477_s5 + $0x7a8] ss:$16 sps:$4 sm:$0xff]   ;;  %v16808_v22 = vld [vmem:[%s21477_s5 + $0x7cc] ss:$16 sps:$4 sm:$0xff]  }
 0x70a   :  { %v9242_v53 = vsel %vm7483_vm1, %v9241_v12, %v9239_v18  ;;  %v16776_v61 = vld [vmem:[%s21477_s5 + $0x780] ss:$16 sps:$4 sm:$0xff]   ;;  %v16781_v12 = vld [vmem:[%s21477_s5 + $0x7a4] ss:$16 sps:$4 sm:$0xff]  }
 0x70b   :  { %v9243_v9 = vpack.c.b16 %v9242_v53, %v9242_v53  ;;  %v9504_v40 = vmax.f32 %v9500_v4, %v9502_v6 }
 0x70c   :  { %9418 = vmatpush1.bf16.msra.mxu1 %v16734_v55  ;;  %v9491_v55 = vld [vmem:[#allocation3 + $0x16] sm:$0x1] }
 0x70d   :  { %9419 = vmatprep.subr.bf16.mxu1 %v16739_v7  ;;  %v9501_v7 = vmax.f32 %v9495_v39, %v9497_v24  ;;  %v9506_v18 = vpack.c.bf16 %v9504_v40, %v9504_v40  ;;  %v16812_v39 = vld [vmem:[%s21477_s5 + $0x800] ss:$16 sps:$4 sm:$0xff]   ;;  %v16817_v24 = vld [vmem:[%s21477_s5 + $0x824] ss:$16 sps:$4 sm:$0xff]  }
 0x70e   :  { %v16815_v40 = vld [vmem:[%s21477_s5 + $0x820] ss:$16 sps:$4 sm:$0xff]  }
 0x710   :  { %9420 = vmatpush1.bf16.msra.mxu1 %v16737_v35  ;;  %v9499_v35 = vmax.f32 %v9491_v55, %v9493_v26  ;;  %v16820_v55 = vld [vmem:[%s21477_s5 + $0x844] ss:$16 sps:$4 sm:$0xff]   ;;  %v9800_v26 = vld [vmem:[#allocation3 + $0x68] sm:$0x1] }
 0x711   :  { %9446 = vmatprep.subr.bf16.mxu1 %v16742_v2  ;;  %v16779_v2 = vld [vmem:[%s21477_s5 + $0x7a0] ss:$16 sps:$4 sm:$0xff]  }
 0x712   :  { %v9503_v53 = vmax.f32 %v9499_v35, %v9501_v7  ;;  %v16818_v7 = vld [vmem:[%s21477_s5 + $0x840] ss:$16 sps:$4 sm:$0xff]  }
 0x713   :  { %9438 = vmatmul.mubr.bf16.vlgmr.msra.gmra.mrb[152].mxu1 %v9243_v9  ;;  %v9795_v35 = vld [vmem:[#allocation3 + $0x60] sm:$0x1] }
 0x714   :  { %9447 = vmatpush1.bf16.msra.mxu1 %v16740_v10  ;;  %9478 = vmatprep.mubr.bf16.mxu1 %v17235_v29  ;;  %v16784_v10 = vld [vmem:[%s21477_s5 + $0x7c4] ss:$16 sps:$4 sm:$0xff]  }
 0x715   :  { %9448 = vmatprep.subr.bf16.mxu1 %v16745_v23  ;;  %v9542_v23 = vunpack.c.l.b16 %v9506_v18  ;;  %v9797_v18 = vld [vmem:[#allocation3 + $0x61] sm:$0x1] }
 0x718   :  { %9449 = vmatpush1.bf16.msra.mxu1 %v16743_v52 }
 0x719   :  { %9450 = vmatprep.subr.bf16.mxu1 %v16748_v45 }
 0x71c   :  { %9451 = vmatpush1.bf16.msra.mxu1 %v16746_v36 }
 0x71d   :  { %9452 = vmatprep.subr.bf16.mxu1 %v16751_v48 }
 0x720   :  { %9453 = vmatpush1.bf16.msra.mxu1 %v16749_v57  ;;  %v16782_v57 = vld [vmem:[%s21477_s5 + $0x7c0] ss:$16 sps:$4 sm:$0xff]  }
 0x721   :  { %9454 = vmatprep.subr.bf16.mxu1 %v16754_v30  ;;  %v9505_v30 = vpack.c.bf16 %v9503_v53, %v9503_v53  ;;  %v16821_v53 = vld [vmem:[%s21477_s5 + $0x860] ss:$16 sps:$4 sm:$0xff]  }
 0x724   :  { %9455 = vmatpush1.bf16.msra.mxu1 %v16752_v38 }
 0x725   :  { %9456 = vmatprep.subr.bf16.mxu1 %v16757_v16  ;;  %v16787_v16 = vld [vmem:[%s21477_s5 + $0x7e4] ss:$16 sps:$4 sm:$0xff]  }
 0x726   :  { %v8531_v1 = vpop.f32.mrb[128].mxu1 }
 0x727   :  { %v20553_v34 = vadd.f32 %v8531_v1, %v20442_v49  ;;  %v8533_v15 = vpop.f32.mrb[129].mxu1  ;;  %v16761_v49 = vld [vmem:[%s21477_s5 + $0x6e8] ss:$16 sps:$4 sm:$0xff]  }
 0x728   :  { %v20556_v11 = vadd.f32 %v8533_v15, %v20445_v59  ;;  %v8535_v54 = vpop.f32.mrb[130].mxu1  ;;  %9457 = vmatpush1.bf16.msra.mxu1 %v16755_v63  ;;  %v16766_v59 = vld [vmem:[%s21477_s5 + $0x704] ss:$16 sps:$4 sm:$0xff]   ;;  %v9543_v63 = vrot.slane %v9542_v23, 7  ;;  %v16788_v15 = vld [vmem:[%s21477_s5 + $0x708] ss:$16 sps:$4 sm:$0xff]  }
 0x729   :  { %v8536_v8 = vpop.f32.mrb[131].mxu1  ;;  %9458 = vmatprep.subr.bf16.mxu1 %v16760_v42  ;;  %v16790_v42 = vld [vmem:[%s21477_s5 + $0x70c] ss:$16 sps:$4 sm:$0xff]   ;;  %v9799_v23 = vld [vmem:[#allocation3 + $0x28] sm:$0x1] }
 0x72a   :  { %v16791_v8 = vld [vmem:[%s21477_s5 + $0x728] ss:$16 sps:$4 sm:$0xff]  }
 0x72c   :  { %9459 = vmatpush1.bf16.msra.mxu1 %v16758_v32  ;;  %v16793_v32 = vld [vmem:[%s21477_s5 + $0x72c] ss:$16 sps:$4 sm:$0xff]  }
 0x72d   :  { %9460 = vmatprep.subr.bf16.mxu1 %v16763_v37  ;;  %v16796_v37 = vld [vmem:[%s21477_s5 + $0x74c] ss:$16 sps:$4 sm:$0xff]  }
 0x730   :  { %9461 = vmatpush1.bf16.msra.mxu1 %v16761_v49  ;;  %v16794_v49 = vld [vmem:[%s21477_s5 + $0x748] ss:$16 sps:$4 sm:$0xff]  }
 0x731   :  { %9707 = vmatprep.subr.bf16.mxu1 %v16766_v59  ;;  %v16799_v59 = vld [vmem:[%s21477_s5 + $0x76c] ss:$16 sps:$4 sm:$0xff]  }
 0x733   :  { %9479 = vmatmul.mubr.bf16.vlgmr.msra.gmra.mrb[156].mxu1 %v9243_v9 }
 0x734   :  { %9708 = vmatpush1.bf16.msra.mxu1 %v16764_v0  ;;  %9739 = vmatprep.mubr.bf16.mxu1 %v17235_v29  ;;  %v16797_v0 = vld [vmem:[%s21477_s5 + $0x768] ss:$16 sps:$4 sm:$0xff]  }
 0x735   :  { %9709 = vmatprep.subr.bf16.mxu1 %v16769_v60  ;;  %v16802_v60 = vld [vmem:[%s21477_s5 + $0x78c] ss:$16 sps:$4 sm:$0xff]  }
 0x738   :  { %9710 = vmatpush1.bf16.msra.mxu1 %v16767_v50  ;;  %v16800_v50 = vld [vmem:[%s21477_s5 + $0x788] ss:$16 sps:$4 sm:$0xff]  }
 0x739   :  { %9711 = vmatprep.subr.bf16.mxu1 %v16772_v51  ;;  %v16805_v51 = vld [vmem:[%s21477_s5 + $0x7ac] ss:$16 sps:$4 sm:$0xff]  }
 0x73c   :  { %9712 = vmatpush1.bf16.msra.mxu1 %v16770_v62 }
 0x73d   :  { %9713 = vmatprep.subr.bf16.mxu1 %v16775_v43 }
 0x740   :  { %9714 = vmatpush1.bf16.msra.mxu1 %v16773_v14  ;;  %v16806_v14 = vld [vmem:[%s21477_s5 + $0x7c8] ss:$16 sps:$4 sm:$0xff]  }
 0x741   :  { %9715 = vmatprep.subr.bf16.mxu1 %v16778_v56  ;;  %v16811_v56 = vld [vmem:[%s21477_s5 + $0x7ec] ss:$16 sps:$4 sm:$0xff]  }
 0x744   :  { %9716 = vmatpush1.bf16.msra.mxu1 %v16776_v61  ;;  %v9802_v61 = vld [vmem:[#allocation3 + $0x69] sm:$0x1] }
 0x745   :  { %9717 = vmatprep.subr.bf16.mxu1 %v16781_v12  ;;  %v16823_v12 = vld [vmem:[%s21477_s5 + $0x864] ss:$16 sps:$4 sm:$0xff]  }
 0x746   :  { %v8572_v9 = vpop.f32.mrb[132].mxu1 }
 0x747   :  { %v20608_v52 = vadd.f32 %v8572_v9, %v20497_v44  ;;  %v8574_v45 = vpop.f32.mrb[133].mxu1  ;;  %v16785_v44 = vld [vmem:[%s21477_s5 + $0x7e0] ss:$16 sps:$4 sm:$0xff]   ;;  %v16826_v9 = vld [vmem:[%s21477_s5 + $0x884] ss:$16 sps:$4 sm:$0xff]  }
 0x748   :  { %v20611_v36 = vadd.f32 %v8574_v45, %v20500_v41  ;;  %v8576_v48 = vpop.f32.mrb[134].mxu1  ;;  %9718 = vmatpush1.bf16.msra.mxu1 %v16779_v2  ;;  %v9541_v41 = vunpack.c.l.b16 %v9505_v30  ;;  %v9806_v2 = vmax.f32 %v9800_v26, %v9802_v61  ;;  %v9801_v45 = vld [vmem:[#allocation3 + $0x29] sm:$0x1]  ;;  %v9796_v30 = vld [vmem:[#allocation3 + $0x21] sm:$0x1] }
 0x749   :  { %v8577_v38 = vpop.f32.mrb[135].mxu1  ;;  %9719 = vmatprep.subr.bf16.mxu1 %v16784_v10  ;;  %v9804_v10 = vmax.f32 %v9795_v35, %v9797_v18  ;;  %v16851_v26 = vld [vmem:[%s21477_s5 + $0x8a8] ss:$16 sps:$4 sm:$0xff]   ;;  %v16856_v61 = vld [vmem:[%s21477_s5 + $0x8cc] ss:$16 sps:$4 sm:$0xff]  }
 0x74a   :  { %v9544_v1 = vsel %vm7483_vm1, %v9543_v63, %v9541_v41  ;;  %v16824_v38 = vld [vmem:[%s21477_s5 + $0x880] ss:$16 sps:$4 sm:$0xff]   ;;  %v16829_v63 = vld [vmem:[%s21477_s5 + $0x8a4] ss:$16 sps:$4 sm:$0xff]  }
 0x74b   :  { %v9545_v54 = vpack.c.b16 %v9544_v1, %v9544_v1  ;;  %v9808_v48 = vmax.f32 %v9804_v10, %v9806_v2 }
 0x74c   :  { %9720 = vmatpush1.bf16.msra.mxu1 %v16782_v57  ;;  %v9794_v57 = vld [vmem:[#allocation3 + $0x20] sm:$0x1] }
 0x74d   :  { %9721 = vmatprep.subr.bf16.mxu1 %v16787_v16  ;;  %v9805_v16 = vmax.f32 %v9799_v23, %v9801_v45  ;;  %v9810_v41 = vpack.c.bf16 %v9808_v48, %v9808_v48  ;;  %v16860_v23 = vld [vmem:[%s21477_s5 + $0x900] ss:$16 sps:$4 sm:$0xff]   ;;  %v16865_v45 = vld [vmem:[%s21477_s5 + $0x924] ss:$16 sps:$4 sm:$0xff]  }
 0x74e   :  { %v16863_v48 = vld [vmem:[%s21477_s5 + $0x920] ss:$16 sps:$4 sm:$0xff]  }
 0x750   :  { %9722 = vmatpush1.bf16.msra.mxu1 %v16785_v44  ;;  %v9803_v44 = vmax.f32 %v9794_v57, %v9796_v30  ;;  %v16868_v57 = vld [vmem:[%s21477_s5 + $0x944] ss:$16 sps:$4 sm:$0xff]   ;;  %v10102_v30 = vld [vmem:[#allocation3 + $0x6a] sm:$0x1] }
 0x751   :  { %9748 = vmatprep.subr.bf16.mxu1 %v16790_v42  ;;  %v16827_v42 = vld [vmem:[%s21477_s5 + $0x8a0] ss:$16 sps:$4 sm:$0xff]  }
 0x752   :  { %v9807_v1 = vmax.f32 %v9803_v44, %v9805_v16  ;;  %v16866_v16 = vld [vmem:[%s21477_s5 + $0x940] ss:$16 sps:$4 sm:$0xff]  }
 0x753   :  { %9740 = vmatmul.mubr.bf16.vlgmr.msra.gmra.mrb[160].mxu1 %v9545_v54  ;;  %v10098_v44 = vld [vmem:[#allocation3 + $0x62] sm:$0x1] }
 0x754   :  { %9749 = vmatpush1.bf16.msra.mxu1 %v16788_v15  ;;  %9780 = vmatprep.mubr.bf16.mxu1 %v17235_v29  ;;  %v16832_v15 = vld [vmem:[%s21477_s5 + $0x8c4] ss:$16 sps:$4 sm:$0xff]  }
 0x755   :  { %9750 = vmatprep.subr.bf16.mxu1 %v16793_v32  ;;  %v9846_v32 = vunpack.c.l.b16 %v9810_v41  ;;  %v10100_v41 = vld [vmem:[#allocation3 + $0x63] sm:$0x1] }
 0x758   :  { %9751 = vmatpush1.bf16.msra.mxu1 %v16791_v8 }
 0x759   :  { %9752 = vmatprep.subr.bf16.mxu1 %v16796_v37 }
 0x75c   :  { %9753 = vmatpush1.bf16.msra.mxu1 %v16794_v49 }
 0x75d   :  { %9754 = vmatprep.subr.bf16.mxu1 %v16799_v59 }
 0x760   :  { %9755 = vmatpush1.bf16.msra.mxu1 %v16797_v0  ;;  %v16830_v0 = vld [vmem:[%s21477_s5 + $0x8c0] ss:$16 sps:$4 sm:$0xff]  }
 0x761   :  { %9756 = vmatprep.subr.bf16.mxu1 %v16802_v60  ;;  %v9809_v60 = vpack.c.bf16 %v9807_v1, %v9807_v1  ;;  %v16869_v1 = vld [vmem:[%s21477_s5 + $0x960] ss:$16 sps:$4 sm:$0xff]  }
 0x764   :  { %9757 = vmatpush1.bf16.msra.mxu1 %v16800_v50 }
 0x765   :  { %9758 = vmatprep.subr.bf16.mxu1 %v16805_v51  ;;  %v16835_v51 = vld [vmem:[%s21477_s5 + $0x8e4] ss:$16 sps:$4 sm:$0xff]  }
 0x766   :  { %v8835_v62 = vpop.f32.mrb[136].mxu1 }
 0x767   :  { %v20664_v43 = vadd.f32 %v8835_v62, %v20553_v34  ;;  %v8837_v17 = vpop.f32.mrb[137].mxu1  ;;  %v16809_v34 = vld [vmem:[%s21477_s5 + $0x7e8] ss:$16 sps:$4 sm:$0xff]  }
 0x768   :  { %v20667_v25 = vadd.f32 %v8837_v17, %v20556_v11  ;;  %v8839_v6 = vpop.f32.mrb[138].mxu1  ;;  %9759 = vmatpush1.bf16.msra.mxu1 %v16803_v58  ;;  %v16814_v11 = vld [vmem:[%s21477_s5 + $0x804] ss:$16 sps:$4 sm:$0xff]   ;;  %v9847_v58 = vrot.slane %v9846_v32, 7  ;;  %v16836_v17 = vld [vmem:[%s21477_s5 + $0x808] ss:$16 sps:$4 sm:$0xff]  }
 0x769   :  { %v8840_v4 = vpop.f32.mrb[139].mxu1  ;;  %9760 = vmatprep.subr.bf16.mxu1 %v16808_v22  ;;  %v16838_v22 = vld [vmem:[%s21477_s5 + $0x80c] ss:$16 sps:$4 sm:$0xff]   ;;  %v10101_v32 = vld [vmem:[#allocation3 + $0x2a] sm:$0x1] }
 0x76a   :  { %v16839_v4 = vld [vmem:[%s21477_s5 + $0x828] ss:$16 sps:$4 sm:$0xff]  }
 0x76c   :  { %9761 = vmatpush1.bf16.msra.mxu1 %v16806_v14  ;;  %v16841_v14 = vld [vmem:[%s21477_s5 + $0x82c] ss:$16 sps:$4 sm:$0xff]  }
 0x76d   :  { %9762 = vmatprep.subr.bf16.mxu1 %v16811_v56  ;;  %v16844_v56 = vld [vmem:[%s21477_s5 + $0x84c] ss:$16 sps:$4 sm:$0xff]  }
 0x770   :  { %9763 = vmatpush1.bf16.msra.mxu1 %v16809_v34  ;;  %v16842_v34 = vld [vmem:[%s21477_s5 + $0x848] ss:$16 sps:$4 sm:$0xff]  }
 0x771   :  { %10011 = vmatprep.subr.bf16.mxu1 %v16814_v11  ;;  %v16847_v11 = vld [vmem:[%s21477_s5 + $0x86c] ss:$16 sps:$4 sm:$0xff]  }
 0x773   :  { %9781 = vmatmul.mubr.bf16.vlgmr.msra.gmra.mrb[164].mxu1 %v9545_v54 }
 0x774   :  { %10012 = vmatpush1.bf16.msra.mxu1 %v16812_v39  ;;  %10043 = vmatprep.mubr.bf16.mxu1 %v17235_v29  ;;  %v16845_v39 = vld [vmem:[%s21477_s5 + $0x868] ss:$16 sps:$4 sm:$0xff]  }
 0x775   :  { %10013 = vmatprep.subr.bf16.mxu1 %v16817_v24  ;;  %v16850_v24 = vld [vmem:[%s21477_s5 + $0x88c] ss:$16 sps:$4 sm:$0xff]  }
 0x778   :  { %10014 = vmatpush1.bf16.msra.mxu1 %v16815_v40  ;;  %v16848_v40 = vld [vmem:[%s21477_s5 + $0x888] ss:$16 sps:$4 sm:$0xff]  }
 0x779   :  { %10015 = vmatprep.subr.bf16.mxu1 %v16820_v55  ;;  %v16853_v55 = vld [vmem:[%s21477_s5 + $0x8ac] ss:$16 sps:$4 sm:$0xff]  }
 0x77c   :  { %10016 = vmatpush1.bf16.msra.mxu1 %v16818_v7 }
 0x77d   :  { %10017 = vmatprep.subr.bf16.mxu1 %v16823_v12 }
 0x780   :  { %10018 = vmatpush1.bf16.msra.mxu1 %v16821_v53  ;;  %v16854_v53 = vld [vmem:[%s21477_s5 + $0x8c8] ss:$16 sps:$4 sm:$0xff]  }
 0x781   :  { %10019 = vmatprep.subr.bf16.mxu1 %v16826_v9  ;;  %v16859_v9 = vld [vmem:[%s21477_s5 + $0x8ec] ss:$16 sps:$4 sm:$0xff]  }
 0x784   :  { %10020 = vmatpush1.bf16.msra.mxu1 %v16824_v38  ;;  %v10104_v38 = vld [vmem:[#allocation3 + $0x6b] sm:$0x1] }
 0x785   :  { %10021 = vmatprep.subr.bf16.mxu1 %v16829_v63  ;;  %v16871_v63 = vld [vmem:[%s21477_s5 + $0x964] ss:$16 sps:$4 sm:$0xff]  }
 0x786   :  { %v8876_v54 = vpop.f32.mrb[140].mxu1 }
 0x787   :  { %v20719_v8 = vadd.f32 %v8876_v54, %v20608_v52  ;;  %v8878_v37 = vpop.f32.mrb[141].mxu1  ;;  %v16833_v52 = vld [vmem:[%s21477_s5 + $0x8e0] ss:$16 sps:$4 sm:$0xff]   ;;  %v16874_v54 = vld [vmem:[%s21477_s5 + $0x984] ss:$16 sps:$4 sm:$0xff]  }
 0x788   :  { %v20722_v49 = vadd.f32 %v8878_v37, %v20611_v36  ;;  %v8880_v59 = vpop.f32.mrb[142].mxu1  ;;  %10022 = vmatpush1.bf16.msra.mxu1 %v16827_v42  ;;  %v9845_v36 = vunpack.c.l.b16 %v9809_v60  ;;  %v10108_v42 = vmax.f32 %v10102_v30, %v10104_v38  ;;  %v10103_v37 = vld [vmem:[#allocation3 + $0x2b] sm:$0x1]  ;;  %v10099_v60 = vld [vmem:[#allocation3 + $0x23] sm:$0x1] }
 0x789   :  { %v8881_v50 = vpop.f32.mrb[143].mxu1  ;;  %10023 = vmatprep.subr.bf16.mxu1 %v16832_v15  ;;  %v10106_v15 = vmax.f32 %v10098_v44, %v10100_v41  ;;  %v16899_v30 = vld [vmem:[%s21477_s5 + $0x9a8] ss:$16 sps:$4 sm:$0xff]   ;;  %v16904_v38 = vld [vmem:[%s21477_s5 + $0x9cc] ss:$16 sps:$4 sm:$0xff]  }
 0x78a   :  { %v9848_v62 = vsel %vm7483_vm1, %v9847_v58, %v9845_v36  ;;  %v16872_v50 = vld [vmem:[%s21477_s5 + $0x980] ss:$16 sps:$4 sm:$0xff]   ;;  %v16877_v58 = vld [vmem:[%s21477_s5 + $0x9a4] ss:$16 sps:$4 sm:$0xff]  }
 0x78b   :  { %v9849_v6 = vpack.c.b16 %v9848_v62, %v9848_v62  ;;  %v10110_v59 = vmax.f32 %v10106_v15, %v10108_v42 }
 0x78c   :  { %10024 = vmatpush1.bf16.msra.mxu1 %v16830_v0  ;;  %v10097_v0 = vld [vmem:[#allocation3 + $0x22] sm:$0x1] }
 0x78d   :  { %10025 = vmatprep.subr.bf16.mxu1 %v16835_v51  ;;  %v10107_v51 = vmax.f32 %v10101_v32, %v10103_v37  ;;  %v10112_v36 = vpack.c.bf16 %v10110_v59, %v10110_v59  ;;  %v16908_v32 = vld [vmem:[%s21477_s5 + $0xa00] ss:$16 sps:$4 sm:$0xff]   ;;  %v16913_v37 = vld [vmem:[%s21477_s5 + $0xa24] ss:$16 sps:$4 sm:$0xff]  }
 0x78e   :  { %v16911_v59 = vld [vmem:[%s21477_s5 + $0xa20] ss:$16 sps:$4 sm:$0xff]  }
 0x790   :  { %10026 = vmatpush1.bf16.msra.mxu1 %v16833_v52  ;;  %v10105_v52 = vmax.f32 %v10097_v0, %v10099_v60  ;;  %v16916_v0 = vld [vmem:[%s21477_s5 + $0xa44] ss:$16 sps:$4 sm:$0xff]   ;;  %v10404_v60 = vld [vmem:[#allocation3 + $0x6c] sm:$0x1] }
 0x791   :  { %10052 = vmatprep.subr.bf16.mxu1 %v16838_v22  ;;  %v16875_v22 = vld [vmem:[%s21477_s5 + $0x9a0] ss:$16 sps:$4 sm:$0xff]  }
 0x792   :  { %v10109_v62 = vmax.f32 %v10105_v52, %v10107_v51  ;;  %v16914_v51 = vld [vmem:[%s21477_s5 + $0xa40] ss:$16 sps:$4 sm:$0xff]   ;;  %v10400_v52 = vld [vmem:[#allocation3 + $0x64] sm:$0x1] }
 0x793   :  { %10044 = vmatmul.mubr.bf16.vlgmr.msra.gmra.mrb[168].mxu1 %v9849_v6 }
 0x794   :  { %10053 = vmatpush1.bf16.msra.mxu1 %v16836_v17  ;;  %10084 = vmatprep.mubr.bf16.mxu1 %v17235_v29  ;;  %v16880_v17 = vld [vmem:[%s21477_s5 + $0x9c4] ss:$16 sps:$4 sm:$0xff]  }
 0x795   :  { %10054 = vmatprep.subr.bf16.mxu1 %v16841_v14  ;;  %v10148_v14 = vunpack.c.l.b16 %v10112_v36  ;;  %v10402_v36 = vld [vmem:[#allocation3 + $0x65] sm:$0x1] }
 0x798   :  { %10055 = vmatpush1.bf16.msra.mxu1 %v16839_v4 }
 0x799   :  { %10056 = vmatprep.subr.bf16.mxu1 %v16844_v56 }
 0x79c   :  { %10057 = vmatpush1.bf16.msra.mxu1 %v16842_v34 }
 0x79d   :  { %10058 = vmatprep.subr.bf16.mxu1 %v16847_v11 }
 0x7a0   :  { %10059 = vmatpush1.bf16.msra.mxu1 %v16845_v39  ;;  %v16878_v39 = vld [vmem:[%s21477_s5 + $0x9c0] ss:$16 sps:$4 sm:$0xff]  }
 0x7a1   :  { %10060 = vmatprep.subr.bf16.mxu1 %v16850_v24  ;;  %v10111_v24 = vpack.c.bf16 %v10109_v62, %v10109_v62  ;;  %v16917_v62 = vld [vmem:[%s21477_s5 + $0xa60] ss:$16 sps:$4 sm:$0xff]  }
 0x7a4   :  { %10061 = vmatpush1.bf16.msra.mxu1 %v16848_v40 }
 0x7a5   :  { %10062 = vmatprep.subr.bf16.mxu1 %v16853_v55  ;;  %v16883_v55 = vld [vmem:[%s21477_s5 + $0x9e4] ss:$16 sps:$4 sm:$0xff]  }
 0x7a6   :  { %v9137_v7 = vpop.f32.mrb[144].mxu1 }
 0x7a7   :  { %v20775_v12 = vadd.f32 %v9137_v7, %v20664_v43  ;;  %v9139_v35 = vpop.f32.mrb[145].mxu1  ;;  %v16857_v43 = vld [vmem:[%s21477_s5 + $0x8e8] ss:$16 sps:$4 sm:$0xff]  }
 0x7a8   :  { %v20778_v18 = vadd.f32 %v9139_v35, %v20667_v25  ;;  %v9141_v2 = vpop.f32.mrb[146].mxu1  ;;  %10063 = vmatpush1.bf16.msra.mxu1 %v16851_v26  ;;  %v16862_v25 = vld [vmem:[%s21477_s5 + $0x904] ss:$16 sps:$4 sm:$0xff]   ;;  %v10149_v26 = vrot.slane %v10148_v14, 7  ;;  %v16884_v35 = vld [vmem:[%s21477_s5 + $0x908] ss:$16 sps:$4 sm:$0xff]  }
 0x7a9   :  { %v9142_v10 = vpop.f32.mrb[147].mxu1  ;;  %10064 = vmatprep.subr.bf16.mxu1 %v16856_v61  ;;  %v16886_v61 = vld [vmem:[%s21477_s5 + $0x90c] ss:$16 sps:$4 sm:$0xff]  }
 0x7aa   :  { %v16887_v10 = vld [vmem:[%s21477_s5 + $0x928] ss:$16 sps:$4 sm:$0xff]   ;;  %v10403_v14 = vld [vmem:[#allocation3 + $0x2c] sm:$0x1] }
 0x7ac   :  { %10065 = vmatpush1.bf16.msra.mxu1 %v16854_v53  ;;  %v16889_v53 = vld [vmem:[%s21477_s5 + $0x92c] ss:$16 sps:$4 sm:$0xff]  }
 0x7ad   :  { %10066 = vmatprep.subr.bf16.mxu1 %v16859_v9  ;;  %v16892_v9 = vld [vmem:[%s21477_s5 + $0x94c] ss:$16 sps:$4 sm:$0xff]  }
 0x7b0   :  { %10067 = vmatpush1.bf16.msra.mxu1 %v16857_v43  ;;  %v16890_v43 = vld [vmem:[%s21477_s5 + $0x948] ss:$16 sps:$4 sm:$0xff]  }
 0x7b1   :  { %10313 = vmatprep.subr.bf16.mxu1 %v16862_v25  ;;  %v16895_v25 = vld [vmem:[%s21477_s5 + $0x96c] ss:$16 sps:$4 sm:$0xff]  }
 0x7b3   :  { %10085 = vmatmul.mubr.bf16.vlgmr.msra.gmra.mrb[172].mxu1 %v9849_v6 }
 0x7b4   :  { %10314 = vmatpush1.bf16.msra.mxu1 %v16860_v23  ;;  %10345 = vmatprep.mubr.bf16.mxu1 %v17235_v29  ;;  %v16893_v23 = vld [vmem:[%s21477_s5 + $0x968] ss:$16 sps:$4 sm:$0xff]  }
 0x7b5   :  { %10315 = vmatprep.subr.bf16.mxu1 %v16865_v45  ;;  %v16898_v45 = vld [vmem:[%s21477_s5 + $0x98c] ss:$16 sps:$4 sm:$0xff]  }
 0x7b8   :  { %10316 = vmatpush1.bf16.msra.mxu1 %v16863_v48  ;;  %v16896_v48 = vld [vmem:[%s21477_s5 + $0x988] ss:$16 sps:$4 sm:$0xff]  }
 0x7b9   :  { %10317 = vmatprep.subr.bf16.mxu1 %v16868_v57  ;;  %v16901_v57 = vld [vmem:[%s21477_s5 + $0x9ac] ss:$16 sps:$4 sm:$0xff]  }
 0x7bc   :  { %10318 = vmatpush1.bf16.msra.mxu1 %v16866_v16 }
 0x7bd   :  { %10319 = vmatprep.subr.bf16.mxu1 %v16871_v63 }
 0x7c0   :  { %10320 = vmatpush1.bf16.msra.mxu1 %v16869_v1  ;;  %v16902_v1 = vld [vmem:[%s21477_s5 + $0x9c8] ss:$16 sps:$4 sm:$0xff]  }
 0x7c1   :  { %10321 = vmatprep.subr.bf16.mxu1 %v16874_v54  ;;  %v16907_v54 = vld [vmem:[%s21477_s5 + $0x9ec] ss:$16 sps:$4 sm:$0xff]  }
 0x7c4   :  { %10322 = vmatpush1.bf16.msra.mxu1 %v16872_v50  ;;  %v10406_v50 = vld [vmem:[#allocation3 + $0x6d] sm:$0x1] }
 0x7c5   :  { %10323 = vmatprep.subr.bf16.mxu1 %v16877_v58  ;;  %v16919_v58 = vld [vmem:[%s21477_s5 + $0xa64] ss:$16 sps:$4 sm:$0xff]  }
 0x7c6   :  { %v9178_v6 = vpop.f32.mrb[148].mxu1 }
 0x7c7   :  { %v20830_v4 = vadd.f32 %v9178_v6, %v20719_v8  ;;  %v9180_v56 = vpop.f32.mrb[149].mxu1  ;;  %v16881_v8 = vld [vmem:[%s21477_s5 + $0x9e0] ss:$16 sps:$4 sm:$0xff]   ;;  %v16922_v6 = vld [vmem:[%s21477_s5 + $0xa84] ss:$16 sps:$4 sm:$0xff]  }
 0x7c8   :  { %v20833_v34 = vadd.f32 %v9180_v56, %v20722_v49  ;;  %v9182_v11 = vpop.f32.mrb[150].mxu1  ;;  %10324 = vmatpush1.bf16.msra.mxu1 %v16875_v22  ;;  %v10147_v49 = vunpack.c.l.b16 %v10111_v24  ;;  %v10410_v22 = vmax.f32 %v10404_v60, %v10406_v50  ;;  %v10405_v56 = vld [vmem:[#allocation3 + $0x2d] sm:$0x1]  ;;  %v10401_v24 = vld [vmem:[#allocation3 + $0x25] sm:$0x1] }
 0x7c9   :  { %v9183_v40 = vpop.f32.mrb[151].mxu1  ;;  %10325 = vmatprep.subr.bf16.mxu1 %v16880_v17  ;;  %v10408_v17 = vmax.f32 %v10400_v52, %v10402_v36  ;;  %v16947_v60 = vld [vmem:[%s21477_s5 + $0xaa8] ss:$16 sps:$4 sm:$0xff]   ;;  %v16952_v50 = vld [vmem:[%s21477_s5 + $0xacc] ss:$16 sps:$4 sm:$0xff]  }
 0x7ca   :  { %v10150_v7 = vsel %vm7483_vm1, %v10149_v26, %v10147_v49  ;;  %v16920_v40 = vld [vmem:[%s21477_s5 + $0xa80] ss:$16 sps:$4 sm:$0xff]   ;;  %v16925_v26 = vld [vmem:[%s21477_s5 + $0xaa4] ss:$16 sps:$4 sm:$0xff]  }
 0x7cb   :  { %v10151_v2 = vpack.c.b16 %v10150_v7, %v10150_v7  ;;  %v10412_v11 = vmax.f32 %v10408_v17, %v10410_v22 }
 0x7cc   :  { %10326 = vmatpush1.bf16.msra.mxu1 %v16878_v39  ;;  %v10399_v39 = vld [vmem:[#allocation3 + $0x24] sm:$0x1] }
 0x7cd   :  { %10327 = vmatprep.subr.bf16.mxu1 %v16883_v55  ;;  %v10409_v55 = vmax.f32 %v10403_v14, %v10405_v56  ;;  %v10414_v49 = vpack.c.bf16 %v10412_v11, %v10412_v11  ;;  %v16956_v14 = vld [vmem:[%s21477_s5 + $0xb00] ss:$16 sps:$4 sm:$0xff]   ;;  %v16961_v56 = vld [vmem:[%s21477_s5 + $0xb24] ss:$16 sps:$4 sm:$0xff]  }
 0x7ce   :  { %v16959_v11 = vld [vmem:[%s21477_s5 + $0xb20] ss:$16 sps:$4 sm:$0xff]  }
 0x7d0   :  { %10328 = vmatpush1.bf16.msra.mxu1 %v16881_v8  ;;  %v10407_v8 = vmax.f32 %v10399_v39, %v10401_v24  ;;  %v16964_v39 = vld [vmem:[%s21477_s5 + $0xb44] ss:$16 sps:$4 sm:$0xff]   ;;  %v10706_v24 = vld [vmem:[#allocation3 + $0x6e] sm:$0x1] }
 0x7d1   :  { %10354 = vmatprep.subr.bf16.mxu1 %v16886_v61  ;;  %v16923_v61 = vld [vmem:[%s21477_s5 + $0xaa0] ss:$16 sps:$4 sm:$0xff]  }
 0x7d2   :  { %v10411_v7 = vmax.f32 %v10407_v8, %v10409_v55  ;;  %v16962_v55 = vld [vmem:[%s21477_s5 + $0xb40] ss:$16 sps:$4 sm:$0xff]   ;;  %v10702_v8 = vld [vmem:[#allocation3 + $0x66] sm:$0x1] }
 0x7d3   :  { %10346 = vmatmul.mubr.bf16.vlgmr.msra.gmra.mrb[176].mxu1 %v10151_v2 }
 0x7d4   :  { %10355 = vmatpush1.bf16.msra.mxu1 %v16884_v35  ;;  %10386 = vmatprep.mubr.bf16.mxu1 %v17235_v29  ;;  %v16928_v35 = vld [vmem:[%s21477_s5 + $0xac4] ss:$16 sps:$4 sm:$0xff]  }
 0x7d5   :  { %10356 = vmatprep.subr.bf16.mxu1 %v16889_v53  ;;  %v10450_v53 = vunpack.c.l.b16 %v10414_v49  ;;  %v10704_v49 = vld [vmem:[#allocation3 + $0x67] sm:$0x1] }
 0x7d8   :  { %10357 = vmatpush1.bf16.msra.mxu1 %v16887_v10 }
 0x7d9   :  { %10358 = vmatprep.subr.bf16.mxu1 %v16892_v9 }
 0x7dc   :  { %10359 = vmatpush1.bf16.msra.mxu1 %v16890_v43 }
 0x7dd   :  { %10360 = vmatprep.subr.bf16.mxu1 %v16895_v25 }
 0x7e0   :  { %10361 = vmatpush1.bf16.msra.mxu1 %v16893_v23  ;;  %v16926_v23 = vld [vmem:[%s21477_s5 + $0xac0] ss:$16 sps:$4 sm:$0xff]  }
 0x7e1   :  { %10362 = vmatprep.subr.bf16.mxu1 %v16898_v45  ;;  %v10413_v45 = vpack.c.bf16 %v10411_v7, %v10411_v7  ;;  %v16965_v7 = vld [vmem:[%s21477_s5 + $0xb60] ss:$16 sps:$4 sm:$0xff]  }
 0x7e4   :  { %10363 = vmatpush1.bf16.msra.mxu1 %v16896_v48 }
 0x7e5   :  { %10364 = vmatprep.subr.bf16.mxu1 %v16901_v57  ;;  %v16931_v57 = vld [vmem:[%s21477_s5 + $0xae4] ss:$16 sps:$4 sm:$0xff]  }
 0x7e6   :  { %v9439_v16 = vpop.f32.mrb[152].mxu1 }
 0x7e7   :  { %v20886_v63 = vadd.f32 %v9439_v16, %v20775_v12  ;;  %v9441_v44 = vpop.f32.mrb[153].mxu1  ;;  %v16905_v12 = vld [vmem:[%s21477_s5 + $0x9e8] ss:$16 sps:$4 sm:$0xff]  }
 0x7e8   :  { %v20889_v41 = vadd.f32 %v9441_v44, %v20778_v18  ;;  %v9443_v42 = vpop.f32.mrb[154].mxu1  ;;  %10365 = vmatpush1.bf16.msra.mxu1 %v16899_v30  ;;  %v16910_v18 = vld [vmem:[%s21477_s5 + $0xa04] ss:$16 sps:$4 sm:$0xff]   ;;  %v10451_v30 = vrot.slane %v10450_v53, 7  ;;  %v16932_v44 = vld [vmem:[%s21477_s5 + $0xa08] ss:$16 sps:$4 sm:$0xff]  }
 0x7e9   :  { %v9444_v15 = vpop.f32.mrb[155].mxu1  ;;  %10366 = vmatprep.subr.bf16.mxu1 %v16904_v38  ;;  %v16934_v38 = vld [vmem:[%s21477_s5 + $0xa0c] ss:$16 sps:$4 sm:$0xff]  }
 0x7ea   :  { %v16935_v15 = vld [vmem:[%s21477_s5 + $0xa28] ss:$16 sps:$4 sm:$0xff]   ;;  %v10705_v53 = vld [vmem:[#allocation3 + $0x2e] sm:$0x1] }
 0x7ec   :  { %10367 = vmatpush1.bf16.msra.mxu1 %v16902_v1  ;;  %v16937_v1 = vld [vmem:[%s21477_s5 + $0xa2c] ss:$16 sps:$4 sm:$0xff]  }
 0x7ed   :  { %10368 = vmatprep.subr.bf16.mxu1 %v16907_v54  ;;  %v16940_v54 = vld [vmem:[%s21477_s5 + $0xa4c] ss:$16 sps:$4 sm:$0xff]  }
 0x7f0   :  { %10369 = vmatpush1.bf16.msra.mxu1 %v16905_v12  ;;  %v16938_v12 = vld [vmem:[%s21477_s5 + $0xa48] ss:$16 sps:$4 sm:$0xff]  }
 0x7f1   :  { %10615 = vmatprep.subr.bf16.mxu1 %v16910_v18  ;;  %v16943_v18 = vld [vmem:[%s21477_s5 + $0xa6c] ss:$16 sps:$4 sm:$0xff]  }
 0x7f3   :  { %10387 = vmatmul.mubr.bf16.vlgmr.msra.gmra.mrb[180].mxu1 %v10151_v2 }
 0x7f4   :  { %10616 = vmatpush1.bf16.msra.mxu1 %v16908_v32  ;;  %10647 = vmatprep.mubr.bf16.mxu1 %v17235_v29  ;;  %v16941_v32 = vld [vmem:[%s21477_s5 + $0xa68] ss:$16 sps:$4 sm:$0xff]  }
 0x7f5   :  { %10617 = vmatprep.subr.bf16.mxu1 %v16913_v37  ;;  %v16946_v37 = vld [vmem:[%s21477_s5 + $0xa8c] ss:$16 sps:$4 sm:$0xff]  }
 0x7f8   :  { %10618 = vmatpush1.bf16.msra.mxu1 %v16911_v59  ;;  %v16944_v59 = vld [vmem:[%s21477_s5 + $0xa88] ss:$16 sps:$4 sm:$0xff]  }
 0x7f9   :  { %10619 = vmatprep.subr.bf16.mxu1 %v16916_v0  ;;  %v16949_v0 = vld [vmem:[%s21477_s5 + $0xaac] ss:$16 sps:$4 sm:$0xff]  }
 0x7fc   :  { %10620 = vmatpush1.bf16.msra.mxu1 %v16914_v51 }
 0x7fd   :  { %10621 = vmatprep.subr.bf16.mxu1 %v16919_v58 }
 0x800   :  { %10622 = vmatpush1.bf16.msra.mxu1 %v16917_v62  ;;  %v16950_v62 = vld [vmem:[%s21477_s5 + $0xac8] ss:$16 sps:$4 sm:$0xff]  }
 0x801   :  { %10623 = vmatprep.subr.bf16.mxu1 %v16922_v6  ;;  %v16955_v6 = vld [vmem:[%s21477_s5 + $0xaec] ss:$16 sps:$4 sm:$0xff]  }
 0x804   :  { %10624 = vmatpush1.bf16.msra.mxu1 %v16920_v40  ;;  %v10708_v40 = vld [vmem:[#allocation3 + $0x6f] sm:$0x1] }
 0x805   :  { %10625 = vmatprep.subr.bf16.mxu1 %v16925_v26  ;;  %v16967_v26 = vld [vmem:[%s21477_s5 + $0xb64] ss:$16 sps:$4 sm:$0xff]  }
 0x806   :  { %v9480_v2 = vpop.f32.mrb[156].mxu1 }
 0x807   :  { %v20941_v10 = vadd.f32 %v9480_v2, %v20830_v4  ;;  %v9482_v9 = vpop.f32.mrb[157].mxu1  ;;  %v16929_v4 = vld [vmem:[%s21477_s5 + $0xae0] ss:$16 sps:$4 sm:$0xff]   ;;  %v16970_v2 = vld [vmem:[%s21477_s5 + $0xb84] ss:$16 sps:$4 sm:$0xff]  }
 0x808   :  { %v20944_v43 = vadd.f32 %v9482_v9, %v20833_v34  ;;  %v9484_v25 = vpop.f32.mrb[158].mxu1  ;;  %10626 = vmatpush1.bf16.msra.mxu1 %v16923_v61  ;;  %v10449_v34 = vunpack.c.l.b16 %v10413_v45  ;;  %v10712_v61 = vmax.f32 %v10706_v24, %v10708_v40  ;;  %v10707_v9 = vld [vmem:[#allocation3 + $0x2f] sm:$0x1]  ;;  %v10703_v45 = vld [vmem:[#allocation3 + $0x27] sm:$0x1] }
 0x809   :  { %v9485_v48 = vpop.f32.mrb[159].mxu1  ;;  %10627 = vmatprep.subr.bf16.mxu1 %v16928_v35  ;;  %v10710_v35 = vmax.f32 %v10702_v8, %v10704_v49  ;;  %v16995_v24 = vld [vmem:[%s21477_s5 + $0xba8] ss:$16 sps:$4 sm:$0xff]   ;;  %v17000_v40 = vld [vmem:[%s21477_s5 + $0xbcc] ss:$16 sps:$4 sm:$0xff]  }
 0x80a   :  { %v10452_v16 = vsel %vm7483_vm1, %v10451_v30, %v10449_v34  ;;  %v16968_v48 = vld [vmem:[%s21477_s5 + $0xb80] ss:$16 sps:$4 sm:$0xff]   ;;  %v16973_v30 = vld [vmem:[%s21477_s5 + $0xba4] ss:$16 sps:$4 sm:$0xff]  }
 0x80b   :  { %v10453_v42 = vpack.c.b16 %v10452_v16, %v10452_v16  ;;  %v10714_v25 = vmax.f32 %v10710_v35, %v10712_v61 }
 0x80c   :  { %10628 = vmatpush1.bf16.msra.mxu1 %v16926_v23  ;;  %v10701_v23 = vld [vmem:[#allocation3 + $0x26] sm:$0x1] }
 0x80d   :  { %10629 = vmatprep.subr.bf16.mxu1 %v16931_v57  ;;  %v10711_v57 = vmax.f32 %v10705_v53, %v10707_v9  ;;  %v10716_v34 = vpack.c.bf16 %v10714_v25, %v10714_v25  ;;  %v17004_v53 = vld [vmem:[%s21477_s5 + $0xc00] ss:$16 sps:$4 sm:$0xff]   ;;  %v17009_v9 = vld [vmem:[%s21477_s5 + $0xc24] ss:$16 sps:$4 sm:$0xff]  }
 0x80e   :  { %v17007_v25 = vld [vmem:[%s21477_s5 + $0xc20] ss:$16 sps:$4 sm:$0xff]  }
 0x810   :  { %10630 = vmatpush1.bf16.msra.mxu1 %v16929_v4  ;;  %v10709_v4 = vmax.f32 %v10701_v23, %v10703_v45  ;;  %v17012_v23 = vld [vmem:[%s21477_s5 + $0xc44] ss:$16 sps:$4 sm:$0xff]   ;;  %v17010_v45 = vld [vmem:[%s21477_s5 + $0xc40] ss:$16 sps:$4 sm:$0xff]  }
 0x811   :  { %10656 = vmatprep.subr.bf16.mxu1 %v16934_v38  ;;  %v16971_v38 = vld [vmem:[%s21477_s5 + $0xba0] ss:$16 sps:$4 sm:$0xff]  }
 0x812   :  { %v10713_v16 = vmax.f32 %v10709_v4, %v10711_v57  ;;  %v17013_v57 = vld [vmem:[%s21477_s5 + $0xc60] ss:$16 sps:$4 sm:$0xff]  }
 0x813   :  { %10648 = vmatmul.mubr.bf16.vlgmr.msra.gmra.mrb[184].mxu1 %v10453_v42  ;;  %v17016_v4 = vld [vmem:[%s21477_s5 + $0xc80] ss:$16 sps:$4 sm:$0xff]  }
 0x814   :  { %10657 = vmatpush1.bf16.msra.mxu1 %v16932_v44  ;;  %10688 = vmatprep.mubr.bf16.mxu1 %v17235_v29  ;;  %v16976_v44 = vld [vmem:[%s21477_s5 + $0xbc4] ss:$16 sps:$4 sm:$0xff]  }
 0x815   :  { %10658 = vmatprep.subr.bf16.mxu1 %v16937_v1  ;;  %v10752_v1 = vunpack.c.l.b16 %v10716_v34  ;;  %v17021_v34 = vld [vmem:[%s21477_s5 + $0xca4] ss:$16 sps:$4 sm:$0xff]  }
 0x818   :  { %10659 = vmatpush1.bf16.msra.mxu1 %v16935_v15 }
 0x819   :  { %10660 = vmatprep.subr.bf16.mxu1 %v16940_v54 }
 0x81c   :  { %10661 = vmatpush1.bf16.msra.mxu1 %v16938_v12 }
 0x81d   :  { %10662 = vmatprep.subr.bf16.mxu1 %v16943_v18 }
 0x820   :  { %10663 = vmatpush1.bf16.msra.mxu1 %v16941_v32  ;;  %v16974_v32 = vld [vmem:[%s21477_s5 + $0xbc0] ss:$16 sps:$4 sm:$0xff]  }
 0x821   :  { %10664 = vmatprep.subr.bf16.mxu1 %v16946_v37  ;;  %v10715_v37 = vpack.c.bf16 %v10713_v16, %v10713_v16  ;;  %v17024_v16 = vld [vmem:[%s21477_s5 + $0xcc4] ss:$16 sps:$4 sm:$0xff]  }
 0x824   :  { %10665 = vmatpush1.bf16.msra.mxu1 %v16944_v59 }
 0x825   :  { %10666 = vmatprep.subr.bf16.mxu1 %v16949_v0  ;;  %v16979_v0 = vld [vmem:[%s21477_s5 + $0xbe4] ss:$16 sps:$4 sm:$0xff]  }
 0x826   :  { %v9741_v51 = vpop.f32.mrb[160].mxu1 }
 0x827   :  { %v20997_v58 = vadd.f32 %v9741_v51, %v20886_v63  ;;  %v9743_v52 = vpop.f32.mrb[161].mxu1  ;;  %v16953_v63 = vld [vmem:[%s21477_s5 + $0xae8] ss:$16 sps:$4 sm:$0xff]  }
 0x828   :  { %v21000_v36 = vadd.f32 %v9743_v52, %v20889_v41  ;;  %v9745_v22 = vpop.f32.mrb[162].mxu1  ;;  %10667 = vmatpush1.bf16.msra.mxu1 %v16947_v60  ;;  %v16958_v41 = vld [vmem:[%s21477_s5 + $0xb04] ss:$16 sps:$4 sm:$0xff]   ;;  %v10753_v60 = vrot.slane %v10752_v1, 7  ;;  %v16980_v52 = vld [vmem:[%s21477_s5 + $0xb08] ss:$16 sps:$4 sm:$0xff]  }
 0x829   :  { %v9746_v17 = vpop.f32.mrb[163].mxu1  ;;  %10668 = vmatprep.subr.bf16.mxu1 %v16952_v50  ;;  %v16982_v50 = vld [vmem:[%s21477_s5 + $0xb0c] ss:$16 sps:$4 sm:$0xff]  }
 0x82a   :  { %v16983_v17 = vld [vmem:[%s21477_s5 + $0xb28] ss:$16 sps:$4 sm:$0xff]  }
 0x82c   :  { %10669 = vmatpush1.bf16.msra.mxu1 %v16950_v62  ;;  %v16985_v62 = vld [vmem:[%s21477_s5 + $0xb2c] ss:$16 sps:$4 sm:$0xff]  }
 0x82d   :  { %10670 = vmatprep.subr.bf16.mxu1 %v16955_v6  ;;  %v16988_v6 = vld [vmem:[%s21477_s5 + $0xb4c] ss:$16 sps:$4 sm:$0xff]  }
 0x830   :  { %10671 = vmatpush1.bf16.msra.mxu1 %v16953_v63  ;;  %v16986_v63 = vld [vmem:[%s21477_s5 + $0xb48] ss:$16 sps:$4 sm:$0xff]  }
 0x831   :  { %10917 = vmatprep.subr.bf16.mxu1 %v16958_v41  ;;  %v16991_v41 = vld [vmem:[%s21477_s5 + $0xb6c] ss:$16 sps:$4 sm:$0xff]  }
 0x833   :  { %10689 = vmatmul.mubr.bf16.vlgmr.msra.gmra.mrb[188].mxu1 %v10453_v42 }
 0x834   :  { %10918 = vmatpush1.bf16.msra.mxu1 %v16956_v14  ;;  %10949 = vmatprep.mubr.bf16.mxu1 %v17235_v29  ;;  %v16989_v14 = vld [vmem:[%s21477_s5 + $0xb68] ss:$16 sps:$4 sm:$0xff]  }
 0x835   :  { %10919 = vmatprep.subr.bf16.mxu1 %v16961_v56  ;;  %v16994_v56 = vld [vmem:[%s21477_s5 + $0xb8c] ss:$16 sps:$4 sm:$0xff]  }
 0x838   :  { %10920 = vmatpush1.bf16.msra.mxu1 %v16959_v11  ;;  %v16992_v11 = vld [vmem:[%s21477_s5 + $0xb88] ss:$16 sps:$4 sm:$0xff]  }
 0x839   :  { %10921 = vmatprep.subr.bf16.mxu1 %v16964_v39  ;;  %v16997_v39 = vld [vmem:[%s21477_s5 + $0xbac] ss:$16 sps:$4 sm:$0xff]  }
 0x83c   :  { %10922 = vmatpush1.bf16.msra.mxu1 %v16962_v55 }
 0x83d   :  { %10923 = vmatprep.subr.bf16.mxu1 %v16967_v26 }
 0x840   :  { %10924 = vmatpush1.bf16.msra.mxu1 %v16965_v7  ;;  %v16998_v7 = vld [vmem:[%s21477_s5 + $0xbc8] ss:$16 sps:$4 sm:$0xff]  }
 0x841   :  { %10925 = vmatprep.subr.bf16.mxu1 %v16970_v2  ;;  %v17003_v2 = vld [vmem:[%s21477_s5 + $0xbec] ss:$16 sps:$4 sm:$0xff]  }
 0x844   :  { %10926 = vmatpush1.bf16.msra.mxu1 %v16968_v48  ;;  %v17015_v48 = vld [vmem:[%s21477_s5 + $0xc64] ss:$16 sps:$4 sm:$0xff]  }
 0x845   :  { %10927 = vmatprep.subr.bf16.mxu1 %v16973_v30  ;;  %v17018_v30 = vld [vmem:[%s21477_s5 + $0xc84] ss:$16 sps:$4 sm:$0xff]  }
 0x846   :  { %v9782_v42 = vpop.f32.mrb[164].mxu1 }
 0x847   :  { %v21052_v15 = vadd.f32 %v9782_v42, %v20941_v10  ;;  %v9784_v54 = vpop.f32.mrb[165].mxu1  ;;  %v16977_v10 = vld [vmem:[%s21477_s5 + $0xbe0] ss:$16 sps:$4 sm:$0xff]  }
 0x848   :  { %v21055_v12 = vadd.f32 %v9784_v54, %v20944_v43  ;;  %v9786_v18 = vpop.f32.mrb[166].mxu1  ;;  %10928 = vmatpush1.bf16.msra.mxu1 %v16971_v38  ;;  %v10751_v43 = vunpack.c.l.b16 %v10715_v37  ;;  %v17019_v38 = vld [vmem:[%s21477_s5 + $0xca0] ss:$16 sps:$4 sm:$0xff]  }
 0x849   :  { %v9787_v59 = vpop.f32.mrb[167].mxu1  ;;  %10929 = vmatprep.subr.bf16.mxu1 %v16976_v44 }
 0x84a   :  { %v10754_v51 = vsel %vm7483_vm1, %v10753_v60, %v10751_v43  ;;  %v17027_v59 = vld [vmem:[%s21477_s5 + $0xce4] ss:$16 sps:$4 sm:$0xff]  }
 0x84b   :  { %v10755_v22 = vpack.c.b16 %v10754_v51, %v10754_v51  ;;  %v17033_v60 = vld [vmem:[%s21477_s5 + $0xd24] ss:$16 sps:$4 sm:$0xff]   ;;  %v17037_v51 = vld [vmem:[%s21477_s5 + $0xd60] ss:$16 sps:$4 sm:$0xff]  }
 0x84c   :  { %10930 = vmatpush1.bf16.msra.mxu1 %v16974_v32  ;;  %v17022_v32 = vld [vmem:[%s21477_s5 + $0xcc0] ss:$16 sps:$4 sm:$0xff]   ;;  %v17036_v43 = vld [vmem:[%s21477_s5 + $0xd44] ss:$16 sps:$4 sm:$0xff]  }
 0x84d   :  { %10931 = vmatprep.subr.bf16.mxu1 %v16979_v0  ;;  %v17028_v0 = vld [vmem:[%s21477_s5 + $0xd00] ss:$16 sps:$4 sm:$0xff]  }
 0x850   :  { %10932 = vmatpush1.bf16.msra.mxu1 %v16977_v10  ;;  %v17031_v10 = vld [vmem:[%s21477_s5 + $0xd20] ss:$16 sps:$4 sm:$0xff]  }
 0x851   :  { %10958 = vmatprep.subr.bf16.mxu1 %v16982_v50  ;;  %v17034_v50 = vld [vmem:[%s21477_s5 + $0xd40] ss:$16 sps:$4 sm:$0xff]  }
 0x853   :  { %10950 = vmatmul.mubr.bf16.vlgmr.msra.gmra.mrb[192].mxu1 %v10755_v22 }
 0x854   :  { %10959 = vmatpush1.bf16.msra.mxu1 %v16980_v52  ;;  %10990 = vmatprep.mubr.bf16.mxu1 %v17235_v29  ;;  %v17042_v52 = vld [vmem:[%s21477_s5 + $0xd84] ss:$16 sps:$4 sm:$0xff]  }
 0x855   :  { %10960 = vmatprep.subr.bf16.mxu1 %v16985_v62  ;;  %v17045_v62 = vld [vmem:[%s21477_s5 + $0xda4] ss:$16 sps:$4 sm:$0xff]  }
 0x858   :  { %10961 = vmatpush1.bf16.msra.mxu1 %v16983_v17  ;;  %v17043_v17 = vld [vmem:[%s21477_s5 + $0xda0] ss:$16 sps:$4 sm:$0xff]  }
 0x859   :  { %10962 = vmatprep.subr.bf16.mxu1 %v16988_v6  ;;  %v17048_v6 = vld [vmem:[%s21477_s5 + $0xdc4] ss:$16 sps:$4 sm:$0xff]  }
 0x85c   :  { %10963 = vmatpush1.bf16.msra.mxu1 %v16986_v63 }
 0x85d   :  { %10964 = vmatprep.subr.bf16.mxu1 %v16991_v41 }
 0x860   :  { %10965 = vmatpush1.bf16.msra.mxu1 %v16989_v14 }
 0x861   :  { %10966 = vmatprep.subr.bf16.mxu1 %v16994_v56 }
 0x864   :  { %10967 = vmatpush1.bf16.msra.mxu1 %v16992_v11 }
 0x865   :  { %10968 = vmatprep.subr.bf16.mxu1 %v16997_v39  ;;  %v17046_v39 = vld [vmem:[%s21477_s5 + $0xdc0] ss:$16 sps:$4 sm:$0xff]  }
 0x866   :  { %v10045_v55 = vpop.f32.mrb[168].mxu1 }
 0x867   :  { %v21108_v26 = vadd.f32 %v10045_v55, %v20997_v58  ;;  %v10047_v8 = vpop.f32.mrb[169].mxu1  ;;  %v17001_v58 = vld [vmem:[%s21477_s5 + $0xbe8] ss:$16 sps:$4 sm:$0xff]   ;;  %v17100_v55 = vld [vmem:[%s21479_s7 + $0xc0] sm:$0xff]  }
 0x868   :  { %v21111_v49 = vadd.f32 %v10047_v8, %v21000_v36  ;;  %v10049_v61 = vpop.f32.mrb[170].mxu1  ;;  %10969 = vmatpush1.bf16.msra.mxu1 %v16995_v24  ;;  %v17006_v36 = vld [vmem:[%s21477_s5 + $0xc04] ss:$16 sps:$4 sm:$0xff]   ;;  %v17102_v8 = vld [vmem:[%s21479_s7 + $0xc8] sm:$0xff]   ;;  %14614 = vmatprep.subr.bf16.mxu0 %v17100_v55 }
 0x869   :  { %v10050_v35 = vpop.f32.mrb[171].mxu1  ;;  %10970 = vmatprep.subr.bf16.mxu1 %v17000_v40  ;;  %v17051_v24 = vld [vmem:[%s21477_s5 + $0xde4] ss:$16 sps:$4 sm:$0xff]   ;;  %v17103_v61 = vld [vmem:[%s21479_s7 + $0x88] sm:$0xff]  }
 0x86a   :  { %v17104_v35 = vld [vmem:[%s21479_s7 + $0xd0] sm:$0xff]  }
 0x86c   :  { %10971 = vmatpush1.bf16.msra.mxu1 %v16998_v7  ;;  %v17054_v7 = vld [vmem:[%s21477_s5 + $0xe04] ss:$16 sps:$4 sm:$0xff]  }
 0x86d   :  { %10972 = vmatprep.subr.bf16.mxu1 %v17003_v2  ;;  %v17052_v2 = vld [vmem:[%s21477_s5 + $0xe00] ss:$16 sps:$4 sm:$0xff]  }
 0x870   :  { %10973 = vmatpush1.bf16.msra.mxu1 %v17001_v58  ;;  %v17057_v58 = vld [vmem:[%s21477_s5 + $0xe24] ss:$16 sps:$4 sm:$0xff]  }
 0x871   :  { %11221 = vmatprep.subr.bf16.mxu1 %v17006_v36  ;;  %v17105_v36 = vld [vmem:[%s21479_s7 + $0x90] sm:$0xff]  }
 0x873   :  { %10991 = vmatmul.mubr.bf16.vlgmr.msra.gmra.mrb[196].mxu1 %v10755_v22  ;;  %v17040_v22 = vld [vmem:[%s21477_s5 + $0xd80] ss:$16 sps:$4 sm:$0xff]  }
 0x874   :  { %11222 = vmatpush1.bf16.msra.mxu1 %v17004_v53  ;;  %11253 = vmatprep.mubr.bf16.mxu1 %v17235_v29  ;;  %v17106_v53 = vld [vmem:[%s21479_s7 + $0xd8] sm:$0xff]  }
 0x875   :  { %11223 = vmatprep.subr.bf16.mxu1 %v17009_v9  ;;  %v17055_v9 = vld [vmem:[%s21477_s5 + $0xe20] ss:$16 sps:$4 sm:$0xff]  }
 0x878   :  { %11224 = vmatpush1.bf16.msra.mxu1 %v17007_v25  ;;  %v17060_v25 = vld [vmem:[%s21477_s5 + $0xe44] ss:$16 sps:$4 sm:$0xff]  }
 0x879   :  { %11225 = vmatprep.subr.bf16.mxu1 %v17012_v23  ;;  %v17058_v23 = vld [vmem:[%s21477_s5 + $0xe40] ss:$16 sps:$4 sm:$0xff]  }
 0x87c   :  { %11226 = vmatpush1.bf16.msra.mxu1 %v17010_v45  ;;  %v17061_v45 = vld [vmem:[%s21477_s5 + $0xe60] ss:$16 sps:$4 sm:$0xff]  }
 0x87d   :  { %11227 = vmatprep.subr.bf16.mxu1 %v17015_v48  ;;  %v17066_v48 = vld [vmem:[%s21477_s5 + $0xe84] ss:$16 sps:$4 sm:$0xff]  }
 0x880   :  { %11228 = vmatpush1.bf16.msra.mxu1 %v17013_v57  ;;  %v17064_v57 = vld [vmem:[%s21477_s5 + $0xe80] ss:$16 sps:$4 sm:$0xff]  }
 0x881   :  { %11229 = vmatprep.subr.bf16.mxu1 %v17018_v30  ;;  %v17069_v30 = vld [vmem:[%s21477_s5 + $0xea4] ss:$16 sps:$4 sm:$0xff]  }
 0x884   :  { %11230 = vmatpush1.bf16.msra.mxu1 %v17016_v4  ;;  %v17067_v4 = vld [vmem:[%s21477_s5 + $0xea0] ss:$16 sps:$4 sm:$0xff]  }
 0x885   :  { %11231 = vmatprep.subr.bf16.mxu1 %v17021_v34  ;;  %v17072_v34 = vld [vmem:[%s21477_s5 + $0xec4] ss:$16 sps:$4 sm:$0xff]  }
 0x886   :  { %v10086_v44 = vpop.f32.mrb[172].mxu1 }
 0x887   :  { %v21163_v42 = vadd.f32 %v10086_v44, %v21052_v15  ;;  %v10088_v1 = vpop.f32.mrb[173].mxu1  ;;  %v17025_v15 = vld [vmem:[%s21477_s5 + $0xce0] ss:$16 sps:$4 sm:$0xff]  }
 0x888   :  { %v21166_v54 = vadd.f32 %v10088_v1, %v21055_v12  ;;  %v10090_v18 = vpop.f32.mrb[174].mxu1  ;;  %11232 = vmatpush1.bf16.msra.mxu1 %v17019_v38  ;;  %v17030_v12 = vld [vmem:[%s21477_s5 + $0xd04] ss:$16 sps:$4 sm:$0xff]  }
 0x889   :  { %v10091_v37 = vpop.f32.mrb[175].mxu1  ;;  %11233 = vmatprep.subr.bf16.mxu1 %v17024_v16 }
 0x88c   :  { %11234 = vmatpush1.bf16.msra.mxu1 %v17022_v32  ;;  %v17070_v32 = vld [vmem:[%s21477_s5 + $0xec0] ss:$16 sps:$4 sm:$0xff]  }
 0x88d   :  { %11235 = vmatprep.subr.bf16.mxu1 %v17027_v59  ;;  %v17075_v59 = vld [vmem:[%s21477_s5 + $0xee4] ss:$16 sps:$4 sm:$0xff]  }
 0x890   :  { %11236 = vmatpush1.bf16.msra.mxu1 %v17025_v15  ;;  %v17107_v15 = vld [vmem:[%s21479_s7 + $0x98] sm:$0xff]  }
 0x891   :  { %11523 = vmatprep.subr.bf16.mxu1 %v17030_v12  ;;  %v17108_v12 = vld [vmem:[%s21479_s7 + $0xe0] sm:$0xff]  }
 0x893   :  { %11254 = vmatmul.mubr.bf16.vlgmr.msra.gmra.mrb[200].mxu1 %v19728_v47  ;;  %v17039_v47 = vld [vmem:[%s21477_s5 + $0xd64] ss:$16 sps:$4 sm:$0xff]  }
 0x894   :  { %11524 = vmatpush1.bf16.msra.mxu1 %v17028_v0  ;;  %11555 = vmatprep.mubr.bf16.mxu1 %v17235_v29  ;;  %v17076_v0 = vld [vmem:[%s21477_s5 + $0xf00] ss:$16 sps:$4 sm:$0xff]  }
 0x895   :  { %11525 = vmatprep.subr.bf16.mxu1 %v17033_v60  ;;  %v17081_v60 = vld [vmem:[%s21477_s5 + $0xf24] ss:$16 sps:$4 sm:$0xff]  }
 0x898   :  { %11526 = vmatpush1.bf16.msra.mxu1 %v17031_v10  ;;  %v17109_v10 = vld [vmem:[%s21479_s7 + $0xa0] sm:$0xff]  }
 0x899   :  { %11527 = vmatprep.subr.bf16.mxu1 %v17036_v43  ;;  %v17110_v43 = vld [vmem:[%s21479_s7 + $0xe8] sm:$0xff]  }
 0x89c   :  { %11528 = vmatpush1.bf16.msra.mxu1 %v17034_v50  ;;  %v17079_v50 = vld [vmem:[%s21477_s5 + $0xf20] ss:$16 sps:$4 sm:$0xff]  }
 0x89d   :  { %11529 = vmatprep.subr.bf16.mxu1 %v17039_v47  ;;  %v17084_v47 = vld [vmem:[%s21477_s5 + $0xf44] ss:$16 sps:$4 sm:$0xff]  }
 0x8a0   :  { %11530 = vmatpush1.bf16.msra.mxu1 %v17037_v51  ;;  %v17111_v51 = vld [vmem:[%s21479_s7 + $0xa8] sm:$0xff]  }
 0x8a1   :  { %11531 = vmatprep.subr.bf16.mxu1 %v17042_v52  ;;  %v17087_v52 = vld [vmem:[%s21477_s5 + $0xf64] ss:$16 sps:$4 sm:$0xff]  }
 0x8a4   :  { %11532 = vmatpush1.bf16.msra.mxu1 %v17040_v22  ;;  %v17113_v22 = vld [vmem:[%s21479_s7 + $0xb0] sm:$0xff]  }
 0x8a5   :  { %11533 = vmatprep.subr.bf16.mxu1 %v17045_v62  ;;  %v17114_v62 = vld [vmem:[%s21479_s7 + $0xf8] sm:$0xff]  }
 0x8a6   :  { %v10347_v63 = vpop.f32.mrb[176].mxu1 }
 0x8a7   :  { %v21219_v41 = vadd.f32 %v10347_v63, %v21108_v26  ;;  %v10349_v14 = vpop.f32.mrb[177].mxu1  ;;  %v17101_v26 = vld [vmem:[%s21479_s7 + $0x80] sm:$0xff]   ;;  %v17115_v63 = vld [vmem:[%s21479_s7 + $0xb8] sm:$0xff]  }
 0x8a8   :  { %v21222_v56 = vadd.f32 %v10349_v14, %v21111_v49  ;;  %v10351_v11 = vpop.f32.mrb[178].mxu1  ;;  %11534 = vmatpush1.bf16.msra.mxu1 %v17043_v17  ;;  %v17049_v49 = vld [vmem:[%s21477_s5 + $0xde0] ss:$16 sps:$4 sm:$0xff]   ;;  %14615 = vmatpush3.bf16.msra.mxu0 %v17101_v26 }
 0x8a9   :  { %v10352_v40 = vpop.f32.mrb[179].mxu1  ;;  %11535 = vmatprep.subr.bf16.mxu1 %v17048_v6  ;;  %14616 = vmatprep.subr.bf16.mxu0 %v17102_v8  ;;  %v17085_v17 = vld [vmem:[%s21477_s5 + $0xf60] ss:$16 sps:$4 sm:$0xff]   ;;  %v17090_v6 = vld [vmem:[%s21477_s5 + $0xf84] ss:$16 sps:$4 sm:$0xff]  }
 0x8aa   :  { %v17088_v14 = vld [vmem:[%s21477_s5 + $0xf80] ss:$16 sps:$4 sm:$0xff]   ;;  %v17093_v11 = vld [vmem:[%s21477_s5 + $0xfa4] ss:$16 sps:$4 sm:$0xff]  }
 0x8ac   :  { %11536 = vmatpush1.bf16.msra.mxu1 %v17046_v39  ;;  %14617 = vmatpush3.bf16.msra.mxu0 %v17103_v61  ;;  %v17091_v39 = vld [vmem:[%s21477_s5 + $0xfa0] ss:$16 sps:$4 sm:$0xff]  }
 0x8ad   :  { %11537 = vmatprep.subr.bf16.mxu1 %v17051_v24  ;;  %14618 = vmatprep.subr.bf16.mxu0 %v17104_v35  ;;  %v17096_v24 = vld [vmem:[%s21477_s5 + $0xfc4] ss:$16 sps:$4 sm:$0xff]   ;;  %v17094_v61 = vld [vmem:[%s21477_s5 + $0xfc0] ss:$16 sps:$4 sm:$0xff]  }
 0x8ae   :  { %v17099_v35 = vld [vmem:[%s21477_s5 + $0xfe4] ss:$16 sps:$4 sm:$0xff]  }
 0x8b0   :  { %11538 = vmatpush1.bf16.msra.mxu1 %v17049_v49  ;;  %14619 = vmatpush3.bf16.msra.mxu0 %v17105_v36 }
 0x8b1   :  { %11825 = vmatprep.subr.bf16.mxu1 %v17054_v7  ;;  %14620 = vmatprep.subr.bf16.mxu0 %v17106_v53 }
 0x8b3   :  { %11556 = vmatmul.mubr.bf16.vlgmr.msra.gmra.mrb[204].mxu1 %v19828_v3  ;;  %v17063_v3 = vld [vmem:[%s21477_s5 + $0xe64] ss:$16 sps:$4 sm:$0xff]  }
 0x8b4   :  { %11826 = vmatpush1.bf16.msra.mxu1 %v17052_v2  ;;  %11857 = vmatprep.mubr.bf16.mxu1 %v17235_v29 }
 0x8b5   :  { %11827 = vmatprep.subr.bf16.mxu1 %v17057_v58  ;;  %14621 = vmatpush3.bf16.msra.mxu0 %v17107_v15 }
 0x8b6   :  { %14622 = vmatprep.subr.bf16.mxu0 %v17108_v12 }
 0x8b8   :  { %11828 = vmatpush1.bf16.msra.mxu1 %v17055_v9 }
 0x8b9   :  { %11829 = vmatprep.subr.bf16.mxu1 %v17060_v25  ;;  %14623 = vmatpush3.bf16.msra.mxu0 %v17109_v10 }
 0x8ba   :  { %14624 = vmatprep.subr.bf16.mxu0 %v17110_v43 }
 0x8bc   :  { %11830 = vmatpush1.bf16.msra.mxu1 %v17058_v23 }
 0x8bd   :  { %11831 = vmatprep.subr.bf16.mxu1 %v17063_v3  ;;  %14625 = vmatpush3.bf16.msra.mxu0 %v17111_v51  ;;  %v12213_v51 = vld [vmem:[%s21478_s6] sm:$0xf] }
 0x8c0   :  { %11832 = vmatpush1.bf16.msra.mxu1 %v17061_v45 }
 0x8c1   :  { %11833 = vmatprep.subr.bf16.mxu1 %v17066_v48 }
 0x8c4   :  { %11834 = vmatpush1.bf16.msra.mxu1 %v17064_v57 }
 0x8c5   :  { %11835 = vmatprep.subr.bf16.mxu1 %v17069_v30  ;;  %v17117_v30 = vld [vmem:[%s21479_s7] sm:$0xff]  }
 0x8c6   :  { %v10388_v38 = vpop.f32.mrb[180].mxu1 }
 0x8c7   :  { %v21296_v16 = vadd.f32 %v10388_v38, %v21163_v42  ;;  %v10390_v44 = vpop.f32.mrb[181].mxu1  ;;  %v17073_v42 = vld [vmem:[%s21477_s5 + $0xee0] ss:$16 sps:$4 sm:$0xff]  }
 0x8c8   :  { %v21299_v1 = vadd.f32 %v10390_v44, %v21166_v54  ;;  %v10392_v18 = vpop.f32.mrb[182].mxu1  ;;  %11836 = vmatpush1.bf16.msra.mxu1 %v17067_v4  ;;  %v17078_v54 = vld [vmem:[%s21477_s5 + $0xf04] ss:$16 sps:$4 sm:$0xff]   ;;  %v17118_v4 = vld [vmem:[%s21479_s7 + $0x48] sm:$0xff]   ;;  %v17122_v44 = vld [vmem:[%s21479_s7 + $0x58] sm:$0xff]  }
 0x8c9   :  { %v10393_v37 = vpop.f32.mrb[183].mxu1  ;;  %11837 = vmatprep.subr.bf16.mxu1 %v17072_v34  ;;  %v17119_v34 = vld [vmem:[%s21479_s7 + $0x8] sm:$0xff]   ;;  %v17120_v38 = vld [vmem:[%s21479_s7 + $0x50] sm:$0xff]   ;;  %v17124_v18 = vld [vmem:[%s21479_s7 + $0x60] sm:$0xff]  }
 0x8ca   :  { %v17126_v37 = vld [vmem:[%s21479_s7 + $0x68] sm:$0xff]  }
 0x8cc   :  { %11838 = vmatpush1.bf16.msra.mxu1 %v17070_v32  ;;  %v17125_v32 = vld [vmem:[%s21479_s7 + $0x20] sm:$0xff]  }
 0x8cd   :  { %11839 = vmatprep.subr.bf16.mxu1 %v17075_v59  ;;  %v12215_v59 = vlaneseq }
 0x8d0   :  { %11840 = vmatpush1.bf16.msra.mxu1 %v17073_v42  ;;  %v12216_v42 = vshrl.u32 %v12215_v59, 7 }
 0x8d1   :  { %12127 = vmatprep.subr.bf16.mxu1 %v17078_v54 }
 0x8d3   :  { %11858 = vmatmul.mubr.bf16.vlgmr.msra.gmra.mrb[208].mxu1 %v19934_v13  ;;  %v17112_v13 = vld [vmem:[%s21479_s7 + $0xf0] sm:$0xff]  }
 0x8d4   :  { %12128 = vmatpush1.bf16.msra.mxu1 %v17076_v0  ;;  %12159 = vmatprep.mubr.bf16.mxu1 %v17235_v29  ;;  %v17082_v29 = vld [vmem:[%s21477_s5 + $0xf40] ss:$16 sps:$4 sm:$0xff]  }
 0x8d5   :  { %12129 = vmatprep.subr.bf16.mxu1 %v17081_v60  ;;  %14626 = vmatprep.subr.bf16.mxu0 %v17112_v13  ;;  %v12229_v13 = vsub.s32 3, %v12216_v42 }
 0x8d6   :  { %14627 = vmatpush3.bf16.msra.mxu0 %v17113_v22 }
 0x8d7   :  { %14628 = vmatprep.subr.bf16.mxu0 %v17114_v62 }
 0x8d8   :  { %12130 = vmatpush1.bf16.msra.mxu1 %v17079_v50  ;;  %v12225_v50 = vsub.s32 2, %v12216_v42 }
 0x8d9   :  { %12131 = vmatprep.subr.bf16.mxu1 %v17084_v47 }
 0x8da   :  { %14629 = vmatpush3.bf16.msra.mxu0 %v17115_v63  ;;  %v12226_v62 = vrot.slane %v12213_v51, %v12225_v50 }
 0x8dc   :  { %12132 = vmatpush1.bf16.msra.mxu1 %v17082_v29 }
 0x8dd   :  { %12133 = vmatprep.subr.bf16.mxu1 %v17087_v52 }
 0x8e0   :  { %12134 = vmatpush1.bf16.msra.mxu1 %v17085_v17 }
 0x8e1   :  { %12135 = vmatprep.subr.bf16.mxu1 %v17090_v6  ;;  %v12230_v6 = vrot.slane %v12213_v51, %v12229_v13 }
 0x8e4   :  { %12136 = vmatpush1.bf16.msra.mxu1 %v17088_v14 }
 0x8e5   :  { %12137 = vmatprep.subr.bf16.mxu1 %v17093_v11 }
 0x8e6   :  { %v10649_v40 = vpop.f32.mrb[184].mxu1 }
 0x8e7   :  { %v10697_v55 = vadd.f32 %v10649_v40, %v21219_v41  ;;  %v10651_v26 = vpop.f32.mrb[185].mxu1  ;;  %v17097_v41 = vld [vmem:[%s21477_s5 + $0xfe0] ss:$16 sps:$4 sm:$0xff]  }
 0x8e8   :  { %v10698_v8 = vadd.f32 %v10651_v26, %v21222_v56  ;;  %v10653_v49 = vpop.f32.mrb[186].mxu1  ;;  %12138 = vmatpush1.bf16.msra.mxu1 %v17091_v39 }
 0x8e9   :  { %v10654_v7 = vpop.f32.mrb[187].mxu1  ;;  %12139 = vmatprep.subr.bf16.mxu1 %v17096_v24 }
 0x8ec   :  { %12140 = vmatpush1.bf16.msra.mxu1 %v17094_v61 }
 0x8ed   :  { %12141 = vmatprep.subr.bf16.mxu1 %v17099_v35 }
 0x8f0   :  { %12142 = vmatpush1.bf16.msra.mxu1 %v17097_v41 }
 0x8f3   :  { %12160 = vmatmul.mubr.bf16.vlgmr.msra.gmra.mrb[212].mxu1 %v20031_v28  ;;  %v17116_v28 = vld [vmem:[%s21479_s7 + $0x40] sm:$0xff]  }
 0x8f4   :  { %14592 = vmatprep.subr.bf16.mxu1 %v17116_v28  ;;  %v12221_v28 = vsub.s32 1, %v12216_v42 }
 0x8f5   :  { %14593 = vmatpush3.bf16.msra.mxu1 %v17117_v30 }
 0x8f6   :  { %14594 = vmatprep.subr.bf16.mxu1 %v17118_v4  ;;  %v12222_v4 = vrot.slane %v12213_v51, %v12221_v28 }
 0x8f9   :  { %14595 = vmatpush3.bf16.msra.mxu1 %v17119_v34 }
 0x8fa   :  { %14596 = vmatprep.subr.bf16.mxu1 %v17120_v38 }
 0x906   :  { %v10690_v56 = vpop.f32.mrb[188].mxu1 }
 0x907   :  { %v10699_v2 = vadd.f32 %v10690_v56, %v21296_v16  ;;  %v10692_v58 = vpop.f32.mrb[189].mxu1  ;;  %v17121_v16 = vld [vmem:[%s21479_s7 + $0x10] sm:$0xff]  }
 0x908   :  { %v10700_v36 = vadd.f32 %v10692_v58, %v21299_v1  ;;  %v10694_v53 = vpop.f32.mrb[190].mxu1  ;;  %14597 = vmatpush3.bf16.msra.mxu1 %v17121_v16  ;;  %v17123_v1 = vld [vmem:[%s21479_s7 + $0x18] sm:$0xff]  }
 0x909   :  { %v10695_v9 = vpop.f32.mrb[191].mxu1  ;;  %14598 = vmatprep.subr.bf16.mxu1 %v17122_v44 }
 0x90c   :  { %14599 = vmatpush3.bf16.msra.mxu1 %v17123_v1 }
 0x90d   :  { %14600 = vmatprep.subr.bf16.mxu1 %v17124_v18 }
 0x910   :  { %14601 = vmatpush3.bf16.msra.mxu1 %v17125_v32 }
 0x911   :  { %14602 = vmatprep.subr.bf16.mxu1 %v17126_v37 }
 0x926   :  { %v10951_v25 = vpop.f32.mrb[192].mxu1 }
 0x927   :  { %v21392_v23 = vadd.f32 %v10951_v25, %v10697_v55  ;;  %v10953_v3 = vpop.f32.mrb[193].mxu1 }
 0x928   :  { %v21394_v45 = vadd.f32 %v10953_v3, %v10698_v8  ;;  %v10955_v48 = vpop.f32.mrb[194].mxu1 }
 0x929   :  { %v10956_v57 = vpop.f32.mrb[195].mxu1 }
 0x92a   :  { %v12217_v57 = vsub.s32 0, %v12216_v42 }
 0x946   :  { %v10992_v54 = vpop.f32.mrb[196].mxu1 }
 0x947   :  { %v11001_v15 = vadd.f32 %v10992_v54, %v10699_v2  ;;  %v10994_v12 = vpop.f32.mrb[197].mxu1 }
 0x948   :  { %v11002_v0 = vadd.f32 %v10994_v12, %v10700_v36  ;;  %v10996_v60 = vpop.f32.mrb[198].mxu1 }
 0x949   :  { %v11305_v10 = vadd.f32 %v20220_v46, %v11001_v15  ;;  %v10997_v43 = vpop.f32.mrb[199].mxu1  ;;  %v17127_v46 = vld [vmem:[%s21479_s7 + $0x28] sm:$0xff]  }
 0x94a   :  { %v11306_v47 = vadd.f32 %v20225_v27, %v11002_v0  ;;  %v17128_v27 = vld [vmem:[%s21479_s7 + $0x70] sm:$0xff]   ;;  %14603 = vmatpush3.bf16.msra.mxu1 %v17127_v46  ;;  %v14055_v43 = vld [vmem:[%s21480_s8] ss:$0 sm:$0xff]  ;;  %s17236_s8 = smov [#allocation4]  }
 0x94b   :  { %v11607_v29 = vadd.f32 %v20277_v19, %v11305_v10  ;;  %v17129_v19 = vld [vmem:[%s21479_s7 + $0x30] sm:$0xff]   ;;  %14604 = vmatprep.subr.bf16.mxu1 %v17128_v27  ;;  %s12611_s29 = sshll.u32 %s17236_s8, 4  ;;  %s12612_s29 = int_to_ptr.vmem [resolvable:$true] %s12611_s29 }
 0x94c   :  { %v11608_v52 = vadd.f32 %v20282_v21, %v11306_v47  ;;  %s17211_s30 = scalar_lea.vmem %s12612_s29, 32  ;;  %p17216_p1 = scmp.lt.s32.totalorder %s12612_s29, %s12612_s29 }
 0x94d   :  { %v11909_v22 = vadd.f32 %v20337_v33, %v11607_v29  ;;  %v17130_v33 = vld [vmem:[%s21479_s7 + $0x78] sm:$0xff]   ;;  %p17212_p0 = scmp.ne.s32.totalorder %s12612_s29, %s17211_s30  ;;  %p17217_p2 = scmp.lt.s32.totalorder %s17211_s30, %s17211_s30 }
 0x94e   :  { %v11910_v17 = vadd.f32 %v20342_v20, %v11608_v52  ;;  %14605 = vmatpush3.bf16.msra.mxu1 %v17129_v19 }
 0x94f   :  { %v12211_v63 = vadd.f32 %v20396_v31, %v11909_v22  ;;  %v17131_v31 = vld [vmem:[%s21479_s7 + $0x38] sm:$0xff]   ;;  %14606 = vmatprep.subr.bf16.mxu1 %v17130_v33  ;;  %p17218_p3 = por %p17217_p2, %p17216_p1 }
 0x950   :  { %v12212_v21 = vadd.f32 %v20401_v5, %v11910_v17 }
 0x951   :  { %v12237_v20 = vadd.f32 %v12226_v62, %v12211_v63  ;;  %p17219_p4 = pnand %p17218_p3, %p17212_p0 }
 0x952   :  { %v12238_v14 = vadd.f32 %v12230_v6, %v12212_v21  ;;  %14607 = vmatpush3.bf16.msra.mxu1 %v17131_v31 }
 0x953   :  { %v12241_v11 = vmax.f32 %v12237_v20, 0.0 }
 0x954   :  { %v12242_v39 = vmax.f32 %v12238_v14, 0.0 }
 0x955   :  { %v12245_v40 = vpack.c.bf16 %v12241_v11, %v12241_v11 }
 0x956   :  { %v12246_v24 = vpack.c.bf16 %v12242_v39, %v12242_v39 }
 0x958   :  { %12582 = vmatprep.mubr.bf16.mxu0 %v12246_v24 }
 0x959   :  { %12583 = vmatmul.mubr.bf16.vlgmr.msra.gmra.mrb[120].mxu0 %v12245_v40 }
 0x966   :  { %v11255_v5 = vpop.f32.mrb[200].mxu1 }
 0x967   :  { %v11303_v55 = vadd.f32 %v11255_v5, %v21392_v23  ;;  %v11257_v26 = vpop.f32.mrb[201].mxu1  ;;  %v12218_v23 = vrot.slane %v12213_v51, %v12217_v57 }
 0x968   :  { %v11304_v8 = vadd.f32 %v11257_v26, %v21394_v45  ;;  %v11259_v49 = vpop.f32.mrb[202].mxu1 }
 0x969   :  { %v11260_v61 = vpop.f32.mrb[203].mxu1 }
 0x986   :  { %v11557_v7 = vpop.f32.mrb[204].mxu1 }
 0x987   :  { %v11605_v35 = vadd.f32 %v11557_v7, %v11303_v55  ;;  %v11559_v41 = vpop.f32.mrb[205].mxu1 }
 0x988   :  { %v11606_v56 = vadd.f32 %v11559_v41, %v11304_v8  ;;  %v11561_v2 = vpop.f32.mrb[206].mxu1 }
 0x989   :  { %v11562_v58 = vpop.f32.mrb[207].mxu1 }
 0x9a6   :  { %v11859_v36 = vpop.f32.mrb[208].mxu1 }
 0x9a7   :  { %v11907_v53 = vadd.f32 %v11859_v36, %v11605_v35  ;;  %v11861_v9 = vpop.f32.mrb[209].mxu1 }
 0x9a8   :  { %v11908_v25 = vadd.f32 %v11861_v9, %v11606_v56  ;;  %v11863_v3 = vpop.f32.mrb[210].mxu1 }
 0x9a9   :  { %v11864_v48 = vpop.f32.mrb[211].mxu1 }
 0x9c6   :  { %v12161_v30 = vpop.f32.mrb[212].mxu1 }
 0x9c7   :  { %v12209_v45 = vadd.f32 %v12161_v30, %v11907_v53  ;;  %v12163_v34 = vpop.f32.mrb[213].mxu1 }
 0x9c8   :  { %v12210_v38 = vadd.f32 %v12163_v34, %v11908_v25  ;;  %v12165_v16 = vpop.f32.mrb[214].mxu1 }
 0x9c9   :  { %v12235_v44 = vadd.f32 %v12218_v23, %v12209_v45  ;;  %v12166_v1 = vpop.f32.mrb[215].mxu1 }
 0x9ca   :  { %v12236_v18 = vadd.f32 %v12222_v4, %v12210_v38 }
 0x9cb   :  { %v12239_v32 = vmax.f32 %v12235_v44, 0.0 }
 0x9cc   :  { %v12240_v37 = vmax.f32 %v12236_v18, 0.0 }
 0x9cd   :  { %v12243_v54 = vpack.c.bf16 %v12239_v32, %v12239_v32 }
 0x9ce   :  { %v12244_v59 = vpack.c.bf16 %v12240_v37, %v12240_v37 }
 0x9d0   :  { %12542 = vmatprep.mubr.bf16.mxu1 %v12244_v59 }
 0x9d1   :  { %12543 = vmatmul.mubr.bf16.vlgmr.msra.gmra.mrb[216].mxu1 %v12243_v54 }
 0xa2c   :  { %v14630_v15 = vpop.f32.mrb[120].mxu0 }
 0xa2d   :  { %v14631_v12 = vpop.f32.mrb[121].mxu0 }
 0xa2e   :  { %v14632_v0 = vadd.f32 %v14631_v12, %v14630_v15  ;;  %v14633_v42 = vpop.f32.mrb[122].mxu0 }
 0xa2f   :  { %v14634_v60 = vpop.f32.mrb[123].mxu0 }
 0xaa4   :  { %v14608_v10 = vpop.f32.mrb[216].mxu1 }
 0xaa5   :  { %v14609_v50 = vpop.f32.mrb[217].mxu1 }
 0xaa6   :  { %v14610_v47 = vadd.f32 %v14609_v50, %v14608_v10  ;;  %v14611_v51 = vpop.f32.mrb[218].mxu1 }
 0xaa7   :  { %v14612_v13 = vpop.f32.mrb[219].mxu1 }
 0xaa8   :  { %v12545_v29 = vadd.f32 %v14610_v47, %v14055_v43 }
 0xaaa   :  { %v12585_v52 = vadd.f32 %v14632_v0, %v12545_v29 }
 0xaac   :  { %v12591_v22 = vsel %vm12590_vm2, %v12585_v52, -inf }
 0xaad   :  { %12592 = vmax.xlane.f32.xlu0 %v12591_v22 }
 0xb3a   :  { %v12593_v62 = vpop.xlane.xlu0 %12592 }
 0xb3b   :  { %v12594_v46 = vsub.f32 %v12585_v52, %v12593_v62 }
 0xb3d   :  { %v12595_v17 = vmul.f32 1.442695, %v12594_v46 }
 0xb3f   :  { %17132 = vpow2.f32 %v12595_v17 }
 0xb49   :  { %v17133_v6 = vpop.eup %17132 }
 0xb4a   :  { %v12597_v27 = vsel %vm12590_vm2, %v17133_v6, 0.0 }
 0xb4b   :  { %12598 = vadd.xlane.f32.xlu0 %v12597_v27 }
 0xbd8   :  { %v12599_v63 = vpop.xlane.xlu0 %12598 }
 0xbd9   :  { %17134 = vlog2.f32 %v12599_v63 }
 0xbe3   :  { %v17135_v19 = vpop.eup %17134 }
 0xbe4   :  { %v12601_v21 = vmul.f32 0.6931472, %v17135_v19 }
 0xbe6   :  { %v12602_v33 = vadd.f32 %v12601_v21, %v12593_v62 }
 0xbe8   :  { %v12603_v20 = vsub.f32 %v12585_v52, %v12602_v33 }
 0xbea   :  { %12604 = vst [vmem:[#allocation4] sm:$0x3] %v12603_v20 }
 0xbeb   :  { %17222 = shalt.err (!%p17219_p4)
}
 0xbec   :  { %s17223_s12 = scalar_lea.hbm %s21481_s9, 32 }
 0xbed   :  { %p17224_p5 = scmp.ne.s32.totalorder %s21481_s9, %s17223_s12  ;;  %p17227_p6 = scmp.lt.u32.totalorder %s17223_s12, %s21481_s9 }
 0xbef   :  { %p17229_p7 = pnand %p17227_p6, %p17224_p5 }
 0xbf1   :  { %17232 = shalt.err (!%p17229_p7)
}
 0xbf2   :  { %12614 = dma.vmem_to_hbm [thread:$0]  %s12612_s29, 32, %s21481_s9, [#allocation5]  }
 0xbf3   :  { %17233 = dma.done.wait [#allocation5], 32  }
 0xbf4   :  { %17234 = vsyncadd [#allocation5], 4294967264 }
 0xbf5   :  { %12618 = vsyncpa [#allocation5], 1 }

</bundles_post_ra>
